<compile_context>
chip_gen: v6e
topology: v6e:2x2x1
jax: 0.10.0
libtpu: 0.0.40
codegen_flags: <defaults>
</compile_context>

<pallas_src>
import functools

import jax
import jax.numpy as jnp
from jax import lax
from jax.experimental import pallas as pl
from jax.experimental.pallas import tpu as pltpu

UNIFORM_INIT_LOWER_BOUND = -0.005
UNIFORM_INIT_UPPER_BOUND = +0.005

_LANE = 128
_NC_SUB = 8          # final-conv classes padded to one sublane group
_NEG_INF = -1e30


def _round_up(x, m):
    return ((x + m - 1) // m) * m


def _vmem_limit(tile_bytes):
    """VMEM scoped limit derived from actual buffer needs, capped for v7x (64 MiB/TC)."""
    return int(min(40 * 1024 * 1024, max(16 * 1024 * 1024, 2 * tile_bytes)))


# ---------------------------------------------------------------------------
# Pallas kernels
# ---------------------------------------------------------------------------
def _maxout_matmul_kernel(p_ref, w_ref, b_ref, o_ref, *, cpad, out_c):
    """One fused MXU dot for both maxout units + bias + maxout epilogue.

    p_ref: (TM, K_pad) bf16 im2col patch rows (pipelined over the grid)
    w_ref: (K_pad, 2*cpad) bf16 resident weights = [w0 | w1], each zero-padded
           to cpad (multiple of 128) output channels; K zero-padded to 128.
    b_ref: (1, 2*cpad) f32 resident bias
    o_ref: (TM, out_c) bf16 output (out_c == cpad for the local path,
           out_c == true cout for the global path so dead lanes are never stored)
    """
    y = jnp.dot(p_ref[...], w_ref[...], preferred_element_type=jnp.float32)
    y = y + b_ref[...]
    # cpad is a multiple of 128 -> both lane slices are vreg-aligned.
    m = jnp.maximum(y[:, :cpad], y[:, cpad:])
    o_ref[...] = m[:, :out_c].astype(o_ref.dtype)


def _maxpool_kernel(x_ref, o_ref, *, k):
    """Separable k x k stride-1 max-pool on one NHWC image: 2*(k-1) maxes, bf16."""
    x = x_ref[...]                            # (1, H, W, C), native dtype (bf16)
    ph = o_ref.shape[1]
    pw = o_ref.shape[2]
    r = x[:, 0:ph]
    for dh in range(1, k):                    # rows first (cheap major-dim slices)
        r = jnp.maximum(r, x[:, dh:dh + ph])
    out = r[:, :, 0:pw]
    # TODO(synk): replace the shifted column slices with pltpu.roll along W
    #             (XLU slot) to avoid k-1 sublane-shifted copies.
    for dw in range(1, k):                    # then columns
        out = jnp.maximum(out, r[:, :, dw:dw + pw])
    o_ref[...] = out


def _concat_conv_softmax_kernel(p_ref, w_ref, b_ref, o_ref, acc_ref):
    """K-tiled final conv with transposed dense weights + f32 acc + bias + softmax.

    p_ref: (TM, TK) bf16 patch tile
    w_ref: (NC_SUB, TK) bf16 transposed weight tile (dense, contiguous k-tiles)
    b_ref: (1, NC_SUB) f32 bias; padding classes hold -1e30 so softmax ignores them
    o_ref: (TM, NC_SUB) f32 probabilities
    """
    k_idx = pl.program_id(1)

    @pl.when(k_idx == 0)
    def _():
        acc_ref[...] = jnp.zeros_like(acc_ref)

    acc_ref[...] += lax.dot_general(
        p_ref[...], w_ref[...],
        dimension_numbers=(((1,), (1,)), ((), ())),   # contract both lane dims
        preferred_element_type=jnp.float32)

    @pl.when(k_idx == pl.num_programs(1) - 1)
    def _():
        logits = acc_ref[...] + b_ref[...]
        m = jnp.max(logits, axis=-1, keepdims=True)
        e = jnp.exp(logits - m)
        o_ref[...] = e / jnp.sum(e, axis=-1, keepdims=True)


# ---------------------------------------------------------------------------
# JAX glue (im2col / padding / parameter setup)
# ---------------------------------------------------------------------------
def im2col(x_nhwc, k):
    """(N,H,W,C) -> (N,HO,WO,k*k*C) valid patches, (kh, kw, c) flatten order."""
    n, h, w, c = x_nhwc.shape
    ho, wo = h - k + 1, w - k + 1
    if ho == 1 and wo == 1:
        # Single output position: the patch is the whole map in (h,w,c) order,
        # which already matches the (kh,kw,c) flatten order -> pure reshape.
        return x_nhwc.reshape(n, 1, 1, k * k * c)
    cols = [x_nhwc[:, i:i + ho, j:j + wo, :] for i in range(k) for j in range(k)]
    patches = jnp.stack(cols, axis=3)  # (N, HO, WO, k*k, C)
    return patches.reshape(n, ho, wo, k * k * c)


def _pick_tm(m):
    """Row-tile size: keep the grid >= 4 steps when possible for DMA overlap."""
    if m >= 2048:
        return 512
    if m >= 256:
        return 256
    return _round_up(m, 8)


def maxout_conv(x_nhwc, w0, b0, w1, b1, out_channels=None):
    """Two parallel valid convs (stride 1) + maxout, as ONE fused bf16 matmul.

    Returns (N, HO, WO, out_c) bf16.  out_c defaults to round_up(cout, 128)
    (padded channels exactly zero, keeps downstream pools lane-dense); pass
    out_channels=cout to store only real channels (used for the global path).
    """
    k, _, cin, cout = w0.shape
    n, h, w, _ = x_nhwc.shape
    ho, wo = h - k + 1, w - k + 1
    K = k * k * cin
    K_pad = _round_up(K, _LANE)            # lane-aligned contracting dim
    cpad = _round_up(cout, _LANE)
    out_c = cpad if out_channels is None else out_channels
    assert cout <= out_c <= cpad

    M = n * ho * wo
    TM = _pick_tm(M)
    M_pad = _round_up(M, TM)

    # bf16 BEFORE im2col / pad -> halves the XLA glue traffic.
    patches = im2col(x_nhwc.astype(jnp.bfloat16), k).reshape(M, K)
    patches = jnp.pad(patches, ((0, M_pad - M), (0, K_pad - K)))

    def _unit(wt, bt):
        wf = jnp.pad(wt.reshape(K, cout).astype(jnp.bfloat16),
                     ((0, K_pad - K), (0, cpad - cout)))
        bf = jnp.pad(bt.astype(jnp.float32), (0, cpad - cout))
        return wf, bf

    w0f, b0f = _unit(w0, b0)
    w1f, b1f = _unit(w1, b1)
    wf = jnp.concatenate([w0f, w1f], axis=-1)                # (K_pad, 2*cpad)
    bf = jnp.concatenate([b0f, b1f]).reshape(1, 2 * cpad)    # (1, 2*cpad) f32

    flops = 2 * M_pad * K_pad * 2 * cpad
    bytes_accessed = (M_pad * K_pad * 2 + K_pad * 2 * cpad * 2
                      + 2 * cpad * 4 + M_pad * out_c * 2)
    tile_bytes = (2 * (TM * K_pad + K_pad * 2 * cpad + TM * out_c) * 2
                  + 2 * 2 * cpad * 4)

    # TODO(synk): mark the resident weight/bias specs pipeline_mode=pl.Buffered(1)
    #             once single-buffered residents are exercised on all backends.
    out = pl.pallas_call(
        functools.partial(_maxout_matmul_kernel, cpad=cpad, out_c=out_c),
        grid=(M_pad // TM,),
        in_specs=[
            pl.BlockSpec((TM, K_pad), lambda i: (i, 0)),         # row tiles, pipelined
            pl.BlockSpec((K_pad, 2 * cpad), lambda i: (0, 0)),   # weights resident
            pl.BlockSpec((1, 2 * cpad), lambda i: (0, 0)),       # bias resident
        ],
        out_specs=pl.BlockSpec((TM, out_c), lambda i: (i, 0)),
        out_shape=jax.ShapeDtypeStruct((M_pad, out_c), jnp.bfloat16),
        compiler_params=pltpu.CompilerParams(
            dimension_semantics=("parallel",),
            vmem_limit_bytes=_vmem_limit(tile_bytes)),
        cost_estimate=pl.CostEstimate(flops=flops, transcendentals=0,
                                      bytes_accessed=bytes_accessed),
    )(patches, wf, bf)
    return out[:M].reshape(n, ho, wo, out_c)


def maxpool(x_nhwc, k):
    """k x k stride-1 max-pool, gridded over batch, separable in-kernel (bf16)."""
    n, h, w, c = x_nhwc.shape
    ho, wo = h - k + 1, w - k + 1
    itemsize = jnp.dtype(x_nhwc.dtype).itemsize
    tile_bytes = 2 * (h * w * c + ho * wo * c) * itemsize
    return pl.pallas_call(
        functools.partial(_maxpool_kernel, k=k),
        grid=(n,),
        in_specs=[pl.BlockSpec((1, h, w, c), lambda b: (b, 0, 0, 0))],
        out_specs=pl.BlockSpec((1, ho, wo, c), lambda b: (b, 0, 0, 0)),
        out_shape=jax.ShapeDtypeStruct((n, ho, wo, c), x_nhwc.dtype),
        compiler_params=pltpu.CompilerParams(
            dimension_semantics=("parallel",),
            vmem_limit_bytes=_vmem_limit(tile_bytes)),
        cost_estimate=pl.CostEstimate(
            flops=n * ho * wo * c * 2 * (k - 1), transcendentals=0,
            bytes_accessed=(n * h * w * c + n * ho * wo * c) * itemsize),
    )(x_nhwc)


def concat_conv_softmax(xc_nhwc, w, b):
    """Final 21x21 conv (K-tiled matmul, transposed dense weights) + bias + softmax."""
    kf, _, cin, nc = w.shape
    n, h, ww, _ = xc_nhwc.shape
    ho, wo = h - kf + 1, ww - kf + 1
    K = kf * kf * cin
    M = n * ho * wo
    assert nc <= _NC_SUB

    TM = _pick_tm(M)
    M_pad = _round_up(M, TM)
    n_m = M_pad // TM

    # Co-derive TK from a VMEM budget (double-buffered bf16 patch + weight tiles),
    # so tiles fit comfortably on v5e/v6e (128 MiB) and v7x (64 MiB/TC) alike.
    budget = 20 * 1024 * 1024
    tk_cap = budget // (4 * (TM + _NC_SUB))              # 2 buffers x 2 bytes
    tk_cap = max(_LANE, min(16384, (tk_cap // _LANE) * _LANE))
    n_k = -(-K // tk_cap)
    TK = _LANE * (-(-K // (_LANE * n_k)))                # lane-aligned, evened out
    K_pad = TK * n_k

    patches = im2col(xc_nhwc.astype(jnp.bfloat16), kf).reshape(M, K)
    patches = jnp.pad(patches, ((0, M_pad - M), (0, K_pad - K)))

    # Weights stored TRANSPOSED (classes x K): dense in HBM, contiguous k-tile DMAs,
    # no (TK, nc) lane-padded blocks.
    wf = jnp.pad(w.reshape(K, nc).T.astype(jnp.bfloat16),
                 ((0, _NC_SUB - nc), (0, K_pad - K)))
    bf = jnp.concatenate(
        [b.astype(jnp.float32),
         jnp.full((_NC_SUB - nc,), _NEG_INF, jnp.float32)]).reshape(1, _NC_SUB)

    flops = 2 * M_pad * K_pad * _NC_SUB
    bytes_accessed = (M_pad * K_pad * 2 + n_m * K_pad * _NC_SUB * 2
                      + _NC_SUB * 4 + M_pad * _NC_SUB * 4)
    tile_bytes = (2 * (TM * TK + _NC_SUB * TK) * 2
                  + 3 * TM * _NC_SUB * 4 + 2 * _NC_SUB * 4)

    probs = pl.pallas_call(
        _concat_conv_softmax_kernel,
        grid=(n_m, n_k),
        in_specs=[
            pl.BlockSpec((TM, TK), lambda i, j: (i, j)),
            pl.BlockSpec((_NC_SUB, TK), lambda i, j: (0, j)),
            pl.BlockSpec((1, _NC_SUB), lambda i, j: (0, 0)),
        ],
        out_specs=pl.BlockSpec((TM, _NC_SUB), lambda i, j: (i, 0)),
        out_shape=jax.ShapeDtypeStruct((M_pad, _NC_SUB), jnp.float32),
        scratch_shapes=[pltpu.VMEM((TM, _NC_SUB), jnp.float32)],
        compiler_params=pltpu.CompilerParams(
            # K axis must stay sequential ("arbitrary"): the accumulator's
            # init/finalize pl.when gates depend on it.
            dimension_semantics=("parallel", "arbitrary"),
            vmem_limit_bytes=_vmem_limit(tile_bytes)),
        cost_estimate=pl.CostEstimate(flops=flops,
                                      transcendentals=M_pad * _NC_SUB,
                                      bytes_accessed=bytes_accessed),
    )(patches, wf, bf)
    return probs[:M, :nc].reshape(n, ho, wo, nc)


def init_params(key, num_input_channels, num_classes):
    keys = iter(jax.random.split(key, 16))

    def conv_w(k, cin, cout):
        return jax.random.uniform(next(keys), (k, k, cin, cout), jnp.float32,
                                  UNIFORM_INIT_LOWER_BOUND, UNIFORM_INIT_UPPER_BOUND)

    def conv_b(cout, fan_in):
        bound = 1.0 / float(fan_in) ** 0.5
        return jax.random.uniform(next(keys), (cout,), jnp.float32, -bound, bound)

    cin = num_input_channels
    p = {}
    p["lc0_w0"], p["lc0_b0"] = conv_w(7, cin, 64), conv_b(64, cin * 7 * 7)
    p["lc0_w1"], p["lc0_b1"] = conv_w(7, cin, 64), conv_b(64, cin * 7 * 7)
    p["lc1_w0"], p["lc1_b0"] = conv_w(3, 64, 64), conv_b(64, 64 * 3 * 3)
    p["lc1_w1"], p["lc1_b1"] = conv_w(3, 64, 64), conv_b(64, 64 * 3 * 3)
    p["gc0_w0"], p["gc0_b0"] = conv_w(13, cin, 160), conv_b(160, cin * 13 * 13)
    p["gc0_w1"], p["gc0_b1"] = conv_w(13, cin, 160), conv_b(160, cin * 13 * 13)
    p["cc_w"], p["cc_b"] = conv_w(21, 224, num_classes), conv_b(num_classes, 224 * 21 * 21)
    return p


def two_path_cnn_forward(params, x_nchw):
    x = jnp.transpose(x_nchw, (0, 2, 3, 1)).astype(jnp.float32)  # NHWC

    # ---- local path: conv7 maxout -> pool4 -> conv3 maxout -> pool2
    # (Dropout2d layers are identity at eval time.)
    l = maxout_conv(x, params["lc0_w0"], params["lc0_b0"],
                    params["lc0_w1"], params["lc0_b1"])           # (N,27,27,128 pad)
    l = maxpool(l, 4)                                             # (N,24,24,128)
    l = maxout_conv(l[..., :64], params["lc1_w0"], params["lc1_b0"],
                    params["lc1_w1"], params["lc1_b1"])           # (N,22,22,128 pad)
    l = maxpool(l, 2)[..., :64]                                   # (N,21,21,64)

    # ---- global path: conv13 maxout (store exactly 160 channels, no dead lanes)
    g = maxout_conv(x, params["gc0_w0"], params["gc0_b0"],
                    params["gc0_w1"], params["gc0_b1"],
                    out_channels=160)                             # (N,21,21,160)

    # ---- concat (channels: local first, then global — matches torch.concat dim=1)
    xc = jnp.concatenate([l, g], axis=-1)                         # (N,21,21,224)

    # ---- concat conv (21x21) + softmax over classes, K-tiled Pallas matmul
    out = concat_conv_softmax(xc, params["cc_w"], params["cc_b"])
    return jnp.transpose(out, (0, 3, 1, 2))                       # back to NCHW


if __name__ == "__main__":
    key = jax.random.PRNGKey(0)
    num_input_channels, num_classes = 4, 5
    # 33x33 is the minimal input for this architecture (final feature map 21x21,
    # final conv kernel 21) -> output spatial 1x1, matching the patch classifier.
    N, H, W = 2, 33, 33

    pkey, xkey = jax.random.split(key)
    params = init_params(pkey, num_input_channels, num_classes)
    x = jax.random.normal(xkey, (N, num_input_channels, H, W), jnp.float32)

    fwd = jax.jit(functools.partial(two_path_cnn_forward, params))
    out = jax.block_until_ready(fwd(x))

    assert out.shape == (N, num_classes, 1, 1), out.shape
    assert bool(jnp.allclose(out.sum(axis=1), 1.0, atol=1e-5))
    print("KERNEL_OK")
</pallas_src>

<mosaic_0001>
module attributes {stable_mosaic.version = 11 : i64} {
  func.func @_maxout_matmul_kernel(%arg0: i32, %arg1: memref<256x768xbf16, #tpu.memory_space<vmem>>, %arg2: memref<768x512xbf16, #tpu.memory_space<vmem>>, %arg3: memref<1x512xf32, #tpu.memory_space<vmem>>, %arg4: memref<256x160xbf16, #tpu.memory_space<vmem>>) attributes {dimension_semantics = [#tpu.dimension_semantics<parallel>], iteration_bounds = array<i64: 4>, scalar_prefetch = 0 : i64, scratch_operands = 0 : i64, tpu.core_type = #tpu.core_type<tc>, window_params = [{transform_indices = @transform_0, window_bounds = array<i64: 256, 768>}, {pipeline_mode = #tpu.pipeline_mode<synchronous>, transform_indices = @transform_1, window_bounds = array<i64: 768, 512>}, {pipeline_mode = #tpu.pipeline_mode<synchronous>, transform_indices = @transform_2, window_bounds = array<i64: 1, 512>}, {transform_indices = @transform_3, window_bounds = array<i64: 256, 160>}]} {
    %c0 = arith.constant 0 : index
    %c0_0 = arith.constant 0 : index
    %0 = vector.load %arg1[%c0, %c0_0] : memref<256x768xbf16, #tpu.memory_space<vmem>>, vector<256x768xbf16>
    %c0_1 = arith.constant 0 : index
    %c0_2 = arith.constant 0 : index
    %1 = vector.load %arg2[%c0_1, %c0_2] : memref<768x512xbf16, #tpu.memory_space<vmem>>, vector<768x512xbf16>
    %cst = arith.constant dense<0.000000e+00> : vector<256x512xf32>
    %2 = tpu.matmul %0, %1, %cst {dimension_numbers = #tpu.dot_dimension_numbers<[1], [0], [0], [1], [0, 0, 1, 1], [], []>} : vector<256x768xbf16>, vector<768x512xbf16>, vector<256x512xf32> -> vector<256x512xf32>
    %c0_3 = arith.constant 0 : index
    %c0_4 = arith.constant 0 : index
    %3 = vector.load %arg3[%c0_3, %c0_4] : memref<1x512xf32, #tpu.memory_space<vmem>>, vector<1x512xf32>
    %4 = vector.broadcast %3 : vector<1x512xf32> to vector<256x512xf32>
    %5 = arith.addf %2, %4 : vector<256x512xf32>
    %6 = vector.extract_strided_slice %5 {offsets = [0, 0], sizes = [256, 256], strides = [1, 1]} : vector<256x512xf32> to vector<256x256xf32>
    %7 = vector.extract_strided_slice %5 {offsets = [0, 256], sizes = [256, 256], strides = [1, 1]} : vector<256x512xf32> to vector<256x256xf32>
    %8 = arith.maximumf %6, %7 : vector<256x256xf32>
    %9 = vector.extract_strided_slice %8 {offsets = [0, 0], sizes = [256, 160], strides = [1, 1]} : vector<256x256xf32> to vector<256x160xf32>
    %10 = arith.truncf %9 : vector<256x160xf32> to vector<256x160xbf16>
    %c0_5 = arith.constant 0 : index
    %c0_6 = arith.constant 0 : index
    %11 = vector.load %arg4[%c0_5, %c0_6] : memref<256x160xbf16, #tpu.memory_space<vmem>>, vector<256x160xbf16>
    tpu.vector_store %arg4[%c0_5, %c0_6], %10 {strides = array<i32>} : memref<256x160xbf16, #tpu.memory_space<vmem>>, vector<256x160xbf16>,
    return
  }
  func.func @transform_0(%arg0: i32) -> (i32, i32) {
    %c0_i32 = arith.constant 0 : i32
    %c0_i32_0 = arith.constant 0 : i32
    return %arg0, %c0_i32 : i32, i32
  }
  func.func @transform_1(%arg0: i32) -> (i32, i32) {
    %c0_i32 = arith.constant 0 : i32
    %c0_i32_0 = arith.constant 0 : i32
    %c0_i32_1 = arith.constant 0 : i32
    return %c0_i32, %c0_i32_0 : i32, i32
  }
  func.func @transform_2(%arg0: i32) -> (i32, i32) {
    %c0_i32 = arith.constant 0 : i32
    %c0_i32_0 = arith.constant 0 : i32
    %c0_i32_1 = arith.constant 0 : i32
    return %c0_i32, %c0_i32_0 : i32, i32
  }
  func.func @transform_3(%arg0: i32) -> (i32, i32) {
    %c0_i32 = arith.constant 0 : i32
    %c0_i32_0 = arith.constant 0 : i32
    return %arg0, %c0_i32 : i32, i32
  }
}

module attributes {stable_mosaic.version = 11 : i64} {
  func.func @_maxout_matmul_kernel(%arg0: i32, %arg1: memref<256x256xbf16, #tpu.memory_space<vmem>>, %arg2: memref<256x256xbf16, #tpu.memory_space<vmem>>, %arg3: memref<1x256xf32, #tpu.memory_space<vmem>>, %arg4: memref<256x128xbf16, #tpu.memory_space<vmem>>) attributes {dimension_semantics = [#tpu.dimension_semantics<parallel>], iteration_bounds = array<i64: 6>, scalar_prefetch = 0 : i64, scratch_operands = 0 : i64, tpu.core_type = #tpu.core_type<tc>, window_params = [{transform_indices = @transform_0, window_bounds = array<i64: 256, 256>}, {pipeline_mode = #tpu.pipeline_mode<synchronous>, transform_indices = @transform_1, window_bounds = array<i64: 256, 256>}, {pipeline_mode = #tpu.pipeline_mode<synchronous>, transform_indices = @transform_2, window_bounds = array<i64: 1, 256>}, {transform_indices = @transform_3, window_bounds = array<i64: 256, 128>}]} {
    %c0 = arith.constant 0 : index
    %c0_0 = arith.constant 0 : index
    %0 = vector.load %arg1[%c0, %c0_0] : memref<256x256xbf16, #tpu.memory_space<vmem>>, vector<256x256xbf16>
    %c0_1 = arith.constant 0 : index
    %c0_2 = arith.constant 0 : index
    %1 = vector.load %arg2[%c0_1, %c0_2] : memref<256x256xbf16, #tpu.memory_space<vmem>>, vector<256x256xbf16>
    %cst = arith.constant dense<0.000000e+00> : vector<256x256xf32>
    %2 = tpu.matmul %0, %1, %cst {dimension_numbers = #tpu.dot_dimension_numbers<[1], [0], [0], [1], [0, 0, 1, 1], [], []>} : vector<256x256xbf16>, vector<256x256xbf16>, vector<256x256xf32> -> vector<256x256xf32>
    %c0_3 = arith.constant 0 : index
    %c0_4 = arith.constant 0 : index
    %3 = vector.load %arg3[%c0_3, %c0_4] : memref<1x256xf32, #tpu.memory_space<vmem>>, vector<1x256xf32>
    %4 = vector.broadcast %3 : vector<1x256xf32> to vector<256x256xf32>
    %5 = arith.addf %2, %4 : vector<256x256xf32>
    %6 = vector.extract_strided_slice %5 {offsets = [0, 0], sizes = [256, 128], strides = [1, 1]} : vector<256x256xf32> to vector<256x128xf32>
    %7 = vector.extract_strided_slice %5 {offsets = [0, 128], sizes = [256, 128], strides = [1, 1]} : vector<256x256xf32> to vector<256x128xf32>
    %8 = arith.maximumf %6, %7 : vector<256x128xf32>
    %9 = arith.truncf %8 : vector<256x128xf32> to vector<256x128xbf16>
    %c0_5 = arith.constant 0 : index
    %c0_6 = arith.constant 0 : index
    %10 = vector.load %arg4[%c0_5, %c0_6] : memref<256x128xbf16, #tpu.memory_space<vmem>>, vector<256x128xbf16>
    tpu.vector_store %arg4[%c0_5, %c0_6], %9 {strides = array<i32>} : memref<256x128xbf16, #tpu.memory_space<vmem>>, vector<256x128xbf16>,
    return
  }
  func.func @transform_0(%arg0: i32) -> (i32, i32) {
    %c0_i32 = arith.constant 0 : i32
    %c0_i32_0 = arith.constant 0 : i32
    return %arg0, %c0_i32 : i32, i32
  }
  func.func @transform_1(%arg0: i32) -> (i32, i32) {
    %c0_i32 = arith.constant 0 : i32
    %c0_i32_0 = arith.constant 0 : i32
    %c0_i32_1 = arith.constant 0 : i32
    return %c0_i32, %c0_i32_0 : i32, i32
  }
  func.func @transform_2(%arg0: i32) -> (i32, i32) {
    %c0_i32 = arith.constant 0 : i32
    %c0_i32_0 = arith.constant 0 : i32
    %c0_i32_1 = arith.constant 0 : i32
    return %c0_i32, %c0_i32_0 : i32, i32
  }
  func.func @transform_3(%arg0: i32) -> (i32, i32) {
    %c0_i32 = arith.constant 0 : i32
    %c0_i32_0 = arith.constant 0 : i32
    return %arg0, %c0_i32 : i32, i32
  }
}

module attributes {stable_mosaic.version = 11 : i64} {
  func.func @_maxpool_kernel(%arg0: i32, %arg1: memref<1x27x27x128xbf16, #tpu.memory_space<vmem>>, %arg2: memref<1x24x24x128xbf16, #tpu.memory_space<vmem>>) attributes {dimension_semantics = [#tpu.dimension_semantics<parallel>], iteration_bounds = array<i64: 2>, scalar_prefetch = 0 : i64, scratch_operands = 0 : i64, tpu.core_type = #tpu.core_type<tc>, window_params = [{transform_indices = @transform_0, window_bounds = array<i64: 1, 27, 27, 128>}, {transform_indices = @transform_1, window_bounds = array<i64: 1, 24, 24, 128>}]} {
    %c0 = arith.constant 0 : index
    %c0_0 = arith.constant 0 : index
    %c0_1 = arith.constant 0 : index
    %c0_2 = arith.constant 0 : index
    %0 = vector.load %arg1[%c0, %c0_0, %c0_1, %c0_2] : memref<1x27x27x128xbf16, #tpu.memory_space<vmem>>, vector<1x27x27x128xbf16>
    %1 = vector.extract_strided_slice %0 {offsets = [0, 0, 0, 0], sizes = [1, 24, 27, 128], strides = [1, 1, 1, 1]} : vector<1x27x27x128xbf16> to vector<1x24x27x128xbf16>
    %2 = vector.extract_strided_slice %0 {offsets = [0, 1, 0, 0], sizes = [1, 24, 27, 128], strides = [1, 1, 1, 1]} : vector<1x27x27x128xbf16> to vector<1x24x27x128xbf16>
    %3 = arith.maximumf %1, %2 : vector<1x24x27x128xbf16>
    %4 = vector.extract_strided_slice %0 {offsets = [0, 2, 0, 0], sizes = [1, 24, 27, 128], strides = [1, 1, 1, 1]} : vector<1x27x27x128xbf16> to vector<1x24x27x128xbf16>
    %5 = arith.maximumf %3, %4 : vector<1x24x27x128xbf16>
    %6 = vector.extract_strided_slice %0 {offsets = [0, 3, 0, 0], sizes = [1, 24, 27, 128], strides = [1, 1, 1, 1]} : vector<1x27x27x128xbf16> to vector<1x24x27x128xbf16>
    %7 = arith.maximumf %5, %6 : vector<1x24x27x128xbf16>
    %8 = vector.extract_strided_slice %7 {offsets = [0, 0, 0, 0], sizes = [1, 24, 24, 128], strides = [1, 1, 1, 1]} : vector<1x24x27x128xbf16> to vector<1x24x24x128xbf16>
    %9 = vector.extract_strided_slice %7 {offsets = [0, 0, 1, 0], sizes = [1, 24, 24, 128], strides = [1, 1, 1, 1]} : vector<1x24x27x128xbf16> to vector<1x24x24x128xbf16>
    %10 = arith.maximumf %8, %9 : vector<1x24x24x128xbf16>
    %11 = vector.extract_strided_slice %7 {offsets = [0, 0, 2, 0], sizes = [1, 24, 24, 128], strides = [1, 1, 1, 1]} : vector<1x24x27x128xbf16> to vector<1x24x24x128xbf16>
    %12 = arith.maximumf %10, %11 : vector<1x24x24x128xbf16>
    %13 = vector.extract_strided_slice %7 {offsets = [0, 0, 3, 0], sizes = [1, 24, 24, 128], strides = [1, 1, 1, 1]} : vector<1x24x27x128xbf16> to vector<1x24x24x128xbf16>
    %14 = arith.maximumf %12, %13 : vector<1x24x24x128xbf16>
    %c0_3 = arith.constant 0 : index
    %c0_4 = arith.constant 0 : index
    %c0_5 = arith.constant 0 : index
    %c0_6 = arith.constant 0 : index
    %15 = vector.load %arg2[%c0_3, %c0_4, %c0_5, %c0_6] : memref<1x24x24x128xbf16, #tpu.memory_space<vmem>>, vector<1x24x24x128xbf16>
    tpu.vector_store %arg2[%c0_3, %c0_4, %c0_5, %c0_6], %14 {strides = array<i32>} : memref<1x24x24x128xbf16, #tpu.memory_space<vmem>>, vector<1x24x24x128xbf16>,
    return
  }
  func.func @transform_0(%arg0: i32) -> (i32, i32, i32, i32) {
    %c0_i32 = arith.constant 0 : i32
    %c0_i32_0 = arith.constant 0 : i32
    %c0_i32_1 = arith.constant 0 : i32
    %c0_i32_2 = arith.constant 0 : i32
    return %arg0, %c0_i32, %c0_i32_0, %c0_i32_1 : i32, i32, i32, i32
  }
  func.func @transform_1(%arg0: i32) -> (i32, i32, i32, i32) {
    %c0_i32 = arith.constant 0 : i32
    %c0_i32_0 = arith.constant 0 : i32
    %c0_i32_1 = arith.constant 0 : i32
    %c0_i32_2 = arith.constant 0 : i32
    return %arg0, %c0_i32, %c0_i32_0, %c0_i32_1 : i32, i32, i32, i32
  }
}

module attributes {stable_mosaic.version = 11 : i64} {
  func.func @_maxout_matmul_kernel(%arg0: i32, %arg1: memref<256x640xbf16, #tpu.memory_space<vmem>>, %arg2: memref<640x256xbf16, #tpu.memory_space<vmem>>, %arg3: memref<1x256xf32, #tpu.memory_space<vmem>>, %arg4: memref<256x128xbf16, #tpu.memory_space<vmem>>) attributes {dimension_semantics = [#tpu.dimension_semantics<parallel>], iteration_bounds = array<i64: 4>, scalar_prefetch = 0 : i64, scratch_operands = 0 : i64, tpu.core_type = #tpu.core_type<tc>, window_params = [{transform_indices = @transform_0, window_bounds = array<i64: 256, 640>}, {pipeline_mode = #tpu.pipeline_mode<synchronous>, transform_indices = @transform_1, window_bounds = array<i64: 640, 256>}, {pipeline_mode = #tpu.pipeline_mode<synchronous>, transform_indices = @transform_2, window_bounds = array<i64: 1, 256>}, {transform_indices = @transform_3, window_bounds = array<i64: 256, 128>}]} {
    %c0 = arith.constant 0 : index
    %c0_0 = arith.constant 0 : index
    %0 = vector.load %arg1[%c0, %c0_0] : memref<256x640xbf16, #tpu.memory_space<vmem>>, vector<256x640xbf16>
    %c0_1 = arith.constant 0 : index
    %c0_2 = arith.constant 0 : index
    %1 = vector.load %arg2[%c0_1, %c0_2] : memref<640x256xbf16, #tpu.memory_space<vmem>>, vector<640x256xbf16>
    %cst = arith.constant dense<0.000000e+00> : vector<256x256xf32>
    %2 = tpu.matmul %0, %1, %cst {dimension_numbers = #tpu.dot_dimension_numbers<[1], [0], [0], [1], [0, 0, 1, 1], [], []>} : vector<256x640xbf16>, vector<640x256xbf16>, vector<256x256xf32> -> vector<256x256xf32>
    %c0_3 = arith.constant 0 : index
    %c0_4 = arith.constant 0 : index
    %3 = vector.load %arg3[%c0_3, %c0_4] : memref<1x256xf32, #tpu.memory_space<vmem>>, vector<1x256xf32>
    %4 = vector.broadcast %3 : vector<1x256xf32> to vector<256x256xf32>
    %5 = arith.addf %2, %4 : vector<256x256xf32>
    %6 = vector.extract_strided_slice %5 {offsets = [0, 0], sizes = [256, 128], strides = [1, 1]} : vector<256x256xf32> to vector<256x128xf32>
    %7 = vector.extract_strided_slice %5 {offsets = [0, 128], sizes = [256, 128], strides = [1, 1]} : vector<256x256xf32> to vector<256x128xf32>
    %8 = arith.maximumf %6, %7 : vector<256x128xf32>
    %9 = arith.truncf %8 : vector<256x128xf32> to vector<256x128xbf16>
    %c0_5 = arith.constant 0 : index
    %c0_6 = arith.constant 0 : index
    %10 = vector.load %arg4[%c0_5, %c0_6] : memref<256x128xbf16, #tpu.memory_space<vmem>>, vector<256x128xbf16>
    tpu.vector_store %arg4[%c0_5, %c0_6], %9 {strides = array<i32>} : memref<256x128xbf16, #tpu.memory_space<vmem>>, vector<256x128xbf16>,
    return
  }
  func.func @transform_0(%arg0: i32) -> (i32, i32) {
    %c0_i32 = arith.constant 0 : i32
    %c0_i32_0 = arith.constant 0 : i32
    return %arg0, %c0_i32 : i32, i32
  }
  func.func @transform_1(%arg0: i32) -> (i32, i32) {
    %c0_i32 = arith.constant 0 : i32
    %c0_i32_0 = arith.constant 0 : i32
    %c0_i32_1 = arith.constant 0 : i32
    return %c0_i32, %c0_i32_0 : i32, i32
  }
  func.func @transform_2(%arg0: i32) -> (i32, i32) {
    %c0_i32 = arith.constant 0 : i32
    %c0_i32_0 = arith.constant 0 : i32
    %c0_i32_1 = arith.constant 0 : i32
    return %c0_i32, %c0_i32_0 : i32, i32
  }
  func.func @transform_3(%arg0: i32) -> (i32, i32) {
    %c0_i32 = arith.constant 0 : i32
    %c0_i32_0 = arith.constant 0 : i32
    return %arg0, %c0_i32 : i32, i32
  }
}

module attributes {stable_mosaic.version = 11 : i64} {
  func.func @_maxpool_kernel(%arg0: i32, %arg1: memref<1x22x22x128xbf16, #tpu.memory_space<vmem>>, %arg2: memref<1x21x21x128xbf16, #tpu.memory_space<vmem>>) attributes {dimension_semantics = [#tpu.dimension_semantics<parallel>], iteration_bounds = array<i64: 2>, scalar_prefetch = 0 : i64, scratch_operands = 0 : i64, tpu.core_type = #tpu.core_type<tc>, window_params = [{transform_indices = @transform_0, window_bounds = array<i64: 1, 22, 22, 128>}, {transform_indices = @transform_1, window_bounds = array<i64: 1, 21, 21, 128>}]} {
    %c0 = arith.constant 0 : index
    %c0_0 = arith.constant 0 : index
    %c0_1 = arith.constant 0 : index
    %c0_2 = arith.constant 0 : index
    %0 = vector.load %arg1[%c0, %c0_0, %c0_1, %c0_2] : memref<1x22x22x128xbf16, #tpu.memory_space<vmem>>, vector<1x22x22x128xbf16>
    %1 = vector.extract_strided_slice %0 {offsets = [0, 0, 0, 0], sizes = [1, 21, 22, 128], strides = [1, 1, 1, 1]} : vector<1x22x22x128xbf16> to vector<1x21x22x128xbf16>
    %2 = vector.extract_strided_slice %0 {offsets = [0, 1, 0, 0], sizes = [1, 21, 22, 128], strides = [1, 1, 1, 1]} : vector<1x22x22x128xbf16> to vector<1x21x22x128xbf16>
    %3 = arith.maximumf %1, %2 : vector<1x21x22x128xbf16>
    %4 = vector.extract_strided_slice %3 {offsets = [0, 0, 0, 0], sizes = [1, 21, 21, 128], strides = [1, 1, 1, 1]} : vector<1x21x22x128xbf16> to vector<1x21x21x128xbf16>
    %5 = vector.extract_strided_slice %3 {offsets = [0, 0, 1, 0], sizes = [1, 21, 21, 128], strides = [1, 1, 1, 1]} : vector<1x21x22x128xbf16> to vector<1x21x21x128xbf16>
    %6 = arith.maximumf %4, %5 : vector<1x21x21x128xbf16>
    %c0_3 = arith.constant 0 : index
    %c0_4 = arith.constant 0 : index
    %c0_5 = arith.constant 0 : index
    %c0_6 = arith.constant 0 : index
    %7 = vector.load %arg2[%c0_3, %c0_4, %c0_5, %c0_6] : memref<1x21x21x128xbf16, #tpu.memory_space<vmem>>, vector<1x21x21x128xbf16>
    tpu.vector_store %arg2[%c0_3, %c0_4, %c0_5, %c0_6], %6 {strides = array<i32>} : memref<1x21x21x128xbf16, #tpu.memory_space<vmem>>, vector<1x21x21x128xbf16>,
    return
  }
  func.func @transform_0(%arg0: i32) -> (i32, i32, i32, i32) {
    %c0_i32 = arith.constant 0 : i32
    %c0_i32_0 = arith.constant 0 : i32
    %c0_i32_1 = arith.constant 0 : i32
    %c0_i32_2 = arith.constant 0 : i32
    return %arg0, %c0_i32, %c0_i32_0, %c0_i32_1 : i32, i32, i32, i32
  }
  func.func @transform_1(%arg0: i32) -> (i32, i32, i32, i32) {
    %c0_i32 = arith.constant 0 : i32
    %c0_i32_0 = arith.constant 0 : i32
    %c0_i32_1 = arith.constant 0 : i32
    %c0_i32_2 = arith.constant 0 : i32
    return %arg0, %c0_i32, %c0_i32_0, %c0_i32_1 : i32, i32, i32, i32
  }
}

module attributes {stable_mosaic.version = 11 : i64} {
  func.func @_concat_conv_softmax_kernel(%arg0: i32, %arg1: i32, %arg2: memref<8x14208xbf16, #tpu.memory_space<vmem>>, %arg3: memref<8x14208xbf16, #tpu.memory_space<vmem>>, %arg4: memref<1x8xf32, #tpu.memory_space<vmem>>, %arg5: memref<8x8xf32, #tpu.memory_space<vmem>>, %arg6: memref<8x8xf32, #tpu.memory_space<vmem>>) attributes {dimension_semantics = [#tpu.dimension_semantics<parallel>, #tpu.dimension_semantics<arbitrary>], iteration_bounds = array<i64: 1, 7>, scalar_prefetch = 0 : i64, scratch_operands = 1 : i64, tpu.core_type = #tpu.core_type<tc>, window_params = [{transform_indices = @transform_0, window_bounds = array<i64: 8, 14208>}, {transform_indices = @transform_1, window_bounds = array<i64: 8, 14208>}, {pipeline_mode = #tpu.pipeline_mode<synchronous>, transform_indices = @transform_2, window_bounds = array<i64: 1, 8>}, {transform_indices = @transform_3, window_bounds = array<i64: 8, 8>}]} {
    %c0_i32 = arith.constant 0 : i32
    %0 = arith.cmpi eq, %arg1, %c0_i32 : i32
    %1 = arith.extui %0 : i1 to i32
    %c0_i32_0 = arith.constant 0 : i32
    %2 = arith.cmpi ne, %1, %c0_i32_0 : i32
    scf.if %2 {
      %cst_9 = arith.constant 0.000000e+00 : f32
      %12 = vector.broadcast %cst_9 : f32 to vector<8x8xf32>
      %c0_10 = arith.constant 0 : index
      %c0_11 = arith.constant 0 : index
      %13 = vector.load %arg6[%c0_10, %c0_11] : memref<8x8xf32, #tpu.memory_space<vmem>>, vector<8x8xf32>
      tpu.vector_store %arg6[%c0_10, %c0_11], %12 {strides = array<i32>} : memref<8x8xf32, #tpu.memory_space<vmem>>, vector<8x8xf32>,
    } else {
    }
    %c0 = arith.constant 0 : index
    %c0_1 = arith.constant 0 : index
    %3 = vector.load %arg6[%c0, %c0_1] : memref<8x8xf32, #tpu.memory_space<vmem>>, vector<8x8xf32>
    %c0_2 = arith.constant 0 : index
    %c0_3 = arith.constant 0 : index
    %4 = vector.load %arg2[%c0_2, %c0_3] : memref<8x14208xbf16, #tpu.memory_space<vmem>>, vector<8x14208xbf16>
    %c0_4 = arith.constant 0 : index
    %c0_5 = arith.constant 0 : index
    %5 = vector.load %arg3[%c0_4, %c0_5] : memref<8x14208xbf16, #tpu.memory_space<vmem>>, vector<8x14208xbf16>
    %cst = arith.constant dense<0.000000e+00> : vector<8x8xf32>
    %6 = tpu.matmul %4, %5, %cst {dimension_numbers = #tpu.dot_dimension_numbers<[1], [1], [0], [0], [0, 0, 1, 0], [], []>} : vector<8x14208xbf16>, vector<8x14208xbf16>, vector<8x8xf32> -> vector<8x8xf32>
    %7 = arith.addf %3, %6 : vector<8x8xf32>
    %c0_6 = arith.constant 0 : index
    %c0_7 = arith.constant 0 : index
    %8 = vector.load %arg6[%c0_6, %c0_7] : memref<8x8xf32, #tpu.memory_space<vmem>>, vector<8x8xf32>
    tpu.vector_store %arg6[%c0_6, %c0_7], %7 {strides = array<i32>} : memref<8x8xf32, #tpu.memory_space<vmem>>, vector<8x8xf32>,
    %c6_i32 = arith.constant 6 : i32
    %9 = arith.cmpi eq, %arg1, %c6_i32 : i32
    %10 = arith.extui %9 : i1 to i32
    %c0_i32_8 = arith.constant 0 : i32
    %11 = arith.cmpi ne, %10, %c0_i32_8 : i32
    scf.if %11 {
      %c0_9 = arith.constant 0 : index
      %c0_10 = arith.constant 0 : index
      %12 = vector.load %arg6[%c0_9, %c0_10] : memref<8x8xf32, #tpu.memory_space<vmem>>, vector<8x8xf32>
      %c0_11 = arith.constant 0 : index
      %c0_12 = arith.constant 0 : index
      %13 = vector.load %arg4[%c0_11, %c0_12] : memref<1x8xf32, #tpu.memory_space<vmem>>, vector<1x8xf32>
      %14 = vector.broadcast %13 : vector<1x8xf32> to vector<8x8xf32>
      %15 = arith.addf %12, %14 : vector<8x8xf32>
      %cst_13 = arith.constant dense<0xFF800000> : vector<8xf32>
      %16 = vector.multi_reduction <maximumf>, %15, %cst_13 [1] : vector<8x8xf32> to vector<8xf32>
      %17 = vector.shape_cast %16 : vector<8xf32> to vector<8x1xf32>
      %18 = vector.broadcast %17 : vector<8x1xf32> to vector<8x8xf32>
      %19 = arith.subf %15, %18 : vector<8x8xf32>
      %20 = math.exp %19 : vector<8x8xf32>
      %cst_14 = arith.constant dense<0.000000e+00> : vector<8xf32>
      %21 = vector.multi_reduction <add>, %20, %cst_14 [1] : vector<8x8xf32> to vector<8xf32>
      %22 = vector.shape_cast %21 : vector<8xf32> to vector<8x1xf32>
      %23 = vector.broadcast %22 : vector<8x1xf32> to vector<8x8xf32>
      %24 = arith.divf %20, %23 : vector<8x8xf32>
      %c0_15 = arith.constant 0 : index
      %c0_16 = arith.constant 0 : index
      %25 = vector.load %arg5[%c0_15, %c0_16] : memref<8x8xf32, #tpu.memory_space<vmem>>, vector<8x8xf32>
      tpu.vector_store %arg5[%c0_15, %c0_16], %24 {strides = array<i32>} : memref<8x8xf32, #tpu.memory_space<vmem>>, vector<8x8xf32>,
    } else {
    }
    return
  }
  func.func @transform_0(%arg0: i32, %arg1: i32) -> (i32, i32) {
    %c0_i32 = arith.constant 0 : i32
    return %arg0, %arg1 : i32, i32
  }
  func.func @transform_1(%arg0: i32, %arg1: i32) -> (i32, i32) {
    %c0_i32 = arith.constant 0 : i32
    %c0_i32_0 = arith.constant 0 : i32
    return %c0_i32, %arg1 : i32, i32
  }
  func.func @transform_2(%arg0: i32, %arg1: i32) -> (i32, i32) {
    %c0_i32 = arith.constant 0 : i32
    %c0_i32_0 = arith.constant 0 : i32
    %c0_i32_1 = arith.constant 0 : i32
    return %c0_i32, %c0_i32_0 : i32, i32
  }
  func.func @transform_3(%arg0: i32, %arg1: i32) -> (i32, i32) {
    %c0_i32 = arith.constant 0 : i32
    %c0_i32_0 = arith.constant 0 : i32
    return %arg0, %c0_i32 : i32, i32
  }
}

</mosaic_0001>

<bundles_post_ra>
// kernel: two_path_cnn_forward.10
= control target key start
LH: loop header
LB: loop body
LE: loop exit
PB: predicated region body
PF: predicated region fallthrough
CT: control target
= control target key end

     0   :  { %s4304_s12 = smov 0   ;;  %s6113_s0 = inlined_call_operand.vmem [shape: bf16[1024,768], index: 0, kind: input, shape index: {}]   ;;  %s6114_s1 = inlined_call_operand.vmem [shape: bf16[768,512], index: 1, kind: input, shape index: {}]   ;;  %s6115_s2 = inlined_call_operand.vmem [shape: f32[1,512], index: 2, kind: input, shape index: {}]   ;;  %s6116_s3 = inlined_call_operand.vmem [shape: bf16[1024,160], index: 3, kind: output, shape index: {}]  }
   0x1 LB: > { %s3436_s13 = sadd.s32 4294967295, %s4282_s12   ;;  %p3440_p0 = scmp.ge.s32.totalorder %s4282_s12, 1  ;;  %s4282_s12 = sphi %s4304_s12, %s13_s12  }
   0x2   : > { %p139_p1 = scmp.lt.s32.totalorder %s4282_s12, 5 }
   0x4   : > { %p140_p2 = pnand %p3440_p0, %p139_p1 }
   0x6   : > { %143 = sbr.rel (%p140_p2) target bundleno = 660 (0x294), region = 32 }
   0xb   : > { %v3810_v0 = vld [vmem:[%s6114_s1 + $0xe4] ss:$16 sps:$4 sm:$0xff]   ;;  %v3814_v2 = vld [vmem:[%s6114_s1 + $0xe0] ss:$16 sps:$4 sm:$0xff]   ;;  %s3441_s24 = sshll.u32 %s3436_s13, 5  ;;  %vm3343_vm0 = vcmask 1043456  }
   0xc   : > { %v3812_v1 = vld [vmem:[%s6114_s1 + $0x2e4] ss:$16 sps:$4 sm:$0xff]   ;;  %1929 = vmatprep.subr.bf16.mxu0 %v3810_v0  ;;  %v3815_v3 = vld [vmem:[%s6114_s1 + $0x2e0] ss:$16 sps:$4 sm:$0xff]   ;;  %p166_p3 = scmp.lt.s32.totalorder %s3441_s24, 127  ;;  %vm3344_vm1 = vcmask 261124  }
   0xd   : > { %2122 = vmatprep.subr.bf16.mxu1 %v3812_v1  ;;  %v3816_v4 = vld [vmem:[%s6114_s1 + $0xc4] ss:$16 sps:$4 sm:$0xff]   ;;  %1930 = vmatpush1.bf16.msra.mxu0 %v3814_v2  ;;  %v3820_v6 = vld [vmem:[%s6114_s1 + $0xc0] ss:$16 sps:$4 sm:$0xff]   ;;  %vm5832_vm2 = vmor %vm3344_vm1, %vm3343_vm0 }
   0xe   : > { %2123 = vmatpush1.bf16.msra.mxu1 %v3815_v3  ;;  %v3818_v5 = vld [vmem:[%s6114_s1 + $0x2c4] ss:$16 sps:$4 sm:$0xff]   ;;  %1931 = vmatprep.subr.bf16.mxu0 %v3816_v4  ;;  %v3821_v7 = vld [vmem:[%s6114_s1 + $0x2c0] ss:$16 sps:$4 sm:$0xff]   ;;  %s6351_s24 = smov (!%p166_p3, %s3441_s24), 127 }
   0xf   : > { %2124 = vmatprep.subr.bf16.mxu1 %v3818_v5  ;;  %v3822_v8 = vld [vmem:[%s6114_s1 + $0xa4] ss:$16 sps:$4 sm:$0xff]   ;;  %v3826_v10 = vld [vmem:[%s6114_s1 + $0xa0] ss:$16 sps:$4 sm:$0xff]   ;;  %s3801_s21 = smul.u32 24, %s6351_s24  ;;  %s3768_s17 = sshll.u32 %s6351_s24, 3 }
  0x10   : > { %v3824_v9 = vld [vmem:[%s6114_s1 + $0x2a4] ss:$16 sps:$4 sm:$0xff]   ;;  %v3827_v11 = vld [vmem:[%s6114_s1 + $0x2a0] ss:$16 sps:$4 sm:$0xff]   ;;  %v3917_v3 = vld [vmem:[%s6114_s1 + $0xec] ss:$16 sps:$4 sm:$0xff]   ;;  %s5829_s20 = scalar_lea.vmem %s6116_s3, %s3768_s17 }
  0x11   : > { %1932 = vmatpush1.bf16.msra.mxu0 %v3820_v6  ;;  %v3828_v12 = vld [vmem:[%s6114_s1 + $0x84] ss:$16 sps:$4 sm:$0xff]   ;;  %v3832_v14 = vld [vmem:[%s6114_s1 + $0x80] ss:$16 sps:$4 sm:$0xff]   ;;  %s4455_s13 = scalar_lea.vmem %s6113_s0, %s3801_s21 }
  0x12   : > { %2125 = vmatpush1.bf16.msra.mxu1 %v3821_v7  ;;  %1933 = vmatprep.subr.bf16.mxu0 %v3822_v8  ;;  %v3830_v13 = vld [vmem:[%s6114_s1 + $0x284] ss:$16 sps:$4 sm:$0xff]   ;;  %v3833_v15 = vld [vmem:[%s6114_s1 + $0x280] ss:$16 sps:$4 sm:$0xff]   ;;  %v3915_v7 = vld [vmem:[%s6114_s1 + $0xe8] ss:$16 sps:$4 sm:$0xff]  }
  0x13   : > { %2126 = vmatprep.subr.bf16.mxu1 %v3824_v9  ;;  %v3834_v16 = vld [vmem:[%s6114_s1 + $0x64] ss:$16 sps:$4 sm:$0xff]   ;;  %v3838_v18 = vld [vmem:[%s6114_s1 + $0x60] ss:$16 sps:$4 sm:$0xff]  }
  0x14   : > { %v3836_v17 = vld [vmem:[%s6114_s1 + $0x264] ss:$16 sps:$4 sm:$0xff]   ;;  %v3839_v19 = vld [vmem:[%s6114_s1 + $0x260] ss:$16 sps:$4 sm:$0xff]  }
  0x15   : > { %1934 = vmatpush1.bf16.msra.mxu0 %v3826_v10  ;;  %v3840_v20 = vld [vmem:[%s6114_s1 + $0x44] ss:$16 sps:$4 sm:$0xff]   ;;  %v3844_v22 = vld [vmem:[%s6114_s1 + $0x40] ss:$16 sps:$4 sm:$0xff]  }
  0x16   : > { %2127 = vmatpush1.bf16.msra.mxu1 %v3827_v11  ;;  %1935 = vmatprep.subr.bf16.mxu0 %v3828_v12  ;;  %v3842_v21 = vld [vmem:[%s6114_s1 + $0x244] ss:$16 sps:$4 sm:$0xff]   ;;  %v3845_v23 = vld [vmem:[%s6114_s1 + $0x240] ss:$16 sps:$4 sm:$0xff]   ;;  %v3929_v11 = vld [vmem:[%s6114_s1 + $0xcc] ss:$16 sps:$4 sm:$0xff]  }
  0x17   : > { %2128 = vmatprep.subr.bf16.mxu1 %v3830_v13  ;;  %v3846_v24 = vld [vmem:[%s6114_s1 + $0x24] ss:$16 sps:$4 sm:$0xff]   ;;  %v3850_v26 = vld [vmem:[%s6114_s1 + $0x20] ss:$16 sps:$4 sm:$0xff]   ;;  %v3927_v13 = vld [vmem:[%s6114_s1 + $0xc8] ss:$16 sps:$4 sm:$0xff]  }
  0x18   : > { %v3848_v25 = vld [vmem:[%s6114_s1 + $0x224] ss:$16 sps:$4 sm:$0xff]   ;;  %v3851_v27 = vld [vmem:[%s6114_s1 + $0x220] ss:$16 sps:$4 sm:$0xff]  }
  0x19   : > { %1936 = vmatpush1.bf16.msra.mxu0 %v3832_v14  ;;  %v3852_v28 = vld [vmem:[%s6114_s1 + $0x4] ss:$16 sps:$4 sm:$0xff]   ;;  %v3856_v30 = vld [vmem:[%s6114_s1] ss:$16 sps:$4 sm:$0xff]  }
  0x1a   : > { %2129 = vmatpush1.bf16.msra.mxu1 %v3833_v15  ;;  %1937 = vmatprep.subr.bf16.mxu0 %v3834_v16  ;;  %v3854_v29 = vld [vmem:[%s6114_s1 + $0x204] ss:$16 sps:$4 sm:$0xff]   ;;  %v3857_v31 = vld [vmem:[%s6114_s1 + $0x200] ss:$16 sps:$4 sm:$0xff]   ;;  %v3941_v15 = vld [vmem:[%s6114_s1 + $0xac] ss:$16 sps:$4 sm:$0xff]  }
  0x1b   : > { %2130 = vmatprep.subr.bf16.mxu1 %v3836_v17  ;;  %v3858_v32 = vld [vmem:[%s6114_s1 + $0x1e4] ss:$16 sps:$4 sm:$0xff]   ;;  %v3862_v34 = vld [vmem:[%s6114_s1 + $0x1e0] ss:$16 sps:$4 sm:$0xff]  }
  0x1c   : > { %v3860_v33 = vld [vmem:[%s6114_s1 + $0x3e4] ss:$16 sps:$4 sm:$0xff]   ;;  %v3863_v35 = vld [vmem:[%s6114_s1 + $0x3e0] ss:$16 sps:$4 sm:$0xff]  }
  0x1d   : > { %1938 = vmatpush1.bf16.msra.mxu0 %v3838_v18  ;;  %v3864_v36 = vld [vmem:[%s6114_s1 + $0x1c4] ss:$16 sps:$4 sm:$0xff]   ;;  %v3868_v38 = vld [vmem:[%s6114_s1 + $0x1c0] ss:$16 sps:$4 sm:$0xff]  }
  0x1e   : > { %2131 = vmatpush1.bf16.msra.mxu1 %v3839_v19  ;;  %1939 = vmatprep.subr.bf16.mxu0 %v3840_v20  ;;  %v3866_v37 = vld [vmem:[%s6114_s1 + $0x3c4] ss:$16 sps:$4 sm:$0xff]   ;;  %v3869_v39 = vld [vmem:[%s6114_s1 + $0x3c0] ss:$16 sps:$4 sm:$0xff]  }
  0x1f   : > { %2132 = vmatprep.subr.bf16.mxu1 %v3842_v21  ;;  %v3870_v40 = vld [vmem:[%s6114_s1 + $0x1a4] ss:$16 sps:$4 sm:$0xff]   ;;  %v3874_v42 = vld [vmem:[%s6114_s1 + $0x1a0] ss:$16 sps:$4 sm:$0xff]   ;;  %v3939_v21 = vld [vmem:[%s6114_s1 + $0xa8] ss:$16 sps:$4 sm:$0xff]  }
  0x20   : > { %v3872_v41 = vld [vmem:[%s6114_s1 + $0x3a4] ss:$16 sps:$4 sm:$0xff]   ;;  %v3875_v43 = vld [vmem:[%s6114_s1 + $0x3a0] ss:$16 sps:$4 sm:$0xff]  }
  0x21   : > { %1940 = vmatpush1.bf16.msra.mxu0 %v3844_v22  ;;  %v3876_v44 = vld [vmem:[%s6114_s1 + $0x184] ss:$16 sps:$4 sm:$0xff]   ;;  %v3880_v46 = vld [vmem:[%s6114_s1 + $0x180] ss:$16 sps:$4 sm:$0xff]  }
  0x22   : > { %2133 = vmatpush1.bf16.msra.mxu1 %v3845_v23  ;;  %1941 = vmatprep.subr.bf16.mxu0 %v3846_v24  ;;  %v3878_v45 = vld [vmem:[%s6114_s1 + $0x384] ss:$16 sps:$4 sm:$0xff]   ;;  %v3881_v47 = vld [vmem:[%s6114_s1 + $0x380] ss:$16 sps:$4 sm:$0xff]   ;;  %v3953_v23 = vld [vmem:[%s6114_s1 + $0x8c] ss:$16 sps:$4 sm:$0xff]  }
  0x23   : > { %2134 = vmatprep.subr.bf16.mxu1 %v3848_v25  ;;  %v3882_v48 = vld [vmem:[%s6114_s1 + $0x164] ss:$16 sps:$4 sm:$0xff]   ;;  %v3886_v52 = vld [vmem:[%s6114_s1 + $0x160] ss:$16 sps:$4 sm:$0xff]  }
  0x24   : > { %v3908_v49 = vld [vmem:[%s4455_s13 + $0x4] ss:$24 sps:$4 sm:$0xff]   ;;  %v3887_v53 = vld [vmem:[%s6114_s1 + $0x360] ss:$16 sps:$4 sm:$0xff]   ;;  %v4533_v8 = vld [vmem:[%s4455_s13 + $0x34] ss:$24 sps:$4 sm:$0xff]  }
  0x25   : > { %1942 = vmatpush1.bf16.msra.mxu0 %v3850_v26  ;;  %v3884_v50 = vld [vmem:[%s6114_s1 + $0x364] ss:$16 sps:$4 sm:$0xff]   ;;  %1961 = vmatprep.mubr.bf16.mxu0 %v3908_v49  ;;  %v3892_v56 = vld [vmem:[%s6114_s1 + $0x140] ss:$16 sps:$4 sm:$0xff]  }
  0x26   : > { %2135 = vmatpush1.bf16.msra.mxu1 %v3851_v27  ;;  %1943 = vmatprep.subr.bf16.mxu0 %v3852_v28  ;;  %v3911_v51 = vld [vmem:[%s4455_s13 + $0xc] ss:$24 sps:$4 sm:$0xff]   ;;  %v3893_v57 = vld [vmem:[%s6114_s1 + $0x340] ss:$16 sps:$4 sm:$0xff]   ;;  %v3920_v9 = vld [vmem:[%s4455_s13 + $0x3c] ss:$24 sps:$4 sm:$0xff]  }
  0x27   : > { %2136 = vmatprep.subr.bf16.mxu1 %v3854_v29  ;;  %2154 = vmatprep.mubr.bf16.mxu1 %v3911_v51  ;;  %v3888_v54 = vld [vmem:[%s6114_s1 + $0x144] ss:$16 sps:$4 sm:$0xff]   ;;  %v3898_v60 = vld [vmem:[%s6114_s1 + $0x120] ss:$16 sps:$4 sm:$0xff]   ;;  %v3951_v27 = vld [vmem:[%s6114_s1 + $0x88] ss:$16 sps:$4 sm:$0xff]  }
  0x28   : > { %v3890_v55 = vld [vmem:[%s6114_s1 + $0x344] ss:$16 sps:$4 sm:$0xff]   ;;  %v3899_v61 = vld [vmem:[%s6114_s1 + $0x320] ss:$16 sps:$4 sm:$0xff]   ;;  %v3965_v29 = vld [vmem:[%s6114_s1 + $0x6c] ss:$16 sps:$4 sm:$0xff]  }
  0x29   : > { %1944 = vmatpush1.bf16.msra.mxu0 %v3856_v30  ;;  %v3894_v58 = vld [vmem:[%s6114_s1 + $0x124] ss:$16 sps:$4 sm:$0xff]   ;;  %v3904_v0 = vld [vmem:[%s6114_s1 + $0x100] ss:$16 sps:$4 sm:$0xff]   ;;  %v3999_v51 = vld [vmem:[%s6114_s1 + $0x8] ss:$16 sps:$4 sm:$0xff]  }
  0x2a   : > { %2137 = vmatpush1.bf16.msra.mxu1 %v3857_v31  ;;  %1945 = vmatprep.subr.bf16.mxu0 %v3858_v32  ;;  %v3896_v59 = vld [vmem:[%s6114_s1 + $0x324] ss:$16 sps:$4 sm:$0xff]   ;;  %v3905_v1 = vld [vmem:[%s6114_s1 + $0x300] ss:$16 sps:$4 sm:$0xff]  }
  0x2b   : > { %2138 = vmatprep.subr.bf16.mxu1 %v3860_v33  ;;  %v3900_v62 = vld [vmem:[%s6114_s1 + $0x104] ss:$16 sps:$4 sm:$0xff]   ;;  %v4523_v4 = vld [vmem:[%s4455_s13] ss:$24 sps:$4 sm:$0xff]   ;;  %v4557_v16 = vld [vmem:[%s4455_s13 + $0x30] ss:$24 sps:$4 sm:$0xff]  }
  0x2c   : > { %v3902_v63 = vld [vmem:[%s6114_s1 + $0x304] ss:$16 sps:$4 sm:$0xff]   ;;  %v3909_v5 = vld [vmem:[%s4455_s13 + $0x8] ss:$24 sps:$4 sm:$0xff]   ;;  %v3923_v17 = vld [vmem:[%s4455_s13 + $0x38] ss:$24 sps:$4 sm:$0xff]  }
  0x2d   : > { %1946 = vmatpush2.bf16.msra.mxu0 %v3862_v34  ;;  %v3914_v2 = vld [vmem:[%s6114_s1 + $0x4e4] ss:$16 sps:$4 sm:$0xff]   ;;  %v3912_v6 = vld [vmem:[%s6114_s1 + $0x4e0] ss:$16 sps:$4 sm:$0xff]   ;;  %v3963_v33 = vld [vmem:[%s6114_s1 + $0x68] ss:$16 sps:$4 sm:$0xff]  }
  0x2e   : > { %2139 = vmatpush2.bf16.msra.mxu1 %v3863_v35  ;;  %1947 = vmatprep.subr.bf16.mxu0 %v3864_v36  ;;  %v3926_v10 = vld [vmem:[%s6114_s1 + $0x4c4] ss:$16 sps:$4 sm:$0xff]   ;;  %v3924_v12 = vld [vmem:[%s6114_s1 + $0x4c0] ss:$16 sps:$4 sm:$0xff]   ;;  %v3977_v35 = vld [vmem:[%s6114_s1 + $0x4c] ss:$16 sps:$4 sm:$0xff]  }
  0x2f   : > { %2140 = vmatprep.subr.bf16.mxu1 %v3866_v37  ;;  %v3938_v14 = vld [vmem:[%s6114_s1 + $0x4a4] ss:$16 sps:$4 sm:$0xff]   ;;  %v3936_v20 = vld [vmem:[%s6114_s1 + $0x4a0] ss:$16 sps:$4 sm:$0xff]   ;;  %v3975_v37 = vld [vmem:[%s6114_s1 + $0x48] ss:$16 sps:$4 sm:$0xff]  }
  0x30   : > { %v4561_v18 = vld [vmem:[%s4455_s13 + $0x64] ss:$24 sps:$4 sm:$0xff]   ;;  %v3948_v24 = vld [vmem:[%s6114_s1 + $0x480] ss:$16 sps:$4 sm:$0xff]   ;;  %v4595_v30 = vld [vmem:[%s4455_s13 + $0x94] ss:$24 sps:$4 sm:$0xff]  }
  0x31   : > { %1948 = vmatpush2.bf16.msra.mxu0 %v3868_v38  ;;  %v3932_v19 = vld [vmem:[%s4455_s13 + $0x6c] ss:$24 sps:$4 sm:$0xff]   ;;  %v4582_v25 = vld [vmem:[%s4455_s13 + $0x60] ss:$24 sps:$4 sm:$0xff]   ;;  %v3944_v31 = vld [vmem:[%s4455_s13 + $0x9c] ss:$24 sps:$4 sm:$0xff]  }
  0x32   : > { %2141 = vmatpush2.bf16.msra.mxu1 %v3869_v39  ;;  %1949 = vmatprep.subr.bf16.mxu0 %v3870_v40  ;;  %v3950_v22 = vld [vmem:[%s6114_s1 + $0x484] ss:$16 sps:$4 sm:$0xff]   ;;  %v3935_v26 = vld [vmem:[%s4455_s13 + $0x68] ss:$24 sps:$4 sm:$0xff]   ;;  %v3989_v40 = vld [vmem:[%s6114_s1 + $0x2c] ss:$16 sps:$4 sm:$0xff]  }
  0x33   : > { %2142 = vmatprep.subr.bf16.mxu1 %v3872_v41  ;;  %v3962_v28 = vld [vmem:[%s6114_s1 + $0x464] ss:$16 sps:$4 sm:$0xff]   ;;  %v3960_v32 = vld [vmem:[%s6114_s1 + $0x460] ss:$16 sps:$4 sm:$0xff]  }
  0x34   : > { %v3974_v34 = vld [vmem:[%s6114_s1 + $0x444] ss:$16 sps:$4 sm:$0xff]   ;;  %v3972_v36 = vld [vmem:[%s6114_s1 + $0x440] ss:$16 sps:$4 sm:$0xff]  }
  0x35   : > { %1950 = vmatpush2.bf16.msra.mxu0 %v3874_v42  ;;  %v4619_v38 = vld [vmem:[%s4455_s13 + $0x90] ss:$24 sps:$4 sm:$0xff]   ;;  %v3986_v39 = vld [vmem:[%s6114_s1 + $0x424] ss:$16 sps:$4 sm:$0xff]   ;;  %v4650_v49 = vld [vmem:[%s4455_s13 + $0xc0] ss:$24 sps:$4 sm:$0xff]  }
  0x36   : > { %2143 = vmatpush2.bf16.msra.mxu1 %v3875_v43  ;;  %1951 = vmatprep.subr.bf16.mxu0 %v3876_v44  ;;  %v3947_v41 = vld [vmem:[%s4455_s13 + $0x98] ss:$24 sps:$4 sm:$0xff]   ;;  %v4629_v42 = vld [vmem:[%s4455_s13 + $0xc4] ss:$24 sps:$4 sm:$0xff]  }
  0x37   : > { %2144 = vmatprep.subr.bf16.mxu1 %v3878_v45  ;;  %v3956_v43 = vld [vmem:[%s4455_s13 + $0xcc] ss:$24 sps:$4 sm:$0xff]   ;;  %v3984_v44 = vld [vmem:[%s6114_s1 + $0x420] ss:$16 sps:$4 sm:$0xff]   ;;  %v3987_v45 = vld [vmem:[%s6114_s1 + $0x28] ss:$16 sps:$4 sm:$0xff]  }
  0x39   : > { %1952 = vmatpush2.bf16.msra.mxu0 %v3880_v46  ;;  %v3998_v46 = vld [vmem:[%s6114_s1 + $0x404] ss:$16 sps:$4 sm:$0xff]  }
  0x3a   : > { %2145 = vmatpush2.bf16.msra.mxu1 %v3881_v47  ;;  %1953 = vmatprep.subr.bf16.mxu0 %v3882_v48  ;;  %v4001_v47 = vld [vmem:[%s6114_s1 + $0xc] ss:$16 sps:$4 sm:$0xff]   ;;  %v3996_v48 = vld [vmem:[%s6114_s1 + $0x400] ss:$16 sps:$4 sm:$0xff]  }
  0x3b   : > { %2146 = vmatprep.subr.bf16.mxu1 %v3884_v50  ;;  %v3959_v50 = vld [vmem:[%s4455_s13 + $0xc8] ss:$24 sps:$4 sm:$0xff]  }
  0x3d   : > { %1954 = vmatpush2.bf16.msra.mxu0 %v3886_v52  ;;  %v4010_v52 = vld [vmem:[%s6114_s1 + $0x5e4] ss:$16 sps:$4 sm:$0xff]  }
  0x3e   : > { %2147 = vmatpush2.bf16.msra.mxu1 %v3887_v53  ;;  %1955 = vmatprep.subr.bf16.mxu0 %v3888_v54  ;;  %v4013_v53 = vld [vmem:[%s6114_s1 + $0x1ec] ss:$16 sps:$4 sm:$0xff]  }
  0x3f   : > { %2148 = vmatprep.subr.bf16.mxu1 %v3890_v55  ;;  %v4663_v54 = vld [vmem:[%s4455_s13 + $0xf4] ss:$24 sps:$4 sm:$0xff]  }
  0x40   : > { %v3968_v55 = vld [vmem:[%s4455_s13 + $0xfc] ss:$24 sps:$4 sm:$0xff]  }
  0x41   : > { %1956 = vmatpush2.bf16.msra.mxu0 %v3892_v56  ;;  %v4008_v56 = vld [vmem:[%s6114_s1 + $0x5e0] ss:$16 sps:$4 sm:$0xff]  }
  0x42   : > { %2149 = vmatpush2.bf16.msra.mxu1 %v3893_v57  ;;  %1957 = vmatprep.subr.bf16.mxu0 %v3894_v58  ;;  %v4011_v57 = vld [vmem:[%s6114_s1 + $0x1e8] ss:$16 sps:$4 sm:$0xff]   ;;  %v4022_v58 = vld [vmem:[%s6114_s1 + $0x5c4] ss:$16 sps:$4 sm:$0xff]  }
  0x43   : > { %2150 = vmatprep.subr.bf16.mxu1 %v3896_v59  ;;  %v4025_v59 = vld [vmem:[%s6114_s1 + $0x1cc] ss:$16 sps:$4 sm:$0xff]  }
  0x45   : > { %1958 = vmatpush2.bf16.msra.mxu0 %v3898_v60  ;;  %v4020_v60 = vld [vmem:[%s6114_s1 + $0x5c0] ss:$16 sps:$4 sm:$0xff]  }
  0x46   : > { %2151 = vmatpush2.bf16.msra.mxu1 %v3899_v61  ;;  %1959 = vmatprep.subr.bf16.mxu0 %v3900_v62  ;;  %v4023_v61 = vld [vmem:[%s6114_s1 + $0x1c8] ss:$16 sps:$4 sm:$0xff]  }
  0x47   : > { %2152 = vmatprep.subr.bf16.mxu1 %v3902_v63  ;;  %v4687_v62 = vld [vmem:[%s4455_s13 + $0xf0] ss:$24 sps:$4 sm:$0xff]   ;;  %v4034_v63 = vld [vmem:[%s6114_s1 + $0x5a4] ss:$16 sps:$4 sm:$0xff]  }
  0x49   : > { %1960 = vmatpush2.bf16.msra.mxu0 %v3904_v0  ;;  %v4037_v0 = vld [vmem:[%s6114_s1 + $0x1ac] ss:$16 sps:$4 sm:$0xff]  }
  0x4a   : > { %2153 = vmatpush2.bf16.msra.mxu1 %v3905_v1  ;;  %2315 = vmatprep.subr.bf16.mxu0 %v3914_v2  ;;  %v3971_v1 = vld [vmem:[%s4455_s13 + $0xf8] ss:$24 sps:$4 sm:$0xff]   ;;  %v4697_v2 = vld [vmem:[%s4455_s13 + $0x124] ss:$24 sps:$4 sm:$0xff]  }
  0x4b   : > { %2508 = vmatprep.subr.bf16.mxu1 %v3917_v3  ;;  %v3980_v3 = vld [vmem:[%s4455_s13 + $0x12c] ss:$24 sps:$4 sm:$0xff]  }
  0x4c   : > { %1962 = vmatmul.mubr.bf16.vlgmr.msra.gmra.mxu0 %v4523_v4 }
  0x4d   : > { %2155 = vmatmul.mubr.bf16.vlgmr.msra.gmra.mxu1 %v3909_v5  ;;  %2316 = vmatpush1.bf16.msra.mxu0 %v3912_v6  ;;  %v4032_v5 = vld [vmem:[%s6114_s1 + $0x5a0] ss:$16 sps:$4 sm:$0xff]   ;;  %v4035_v6 = vld [vmem:[%s6114_s1 + $0x1a8] ss:$16 sps:$4 sm:$0xff]  }
  0x4e   : > { %2509 = vmatpush1.bf16.msra.mxu1 %v3915_v7  ;;  %1971 = vmatprep.mubr.bf16.mxu0 %v4533_v8  ;;  %v4046_v7 = vld [vmem:[%s6114_s1 + $0x584] ss:$16 sps:$4 sm:$0xff]  }
  0x4f   : > { %2164 = vmatprep.mubr.bf16.mxu1 %v3920_v9  ;;  %2317 = vmatprep.subr.bf16.mxu0 %v3926_v10  ;;  %v4049_v9 = vld [vmem:[%s6114_s1 + $0x18c] ss:$16 sps:$4 sm:$0xff]   ;;  %v4044_v10 = vld [vmem:[%s6114_s1 + $0x580] ss:$16 sps:$4 sm:$0xff]  }
  0x50   : > { %2510 = vmatprep.subr.bf16.mxu1 %v3929_v11  ;;  %v4718_v11 = vld [vmem:[%s4455_s13 + $0x120] ss:$24 sps:$4 sm:$0xff]  }
  0x51   : > { %2318 = vmatpush1.bf16.msra.mxu0 %v3924_v12  ;;  %v3983_v12 = vld [vmem:[%s4455_s13 + $0x128] ss:$24 sps:$4 sm:$0xff]  }
  0x52   : > { %2511 = vmatpush1.bf16.msra.mxu1 %v3927_v13  ;;  %2319 = vmatprep.subr.bf16.mxu0 %v3938_v14  ;;  %v4047_v13 = vld [vmem:[%s6114_s1 + $0x188] ss:$16 sps:$4 sm:$0xff]   ;;  %v4725_v14 = vld [vmem:[%s4455_s13 + $0x154] ss:$24 sps:$4 sm:$0xff]  }
  0x53   : > { %2512 = vmatprep.subr.bf16.mxu1 %v3941_v15  ;;  %v4058_v15 = vld [vmem:[%s6114_s1 + $0x564] ss:$16 sps:$4 sm:$0xff]  }
  0x54   : > { %1972 = vmatmul.mubr.bf16.gmra.mxu0 %v4557_v16 }
  0x55   : > { %2165 = vmatmul.mubr.bf16.gmra.mxu1 %v3923_v17  ;;  %1981 = vmatprep.mubr.bf16.mxu0 %v4561_v18  ;;  %v3992_v17 = vld [vmem:[%s4455_s13 + $0x15c] ss:$24 sps:$4 sm:$0xff]  }
  0x56   : > { %2174 = vmatprep.mubr.bf16.mxu1 %v3932_v19  ;;  %2320 = vmatpush1.bf16.msra.mxu0 %v3936_v20  ;;  %v4061_v19 = vld [vmem:[%s6114_s1 + $0x16c] ss:$16 sps:$4 sm:$0xff]   ;;  %v4056_v20 = vld [vmem:[%s6114_s1 + $0x560] ss:$16 sps:$4 sm:$0xff]  }
  0x57   : > { %2513 = vmatpush1.bf16.msra.mxu1 %v3939_v21  ;;  %2321 = vmatprep.subr.bf16.mxu0 %v3950_v22  ;;  %v4059_v21 = vld [vmem:[%s6114_s1 + $0x168] ss:$16 sps:$4 sm:$0xff]   ;;  %v4068_v22 = vld [vmem:[%s6114_s1 + $0x540] ss:$16 sps:$4 sm:$0xff]  }
  0x58   : > { %2514 = vmatprep.subr.bf16.mxu1 %v3953_v23  ;;  %v4070_v23 = vld [vmem:[%s6114_s1 + $0x544] ss:$16 sps:$4 sm:$0xff]  }
  0x5a   : > { %2322 = vmatpush1.bf16.msra.mxu0 %v3948_v24  ;;  %v4071_v24 = vld [vmem:[%s6114_s1 + $0x148] ss:$16 sps:$4 sm:$0xff]  }
  0x5b   : > { %2515 = vmatpush1.bf16.msra.mxu1 %v3951_v27  ;;  %2323 = vmatprep.subr.bf16.mxu0 %v3962_v28  ;;  %v4755_v27 = vld [vmem:[%s4455_s13 + $0x150] ss:$24 sps:$4 sm:$0xff]  }
  0x5c   : > { %2516 = vmatprep.subr.bf16.mxu1 %v3965_v29  ;;  %1982 = vmatmul.mubr.bf16.gmra.mxu0 %v4582_v25  ;;  %v3995_v28 = vld [vmem:[%s4455_s13 + $0x158] ss:$24 sps:$4 sm:$0xff]   ;;  %v4759_v29 = vld [vmem:[%s4455_s13 + $0x184] ss:$24 sps:$4 sm:$0xff]  }
  0x5d   : > { %2175 = vmatmul.mubr.bf16.gmra.mxu1 %v3935_v26  ;;  %1991 = vmatprep.mubr.bf16.mxu0 %v4595_v30  ;;  %v4073_v26 = vld [vmem:[%s6114_s1 + $0x14c] ss:$16 sps:$4 sm:$0xff]  }
  0x5e   : > { %2184 = vmatprep.mubr.bf16.mxu1 %v3944_v31  ;;  %2324 = vmatpush1.bf16.msra.mxu0 %v3960_v32  ;;  %v4004_v31 = vld [vmem:[%s4455_s13 + $0x18c] ss:$24 sps:$4 sm:$0xff]   ;;  %v4080_v32 = vld [vmem:[%s6114_s1 + $0x520] ss:$16 sps:$4 sm:$0xff]  }
  0x5f   : > { %2517 = vmatpush1.bf16.msra.mxu1 %v3963_v33  ;;  %2325 = vmatprep.subr.bf16.mxu0 %v3974_v34  ;;  %v4082_v33 = vld [vmem:[%s6114_s1 + $0x524] ss:$16 sps:$4 sm:$0xff]   ;;  %v4083_v34 = vld [vmem:[%s6114_s1 + $0x128] ss:$16 sps:$4 sm:$0xff]  }
  0x60   : > { %2518 = vmatprep.subr.bf16.mxu1 %v3977_v35  ;;  %v4085_v35 = vld [vmem:[%s6114_s1 + $0x12c] ss:$16 sps:$4 sm:$0xff]  }
  0x62   : > { %2326 = vmatpush1.bf16.msra.mxu0 %v3972_v36  ;;  %v4777_v36 = vld [vmem:[%s4455_s13 + $0x180] ss:$24 sps:$4 sm:$0xff]  }
  0x63   : > { %2519 = vmatpush1.bf16.msra.mxu1 %v3975_v37  ;;  %2327 = vmatprep.subr.bf16.mxu0 %v3986_v39  ;;  %v4007_v37 = vld [vmem:[%s4455_s13 + $0x188] ss:$24 sps:$4 sm:$0xff]   ;;  %v4781_v39 = vld [vmem:[%s4455_s13 + $0x1b4] ss:$24 sps:$4 sm:$0xff]  }
  0x64   : > { %2520 = vmatprep.subr.bf16.mxu1 %v3989_v40  ;;  %1992 = vmatmul.mubr.bf16.gmra.mxu0 %v4619_v38  ;;  %v4092_v40 = vld [vmem:[%s6114_s1 + $0x500] ss:$16 sps:$4 sm:$0xff]  }
  0x65   : > { %2185 = vmatmul.mubr.bf16.gmra.mxu1 %v3947_v41  ;;  %2001 = vmatprep.mubr.bf16.mxu0 %v4629_v42  ;;  %v4094_v41 = vld [vmem:[%s6114_s1 + $0x504] ss:$16 sps:$4 sm:$0xff]  }
  0x66   : > { %2194 = vmatprep.mubr.bf16.mxu1 %v3956_v43  ;;  %2328 = vmatpush1.bf16.msra.mxu0 %v3984_v44  ;;  %v4095_v43 = vld [vmem:[%s6114_s1 + $0x108] ss:$16 sps:$4 sm:$0xff]   ;;  %v4097_v44 = vld [vmem:[%s6114_s1 + $0x10c] ss:$16 sps:$4 sm:$0xff]  }
  0x67   : > { %2521 = vmatpush1.bf16.msra.mxu1 %v3987_v45  ;;  %2329 = vmatprep.subr.bf16.mxu0 %v3998_v46  ;;  %v4016_v45 = vld [vmem:[%s4455_s13 + $0x1bc] ss:$24 sps:$4 sm:$0xff]  }
  0x68   : > { %2522 = vmatprep.subr.bf16.mxu1 %v4001_v47  ;;  %v4103_v46 = vld [vmem:[%s6114_s1 + $0x2ec] ss:$16 sps:$4 sm:$0xff]  }
  0x69   : > { %v4106_v47 = vld [vmem:[%s6114_s1 + $0x4ec] ss:$16 sps:$4 sm:$0xff]  }
  0x6a   : > { %2330 = vmatpush1.bf16.msra.mxu0 %v3996_v48  ;;  %v4805_v48 = vld [vmem:[%s4455_s13 + $0x1b0] ss:$24 sps:$4 sm:$0xff]  }
  0x6b   : > { %2523 = vmatpush1.bf16.msra.mxu1 %v3999_v51  ;;  %2331 = vmatprep.subr.bf16.mxu0 %v4010_v52  ;;  %v4809_v51 = vld [vmem:[%s4455_s13 + $0x1e4] ss:$24 sps:$4 sm:$0xff]  }
  0x6c   : > { %2524 = vmatprep.subr.bf16.mxu1 %v4013_v53  ;;  %2002 = vmatmul.mubr.bf16.gmra.mxu0 %v4650_v49  ;;  %v4028_v52 = vld [vmem:[%s4455_s13 + $0x1ec] ss:$24 sps:$4 sm:$0xff]   ;;  %v4815_v53 = vld [vmem:[%s4455_s13 + $0x1e0] ss:$24 sps:$4 sm:$0xff]  }
  0x6d   : > { %2195 = vmatmul.mubr.bf16.gmra.mxu1 %v3959_v50  ;;  %2011 = vmatprep.mubr.bf16.mxu0 %v4663_v54  ;;  %v4019_v50 = vld [vmem:[%s4455_s13 + $0x1b8] ss:$24 sps:$4 sm:$0xff]  }
  0x6e   : > { %2204 = vmatprep.mubr.bf16.mxu1 %v3968_v55  ;;  %2332 = vmatpush2.bf16.msra.mxu0 %v4008_v56  ;;  %v4031_v55 = vld [vmem:[%s4455_s13 + $0x1e8] ss:$24 sps:$4 sm:$0xff]   ;;  %v4819_v56 = vld [vmem:[%s4455_s13 + $0x214] ss:$24 sps:$4 sm:$0xff]  }
  0x6f   : > { %2525 = vmatpush2.bf16.msra.mxu1 %v4011_v57  ;;  %2333 = vmatprep.subr.bf16.mxu0 %v4022_v58  ;;  %v4040_v57 = vld [vmem:[%s4455_s13 + $0x21c] ss:$24 sps:$4 sm:$0xff]   ;;  %v4825_v58 = vld [vmem:[%s4455_s13 + $0x210] ss:$24 sps:$4 sm:$0xff]  }
  0x70   : > { %2526 = vmatprep.subr.bf16.mxu1 %v4025_v59  ;;  %v4043_v59 = vld [vmem:[%s4455_s13 + $0x218] ss:$24 sps:$4 sm:$0xff]  }
  0x72   : > { %2334 = vmatpush2.bf16.msra.mxu0 %v4020_v60  ;;  %v4829_v60 = vld [vmem:[%s4455_s13 + $0x244] ss:$24 sps:$4 sm:$0xff]  }
  0x73   : > { %2527 = vmatpush2.bf16.msra.mxu1 %v4023_v61  ;;  %2335 = vmatprep.subr.bf16.mxu0 %v4034_v63  ;;  %v4052_v61 = vld [vmem:[%s4455_s13 + $0x24c] ss:$24 sps:$4 sm:$0xff]   ;;  %v4835_v63 = vld [vmem:[%s4455_s13 + $0x240] ss:$24 sps:$4 sm:$0xff]  }
  0x74   : > { %2528 = vmatprep.subr.bf16.mxu1 %v4037_v0  ;;  %2012 = vmatmul.mubr.bf16.gmra.mxu0 %v4687_v62  ;;  %v4055_v0 = vld [vmem:[%s4455_s13 + $0x248] ss:$24 sps:$4 sm:$0xff]  }
  0x75   : > { %2205 = vmatmul.mubr.bf16.gmra.mxu1 %v3971_v1  ;;  %2021 = vmatprep.mubr.bf16.mxu0 %v4697_v2  ;;  %v4839_v1 = vld [vmem:[%s4455_s13 + $0x274] ss:$24 sps:$4 sm:$0xff]  }
  0x76   : > { %2214 = vmatprep.mubr.bf16.mxu1 %v3980_v3  ;;  %2336 = vmatpush2.bf16.msra.mxu0 %v4032_v5  ;;  %v4064_v3 = vld [vmem:[%s4455_s13 + $0x27c] ss:$24 sps:$4 sm:$0xff]   ;;  %v4845_v5 = vld [vmem:[%s4455_s13 + $0x270] ss:$24 sps:$4 sm:$0xff]  }
  0x77   : > { %2529 = vmatpush2.bf16.msra.mxu1 %v4035_v6  ;;  %2337 = vmatprep.subr.bf16.mxu0 %v4046_v7  ;;  %v4067_v6 = vld [vmem:[%s4455_s13 + $0x278] ss:$24 sps:$4 sm:$0xff]   ;;  %v4849_v7 = vld [vmem:[%s4455_s13 + $0x2a4] ss:$24 sps:$4 sm:$0xff]  }
  0x78   : > { %2530 = vmatprep.subr.bf16.mxu1 %v4049_v9  ;;  %v4076_v9 = vld [vmem:[%s4455_s13 + $0x2ac] ss:$24 sps:$4 sm:$0xff]  }
  0x7a   : > { %2338 = vmatpush2.bf16.msra.mxu0 %v4044_v10  ;;  %v4855_v10 = vld [vmem:[%s4455_s13 + $0x2a0] ss:$24 sps:$4 sm:$0xff]  }
  0x7b   : > { %2531 = vmatpush2.bf16.msra.mxu1 %v4047_v13  ;;  %2339 = vmatprep.subr.bf16.mxu0 %v4058_v15  ;;  %v4859_v13 = vld [vmem:[%s4455_s13 + $0x2d4] ss:$24 sps:$4 sm:$0xff]  }
  0x7c   : > { %2532 = vmatprep.subr.bf16.mxu1 %v4061_v19  ;;  %2022 = vmatmul.mubr.bf16.gmra.mxu0 %v4718_v11  ;;  %v4088_v15 = vld [vmem:[%s4455_s13 + $0x2dc] ss:$24 sps:$4 sm:$0xff]   ;;  %v4091_v19 = vld [vmem:[%s4455_s13 + $0x2d8] ss:$24 sps:$4 sm:$0xff]  }
  0x7d   : > { %2215 = vmatmul.mubr.bf16.gmra.mxu1 %v3983_v12  ;;  %2031 = vmatprep.mubr.bf16.mxu0 %v4725_v14  ;;  %v4079_v12 = vld [vmem:[%s4455_s13 + $0x2a8] ss:$24 sps:$4 sm:$0xff]  }
  0x7e   : > { %2224 = vmatprep.mubr.bf16.mxu1 %v3992_v17  ;;  %2340 = vmatpush2.bf16.msra.mxu0 %v4056_v20  ;;  %v4865_v17 = vld [vmem:[%s4455_s13 + $0x2d0] ss:$24 sps:$4 sm:$0xff]   ;;  %v4869_v20 = vld [vmem:[%s4455_s13 + $0x14] ss:$24 sps:$4 sm:$0xff]  }
  0x7f   : > { %2533 = vmatpush2.bf16.msra.mxu1 %v4059_v21  ;;  %2341 = vmatprep.subr.bf16.mxu0 %v4070_v23  ;;  %v4242_v21 = vld [vmem:[%s4455_s13 + $0x4] ss:$24 sps:$4 sm:$0xff]   ;;  %v4101_v23 = vld [vmem:[%s6114_s1 + $0x2e8] ss:$16 sps:$4 sm:$0xff]  }
  0x80   : > { %2534 = vmatprep.subr.bf16.mxu1 %v4073_v26  ;;  %v4884_v26 = vld [vmem:[%s4455_s13 + $0x44] ss:$24 sps:$4 sm:$0xff]  }
  0x82   : > { %2342 = vmatpush2.bf16.msra.mxu0 %v4068_v22  ;;  %v4875_v22 = vld [vmem:[%s4455_s13 + $0x10] ss:$24 sps:$4 sm:$0xff]  }
  0x83   : > { %2535 = vmatpush2.bf16.msra.mxu1 %v4071_v24  ;;  %2343 = vmatprep.subr.bf16.mxu0 %v4082_v33  ;;  %v4104_v24 = vld [vmem:[%s6114_s1 + $0x4e8] ss:$16 sps:$4 sm:$0xff]  }
  0x84   : > { %2032 = vmatmul.mubr.bf16.gmra.mxu0 %v4755_v27  ;;  %2536 = vmatprep.subr.bf16.mxu1 %v4085_v35  ;;  %v4113_v33 = vld [vmem:[%s6114_s1 + $0x4c8] ss:$16 sps:$4 sm:$0xff]  }
  0x85   : > { %2225 = vmatmul.mubr.bf16.gmra.mxu1 %v3995_v28  ;;  %2041 = vmatprep.mubr.bf16.mxu0 %v4759_v29  ;;  %v4112_v28 = vld [vmem:[%s6114_s1 + $0x2cc] ss:$16 sps:$4 sm:$0xff]   ;;  %v4909_v35 = vld [vmem:[%s4455_s13 + $0x40] ss:$24 sps:$4 sm:$0xff]  }
  0x86   : > { %2234 = vmatprep.mubr.bf16.mxu1 %v4004_v31  ;;  %2344 = vmatpush2.bf16.msra.mxu0 %v4080_v32  ;;  %v4115_v31 = vld [vmem:[%s6114_s1 + $0x4cc] ss:$16 sps:$4 sm:$0xff]   ;;  %v4110_v32 = vld [vmem:[%s6114_s1 + $0x2c8] ss:$16 sps:$4 sm:$0xff]  }
  0x87   : > { %2537 = vmatpush2.bf16.msra.mxu1 %v4083_v34  ;;  %2345 = vmatprep.subr.bf16.mxu0 %v4094_v41  ;;  %v4121_v34 = vld [vmem:[%s6114_s1 + $0x2ac] ss:$16 sps:$4 sm:$0xff]  }
  0x88   : > { %2538 = vmatprep.subr.bf16.mxu1 %v4097_v44  ;;  %v4130_v41 = vld [vmem:[%s6114_s1 + $0x28c] ss:$16 sps:$4 sm:$0xff]   ;;  %v4128_v44 = vld [vmem:[%s6114_s1 + $0x288] ss:$16 sps:$4 sm:$0xff]  }
  0x8a   : > { %2346 = vmatpush2.bf16.msra.mxu0 %v4092_v40  ;;  %v4122_v40 = vld [vmem:[%s6114_s1 + $0x4a8] ss:$16 sps:$4 sm:$0xff]  }
  0x8b   : > { %2539 = vmatpush2.bf16.msra.mxu1 %v4095_v43  ;;  %2701 = vmatprep.subr.bf16.mxu0 %v4103_v46  ;;  %v4133_v43 = vld [vmem:[%s6114_s1 + $0x48c] ss:$16 sps:$4 sm:$0xff]   ;;  %v4943_v46 = vld [vmem:[%s4455_s13 + $0x70] ss:$24 sps:$4 sm:$0xff]  }
  0x8c   : > { %2042 = vmatmul.mubr.bf16.gmra.mxu0 %v4777_v36  ;;  %2894 = vmatprep.subr.bf16.mxu1 %v4106_v47  ;;  %v4946_v47 = vld [vmem:[%s4455_s13 + $0xa4] ss:$24 sps:$4 sm:$0xff]  }
  0x8d   : > { %2235 = vmatmul.mubr.bf16.gmra.mxu1 %v4007_v37  ;;  %2051 = vmatprep.mubr.bf16.mxu0 %v4781_v39  ;;  %v4912_v37 = vld [vmem:[%s4455_s13 + $0x74] ss:$24 sps:$4 sm:$0xff]  }
  0x8e   : > { %2244 = vmatprep.mubr.bf16.mxu1 %v4016_v45  ;;  %v4131_v45 = vld [vmem:[%s6114_s1 + $0x488] ss:$16 sps:$4 sm:$0xff]  }
  0x94   : > { %2052 = vmatmul.mubr.bf16.gmra.mxu0 %v4805_v48 }
  0x95   : > { %2245 = vmatmul.mubr.bf16.gmra.mxu1 %v4019_v50  ;;  %2061 = vmatprep.mubr.bf16.mxu0 %v4809_v51  ;;  %v4137_v50 = vld [vmem:[%s6114_s1 + $0x268] ss:$16 sps:$4 sm:$0xff]  }
  0x96   : > { %2254 = vmatprep.mubr.bf16.mxu1 %v4028_v52  ;;  %v4140_v52 = vld [vmem:[%s6114_s1 + $0x468] ss:$16 sps:$4 sm:$0xff]  }
  0x9c   : > { %2062 = vmatmul.mubr.bf16.gmra.mxu0 %v4815_v53 }
  0x9d   : > { %2255 = vmatmul.mubr.bf16.gmra.mxu1 %v4031_v55  ;;  %2071 = vmatprep.mubr.bf16.mxu0 %v4819_v56  ;;  %v4148_v55 = vld [vmem:[%s6114_s1 + $0x24c] ss:$16 sps:$4 sm:$0xff]  }
  0x9e   : > { %2264 = vmatprep.mubr.bf16.mxu1 %v4040_v57  ;;  %v4151_v57 = vld [vmem:[%s6114_s1 + $0x44c] ss:$16 sps:$4 sm:$0xff]  }
  0xa4   : > { %2072 = vmatmul.mubr.bf16.gmra.mxu0 %v4825_v58 }
  0xa5   : > { %2265 = vmatmul.mubr.bf16.gmra.mxu1 %v4043_v59  ;;  %2081 = vmatprep.mubr.bf16.mxu0 %v4829_v60  ;;  %v4146_v59 = vld [vmem:[%s6114_s1 + $0x248] ss:$16 sps:$4 sm:$0xff]  }
  0xa6   : > { %2274 = vmatprep.mubr.bf16.mxu1 %v4052_v61  ;;  %v4149_v61 = vld [vmem:[%s6114_s1 + $0x448] ss:$16 sps:$4 sm:$0xff]  }
  0xac   : > { %2082 = vmatmul.mubr.bf16.gmra.mxu0 %v4835_v63 }
  0xad   : > { %2275 = vmatmul.mubr.bf16.gmra.mxu1 %v4055_v0  ;;  %2091 = vmatprep.mubr.bf16.mxu0 %v4839_v1  ;;  %v4977_v0 = vld [vmem:[%s4455_s13 + $0xa0] ss:$24 sps:$4 sm:$0xff]  }
  0xae   : > { %2284 = vmatprep.mubr.bf16.mxu1 %v4064_v3  ;;  %v4980_v3 = vld [vmem:[%s4455_s13 + $0xd4] ss:$24 sps:$4 sm:$0xff]  }
  0xb4   : > { %2092 = vmatmul.mubr.bf16.gmra.mxu0 %v4845_v5 }
  0xb5   : > { %2285 = vmatmul.mubr.bf16.gmra.mxu1 %v4067_v6  ;;  %2101 = vmatprep.mubr.bf16.mxu0 %v4849_v7  ;;  %v4155_v6 = vld [vmem:[%s6114_s1 + $0x228] ss:$16 sps:$4 sm:$0xff]  }
  0xb6   : > { %2294 = vmatprep.mubr.bf16.mxu1 %v4076_v9  ;;  %v4158_v9 = vld [vmem:[%s6114_s1 + $0x428] ss:$16 sps:$4 sm:$0xff]  }
  0xbc   : > { %2102 = vmatmul.mubr.bf16.gmra.mxu0 %v4855_v10 }
  0xbd   : > { %2295 = vmatmul.mubr.bf16.gmra.mxu1 %v4079_v12  ;;  %2111 = vmatprep.mubr.bf16.mxu0 %v4859_v13  ;;  %v4166_v12 = vld [vmem:[%s6114_s1 + $0x20c] ss:$16 sps:$4 sm:$0xff]  }
  0xbe   : > { %2304 = vmatprep.mubr.bf16.mxu1 %v4088_v15  ;;  %v4169_v15 = vld [vmem:[%s6114_s1 + $0x40c] ss:$16 sps:$4 sm:$0xff]  }
  0xc4   : > { %2112 = vmatmul.mubr.bf16.gmra.mxu0 %v4865_v17 }
  0xc5   : > { %2305 = vmatmul.mubr.bf16.gmra.mxu1 %v4091_v19  ;;  %2347 = vmatprep.mubr.bf16.mxu0 %v4869_v20  ;;  %v4164_v19 = vld [vmem:[%s6114_s1 + $0x208] ss:$16 sps:$4 sm:$0xff]  }
  0xc6   : > { %2540 = vmatprep.mubr.bf16.mxu1 %v4242_v21  ;;  %v4167_v21 = vld [vmem:[%s6114_s1 + $0x408] ss:$16 sps:$4 sm:$0xff]  }
  0xcc   : > { %2348 = vmatmul.mubr.bf16.vlgmr.msra.gmra.mxu0 %v4875_v22 }
  0xcd   : > { %2541 = vmatmul.mubr.bf16.vlgmr.msra.gmra.mxu1 %v4523_v4  ;;  %2702 = vmatpush1.bf16.msra.mxu0 %v4101_v23  ;;  %v4124_v4 = vld [vmem:[%s6114_s1 + $0x4ac] ss:$16 sps:$4 sm:$0xff]   ;;  %v5011_v23 = vld [vmem:[%s4455_s13 + $0xd0] ss:$24 sps:$4 sm:$0xff]  }
  0xce   : > { %2895 = vmatpush1.bf16.msra.mxu1 %v4104_v24  ;;  %2357 = vmatprep.mubr.bf16.mxu0 %v4884_v26  ;;  %v5014_v24 = vld [vmem:[%s4455_s13 + $0x104] ss:$24 sps:$4 sm:$0xff]  }
  0xcf   : > { %2550 = vmatprep.mubr.bf16.mxu1 %v4533_v8  ;;  %2703 = vmatprep.subr.bf16.mxu0 %v4112_v28  ;;  %v4119_v8 = vld [vmem:[%s6114_s1 + $0x2a8] ss:$16 sps:$4 sm:$0xff]  }
  0xd0   : > { %2896 = vmatprep.subr.bf16.mxu1 %v4115_v31  ;;  %v4173_v28 = vld [vmem:[%s6114_s1 + $0x3e8] ss:$16 sps:$4 sm:$0xff]  }
  0xd1   : > { %2704 = vmatpush1.bf16.msra.mxu0 %v4110_v32  ;;  %v4176_v31 = vld [vmem:[%s6114_s1 + $0x5e8] ss:$16 sps:$4 sm:$0xff]   ;;  %v4184_v32 = vld [vmem:[%s6114_s1 + $0x3cc] ss:$16 sps:$4 sm:$0xff]  }
  0xd2   : > { %2897 = vmatpush1.bf16.msra.mxu1 %v4113_v33  ;;  %2705 = vmatprep.subr.bf16.mxu0 %v4121_v34  ;;  %v4187_v33 = vld [vmem:[%s6114_s1 + $0x5cc] ss:$16 sps:$4 sm:$0xff]   ;;  %v4182_v34 = vld [vmem:[%s6114_s1 + $0x3c8] ss:$16 sps:$4 sm:$0xff]  }
  0xd3   : > { %2898 = vmatprep.subr.bf16.mxu1 %v4124_v4  ;;  %v4185_v4 = vld [vmem:[%s6114_s1 + $0x5c8] ss:$16 sps:$4 sm:$0xff]  }
  0xd4   : > { %2358 = vmatmul.mubr.bf16.gmra.mxu0 %v4909_v35 }
  0xd5   : > { %2551 = vmatmul.mubr.bf16.gmra.mxu1 %v4557_v16  ;;  %2367 = vmatprep.mubr.bf16.mxu0 %v4912_v37  ;;  %v4139_v16 = vld [vmem:[%s6114_s1 + $0x26c] ss:$16 sps:$4 sm:$0xff]  }
  0xd6   : > { %2560 = vmatprep.mubr.bf16.mxu1 %v4561_v18  ;;  %2706 = vmatpush1.bf16.msra.mxu0 %v4119_v8  ;;  %v4142_v18 = vld [vmem:[%s6114_s1 + $0x46c] ss:$16 sps:$4 sm:$0xff]   ;;  %v5045_v8 = vld [vmem:[%s4455_s13 + $0x100] ss:$24 sps:$4 sm:$0xff]  }
  0xd7   : > { %2899 = vmatpush1.bf16.msra.mxu1 %v4122_v40  ;;  %2707 = vmatprep.subr.bf16.mxu0 %v4130_v41  ;;  %v5048_v40 = vld [vmem:[%s4455_s13 + $0x134] ss:$24 sps:$4 sm:$0xff]   ;;  %v4191_v41 = vld [vmem:[%s6114_s1 + $0x3a8] ss:$16 sps:$4 sm:$0xff]  }
  0xd8   : > { %2900 = vmatprep.subr.bf16.mxu1 %v4133_v43  ;;  %v4194_v43 = vld [vmem:[%s6114_s1 + $0x5a8] ss:$16 sps:$4 sm:$0xff]  }
  0xda   : > { %2708 = vmatpush1.bf16.msra.mxu0 %v4128_v44  ;;  %v4202_v44 = vld [vmem:[%s6114_s1 + $0x38c] ss:$16 sps:$4 sm:$0xff]  }
  0xdb   : > { %2901 = vmatpush1.bf16.msra.mxu1 %v4131_v45  ;;  %2709 = vmatprep.subr.bf16.mxu0 %v4139_v16  ;;  %v4205_v45 = vld [vmem:[%s6114_s1 + $0x58c] ss:$16 sps:$4 sm:$0xff]   ;;  %v4200_v16 = vld [vmem:[%s6114_s1 + $0x388] ss:$16 sps:$4 sm:$0xff]  }
  0xdc   : > { %2902 = vmatprep.subr.bf16.mxu1 %v4142_v18  ;;  %2368 = vmatmul.mubr.bf16.gmra.mxu0 %v4943_v46  ;;  %v4203_v18 = vld [vmem:[%s6114_s1 + $0x588] ss:$16 sps:$4 sm:$0xff]  }
  0xdd   : > { %2561 = vmatmul.mubr.bf16.gmra.mxu1 %v4582_v25  ;;  %2377 = vmatprep.mubr.bf16.mxu0 %v4946_v47  ;;  %v4157_v25 = vld [vmem:[%s6114_s1 + $0x22c] ss:$16 sps:$4 sm:$0xff]  }
  0xde   : > { %2570 = vmatprep.mubr.bf16.mxu1 %v4595_v30  ;;  %2710 = vmatpush1.bf16.msra.mxu0 %v4137_v50  ;;  %v4160_v30 = vld [vmem:[%s6114_s1 + $0x42c] ss:$16 sps:$4 sm:$0xff]   ;;  %v5079_v50 = vld [vmem:[%s4455_s13 + $0x130] ss:$24 sps:$4 sm:$0xff]  }
  0xdf   : > { %2903 = vmatpush1.bf16.msra.mxu1 %v4140_v52  ;;  %2711 = vmatprep.subr.bf16.mxu0 %v4148_v55  ;;  %v5082_v52 = vld [vmem:[%s4455_s13 + $0x164] ss:$24 sps:$4 sm:$0xff]   ;;  %v4209_v55 = vld [vmem:[%s6114_s1 + $0x368] ss:$16 sps:$4 sm:$0xff]  }
  0xe0   : > { %2904 = vmatprep.subr.bf16.mxu1 %v4151_v57  ;;  %v4212_v57 = vld [vmem:[%s6114_s1 + $0x568] ss:$16 sps:$4 sm:$0xff]  }
  0xe2   : > { %2712 = vmatpush1.bf16.msra.mxu0 %v4146_v59  ;;  %v4220_v59 = vld [vmem:[%s6114_s1 + $0x34c] ss:$16 sps:$4 sm:$0xff]  }
  0xe3   : > { %2905 = vmatpush1.bf16.msra.mxu1 %v4149_v61  ;;  %2713 = vmatprep.subr.bf16.mxu0 %v4157_v25  ;;  %v4223_v61 = vld [vmem:[%s6114_s1 + $0x54c] ss:$16 sps:$4 sm:$0xff]   ;;  %v469_v25 = vlaneseq }
  0xe4   : > { %2906 = vmatprep.subr.bf16.mxu1 %v4160_v30  ;;  %2378 = vmatmul.mubr.bf16.gmra.mxu0 %v4977_v0  ;;  %v4218_v30 = vld [vmem:[%s6114_s1 + $0x348] ss:$16 sps:$4 sm:$0xff]  }
  0xe5   : > { %2571 = vmatmul.mubr.bf16.gmra.mxu1 %v4619_v38  ;;  %2387 = vmatprep.mubr.bf16.mxu0 %v4980_v3  ;;  %v4175_v38 = vld [vmem:[%s6114_s1 + $0x3ec] ss:$16 sps:$4 sm:$0xff]  }
  0xe6   : > { %2580 = vmatprep.mubr.bf16.mxu1 %v4629_v42  ;;  %2714 = vmatpush1.bf16.msra.mxu0 %v4155_v6  ;;  %v4178_v42 = vld [vmem:[%s6114_s1 + $0x5ec] ss:$16 sps:$4 sm:$0xff]   ;;  %v4221_v6 = vld [vmem:[%s6114_s1 + $0x548] ss:$16 sps:$4 sm:$0xff]  }
  0xe7   : > { %2907 = vmatpush1.bf16.msra.mxu1 %v4158_v9  ;;  %2715 = vmatprep.subr.bf16.mxu0 %v4166_v12  ;;  %v5113_v9 = vld [vmem:[%s4455_s13 + $0x160] ss:$24 sps:$4 sm:$0xff]   ;;  %v5116_v12 = vld [vmem:[%s4455_s13 + $0x194] ss:$24 sps:$4 sm:$0xff]  }
  0xe8   : > { %2908 = vmatprep.subr.bf16.mxu1 %v4169_v15  ;;  %v5118_v15 = vshrl.u32 %v469_v25, 7 }
  0xea   : > { %2716 = vmatpush1.bf16.msra.mxu0 %v4164_v19  ;;  %6126 = vst [vmem:[#allocation2_spill] sm:$0xff] %v5118_v15  ;;  %v4227_v19 = vld [vmem:[%s6114_s1 + $0x328] ss:$16 sps:$4 sm:$0xff]  }
  0xeb   : > { %2909 = vmatpush1.bf16.msra.mxu1 %v4167_v21  ;;  %2717 = vmatprep.subr.bf16.mxu0 %v4175_v38  ;;  %v4230_v21 = vld [vmem:[%s6114_s1 + $0x528] ss:$16 sps:$4 sm:$0xff]   ;;  %v4238_v38 = vld [vmem:[%s6114_s1 + $0x30c] ss:$16 sps:$4 sm:$0xff]  }
  0xec   : > { %2910 = vmatprep.subr.bf16.mxu1 %v4178_v42  ;;  %2388 = vmatmul.mubr.bf16.gmra.mxu0 %v5011_v23  ;;  %v4241_v42 = vld [vmem:[%s6114_s1 + $0x50c] ss:$16 sps:$4 sm:$0xff]  }
  0xed   : > { %2581 = vmatmul.mubr.bf16.gmra.mxu1 %v4650_v49  ;;  %2397 = vmatprep.mubr.bf16.mxu0 %v5014_v24  ;;  %v4193_v49 = vld [vmem:[%s6114_s1 + $0x3ac] ss:$16 sps:$4 sm:$0xff]  }
  0xee   : > { %2590 = vmatprep.mubr.bf16.mxu1 %v4663_v54  ;;  %2718 = vmatpush2.bf16.msra.mxu0 %v4173_v28  ;;  %v4196_v54 = vld [vmem:[%s6114_s1 + $0x5ac] ss:$16 sps:$4 sm:$0xff]   ;;  %v471_v28 = vsub.s32 0, %v5118_v15 }
  0xef   : > { %2911 = vmatpush2.bf16.msra.mxu1 %v4176_v31  ;;  %2719 = vmatprep.subr.bf16.mxu0 %v4184_v32  ;;  %v467_v31 = vld [vmem:[%s6115_s2] sm:$0xf]  ;;  %v4236_v32 = vld [vmem:[%s6114_s1 + $0x308] ss:$16 sps:$4 sm:$0xff]  }
  0xf0   : > { %2912 = vmatprep.subr.bf16.mxu1 %v4187_v33  ;;  %v475_v33 = vsub.s32 1, %v5118_v15  ;;  %v5254_v15 = vld [vmem:[%s4455_s13 + $0x280] ss:$24 sps:$4 sm:$0xff]  }
  0xf1   : > { %6129 = vst [vmem:[#allocation5_spill] sm:$0xff] %v5254_v15 }
  0xf2   : > { %2720 = vmatpush2.bf16.msra.mxu0 %v4182_v34  ;;  %v5150_v34 = vrot.slane %v467_v31, %v471_v28 }
  0xf3   : > { %2913 = vmatpush2.bf16.msra.mxu1 %v4185_v4  ;;  %2721 = vmatprep.subr.bf16.mxu0 %v4193_v49  ;;  %v5153_v4 = vld [vmem:[%s4455_s13 + $0x1c4] ss:$24 sps:$4 sm:$0xff]   ;;  %v5155_v49 = vrot.slane %v467_v31, %v475_v33 }
  0xf4   : > { %2914 = vmatprep.subr.bf16.mxu1 %v4196_v54  ;;  %2398 = vmatmul.mubr.bf16.gmra.mxu0 %v5045_v8 }
  0xf5   : > { %2591 = vmatmul.mubr.bf16.gmra.mxu1 %v4687_v62  ;;  %2407 = vmatprep.mubr.bf16.mxu0 %v5048_v40  ;;  %v4211_v62 = vld [vmem:[%s6114_s1 + $0x36c] ss:$16 sps:$4 sm:$0xff]  }
  0xf6   : > { %2600 = vmatprep.mubr.bf16.mxu1 %v4697_v2  ;;  %2722 = vmatpush2.bf16.msra.mxu0 %v4191_v41  ;;  %v4214_v2 = vld [vmem:[%s6114_s1 + $0x56c] ss:$16 sps:$4 sm:$0xff]  }
  0xf7   : > { %2915 = vmatpush2.bf16.msra.mxu1 %v4194_v43  ;;  %2723 = vmatprep.subr.bf16.mxu0 %v4202_v44 }
  0xf8   : > { %2916 = vmatprep.subr.bf16.mxu1 %v4205_v45 }
  0xfa   : > { %2724 = vmatpush2.bf16.msra.mxu0 %v4200_v16 }
  0xfb   : > { %2917 = vmatpush2.bf16.msra.mxu1 %v4203_v18  ;;  %2725 = vmatprep.subr.bf16.mxu0 %v4211_v62 }
  0xfc   : > { %2918 = vmatprep.subr.bf16.mxu1 %v4214_v2  ;;  %2408 = vmatmul.mubr.bf16.gmra.mxu0 %v5079_v50 }
  0xfd   : > { %2601 = vmatmul.mubr.bf16.gmra.mxu1 %v4718_v11  ;;  %2417 = vmatprep.mubr.bf16.mxu0 %v5082_v52  ;;  %v4229_v11 = vld [vmem:[%s6114_s1 + $0x32c] ss:$16 sps:$4 sm:$0xff]  }
  0xfe   : > { %2610 = vmatprep.mubr.bf16.mxu1 %v4725_v14  ;;  %2726 = vmatpush2.bf16.msra.mxu0 %v4209_v55  ;;  %v4232_v14 = vld [vmem:[%s6114_s1 + $0x52c] ss:$16 sps:$4 sm:$0xff]   ;;  %v5166_v55 = vld [vmem:[%s4455_s13 + $0x1c0] ss:$24 sps:$4 sm:$0xff]  }
  0xff   : > { %2919 = vmatpush2.bf16.msra.mxu1 %v4212_v57  ;;  %2727 = vmatprep.subr.bf16.mxu0 %v4220_v59  ;;  %v5172_v59 = vld [vmem:[%s4455_s13 + $0x1f4] ss:$24 sps:$4 sm:$0xff]  }
 0x100   : > { %2920 = vmatprep.subr.bf16.mxu1 %v4223_v61 }
 0x102   : > { %2728 = vmatpush2.bf16.msra.mxu0 %v4218_v30 }
 0x103   : > { %2921 = vmatpush2.bf16.msra.mxu1 %v4221_v6  ;;  %2729 = vmatprep.subr.bf16.mxu0 %v4229_v11 }
 0x104   : > { %2922 = vmatprep.subr.bf16.mxu1 %v4232_v14  ;;  %2418 = vmatmul.mubr.bf16.gmra.mxu0 %v5113_v9 }
 0x105   : > { %2611 = vmatmul.mubr.bf16.gmra.mxu1 %v4755_v27  ;;  %2427 = vmatprep.mubr.bf16.mxu0 %v5116_v12  ;;  %v4239_v27 = vld [vmem:[%s6114_s1 + $0x508] ss:$16 sps:$4 sm:$0xff]  }
 0x106   : > { %2620 = vmatprep.mubr.bf16.mxu1 %v4759_v29  ;;  %2730 = vmatpush2.bf16.msra.mxu0 %v4227_v19  ;;  %v5148_v29 = vld [vmem:[%s4455_s13 + $0x190] ss:$24 sps:$4 sm:$0xff]  }
 0x107   : > { %2923 = vmatpush2.bf16.msra.mxu1 %v4230_v21  ;;  %2731 = vmatprep.subr.bf16.mxu0 %v4238_v38 }
 0x108   : > { %2924 = vmatprep.subr.bf16.mxu1 %v4241_v42 }
 0x10a   : > { %2732 = vmatpush2.bf16.msra.mxu0 %v4236_v32 }
 0x10b   : > { %2925 = vmatpush2.bf16.msra.mxu1 %v4239_v27  ;;  %v5188_v27 = vld [vmem:[%s4455_s13 + $0x1f0] ss:$24 sps:$4 sm:$0xff]  }
 0x10c   : > { %v1963_v54 = vpop.f32.mrf.mxu0  ;;  %2428 = vmatmul.mubr.bf16.gmra.mxu0 %v5148_v29 }
 0x10d   : > { %v2156_v41 = vpop.f32.mrf.mxu1  ;;  %2621 = vmatmul.mubr.bf16.gmra.mxu1 %v4777_v36  ;;  %v1964_v43 = vadd.f32 %v1963_v54, %v5150_v34  ;;  %2437 = vmatprep.mubr.bf16.mxu0 %v5153_v4  ;;  %v5194_v54 = vld [vmem:[%s4455_s13 + $0x224] ss:$24 sps:$4 sm:$0xff]  }
 0x10e   : > { %2630 = vmatprep.mubr.bf16.mxu1 %v4781_v39  ;;  %v1965_v44 = vpop.f32.mrf.mxu0 }
 0x10f   : > { %v2158_v45 = vpop.f32.mrf.mxu1  ;;  %v5162_v16 = vadd.f32 %v2156_v41, %v1964_v43  ;;  %v1966_v18 = vadd.f32 %v1965_v44, %v5155_v49 }
 0x110   : > { %v1967_v62 = vpop.f32.mrf.mxu0 }
 0x111   : > { %v2160_v2 = vpop.f32.mrf.mxu1  ;;  %v5168_v57 = vadd.f32 %v2158_v45, %v1966_v18  ;;  %v1968_v36 = vadd.f32 %v1967_v62, %v5150_v34 }
 0x112   : > { %v1969_v61 = vpop.f32.mrf.mxu0 }
 0x113   : > { %v2162_v25 = vpop.f32.mrf.mxu1  ;;  %v5174_v30 = vadd.f32 %v2160_v2, %v1968_v36  ;;  %v1970_v39 = vadd.f32 %v1969_v61, %v5155_v49 }
 0x114   : > { %v1973_v6 = vpop.f32.mrf.mxu0  ;;  %2438 = vmatmul.mubr.bf16.gmra.mxu0 %v5166_v55 }
 0x115   : > { %v2166_v11 = vpop.f32.mrf.mxu1  ;;  %2631 = vmatmul.mubr.bf16.gmra.mxu1 %v4805_v48  ;;  %v5179_v14 = vadd.f32 %v2162_v25, %v1970_v39  ;;  %v1974_v19 = vadd.f32 %v1973_v6, %v5150_v34  ;;  %2447 = vmatprep.mubr.bf16.mxu0 %v5172_v59 }
 0x116   : > { %2640 = vmatprep.mubr.bf16.mxu1 %v4809_v51  ;;  %v1975_v21 = vpop.f32.mrf.mxu0 }
 0x117   : > { %v2168_v38 = vpop.f32.mrf.mxu1  ;;  %v5184_v42 = vadd.f32 %v2166_v11, %v1974_v19  ;;  %v1976_v28 = vadd.f32 %v1975_v21, %v5155_v49  ;;  %v5210_v19 = vld [vmem:[%s4455_s13 + $0x220] ss:$24 sps:$4 sm:$0xff]  }
 0x118   : > { %v1977_v31 = vpop.f32.mrf.mxu0 }
 0x119   : > { %v2170_v32 = vpop.f32.mrf.mxu1  ;;  %v5190_v33 = vadd.f32 %v2168_v38, %v1976_v28  ;;  %v1978_v48 = vadd.f32 %v1977_v31, %v5150_v34  ;;  %v5216_v38 = vld [vmem:[%s4455_s13 + $0x254] ss:$24 sps:$4 sm:$0xff]  }
 0x11a   : > { %v1979_v41 = vpop.f32.mrf.mxu0 }
 0x11b   : > { %v2172_v43 = vpop.f32.mrf.mxu1  ;;  %v5196_v44 = vadd.f32 %v2170_v32, %v1978_v48  ;;  %v1980_v51 = vadd.f32 %v1979_v41, %v5155_v49 }
 0x11c   : > { %v1983_v45 = vpop.f32.mrf.mxu0  ;;  %2448 = vmatmul.mubr.bf16.gmra.mxu0 %v5188_v27 }
 0x11d   : > { %v2176_v18 = vpop.f32.mrf.mxu1  ;;  %2641 = vmatmul.mubr.bf16.gmra.mxu1 %v4815_v53  ;;  %v5201_v62 = vadd.f32 %v2172_v43, %v1980_v51  ;;  %v1984_v2 = vadd.f32 %v1983_v45, %v5150_v34  ;;  %2457 = vmatprep.mubr.bf16.mxu0 %v5194_v54 }
 0x11e   : > { %2650 = vmatprep.mubr.bf16.mxu1 %v4819_v56  ;;  %v1985_v36 = vpop.f32.mrf.mxu0 }
 0x11f   : > { %v2178_v61 = vpop.f32.mrf.mxu1  ;;  %v5206_v25 = vadd.f32 %v2176_v18, %v1984_v2  ;;  %v1986_v39 = vadd.f32 %v1985_v36, %v5155_v49 }
 0x120   : > { %v1987_v6 = vpop.f32.mrf.mxu0 }
 0x121   : > { %v2180_v11 = vpop.f32.mrf.mxu1  ;;  %v5212_v21 = vadd.f32 %v2178_v61, %v1986_v39  ;;  %v1988_v53 = vadd.f32 %v1987_v6, %v5150_v34  ;;  %v5232_v6 = vld [vmem:[%s4455_s13 + $0x250] ss:$24 sps:$4 sm:$0xff]  }
 0x122   : > { %v1989_v28 = vpop.f32.mrf.mxu0  ;;  %6127 = vst [vmem:[#allocation3_spill] sm:$0xff] %v5232_v6 }
 0x123   : > { %v2182_v31 = vpop.f32.mrf.mxu1  ;;  %v5218_v32 = vadd.f32 %v2180_v11, %v1988_v53  ;;  %v1990_v56 = vadd.f32 %v1989_v28, %v5155_v49  ;;  %v5238_v53 = vld [vmem:[%s4455_s13 + $0x284] ss:$24 sps:$4 sm:$0xff]  }
 0x124   : > { %v1993_v48 = vpop.f32.mrf.mxu0  ;;  %2458 = vmatmul.mubr.bf16.gmra.mxu0 %v5210_v19  ;;  %6128 = vst [vmem:[#allocation4_spill] sm:$0xff] %v5238_v53 }
 0x125   : > { %v2186_v41 = vpop.f32.mrf.mxu1  ;;  %2651 = vmatmul.mubr.bf16.gmra.mxu1 %v4825_v58  ;;  %v5223_v43 = vadd.f32 %v2182_v31, %v1990_v56  ;;  %v1994_v51 = vadd.f32 %v1993_v48, %v5150_v34  ;;  %2467 = vmatprep.mubr.bf16.mxu0 %v5216_v38 }
 0x126   : > { %2660 = vmatprep.mubr.bf16.mxu1 %v4829_v60  ;;  %v1995_v45 = vpop.f32.mrf.mxu0 }
 0x127   : > { %v2188_v18 = vpop.f32.mrf.mxu1  ;;  %v5228_v2 = vadd.f32 %v2186_v41, %v1994_v51  ;;  %v1996_v36 = vadd.f32 %v1995_v45, %v5155_v49 }
 0x128   : > { %v1997_v61 = vpop.f32.mrf.mxu0 }
 0x129   : > { %v2190_v39 = vpop.f32.mrf.mxu1  ;;  %v5234_v11 = vadd.f32 %v2188_v18, %v1996_v36  ;;  %v1998_v58 = vadd.f32 %v1997_v61, %v5150_v34 }
 0x12a   : > { %v1999_v28 = vpop.f32.mrf.mxu0 }
 0x12b   : > { %v2192_v31 = vpop.f32.mrf.mxu1  ;;  %v5240_v56 = vadd.f32 %v2190_v39, %v1998_v58  ;;  %v2000_v60 = vadd.f32 %v1999_v28, %v5155_v49 }
 0x12c   : > { %v2003_v48 = vpop.f32.mrf.mxu0  ;;  %2468 = vmatmul.mubr.bf16.gmra.mxu0 %v5232_v6 }
 0x12d   : > { %v2196_v41 = vpop.f32.mrf.mxu1  ;;  %2661 = vmatmul.mubr.bf16.gmra.mxu1 %v4835_v63  ;;  %v5245_v51 = vadd.f32 %v2192_v31, %v2000_v60  ;;  %v2004_v45 = vadd.f32 %v2003_v48, %v5150_v34  ;;  %2477 = vmatprep.mubr.bf16.mxu0 %v5238_v53  ;;  %v5260_v31 = vld [vmem:[%s4455_s13 + $0x2b4] ss:$24 sps:$4 sm:$0xff]  }
 0x12e   : > { %2670 = vmatprep.mubr.bf16.mxu1 %v4839_v1  ;;  %v2005_v18 = vpop.f32.mrf.mxu0  ;;  %6131 = vst [vmem:[#allocation7_spill] sm:$0xff] %v5260_v31 }
 0x12f   : > { %v2198_v36 = vpop.f32.mrf.mxu1  ;;  %v5250_v61 = vadd.f32 %v2196_v41, %v2004_v45  ;;  %v2006_v39 = vadd.f32 %v2005_v18, %v5155_v49 }
 0x130   : > { %v2007_v58 = vpop.f32.mrf.mxu0 }
 0x131   : > { %v2200_v28 = vpop.f32.mrf.mxu1  ;;  %v5256_v6 = vadd.f32 %v2198_v36, %v2006_v39  ;;  %v2008_v63 = vadd.f32 %v2007_v58, %v5150_v34 }
 0x132   : > { %v2009_v60 = vpop.f32.mrf.mxu0 }
 0x133   : > { %6130 = vst [vmem:[#allocation6_spill] sm:$0xff] %v5256_v6  ;;  %v2202_v48 = vpop.f32.mrf.mxu1  ;;  %v5262_v53 = vadd.f32 %v2200_v28, %v2008_v63  ;;  %v2010_v1 = vadd.f32 %v2009_v60, %v5155_v49  ;;  %v5276_v6 = vld [vmem:[%s4455_s13 + $0x2b0] ss:$24 sps:$4 sm:$0xff]  }
 0x134   : > { %v2013_v41 = vpop.f32.mrf.mxu0  ;;  %2478 = vmatmul.mubr.bf16.gmra.mxu0 %v5254_v15  ;;  %6133 = vst [vmem:[#allocation9_spill] sm:$0xff] %v5276_v6 }
 0x135   : > { %6132 = vst [vmem:[#allocation8_spill] sm:$0xff] %v5262_v53  ;;  %v2206_v45 = vpop.f32.mrf.mxu1  ;;  %2671 = vmatmul.mubr.bf16.gmra.mxu1 %v4845_v5  ;;  %v5267_v18 = vadd.f32 %v2202_v48, %v2010_v1  ;;  %v2014_v36 = vadd.f32 %v2013_v41, %v5150_v34  ;;  %2487 = vmatprep.mubr.bf16.mxu0 %v5260_v31  ;;  %v5282_v48 = vld [vmem:[%s4455_s13 + $0x2e4] ss:$24 sps:$4 sm:$0xff]  }
 0x136   : > { %2680 = vmatprep.mubr.bf16.mxu1 %v4849_v7  ;;  %v2015_v39 = vpop.f32.mrf.mxu0  ;;  %6134 = vst [vmem:[#allocation10_spill] sm:$0xff] %v5282_v48 }
 0x137   : > { %v2208_v58 = vpop.f32.mrf.mxu1  ;;  %v5272_v28 = vadd.f32 %v2206_v45, %v2014_v36  ;;  %v2016_v63 = vadd.f32 %v2015_v39, %v5155_v49 }
 0x138   : > { %v2017_v60 = vpop.f32.mrf.mxu0 }
 0x139   : > { %v2210_v53 = vpop.f32.mrf.mxu1  ;;  %v5278_v15 = vadd.f32 %v2208_v58, %v2016_v63  ;;  %v2018_v5 = vadd.f32 %v2017_v60, %v5150_v34 }
 0x13a   : > { %v2019_v1 = vpop.f32.mrf.mxu0 }
 0x13b   : > { %v2212_v41 = vpop.f32.mrf.mxu1  ;;  %v5284_v31 = vadd.f32 %v2210_v53, %v2018_v5  ;;  %v2020_v7 = vadd.f32 %v2019_v1, %v5155_v49 }
 0x13c   : > { %v2023_v45 = vpop.f32.mrf.mxu0  ;;  %2488 = vmatmul.mubr.bf16.gmra.mxu0 %v5276_v6  ;;  %v5298_v6 = vld [vmem:[%s4455_s13 + $0x2e0] ss:$24 sps:$4 sm:$0xff]  }
 0x13d   : > { %6135 = vst [vmem:[#allocation11_spill] sm:$0xff] %v5284_v31  ;;  %v2216_v36 = vpop.f32.mrf.mxu1  ;;  %2681 = vmatmul.mubr.bf16.gmra.mxu1 %v4855_v10  ;;  %v5289_v39 = vadd.f32 %v2212_v41, %v2020_v7  ;;  %v2024_v58 = vadd.f32 %v2023_v45, %v5150_v34  ;;  %2497 = vmatprep.mubr.bf16.mxu0 %v5282_v48  ;;  %6137 = vst [vmem:[#allocation13_spill] sm:$0xff] %v5298_v6 }
 0x13e   : > { %2690 = vmatprep.mubr.bf16.mxu1 %v4859_v13  ;;  %v2025_v63 = vpop.f32.mrf.mxu0 }
 0x13f   : > { %6136 = vst [vmem:[#allocation12_spill] sm:$0xff] %v5289_v39  ;;  %v2218_v53 = vpop.f32.mrf.mxu1  ;;  %v5294_v60 = vadd.f32 %v2216_v36, %v2024_v58  ;;  %v2026_v5 = vadd.f32 %v2025_v63, %v5155_v49 }
 0x140   : > { %v2027_v1 = vpop.f32.mrf.mxu0 }
 0x141   : > { %v2220_v31 = vpop.f32.mrf.mxu1  ;;  %v5300_v10 = vadd.f32 %v2218_v53, %v2026_v5  ;;  %v2028_v41 = vadd.f32 %v2027_v1, %v5150_v34  ;;  %v4243_v53 = vld [vmem:[%s4455_s13 + $0xc] ss:$24 sps:$4 sm:$0xff]  }
 0x142   : > { %v2029_v7 = vpop.f32.mrf.mxu0 }
 0x143   : > { %6138 = vst [vmem:[#allocation14_spill] sm:$0xff] %v5300_v10  ;;  %v2222_v45 = vpop.f32.mrf.mxu1  ;;  %v5303_v48 = vadd.f32 %v2220_v31, %v2028_v41  ;;  %v2030_v13 = vadd.f32 %v2029_v7, %v5155_v49  ;;  %v4244_v10 = vld [vmem:[%s4455_s13 + $0x8] ss:$24 sps:$4 sm:$0xff]  }
 0x144   : > { %v2033_v39 = vpop.f32.mrf.mxu0  ;;  %2498 = vmatmul.mubr.bf16.gmra.mxu0 %v5298_v6 }
 0x145   : > { %6139 = vst [vmem:[#allocation15_spill] sm:$0xff] %v5303_v48  ;;  %v2226_v36 = vpop.f32.mrf.mxu1  ;;  %2691 = vmatmul.mubr.bf16.gmra.mxu1 %v4865_v17  ;;  %v5308_v58 = vadd.f32 %v2222_v45, %v2030_v13  ;;  %v2034_v63 = vadd.f32 %v2033_v39, %v5150_v34  ;;  %2733 = vmatprep.mubr.bf16.mxu0 %v4243_v53 }
 0x146   : > { %2926 = vmatprep.mubr.bf16.mxu1 %v4869_v20  ;;  %v2035_v5 = vpop.f32.mrf.mxu0 }
 0x147   : > { %6140 = vst [vmem:[#allocation16_spill] sm:$0xff] %v5308_v58  ;;  %v2228_v31 = vpop.f32.mrf.mxu1  ;;  %v5313_v1 = vadd.f32 %v2226_v36, %v2034_v63  ;;  %v2036_v41 = vadd.f32 %v2035_v5, %v5155_v49  ;;  %v4245_v5 = vld [vmem:[%s4455_s13 + $0x3c] ss:$24 sps:$4 sm:$0xff]  }
 0x148   : > { %v2037_v7 = vpop.f32.mrf.mxu0 }
 0x149   : > { %v2230_v6 = vpop.f32.mrf.mxu1  ;;  %v5316_v48 = vadd.f32 %v2228_v31, %v2036_v41  ;;  %v2038_v17 = vadd.f32 %v2037_v7, %v5150_v34 }
 0x14a   : > { %v2039_v45 = vpop.f32.mrf.mxu0 }
 0x14b   : > { %v2232_v39 = vpop.f32.mrf.mxu1  ;;  %v5319_v13 = vadd.f32 %v2230_v6, %v2038_v17  ;;  %v2040_v53 = vadd.f32 %v2039_v45, %v5155_v49 }
 0x14c   : > { %v2043_v20 = vpop.f32.mrf.mxu0  ;;  %2734 = vmatmul.mubr.bf16.vlgmr.msra.gmra.mxu0 %v4244_v10 }
 0x14d   : > { %6141 = vst [vmem:[#allocation17_spill] sm:$0xff] %v5319_v13  ;;  %v2236_v58 = vpop.f32.mrf.mxu1  ;;  %2927 = vmatmul.mubr.bf16.vlgmr.msra.gmra.mxu1 %v4875_v22  ;;  %v5324_v36 = vadd.f32 %v2232_v39, %v2040_v53  ;;  %v2044_v63 = vadd.f32 %v2043_v20, %v5150_v34  ;;  %2743 = vmatprep.mubr.bf16.mxu0 %v4245_v5  ;;  %v4246_v13 = vld [vmem:[%s4455_s13 + $0x38] ss:$24 sps:$4 sm:$0xff]  }
 0x14e   : > { %2936 = vmatprep.mubr.bf16.mxu1 %v4884_v26  ;;  %v2045_v31 = vpop.f32.mrf.mxu0 }
 0x14f   : > { %6142 = vst [vmem:[#allocation18_spill] sm:$0xff] %v5324_v36  ;;  %v2238_v6 = vpop.f32.mrf.mxu1  ;;  %v5329_v41 = vadd.f32 %v2236_v58, %v2044_v63  ;;  %v2046_v7 = vadd.f32 %v2045_v31, %v5155_v49  ;;  %v4247_v31 = vld [vmem:[%s4455_s13 + $0x6c] ss:$24 sps:$4 sm:$0xff]  }
 0x150   : > { %v2047_v17 = vpop.f32.mrf.mxu0 }
 0x151   : > { %v2240_v10 = vpop.f32.mrf.mxu1  ;;  %v5332_v45 = vadd.f32 %v2238_v6, %v2046_v7  ;;  %v2048_v22 = vadd.f32 %v2047_v17, %v5150_v34 }
 0x152   : > { %v2049_v39 = vpop.f32.mrf.mxu0 }
 0x153   : > { %v2242_v53 = vpop.f32.mrf.mxu1  ;;  %v5335_v20 = vadd.f32 %v2240_v10, %v2048_v22  ;;  %v2050_v5 = vadd.f32 %v2049_v39, %v5155_v49 }
 0x154   : > { %v2053_v26 = vpop.f32.mrf.mxu0  ;;  %2744 = vmatmul.mubr.bf16.gmra.mxu0 %v4246_v13 }
 0x155   : > { %6143 = vst [vmem:[#allocation19_spill] sm:$0xff] %v5335_v20  ;;  %v2246_v36 = vpop.f32.mrf.mxu1  ;;  %2937 = vmatmul.mubr.bf16.gmra.mxu1 %v4909_v35  ;;  %v5340_v58 = vadd.f32 %v2242_v53, %v2050_v5  ;;  %v2054_v63 = vadd.f32 %v2053_v26, %v5150_v34  ;;  %2753 = vmatprep.mubr.bf16.mxu0 %v4247_v31  ;;  %v4248_v20 = vld [vmem:[%s4455_s13 + $0x68] ss:$24 sps:$4 sm:$0xff]  }
 0x156   : > { %2946 = vmatprep.mubr.bf16.mxu1 %v4912_v37  ;;  %v2055_v6 = vpop.f32.mrf.mxu0 }
 0x157   : > { %6144 = vst [vmem:[#allocation20_spill] sm:$0xff] %v5340_v58  ;;  %v2248_v7 = vpop.f32.mrf.mxu1  ;;  %v5345_v17 = vadd.f32 %v2246_v36, %v2054_v63  ;;  %v2056_v10 = vadd.f32 %v2055_v6, %v5155_v49  ;;  %v4249_v6 = vld [vmem:[%s4455_s13 + $0x9c] ss:$24 sps:$4 sm:$0xff]  }
 0x158   : > { %v2057_v22 = vpop.f32.mrf.mxu0 }
 0x159   : > { %v2250_v13 = vpop.f32.mrf.mxu1  ;;  %v5348_v39 = vadd.f32 %v2248_v7, %v2056_v10  ;;  %v2058_v35 = vadd.f32 %v2057_v22, %v5150_v34 }
 0x15a   : > { %v2059_v53 = vpop.f32.mrf.mxu0 }
 0x15b   : > { %v2252_v5 = vpop.f32.mrf.mxu1  ;;  %v5351_v26 = vadd.f32 %v2250_v13, %v2058_v35  ;;  %v2060_v31 = vadd.f32 %v2059_v53, %v5155_v49 }
 0x15c   : > { %v2063_v37 = vpop.f32.mrf.mxu0  ;;  %2754 = vmatmul.mubr.bf16.gmra.mxu0 %v4248_v20 }
 0x15d   : > { %6145 = vst [vmem:[#allocation21_spill] sm:$0xff] %v5351_v26  ;;  %v2256_v58 = vpop.f32.mrf.mxu1  ;;  %2947 = vmatmul.mubr.bf16.gmra.mxu1 %v4943_v46  ;;  %v5356_v36 = vadd.f32 %v2252_v5, %v2060_v31  ;;  %v2064_v63 = vadd.f32 %v2063_v37, %v5150_v34  ;;  %2763 = vmatprep.mubr.bf16.mxu0 %v4249_v6  ;;  %v4250_v26 = vld [vmem:[%s4455_s13 + $0x98] ss:$24 sps:$4 sm:$0xff]  }
 0x15e   : > { %2956 = vmatprep.mubr.bf16.mxu1 %v4946_v47  ;;  %v2065_v7 = vpop.f32.mrf.mxu0 }
 0x15f   : > { %6146 = vst [vmem:[#allocation22_spill] sm:$0xff] %v5356_v36  ;;  %v2258_v10 = vpop.f32.mrf.mxu1  ;;  %v5361_v22 = vadd.f32 %v2256_v58, %v2064_v63  ;;  %v2066_v13 = vadd.f32 %v2065_v7, %v5155_v49  ;;  %v4251_v7 = vld [vmem:[%s4455_s13 + $0xcc] ss:$24 sps:$4 sm:$0xff]  }
 0x160   : > { %v2067_v35 = vpop.f32.mrf.mxu0 }
 0x161   : > { %v2260_v20 = vpop.f32.mrf.mxu1  ;;  %v5364_v53 = vadd.f32 %v2258_v10, %v2066_v13  ;;  %v2068_v46 = vadd.f32 %v2067_v35, %v5150_v34 }
 0x162   : > { %v2069_v5 = vpop.f32.mrf.mxu0 }
 0x163   : > { %v2262_v31 = vpop.f32.mrf.mxu1  ;;  %v5367_v37 = vadd.f32 %v2260_v20, %v2068_v46  ;;  %v2070_v6 = vadd.f32 %v2069_v5, %v5155_v49 }
 0x164   : > { %v2073_v47 = vpop.f32.mrf.mxu0  ;;  %2764 = vmatmul.mubr.bf16.gmra.mxu0 %v4250_v26 }
 0x165   : > { %6147 = vst [vmem:[#allocation23_spill] sm:$0xff] %v5367_v37  ;;  %v2266_v36 = vpop.f32.mrf.mxu1  ;;  %2957 = vmatmul.mubr.bf16.gmra.mxu1 %v4977_v0  ;;  %v5372_v58 = vadd.f32 %v2262_v31, %v2070_v6  ;;  %v2074_v63 = vadd.f32 %v2073_v47, %v5150_v34  ;;  %2773 = vmatprep.mubr.bf16.mxu0 %v4251_v7  ;;  %v4252_v37 = vld [vmem:[%s4455_s13 + $0xc8] ss:$24 sps:$4 sm:$0xff]  }
 0x166   : > { %2966 = vmatprep.mubr.bf16.mxu1 %v4980_v3  ;;  %v2075_v10 = vpop.f32.mrf.mxu0 }
 0x167   : > { %6148 = vst [vmem:[#allocation24_spill] sm:$0xff] %v5372_v58  ;;  %v2268_v13 = vpop.f32.mrf.mxu1  ;;  %v5377_v35 = vadd.f32 %v2266_v36, %v2074_v63  ;;  %v2076_v20 = vadd.f32 %v2075_v10, %v5155_v49  ;;  %v4253_v10 = vld [vmem:[%s4455_s13 + $0xfc] ss:$24 sps:$4 sm:$0xff]  }
 0x168   : > { %v2077_v46 = vpop.f32.mrf.mxu0 }
 0x169   : > { %v2270_v26 = vpop.f32.mrf.mxu1  ;;  %v5380_v5 = vadd.f32 %v2268_v13, %v2076_v20  ;;  %v2078_v0 = vadd.f32 %v2077_v46, %v5150_v34 }
 0x16a   : > { %v2079_v31 = vpop.f32.mrf.mxu0 }
 0x16b   : > { %v2272_v6 = vpop.f32.mrf.mxu1  ;;  %v5383_v47 = vadd.f32 %v2270_v26, %v2078_v0  ;;  %v2080_v7 = vadd.f32 %v2079_v31, %v5155_v49 }
 0x16c   : > { %v2083_v3 = vpop.f32.mrf.mxu0  ;;  %2774 = vmatmul.mubr.bf16.gmra.mxu0 %v4252_v37 }
 0x16d   : > { %6149 = vst [vmem:[#allocation25_spill] sm:$0xff] %v5383_v47  ;;  %v2276_v58 = vpop.f32.mrf.mxu1  ;;  %2967 = vmatmul.mubr.bf16.gmra.mxu1 %v5011_v23  ;;  %v5388_v36 = vadd.f32 %v2272_v6, %v2080_v7  ;;  %v2084_v63 = vadd.f32 %v2083_v3, %v5150_v34  ;;  %2783 = vmatprep.mubr.bf16.mxu0 %v4253_v10  ;;  %v4254_v47 = vld [vmem:[%s4455_s13 + $0xf8] ss:$24 sps:$4 sm:$0xff]  }
 0x16e   : > { %2976 = vmatprep.mubr.bf16.mxu1 %v5014_v24  ;;  %v2085_v13 = vpop.f32.mrf.mxu0 }
 0x16f   : > { %6150 = vst [vmem:[#allocation26_spill] sm:$0xff] %v5388_v36  ;;  %v2278_v20 = vpop.f32.mrf.mxu1  ;;  %v5393_v46 = vadd.f32 %v2276_v58, %v2084_v63  ;;  %v2086_v26 = vadd.f32 %v2085_v13, %v5155_v49  ;;  %v4255_v13 = vld [vmem:[%s4455_s13 + $0x12c] ss:$24 sps:$4 sm:$0xff]  }
 0x170   : > { %v2087_v0 = vpop.f32.mrf.mxu0 }
 0x171   : > { %v2280_v37 = vpop.f32.mrf.mxu1  ;;  %v5396_v31 = vadd.f32 %v2278_v20, %v2086_v26  ;;  %v2088_v23 = vadd.f32 %v2087_v0, %v5150_v34 }
 0x172   : > { %v2089_v6 = vpop.f32.mrf.mxu0 }
 0x173   : > { %v2282_v7 = vpop.f32.mrf.mxu1  ;;  %v5399_v3 = vadd.f32 %v2280_v37, %v2088_v23  ;;  %v2090_v10 = vadd.f32 %v2089_v6, %v5155_v49 }
 0x174   : > { %v2093_v24 = vpop.f32.mrf.mxu0  ;;  %2784 = vmatmul.mubr.bf16.gmra.mxu0 %v4254_v47 }
 0x175   : > { %6151 = vst [vmem:[#allocation27_spill] sm:$0xff] %v5399_v3  ;;  %v2286_v36 = vpop.f32.mrf.mxu1  ;;  %2977 = vmatmul.mubr.bf16.gmra.mxu1 %v5045_v8  ;;  %v5404_v58 = vadd.f32 %v2282_v7, %v2090_v10  ;;  %v2094_v63 = vadd.f32 %v2093_v24, %v5150_v34  ;;  %2793 = vmatprep.mubr.bf16.mxu0 %v4255_v13  ;;  %v4256_v3 = vld [vmem:[%s4455_s13 + $0x128] ss:$24 sps:$4 sm:$0xff]  }
 0x176   : > { %2986 = vmatprep.mubr.bf16.mxu1 %v5048_v40  ;;  %v2095_v20 = vpop.f32.mrf.mxu0 }
 0x177   : > { %6152 = vst [vmem:[#allocation28_spill] sm:$0xff] %v5404_v58  ;;  %v2288_v26 = vpop.f32.mrf.mxu1  ;;  %v5409_v0 = vadd.f32 %v2286_v36, %v2094_v63  ;;  %v2096_v37 = vadd.f32 %v2095_v20, %v5155_v49  ;;  %v4257_v20 = vld [vmem:[%s4455_s13 + $0x15c] ss:$24 sps:$4 sm:$0xff]  }
 0x178   : > { %v2097_v23 = vpop.f32.mrf.mxu0 }
 0x179   : > { %v2290_v47 = vpop.f32.mrf.mxu1  ;;  %v5412_v6 = vadd.f32 %v2288_v26, %v2096_v37  ;;  %v2098_v8 = vadd.f32 %v2097_v23, %v5150_v34 }
 0x17a   : > { %v2099_v7 = vpop.f32.mrf.mxu0 }
 0x17b   : > { %v2292_v10 = vpop.f32.mrf.mxu1  ;;  %v5415_v24 = vadd.f32 %v2290_v47, %v2098_v8  ;;  %v2100_v13 = vadd.f32 %v2099_v7, %v5155_v49 }
 0x17c   : > { %v2103_v40 = vpop.f32.mrf.mxu0  ;;  %2794 = vmatmul.mubr.bf16.gmra.mxu0 %v4256_v3 }
 0x17d   : > { %6153 = vst [vmem:[#allocation29_spill] sm:$0xff] %v5415_v24  ;;  %v2296_v58 = vpop.f32.mrf.mxu1  ;;  %2987 = vmatmul.mubr.bf16.gmra.mxu1 %v5079_v50  ;;  %v5420_v36 = vadd.f32 %v2292_v10, %v2100_v13  ;;  %v2104_v63 = vadd.f32 %v2103_v40, %v5150_v34  ;;  %2803 = vmatprep.mubr.bf16.mxu0 %v4257_v20  ;;  %v4258_v24 = vld [vmem:[%s4455_s13 + $0x158] ss:$24 sps:$4 sm:$0xff]  }
 0x17e   : > { %2996 = vmatprep.mubr.bf16.mxu1 %v5082_v52  ;;  %v2105_v26 = vpop.f32.mrf.mxu0 }
 0x17f   : > { %6154 = vst [vmem:[#allocation30_spill] sm:$0xff] %v5420_v36  ;;  %v2298_v37 = vpop.f32.mrf.mxu1  ;;  %v5425_v23 = vadd.f32 %v2296_v58, %v2104_v63  ;;  %v2106_v47 = vadd.f32 %v2105_v26, %v5155_v49  ;;  %v4259_v26 = vld [vmem:[%s4455_s13 + $0x18c] ss:$24 sps:$4 sm:$0xff]  }
 0x180   : > { %v2107_v8 = vpop.f32.mrf.mxu0 }
 0x181   : > { %v2300_v3 = vpop.f32.mrf.mxu1  ;;  %v5428_v7 = vadd.f32 %v2298_v37, %v2106_v47  ;;  %v2108_v50 = vadd.f32 %v2107_v8, %v5150_v34 }
 0x182   : > { %v2109_v10 = vpop.f32.mrf.mxu0 }
 0x183   : > { %v2302_v13 = vpop.f32.mrf.mxu1  ;;  %v5431_v40 = vadd.f32 %v2300_v3, %v2108_v50  ;;  %v2110_v20 = vadd.f32 %v2109_v10, %v5155_v49 }
 0x184   : > { %v2113_v52 = vpop.f32.mrf.mxu0  ;;  %2804 = vmatmul.mubr.bf16.gmra.mxu0 %v4258_v24 }
 0x185   : > { %v2306_v36 = vpop.f32.mrf.mxu1  ;;  %2997 = vmatmul.mubr.bf16.gmra.mxu1 %v5113_v9  ;;  %v5436_v58 = vadd.f32 %v2302_v13, %v2110_v20  ;;  %v2114_v63 = vadd.f32 %v2113_v52, %v5150_v34  ;;  %2813 = vmatprep.mubr.bf16.mxu0 %v4259_v26 }
 0x186   : > { %3006 = vmatprep.mubr.bf16.mxu1 %v5116_v12  ;;  %v2115_v37 = vpop.f32.mrf.mxu0 }
 0x187   : > { %6155 = vst [vmem:[#allocation31_spill] sm:$0xff] %v5436_v58  ;;  %v2308_v47 = vpop.f32.mrf.mxu1  ;;  %v5441_v8 = vadd.f32 %v2306_v36, %v2114_v63  ;;  %v2116_v3 = vadd.f32 %v2115_v37, %v5155_v49  ;;  %v4260_v36 = vld [vmem:[%s4455_s13 + $0x188] ss:$24 sps:$4 sm:$0xff]  }
 0x188   : > { %v2117_v50 = vpop.f32.mrf.mxu0 }
 0x189   : > { %v2310_v24 = vpop.f32.mrf.mxu1  ;;  %v5444_v10 = vadd.f32 %v2308_v47, %v2116_v3  ;;  %v2118_v9 = vadd.f32 %v2117_v50, %v5150_v34  ;;  %v4261_v34 = vld [vmem:[%s4455_s13 + $0x1bc] ss:$24 sps:$4 sm:$0xff]  }
 0x18a   : > { %v2119_v13 = vpop.f32.mrf.mxu0 }
 0x18b   : > { %v2312_v20 = vpop.f32.mrf.mxu1  ;;  %v5447_v52 = vadd.f32 %v2310_v24, %v2118_v9  ;;  %v2120_v26 = vadd.f32 %v2119_v13, %v5155_v49 }
 0x18c   : > { %v2349_v12 = vpop.f32.mrf.mxu0  ;;  %2814 = vmatmul.mubr.bf16.gmra.mxu0 %v4260_v36 }
 0x18d   : > { %v5450_v58 = vpop.f32.mrf.mxu1  ;;  %3007 = vmatmul.mubr.bf16.gmra.mxu1 %v5148_v29  ;;  %v5454_v63 = vadd.f32 %v2312_v20, %v2120_v26  ;;  %v5457_v37 = vadd.f32 %v2349_v12, %v5162_v16  ;;  %2823 = vmatprep.mubr.bf16.mxu0 %v4261_v34  ;;  %v4262_v26 = vld [vmem:[%s4455_s13 + $0x1b8] ss:$24 sps:$4 sm:$0xff]   ;;  %v4263_v12 = vld [vmem:[%s4455_s13 + $0x1ec] ss:$24 sps:$4 sm:$0xff]  }
 0x18e   : > { %3016 = vmatprep.mubr.bf16.mxu1 %v5153_v4  ;;  %v2351_v47 = vpop.f32.mrf.mxu0 }
 0x18f   : > { %v5461_v49 = vpop.f32.mrf.mxu1  ;;  %v5464_v3 = vadd.f32 %v2351_v47, %v5168_v57 }
 0x190   : > { %v2353_v50 = vpop.f32.mrf.mxu0 }
 0x191   : > { %v5466_v24 = vpop.f32.mrf.mxu1  ;;  %v5469_v29 = vadd.f32 %v2353_v50, %v5174_v30 }
 0x192   : > { %v2355_v9 = vpop.f32.mrf.mxu0 }
 0x193   : > { %v5471_v16 = vpop.f32.mrf.mxu1  ;;  %v5474_v13 = vadd.f32 %v2355_v9, %v5179_v14 }
 0x194   : > { %v2359_v4 = vpop.f32.mrf.mxu0  ;;  %2824 = vmatmul.mubr.bf16.gmra.mxu0 %v4262_v26  ;;  %v4264_v26 = vld [vmem:[%s4455_s13 + $0x1e8] ss:$24 sps:$4 sm:$0xff]  }
 0x195   : > { %v5476_v20 = vpop.f32.mrf.mxu1  ;;  %3017 = vmatmul.mubr.bf16.gmra.mxu1 %v5166_v55  ;;  %v5481_v57 = vadd.f32 %v2359_v4, %v5184_v42  ;;  %2833 = vmatprep.mubr.bf16.mxu0 %v4263_v12  ;;  %v4265_v12 = vld [vmem:[%s4455_s13 + $0x21c] ss:$24 sps:$4 sm:$0xff]  }
 0x196   : > { %3026 = vmatprep.mubr.bf16.mxu1 %v5172_v59  ;;  %v2361_v30 = vpop.f32.mrf.mxu0 }
 0x197   : > { %v5485_v36 = vpop.f32.mrf.mxu1  ;;  %v5488_v14 = vadd.f32 %v2361_v30, %v5190_v33 }
 0x198   : > { %v2363_v34 = vpop.f32.mrf.mxu0 }
 0x199   : > { %v5490_v47 = vpop.f32.mrf.mxu1  ;;  %v5493_v55 = vadd.f32 %v2363_v34, %v5196_v44 }
 0x19a   : > { %v2365_v50 = vpop.f32.mrf.mxu0 }
 0x19b   : > { %v5495_v42 = vpop.f32.mrf.mxu1  ;;  %v5498_v9 = vadd.f32 %v2365_v50, %v5201_v62 }
 0x19c   : > { %v2369_v59 = vpop.f32.mrf.mxu0  ;;  %2834 = vmatmul.mubr.bf16.gmra.mxu0 %v4264_v26 }
 0x19d   : > { %v5500_v4 = vpop.f32.mrf.mxu1  ;;  %3027 = vmatmul.mubr.bf16.gmra.mxu1 %v5188_v27  ;;  %v5505_v33 = vadd.f32 %v2369_v59, %v5206_v25  ;;  %2843 = vmatprep.mubr.bf16.mxu0 %v4265_v12 }
 0x19e   : > { %3036 = vmatprep.mubr.bf16.mxu1 %v5194_v54  ;;  %v2371_v44 = vpop.f32.mrf.mxu0 }
 0x19f   : > { %6156 = vst [vmem:[#allocation32_spill] sm:$0xff] %v5505_v33  ;;  %v5509_v30 = vpop.f32.mrf.mxu1  ;;  %v5512_v62 = vadd.f32 %v2371_v44, %v5212_v21  ;;  %v4266_v33 = vld [vmem:[%s4455_s13 + $0x218] ss:$24 sps:$4 sm:$0xff]   ;;  %v4267_v44 = vld [vmem:[%s4455_s13 + $0x24c] ss:$24 sps:$4 sm:$0xff]  }
 0x1a0   : > { %v2373_v34 = vpop.f32.mrf.mxu0 }
 0x1a1   : > { %v5514_v50 = vpop.f32.mrf.mxu1  ;;  %v5517_v27 = vadd.f32 %v2373_v34, %v5218_v32 }
 0x1a2   : > { %v2375_v26 = vpop.f32.mrf.mxu0 }
 0x1a3   : > { %6157 = vst [vmem:[#allocation33_spill] sm:$0xff] %v5517_v27  ;;  %v5519_v25 = vpop.f32.mrf.mxu1  ;;  %v5522_v59 = vadd.f32 %v2375_v26, %v5223_v43  ;;  %v6164_v27 = vld [vmem:[#allocation3_spill] sm:$0xff] }
 0x1a4   : > { %v2379_v54 = vpop.f32.mrf.mxu0  ;;  %2844 = vmatmul.mubr.bf16.gmra.mxu0 %v4266_v33 }
 0x1a5   : > { %6158 = vst [vmem:[#allocation34_spill] sm:$0xff] %v5522_v59  ;;  %v5524_v12 = vpop.f32.mrf.mxu1  ;;  %3037 = vmatmul.mubr.bf16.gmra.mxu1 %v5210_v19  ;;  %v5529_v21 = vadd.f32 %v2379_v54, %v5228_v2  ;;  %2853 = vmatprep.mubr.bf16.mxu0 %v4267_v44 }
 0x1a6   : > { %3046 = vmatprep.mubr.bf16.mxu1 %v5216_v38  ;;  %v2381_v32 = vpop.f32.mrf.mxu0 }
 0x1a7   : > { %6159 = vst [vmem:[#allocation35_spill] sm:$0xff] %v5529_v21  ;;  %v5533_v34 = vpop.f32.mrf.mxu1  ;;  %v5536_v43 = vadd.f32 %v2381_v32, %v5234_v11  ;;  %v4268_v21 = vld [vmem:[%s4455_s13 + $0x248] ss:$24 sps:$4 sm:$0xff]   ;;  %v4269_v32 = vld [vmem:[%s4455_s13 + $0x27c] ss:$24 sps:$4 sm:$0xff]  }
 0x1a8   : > { %v2383_v26 = vpop.f32.mrf.mxu0 }
 0x1a9   : > { %6160 = vst [vmem:[#allocation36_spill] sm:$0xff] %v5536_v43  ;;  %v5538_v59 = vpop.f32.mrf.mxu1  ;;  %v5541_v19 = vadd.f32 %v2383_v26, %v5240_v56  ;;  %v6166_v56 = vld [vmem:[#allocation4_spill] sm:$0xff] }
 0x1aa   : > { %v2385_v33 = vpop.f32.mrf.mxu0 }
 0x1ab   : > { %6161 = vst [vmem:[#allocation37_spill] sm:$0xff] %v5541_v19  ;;  %v5543_v2 = vpop.f32.mrf.mxu1  ;;  %v5546_v54 = vadd.f32 %v2385_v33, %v5245_v51  ;;  %v6168_v51 = vld [vmem:[#allocation6_spill] sm:$0xff] }
 0x1ac   : > { %v2389_v38 = vpop.f32.mrf.mxu0  ;;  %2854 = vmatmul.mubr.bf16.gmra.mxu0 %v4268_v21  ;;  %v6170_v21 = vld [vmem:[#allocation8_spill] sm:$0xff] }
 0x1ad   : > { %6162 = vst [vmem:[#allocation38_spill] sm:$0xff] %v5546_v54  ;;  %v5548_v44 = vpop.f32.mrf.mxu1  ;;  %3047 = vmatmul.mubr.bf16.gmra.mxu1 %v6164_v27  ;;  %v5553_v11 = vadd.f32 %v2389_v38, %v5250_v61  ;;  %2863 = vmatprep.mubr.bf16.mxu0 %v4269_v32 }
 0x1ae   : > { %6163 = vst [vmem:[#allocation39_spill] sm:$0xff] %v5548_v44  ;;  %3056 = vmatprep.mubr.bf16.mxu1 %v6166_v56  ;;  %v2391_v26 = vpop.f32.mrf.mxu0 }
 0x1af   : > { %6165 = vst [vmem:[#allocation3_spill] sm:$0xff] %v5553_v11  ;;  %v5557_v19 = vpop.f32.mrf.mxu1  ;;  %v5560_v33 = vadd.f32 %v2391_v26, %v6168_v51  ;;  %v4270_v11 = vld [vmem:[%s4455_s13 + $0x278] ss:$24 sps:$4 sm:$0xff]   ;;  %v4271_v51 = vld [vmem:[%s4455_s13 + $0x2ac] ss:$24 sps:$4 sm:$0xff]  }
 0x1b0   : > { %6167 = vst [vmem:[#allocation4_spill] sm:$0xff] %v5557_v19  ;;  %v2393_v54 = vpop.f32.mrf.mxu0  ;;  %v6174_v19 = vld [vmem:[#allocation5_spill] sm:$0xff] }
 0x1b1   : > { %6169 = vst [vmem:[#allocation6_spill] sm:$0xff] %v5560_v33  ;;  %v5562_v43 = vpop.f32.mrf.mxu1  ;;  %v5565_v27 = vadd.f32 %v2393_v54, %v6170_v21  ;;  %v6176_v54 = vld [vmem:[#allocation7_spill] sm:$0xff] }
 0x1b2   : > { %v2395_v44 = vpop.f32.mrf.mxu0 }
 0x1b3   : > { %6171 = vst [vmem:[#allocation8_spill] sm:$0xff] %v5565_v27  ;;  %v5567_v61 = vpop.f32.mrf.mxu1  ;;  %v5570_v38 = vadd.f32 %v2395_v44, %v5267_v18 }
 0x1b4   : > { %v2399_v32 = vpop.f32.mrf.mxu0  ;;  %2864 = vmatmul.mubr.bf16.gmra.mxu0 %v4270_v11  ;;  %v6179_v11 = vld [vmem:[#allocation11_spill] sm:$0xff] }
 0x1b5   : > { %6172 = vst [vmem:[#allocation40_spill] sm:$0xff] %v5570_v38  ;;  %v5572_v56 = vpop.f32.mrf.mxu1  ;;  %3057 = vmatmul.mubr.bf16.gmra.mxu1 %v6174_v19  ;;  %v5577_v26 = vadd.f32 %v2399_v32, %v5272_v28  ;;  %2873 = vmatprep.mubr.bf16.mxu0 %v4271_v51  ;;  %v6182_v32 = vld [vmem:[#allocation12_spill] sm:$0xff] }
 0x1b6   : > { %6173 = vst [vmem:[#allocation41_spill] sm:$0xff] %v5572_v56  ;;  %3066 = vmatprep.mubr.bf16.mxu1 %v6176_v54  ;;  %v2401_v21 = vpop.f32.mrf.mxu0  ;;  %v4272_v56 = vld [vmem:[%s4455_s13 + $0x2a8] ss:$24 sps:$4 sm:$0xff]  }
 0x1b7   : > { %6175 = vst [vmem:[#allocation5_spill] sm:$0xff] %v5577_v26  ;;  %v5581_v27 = vpop.f32.mrf.mxu1  ;;  %v5584_v18 = vadd.f32 %v2401_v21, %v5278_v15  ;;  %v4273_v21 = vld [vmem:[%s4455_s13 + $0x2dc] ss:$24 sps:$4 sm:$0xff]  }
 0x1b8   : > { %6177 = vst [vmem:[#allocation7_spill] sm:$0xff] %v5581_v27  ;;  %v2403_v44 = vpop.f32.mrf.mxu0  ;;  %v6185_v27 = vld [vmem:[#allocation9_spill] sm:$0xff] }
 0x1b9   : > { %6178 = vst [vmem:[#allocation42_spill] sm:$0xff] %v5584_v18  ;;  %v5586_v38 = vpop.f32.mrf.mxu1  ;;  %v5589_v19 = vadd.f32 %v2403_v44, %v6179_v11  ;;  %v6187_v44 = vld [vmem:[#allocation10_spill] sm:$0xff] }
 0x1ba   : > { %v2405_v33 = vpop.f32.mrf.mxu0 }
 0x1bb   : > { %6180 = vst [vmem:[#allocation11_spill] sm:$0xff] %v5589_v19  ;;  %v5591_v28 = vpop.f32.mrf.mxu1  ;;  %v5594_v51 = vadd.f32 %v2405_v33, %v6182_v32  ;;  %v6189_v33 = vld [vmem:[#allocation14_spill] sm:$0xff] }
 0x1bc   : > { %6181 = vst [vmem:[#allocation43_spill] sm:$0xff] %v5591_v28  ;;  %v2409_v54 = vpop.f32.mrf.mxu0  ;;  %2874 = vmatmul.mubr.bf16.gmra.mxu0 %v4272_v56  ;;  %v6191_v56 = vld [vmem:[#allocation15_spill] sm:$0xff] }
 0x1bd   : > { %6183 = vst [vmem:[#allocation12_spill] sm:$0xff] %v5594_v51  ;;  %v5596_v26 = vpop.f32.mrf.mxu1  ;;  %3067 = vmatmul.mubr.bf16.gmra.mxu1 %v6185_v27  ;;  %v5601_v15 = vadd.f32 %v2409_v54, %v5294_v60  ;;  %2883 = vmatprep.mubr.bf16.mxu0 %v4273_v21  ;;  %v6193_v60 = vld [vmem:[#allocation16_spill] sm:$0xff] }
 0x1be   : > { %6184 = vst [vmem:[#allocation44_spill] sm:$0xff] %v5596_v26  ;;  %3076 = vmatprep.mubr.bf16.mxu1 %v6187_v44  ;;  %v2411_v11 = vpop.f32.mrf.mxu0 }
 0x1bf   : > { %6186 = vst [vmem:[#allocation9_spill] sm:$0xff] %v5601_v15  ;;  %v5605_v19 = vpop.f32.mrf.mxu1  ;;  %v5608_v32 = vadd.f32 %v2411_v11, %v6189_v33  ;;  %v4274_v15 = vld [vmem:[%s4455_s13 + $0x2d8] ss:$24 sps:$4 sm:$0xff]  }
 0x1c0   : > { %6188 = vst [vmem:[#allocation10_spill] sm:$0xff] %v5605_v19  ;;  %v2413_v51 = vpop.f32.mrf.mxu0  ;;  %v6196_v19 = vld [vmem:[#allocation13_spill] sm:$0xff] }
 0x1c1   : > { %6190 = vst [vmem:[#allocation14_spill] sm:$0xff] %v5608_v32  ;;  %v5610_v18 = vpop.f32.mrf.mxu1  ;;  %v5613_v26 = vadd.f32 %v2413_v51, %v6191_v56 }
 0x1c2   : > { %v2415_v27 = vpop.f32.mrf.mxu0 }
 0x1c3   : > { %6192 = vst [vmem:[#allocation15_spill] sm:$0xff] %v5613_v26  ;;  %v5615_v28 = vpop.f32.mrf.mxu1  ;;  %v5618_v54 = vadd.f32 %v2415_v27, %v6193_v60  ;;  %v6199_v27 = vld [vmem:[#allocation17_spill] sm:$0xff] }
 0x1c4   : > { %v2419_v21 = vpop.f32.mrf.mxu0  ;;  %2884 = vmatmul.mubr.bf16.gmra.mxu0 %v4274_v15  ;;  %v6202_v15 = vld [vmem:[#allocation18_spill] sm:$0xff] }
 0x1c5   : > { %6194 = vst [vmem:[#allocation16_spill] sm:$0xff] %v5618_v54  ;;  %v5620_v44 = vpop.f32.mrf.mxu1  ;;  %3077 = vmatmul.mubr.bf16.gmra.mxu1 %v6196_v19  ;;  %v5625_v11 = vadd.f32 %v2419_v21, %v5313_v1 }
 0x1c6   : > { %6195 = vst [vmem:[#allocation45_spill] sm:$0xff] %v5620_v44  ;;  %v2421_v33 = vpop.f32.mrf.mxu0 }
 0x1c7   : > { %6197 = vst [vmem:[#allocation13_spill] sm:$0xff] %v5625_v11  ;;  %v5627_v32 = vpop.f32.mrf.mxu1  ;;  %v5630_v51 = vadd.f32 %v2421_v33, %v5316_v48 }
 0x1c8   : > { %v2423_v56 = vpop.f32.mrf.mxu0 }
 0x1c9   : > { %6198 = vst [vmem:[#allocation46_spill] sm:$0xff] %v5630_v51  ;;  %v5632_v26 = vpop.f32.mrf.mxu1  ;;  %v5635_v60 = vadd.f32 %v2423_v56, %v6199_v27 }
 0x1ca   : > { %v2425_v54 = vpop.f32.mrf.mxu0 }
 0x1cb   : > { %6200 = vst [vmem:[#allocation17_spill] sm:$0xff] %v5635_v60  ;;  %v5637_v44 = vpop.f32.mrf.mxu1  ;;  %v5640_v19 = vadd.f32 %v2425_v54, %v6202_v15  ;;  %v6207_v60 = vld [vmem:[#allocation19_spill] sm:$0xff] }
 0x1cc   : > { %6201 = vst [vmem:[#allocation47_spill] sm:$0xff] %v5637_v44  ;;  %v2429_v1 = vpop.f32.mrf.mxu0 }
 0x1cd   : > { %6203 = vst [vmem:[#allocation18_spill] sm:$0xff] %v5640_v19  ;;  %v5642_v21 = vpop.f32.mrf.mxu1  ;;  %v5645_v11 = vadd.f32 %v2429_v1, %v5329_v41  ;;  %v6210_v19 = vld [vmem:[#allocation20_spill] sm:$0xff] }
 0x1ce   : > { %6204 = vst [vmem:[#allocation48_spill] sm:$0xff] %v5642_v21  ;;  %v2431_v48 = vpop.f32.mrf.mxu0 }
 0x1cf   : > { %6205 = vst [vmem:[#allocation49_spill] sm:$0xff] %v5645_v11  ;;  %v5647_v33 = vpop.f32.mrf.mxu1  ;;  %v5650_v51 = vadd.f32 %v2431_v48, %v5332_v45 }
 0x1d0   : > { %v2433_v56 = vpop.f32.mrf.mxu0 }
 0x1d1   : > { %6206 = vst [vmem:[#allocation50_spill] sm:$0xff] %v5650_v51  ;;  %v5652_v27 = vpop.f32.mrf.mxu1  ;;  %v5655_v44 = vadd.f32 %v2433_v56, %v6207_v60 }
 0x1d2   : > { %v2435_v54 = vpop.f32.mrf.mxu0 }
 0x1d3   : > { %6208 = vst [vmem:[#allocation19_spill] sm:$0xff] %v5655_v44  ;;  %v5657_v15 = vpop.f32.mrf.mxu1  ;;  %v5660_v21 = vadd.f32 %v2435_v54, %v6210_v19  ;;  %v6215_v44 = vld [vmem:[#allocation21_spill] sm:$0xff] }
 0x1d4   : > { %6209 = vst [vmem:[#allocation51_spill] sm:$0xff] %v5657_v15  ;;  %v2439_v41 = vpop.f32.mrf.mxu0 }
 0x1d5   : > { %6211 = vst [vmem:[#allocation20_spill] sm:$0xff] %v5660_v21  ;;  %v5662_v1 = vpop.f32.mrf.mxu1  ;;  %v5665_v11 = vadd.f32 %v2439_v41, %v5345_v17  ;;  %v6218_v21 = vld [vmem:[#allocation22_spill] sm:$0xff] }
 0x1d6   : > { %6212 = vst [vmem:[#allocation52_spill] sm:$0xff] %v5662_v1  ;;  %v2441_v45 = vpop.f32.mrf.mxu0 }
 0x1d7   : > { %6213 = vst [vmem:[#allocation53_spill] sm:$0xff] %v5665_v11  ;;  %v5667_v48 = vpop.f32.mrf.mxu1  ;;  %v5670_v51 = vadd.f32 %v2441_v45, %v5348_v39 }
 0x1d8   : > { %v2443_v60 = vpop.f32.mrf.mxu0 }
 0x1d9   : > { %6214 = vst [vmem:[#allocation54_spill] sm:$0xff] %v5670_v51  ;;  %v5672_v56 = vpop.f32.mrf.mxu1  ;;  %v5675_v15 = vadd.f32 %v2443_v60, %v6215_v44 }
 0x1da   : > { %v2445_v19 = vpop.f32.mrf.mxu0 }
 0x1db   : > { %6216 = vst [vmem:[#allocation21_spill] sm:$0xff] %v5675_v15  ;;  %v5677_v54 = vpop.f32.mrf.mxu1  ;;  %v5680_v1 = vadd.f32 %v2445_v19, %v6218_v21  ;;  %v6223_v15 = vld [vmem:[#allocation23_spill] sm:$0xff] }
 0x1dc   : > { %6217 = vst [vmem:[#allocation55_spill] sm:$0xff] %v5677_v54  ;;  %v2449_v17 = vpop.f32.mrf.mxu0 }
 0x1dd   : > { %6219 = vst [vmem:[#allocation22_spill] sm:$0xff] %v5680_v1  ;;  %v5682_v41 = vpop.f32.mrf.mxu1  ;;  %v5685_v11 = vadd.f32 %v2449_v17, %v5361_v22  ;;  %v6226_v1 = vld [vmem:[#allocation24_spill] sm:$0xff] }
 0x1de   : > { %6220 = vst [vmem:[#allocation56_spill] sm:$0xff] %v5682_v41  ;;  %v2451_v39 = vpop.f32.mrf.mxu0 }
 0x1df   : > { %6221 = vst [vmem:[#allocation57_spill] sm:$0xff] %v5685_v11  ;;  %v5687_v45 = vpop.f32.mrf.mxu1  ;;  %v5690_v51 = vadd.f32 %v2451_v39, %v5364_v53 }
 0x1e0   : > { %v2453_v44 = vpop.f32.mrf.mxu0 }
 0x1e1   : > { %6222 = vst [vmem:[#allocation58_spill] sm:$0xff] %v5690_v51  ;;  %v5692_v60 = vpop.f32.mrf.mxu1  ;;  %v5695_v54 = vadd.f32 %v2453_v44, %v6223_v15 }
 0x1e2   : > { %v2455_v21 = vpop.f32.mrf.mxu0 }
 0x1e3   : > { %6224 = vst [vmem:[#allocation23_spill] sm:$0xff] %v5695_v54  ;;  %v5697_v19 = vpop.f32.mrf.mxu1  ;;  %v5700_v41 = vadd.f32 %v2455_v21, %v6226_v1  ;;  %v6231_v54 = vld [vmem:[#allocation25_spill] sm:$0xff] }
 0x1e4   : > { %6225 = vst [vmem:[#allocation59_spill] sm:$0xff] %v5697_v19  ;;  %v2459_v22 = vpop.f32.mrf.mxu0 }
 0x1e5   : > { %6227 = vst [vmem:[#allocation24_spill] sm:$0xff] %v5700_v41  ;;  %v5702_v17 = vpop.f32.mrf.mxu1  ;;  %v5705_v11 = vadd.f32 %v2459_v22, %v5377_v35  ;;  %v6234_v41 = vld [vmem:[#allocation26_spill] sm:$0xff] }
 0x1e6   : > { %6228 = vst [vmem:[#allocation60_spill] sm:$0xff] %v5702_v17  ;;  %v2461_v53 = vpop.f32.mrf.mxu0 }
 0x1e7   : > { %6229 = vst [vmem:[#allocation61_spill] sm:$0xff] %v5705_v11  ;;  %v5707_v39 = vpop.f32.mrf.mxu1  ;;  %v5710_v51 = vadd.f32 %v2461_v53, %v5380_v5 }
 0x1e8   : > { %v2463_v15 = vpop.f32.mrf.mxu0 }
 0x1e9   : > { %6230 = vst [vmem:[#allocation62_spill] sm:$0xff] %v5710_v51  ;;  %v5712_v44 = vpop.f32.mrf.mxu1  ;;  %v5715_v19 = vadd.f32 %v2463_v15, %v6231_v54 }
 0x1ea   : > { %v2465_v1 = vpop.f32.mrf.mxu0 }
 0x1eb   : > { %6232 = vst [vmem:[#allocation25_spill] sm:$0xff] %v5715_v19  ;;  %v5717_v21 = vpop.f32.mrf.mxu1  ;;  %v5720_v17 = vadd.f32 %v2465_v1, %v6234_v41  ;;  %v6239_v19 = vld [vmem:[#allocation27_spill] sm:$0xff] }
 0x1ec   : > { %6233 = vst [vmem:[#allocation63_spill] sm:$0xff] %v5717_v21  ;;  %v2469_v35 = vpop.f32.mrf.mxu0 }
 0x1ed   : > { %6235 = vst [vmem:[#allocation26_spill] sm:$0xff] %v5720_v17  ;;  %v5722_v22 = vpop.f32.mrf.mxu1  ;;  %v5725_v11 = vadd.f32 %v2469_v35, %v5393_v46  ;;  %v6242_v17 = vld [vmem:[#allocation28_spill] sm:$0xff] }
 0x1ee   : > { %6236 = vst [vmem:[#allocation64_spill] sm:$0xff] %v5722_v22  ;;  %v2471_v5 = vpop.f32.mrf.mxu0 }
 0x1ef   : > { %6237 = vst [vmem:[#allocation65_spill] sm:$0xff] %v5725_v11  ;;  %v5727_v53 = vpop.f32.mrf.mxu1  ;;  %v5730_v51 = vadd.f32 %v2471_v5, %v5396_v31 }
 0x1f0   : > { %v2473_v54 = vpop.f32.mrf.mxu0 }
 0x1f1   : > { %6238 = vst [vmem:[#allocation66_spill] sm:$0xff] %v5730_v51  ;;  %v5732_v15 = vpop.f32.mrf.mxu1  ;;  %v5735_v21 = vadd.f32 %v2473_v54, %v6239_v19 }
 0x1f2   : > { %v2475_v41 = vpop.f32.mrf.mxu0 }
 0x1f3   : > { %6240 = vst [vmem:[#allocation27_spill] sm:$0xff] %v5735_v21  ;;  %v5737_v1 = vpop.f32.mrf.mxu1  ;;  %v5740_v22 = vadd.f32 %v2475_v41, %v6242_v17  ;;  %v6247_v21 = vld [vmem:[#allocation29_spill] sm:$0xff] }
 0x1f4   : > { %6241 = vst [vmem:[#allocation67_spill] sm:$0xff] %v5737_v1  ;;  %v2479_v46 = vpop.f32.mrf.mxu0 }
 0x1f5   : > { %6243 = vst [vmem:[#allocation28_spill] sm:$0xff] %v5740_v22  ;;  %v5742_v35 = vpop.f32.mrf.mxu1  ;;  %v5745_v11 = vadd.f32 %v2479_v46, %v5409_v0  ;;  %v6250_v22 = vld [vmem:[#allocation30_spill] sm:$0xff] }
 0x1f6   : > { %6244 = vst [vmem:[#allocation68_spill] sm:$0xff] %v5742_v35  ;;  %v2481_v31 = vpop.f32.mrf.mxu0 }
 0x1f7   : > { %6245 = vst [vmem:[#allocation69_spill] sm:$0xff] %v5745_v11  ;;  %v5747_v5 = vpop.f32.mrf.mxu1  ;;  %v5750_v51 = vadd.f32 %v2481_v31, %v5412_v6 }
 0x1f8   : > { %v2483_v19 = vpop.f32.mrf.mxu0 }
 0x1f9   : > { %6246 = vst [vmem:[#allocation70_spill] sm:$0xff] %v5750_v51  ;;  %v5752_v54 = vpop.f32.mrf.mxu1  ;;  %v5755_v1 = vadd.f32 %v2483_v19, %v6247_v21 }
 0x1fa   : > { %v2485_v17 = vpop.f32.mrf.mxu0 }
 0x1fb   : > { %6248 = vst [vmem:[#allocation29_spill] sm:$0xff] %v5755_v1  ;;  %v5757_v41 = vpop.f32.mrf.mxu1  ;;  %v5760_v35 = vadd.f32 %v2485_v17, %v6250_v22 }
 0x1fc   : > { %6249 = vst [vmem:[#allocation71_spill] sm:$0xff] %v5757_v41  ;;  %v2489_v0 = vpop.f32.mrf.mxu0  ;;  %v6258_v41 = vld [vmem:[#allocation31_spill] sm:$0xff] }
 0x1fd   : > { %6251 = vst [vmem:[#allocation30_spill] sm:$0xff] %v5760_v35  ;;  %v5762_v46 = vpop.f32.mrf.mxu1  ;;  %v5765_v11 = vadd.f32 %v2489_v0, %v5425_v23  ;;  %v6257_v35 = vld [vmem:[#allocation2_spill] sm:$0xff] }
 0x1fe   : > { %6252 = vst [vmem:[#allocation72_spill] sm:$0xff] %v5762_v46  ;;  %v2491_v6 = vpop.f32.mrf.mxu0  ;;  %v479_v46 = vsub.s32 2, %v6257_v35 }
 0x1ff   : > { %6253 = vst [vmem:[#allocation73_spill] sm:$0xff] %v5765_v11  ;;  %v5767_v31 = vpop.f32.mrf.mxu1  ;;  %v5770_v51 = vadd.f32 %v2491_v6, %v5428_v7  ;;  %v483_v7 = vsub.s32 3, %v6257_v35 }
 0x200   : > { %v2493_v21 = vpop.f32.mrf.mxu0 }
 0x201   : > { %6254 = vst [vmem:[#allocation74_spill] sm:$0xff] %v5770_v51  ;;  %v5772_v19 = vpop.f32.mrf.mxu1  ;;  %v5775_v1 = vadd.f32 %v2493_v21, %v5431_v40  ;;  %v4275_v40 = vld [vmem:[%s6115_s2] sm:$0xf] }
 0x202   : > { %6255 = vst [vmem:[#allocation75_spill] sm:$0xff] %v5772_v19  ;;  %v2495_v22 = vpop.f32.mrf.mxu0  ;;  %v5794_v21 = vrot.slane %v4275_v40, %v479_v46 }
 0x203   : > { %6256 = vst [vmem:[#allocation76_spill] sm:$0xff] %v5775_v1  ;;  %v5777_v17 = vpop.f32.mrf.mxu1  ;;  %v5781_v23 = vadd.f32 %v2495_v22, %v6258_v41  ;;  %v5801_v1 = vrot.slane %v4275_v40, %v483_v7 }
 0x204   : > { %v2499_v0 = vpop.f32.mrf.mxu0 }
 0x205   : > { %6259 = vst [vmem:[#allocation2_spill] sm:$0xff] %v5781_v23  ;;  %v5783_v11 = vpop.f32.mrf.mxu1  ;;  %v5787_v6 = vadd.f32 %v2499_v0, %v5441_v8 }
 0x206   : > { %v2501_v51 = vpop.f32.mrf.mxu0 }
 0x207   : > { %6260 = vst [vmem:[#allocation31_spill] sm:$0xff] %v5787_v6  ;;  %v5789_v19 = vpop.f32.mrf.mxu1  ;;  %v5797_v41 = vadd.f32 %v2501_v51, %v5444_v10  ;;  %v2543_v6 = vadd.f32 %v5450_v58, %v5794_v21  ;;  %v2549_v58 = vadd.f32 %v5471_v16, %v5801_v1  ;;  %v2555_v16 = vadd.f32 %v5485_v36, %v5801_v1 }
 0x208   : > { %6261 = vst [vmem:[#allocation77_spill] sm:$0xff] %v5789_v19  ;;  %v2503_v22 = vpop.f32.mrf.mxu0  ;;  %v2553_v19 = vadd.f32 %v5476_v20, %v5794_v21 }
 0x209   : > { %6262 = vst [vmem:[#allocation78_spill] sm:$0xff] %v5797_v41  ;;  %v5799_v23 = vpop.f32.mrf.mxu1  ;;  %v5804_v8 = vadd.f32 %v2503_v22, %v5447_v52  ;;  %v2545_v41 = vadd.f32 %v5461_v49, %v5801_v1  ;;  %v2547_v52 = vadd.f32 %v5466_v24, %v5794_v21 }
 0x20a   : > { %6263 = vst [vmem:[#allocation79_spill] sm:$0xff] %v5799_v23  ;;  %v2505_v35 = vpop.f32.mrf.mxu0 }
 0x20b   : > { %6264 = vst [vmem:[#allocation80_spill] sm:$0xff] %v5804_v8  ;;  %v5806_v0 = vpop.f32.mrf.mxu1  ;;  %v5811_v46 = vadd.f32 %v2505_v35, %v5454_v63 }
 0x20c   : > { %6265 = vst [vmem:[#allocation81_spill] sm:$0xff] %v5806_v0  ;;  %v2735_v10 = vpop.f32.mrf.mxu0 }
 0x20d   : > { %6266 = vst [vmem:[#allocation82_spill] sm:$0xff] %v5811_v46  ;;  %v2928_v51 = vpop.f32.mrf.mxu1  ;;  %v2736_v7 = vadd.f32 %v2735_v10, %v2543_v6 }
 0x20e   : > { %v2737_v40 = vpop.f32.mrf.mxu0 }
 0x20f   : > { %v2930_v23 = vpop.f32.mrf.mxu1  ;;  %v2929_v22 = vadd.f32 %v2928_v51, %v2736_v7  ;;  %v2738_v8 = vadd.f32 %v2737_v40, %v2545_v41  ;;  %v2557_v40 = vadd.f32 %v5490_v47, %v5794_v21  ;;  %v2563_v47 = vadd.f32 %v5500_v4, %v5794_v21 }
 0x210   : > { %v2739_v0 = vpop.f32.mrf.mxu0  ;;  %v2567_v4 = vadd.f32 %v5514_v50, %v5794_v21  ;;  %v2573_v50 = vadd.f32 %v5524_v12, %v5794_v21  ;;  %v2577_v12 = vadd.f32 %v5538_v59, %v5794_v21  ;;  %v6273_v59 = vld [vmem:[#allocation39_spill] sm:$0xff] }
 0x211   : > { %v2932_v63 = vpop.f32.mrf.mxu1  ;;  %v3087_v35 = vmax.f32 %v5457_v37, %v2929_v22  ;;  %v2931_v46 = vadd.f32 %v2930_v23, %v2738_v8  ;;  %v2740_v49 = vadd.f32 %v2739_v0, %v2547_v52 }
 0x212   : > { %v2741_v6 = vpop.f32.mrf.mxu0 }
 0x213   : > { %v2934_v10 = vpop.f32.mrf.mxu1  ;;  %v3088_v24 = vmax.f32 %v5464_v3, %v2931_v46  ;;  %v2933_v41 = vadd.f32 %v2932_v63, %v2740_v49  ;;  %v2742_v51 = vadd.f32 %v2741_v6, %v2549_v58  ;;  %v2559_v63 = vadd.f32 %v5495_v42, %v5801_v1 }
 0x214   : > { %v2745_v23 = vpop.f32.mrf.mxu0 }
 0x215   : > { %v2938_v20 = vpop.f32.mrf.mxu1  ;;  %v3769_v8 = vpack.c.bf16 %v3088_v24, %v3087_v35  ;;  %v3089_v3 = vmax.f32 %v5469_v29, %v2933_v41  ;;  %v2935_v0 = vadd.f32 %v2934_v10, %v2742_v51  ;;  %v2746_v46 = vadd.f32 %v2745_v23, %v2553_v19 }
 0x216   : > { %v2747_v7 = vpop.f32.mrf.mxu0 }
 0x217   : > { %v2940_v36 = vpop.f32.mrf.mxu1  ;;  %3346 = vst.msk [vmem:[%s5829_s20] sm:$0xff] %vm5832_vm2, %v3769_v8  ;;  %v3090_v52 = vmax.f32 %v5474_v13, %v2935_v0  ;;  %v2939_v22 = vadd.f32 %v2938_v20, %v2746_v46  ;;  %v2748_v58 = vadd.f32 %v2747_v7, %v2555_v16  ;;  %v2565_v16 = vadd.f32 %v5509_v30, %v5801_v1 }
 0x218   : > { %v2749_v35 = vpop.f32.mrf.mxu0 }
 0x219   : > { %v2942_v29 = vpop.f32.mrf.mxu1  ;;  %v3770_v49 = vpack.c.bf16 %v3090_v52, %v3089_v3  ;;  %v3091_v19 = vmax.f32 %v5481_v57, %v2939_v22  ;;  %v2941_v6 = vadd.f32 %v2940_v36, %v2748_v58  ;;  %v2750_v10 = vadd.f32 %v2749_v35, %v2557_v40  ;;  %v6269_v58 = vld [vmem:[#allocation32_spill] sm:$0xff] }
 0x21a   : > { %v2751_v24 = vpop.f32.mrf.mxu0  ;;  %v2569_v40 = vadd.f32 %v5519_v25, %v5801_v1 }
 0x21b   : > { %v2944_v41 = vpop.f32.mrf.mxu1  ;;  %3347 = vst.msk [vmem:[%s5829_s20 + $0x8] sm:$0xff] %vm5832_vm2, %v3770_v49  ;;  %v3092_v13 = vmax.f32 %v5488_v14, %v2941_v6  ;;  %v2943_v51 = vadd.f32 %v2942_v29, %v2750_v10  ;;  %v2752_v42 = vadd.f32 %v2751_v24, %v2559_v63  ;;  %v2575_v10 = vadd.f32 %v5533_v34, %v5801_v1 }
 0x21c   : > { %v2755_v23 = vpop.f32.mrf.mxu0 }
 0x21d   : > { %v2948_v57 = vpop.f32.mrf.mxu1  ;;  %v3771_v20 = vpack.c.bf16 %v3092_v13, %v3091_v19  ;;  %v3093_v8 = vmax.f32 %v5493_v55, %v2943_v51  ;;  %v2945_v3 = vadd.f32 %v2944_v41, %v2752_v42  ;;  %v2756_v0 = vadd.f32 %v2755_v23, %v2563_v47  ;;  %v6270_v13 = vld [vmem:[#allocation33_spill] sm:$0xff] }
 0x21e   : > { %v2757_v46 = vpop.f32.mrf.mxu0 }
 0x21f   : > { %v2950_v7 = vpop.f32.mrf.mxu1  ;;  %3348 = vst.msk [vmem:[%s5829_s20 + $0x10] sm:$0xff] %vm5832_vm2, %v3771_v20  ;;  %v3094_v14 = vmax.f32 %v5498_v9, %v2945_v3  ;;  %v2949_v36 = vadd.f32 %v2948_v57, %v2756_v0  ;;  %v2758_v30 = vadd.f32 %v2757_v46, %v2565_v16  ;;  %v2579_v3 = vadd.f32 %v5543_v2, %v5801_v1 }
 0x220   : > { %v2759_v52 = vpop.f32.mrf.mxu0 }
 0x221   : > { %v2952_v55 = vpop.f32.mrf.mxu1  ;;  %v3772_v22 = vpack.c.bf16 %v3094_v14, %v3093_v8  ;;  %v3095_v63 = vmax.f32 %v6269_v58, %v2949_v36  ;;  %v2951_v35 = vadd.f32 %v2950_v7, %v2758_v30  ;;  %v2760_v29 = vadd.f32 %v2759_v52, %v2567_v4  ;;  %v6272_v4 = vld [vmem:[#allocation35_spill] sm:$0xff] }
 0x222   : > { %v2761_v49 = vpop.f32.mrf.mxu0 }
 0x223   : > { %v2954_v19 = vpop.f32.mrf.mxu1  ;;  %3349 = vst.msk [vmem:[%s5829_s20 + $0x18] sm:$0xff] %vm5832_vm2, %v3772_v22  ;;  %v3096_v9 = vmax.f32 %v5512_v62, %v2951_v35  ;;  %v2953_v6 = vadd.f32 %v2952_v55, %v2760_v29  ;;  %v2762_v25 = vadd.f32 %v2761_v49, %v2569_v40  ;;  %v6271_v62 = vld [vmem:[#allocation34_spill] sm:$0xff]  ;;  %v2583_v55 = vadd.f32 %v6273_v59, %v5794_v21  ;;  %v6274_v22 = vld [vmem:[#allocation36_spill] sm:$0xff] }
 0x224   : > { %v2765_v24 = vpop.f32.mrf.mxu0  ;;  %v6275_v35 = vld [vmem:[#allocation4_spill] sm:$0xff] }
 0x225   : > { %v2958_v41 = vpop.f32.mrf.mxu1  ;;  %v3773_v47 = vpack.c.bf16 %v3096_v9, %v3095_v63  ;;  %v3097_v51 = vmax.f32 %v6270_v13, %v2953_v6  ;;  %v2955_v42 = vadd.f32 %v2954_v19, %v2762_v25  ;;  %v2766_v16 = vadd.f32 %v2765_v24, %v2573_v50  ;;  %v6276_v9 = vld [vmem:[#allocation37_spill] sm:$0xff]  ;;  %v6277_v13 = vld [vmem:[#allocation38_spill] sm:$0xff] }
 0x226   : > { %v2767_v23 = vpop.f32.mrf.mxu0  ;;  %v2585_v29 = vadd.f32 %v6275_v35, %v5801_v1 }
 0x227   : > { %v2960_v57 = vpop.f32.mrf.mxu1  ;;  %3350 = vst.msk [vmem:[%s5829_s20 + $0x20] sm:$0xff] %vm5832_vm2, %v3773_v47  ;;  %v3098_v20 = vmax.f32 %v6271_v62, %v2955_v42  ;;  %v2959_v8 = vadd.f32 %v2958_v41, %v2766_v16  ;;  %v2768_v34 = vadd.f32 %v2767_v23, %v2575_v10  ;;  %v2587_v47 = vadd.f32 %v5562_v43, %v5794_v21  ;;  %v6279_v43 = vld [vmem:[#allocation41_spill] sm:$0xff] }
 0x228   : > { %v2769_v0 = vpop.f32.mrf.mxu0  ;;  %v2589_v23 = vadd.f32 %v5567_v61, %v5801_v1 }
 0x229   : > { %v2962_v46 = vpop.f32.mrf.mxu1  ;;  %v3774_v7 = vpack.c.bf16 %v3098_v20, %v3097_v51  ;;  %v3099_v14 = vmax.f32 %v6272_v4, %v2959_v8  ;;  %v2961_v36 = vadd.f32 %v2960_v57, %v2768_v34  ;;  %v2770_v30 = vadd.f32 %v2769_v0, %v2577_v12  ;;  %v6278_v20 = vld [vmem:[#allocation3_spill] sm:$0xff]  ;;  %v6280_v4 = vld [vmem:[#allocation6_spill] sm:$0xff] }
 0x22a   : > { %v2771_v40 = vpop.f32.mrf.mxu0 }
 0x22b   : > { %v2964_v52 = vpop.f32.mrf.mxu1  ;;  %3351 = vst.msk [vmem:[%s5829_s20 + $0x28] sm:$0xff] %vm5832_vm2, %v3774_v7  ;;  %v3100_v58 = vmax.f32 %v6274_v22, %v2961_v36  ;;  %v2963_v63 = vadd.f32 %v2962_v46, %v2770_v30  ;;  %v2772_v2 = vadd.f32 %v2771_v40, %v2579_v3  ;;  %v2593_v7 = vadd.f32 %v6279_v43, %v5794_v21  ;;  %v6281_v30 = vld [vmem:[#allocation7_spill] sm:$0xff]  ;;  %v6282_v22 = vld [vmem:[#allocation8_spill] sm:$0xff] }
 0x22c   : > { %v2775_v49 = vpop.f32.mrf.mxu0  ;;  %v2595_v40 = vadd.f32 %v6281_v30, %v5801_v1 }
 0x22d   : > { %v2968_v19 = vpop.f32.mrf.mxu1  ;;  %v3775_v50 = vpack.c.bf16 %v3100_v58, %v3099_v14  ;;  %v3101_v6 = vmax.f32 %v6276_v9, %v2963_v63  ;;  %v2965_v25 = vadd.f32 %v2964_v52, %v2772_v2  ;;  %v2776_v10 = vadd.f32 %v2775_v49, %v2583_v55 }
 0x22e   : > { %v2777_v24 = vpop.f32.mrf.mxu0  ;;  %v2597_v49 = vadd.f32 %v5586_v38, %v5794_v21  ;;  %v6286_v38 = vld [vmem:[#allocation44_spill] sm:$0xff] }
 0x22f   : > { %v2970_v41 = vpop.f32.mrf.mxu1  ;;  %3352 = vst.msk [vmem:[%s5829_s20 + $0x30] sm:$0xff] %vm5832_vm2, %v3775_v50  ;;  %v3102_v51 = vmax.f32 %v6277_v13, %v2965_v25  ;;  %v2969_v42 = vadd.f32 %v2968_v19, %v2776_v10  ;;  %v2778_v16 = vadd.f32 %v2777_v24, %v2585_v29  ;;  %v6283_v19 = vld [vmem:[#allocation40_spill] sm:$0xff]  ;;  %v6284_v25 = vld [vmem:[#allocation43_spill] sm:$0xff]  ;;  %v6285_v13 = vld [vmem:[#allocation5_spill] sm:$0xff] }
 0x230   : > { %v2779_v57 = vpop.f32.mrf.mxu0  ;;  %v2599_v10 = vadd.f32 %v6284_v25, %v5801_v1 }
 0x231   : > { %v2972_v12 = vpop.f32.mrf.mxu1  ;;  %v3776_v62 = vpack.c.bf16 %v3102_v51, %v3101_v6  ;;  %v3103_v8 = vmax.f32 %v6278_v20, %v2969_v42  ;;  %v2971_v34 = vadd.f32 %v2970_v41, %v2778_v16  ;;  %v2780_v3 = vadd.f32 %v2779_v57, %v2587_v47 }
 0x232   : > { %v2781_v0 = vpop.f32.mrf.mxu0 }
 0x233   : > { %v2974_v46 = vpop.f32.mrf.mxu1  ;;  %3353 = vst.msk [vmem:[%s5829_s20 + $0x38] sm:$0xff] %vm5832_vm2, %v3776_v62  ;;  %v3104_v14 = vmax.f32 %v6280_v4, %v2971_v34  ;;  %v2973_v36 = vadd.f32 %v2972_v12, %v2780_v3  ;;  %v2782_v61 = vadd.f32 %v2781_v0, %v2589_v23  ;;  %v2603_v12 = vadd.f32 %v6286_v38, %v5794_v21  ;;  %v6287_v62 = vld [vmem:[#allocation42_spill] sm:$0xff]  ;;  %v6289_v4 = vld [vmem:[#allocation11_spill] sm:$0xff] }
 0x234   : > { %v2785_v52 = vpop.f32.mrf.mxu0  ;;  %v6288_v3 = vld [vmem:[#allocation10_spill] sm:$0xff] }
 0x235   : > { %v2978_v59 = vpop.f32.mrf.mxu1  ;;  %v3777_v55 = vpack.c.bf16 %v3104_v14, %v3103_v8  ;;  %v3105_v58 = vmax.f32 %v6282_v22, %v2973_v36  ;;  %v2975_v63 = vadd.f32 %v2974_v46, %v2782_v61  ;;  %v2786_v2 = vadd.f32 %v2785_v52, %v2593_v7 }
 0x236   : > { %v2787_v35 = vpop.f32.mrf.mxu0  ;;  %v2605_v0 = vadd.f32 %v6288_v3, %v5801_v1  ;;  %v2607_v52 = vadd.f32 %v5610_v18, %v5794_v21  ;;  %v6292_v18 = vld [vmem:[#allocation45_spill] sm:$0xff] }
 0x237   : > { %v2980_v29 = vpop.f32.mrf.mxu1  ;;  %3354 = vst.msk [vmem:[%s5829_s20 + $0x40] sm:$0xff] %vm5832_vm2, %v3777_v55  ;;  %v3106_v50 = vmax.f32 %v6283_v19, %v2975_v63  ;;  %v2979_v9 = vadd.f32 %v2978_v59, %v2786_v2  ;;  %v2788_v6 = vadd.f32 %v2787_v35, %v2595_v40  ;;  %v6290_v59 = vld [vmem:[#allocation12_spill] sm:$0xff]  ;;  %v2609_v63 = vadd.f32 %v5615_v28, %v5801_v1 }
 0x238   : > { %v2789_v24 = vpop.f32.mrf.mxu0 }
 0x239   : > { %v2982_v41 = vpop.f32.mrf.mxu1  ;;  %v3778_v47 = vpack.c.bf16 %v3106_v50, %v3105_v58  ;;  %v3107_v51 = vmax.f32 %v6285_v13, %v2979_v9  ;;  %v2981_v42 = vadd.f32 %v2980_v29, %v2788_v6  ;;  %v2790_v16 = vadd.f32 %v2789_v24, %v2597_v49  ;;  %v6291_v49 = vld [vmem:[#allocation9_spill] sm:$0xff]  ;;  %v6293_v24 = vld [vmem:[#allocation14_spill] sm:$0xff] }
 0x23a   : > { %v2791_v23 = vpop.f32.mrf.mxu0  ;;  %v2615_v13 = vadd.f32 %v5627_v32, %v5801_v1 }
 0x23b   : > { %v2984_v57 = vpop.f32.mrf.mxu1  ;;  %3355 = vst.msk [vmem:[%s5829_s20 + $0x48] sm:$0xff] %vm5832_vm2, %v3778_v47  ;;  %v3108_v20 = vmax.f32 %v6287_v62, %v2981_v42  ;;  %v2983_v8 = vadd.f32 %v2982_v41, %v2790_v16  ;;  %v2792_v34 = vadd.f32 %v2791_v23, %v2599_v10  ;;  %v2613_v10 = vadd.f32 %v6292_v18, %v5794_v21  ;;  %v6294_v23 = vld [vmem:[#allocation15_spill] sm:$0xff] }
 0x23c   : > { %v2795_v46 = vpop.f32.mrf.mxu0 }
 0x23d   : > { %v2988_v43 = vpop.f32.mrf.mxu1  ;;  %v3779_v7 = vpack.c.bf16 %v3108_v20, %v3107_v51  ;;  %v3109_v14 = vmax.f32 %v6289_v4, %v2983_v8  ;;  %v2985_v36 = vadd.f32 %v2984_v57, %v2792_v34  ;;  %v2796_v61 = vadd.f32 %v2795_v46, %v2603_v12  ;;  %v6295_v34 = vld [vmem:[#allocation16_spill] sm:$0xff]  ;;  %v6296_v46 = vld [vmem:[#allocation47_spill] sm:$0xff] }
 0x23e   : > { %v2797_v30 = vpop.f32.mrf.mxu0  ;;  %v2617_v8 = vadd.f32 %v5632_v26, %v5794_v21  ;;  %v6298_v26 = vld [vmem:[#allocation48_spill] sm:$0xff] }
 0x23f   : > { %v2990_v40 = vpop.f32.mrf.mxu1  ;;  %3356 = vst.msk [vmem:[%s5829_s20 + $0x50] sm:$0xff] %vm5832_vm2, %v3779_v7  ;;  %v3110_v55 = vmax.f32 %v6290_v59, %v2985_v36  ;;  %v2989_v22 = vadd.f32 %v2988_v43, %v2796_v61  ;;  %v2798_v58 = vadd.f32 %v2797_v30, %v2605_v0  ;;  %v2619_v43 = vadd.f32 %v6296_v46, %v5801_v1  ;;  %v6297_v36 = vld [vmem:[#allocation13_spill] sm:$0xff] }
 0x240   : > { %v2799_v2 = vpop.f32.mrf.mxu0 }
 0x241   : > { %v2992_v35 = vpop.f32.mrf.mxu1  ;;  %v3780_v29 = vpack.c.bf16 %v3110_v55, %v3109_v14  ;;  %v3111_v19 = vmax.f32 %v6291_v49, %v2989_v22  ;;  %v2991_v50 = vadd.f32 %v2990_v40, %v2798_v58  ;;  %v2800_v9 = vadd.f32 %v2799_v2, %v2607_v52  ;;  %v6299_v22 = vld [vmem:[#allocation46_spill] sm:$0xff] }
 0x242   : > { %v2801_v6 = vpop.f32.mrf.mxu0  ;;  %v2623_v55 = vadd.f32 %v6298_v26, %v5794_v21  ;;  %v2637_v26 = vadd.f32 %v5672_v56, %v5794_v21  ;;  %v6310_v56 = vld [vmem:[#allocation56_spill] sm:$0xff] }
 0x243   : > { %v2994_v25 = vpop.f32.mrf.mxu1  ;;  %3357 = vst.msk [vmem:[%s5829_s20 + $0x58] sm:$0xff] %vm5832_vm2, %v3780_v29  ;;  %v3112_v41 = vmax.f32 %v6293_v24, %v2991_v50  ;;  %v2993_v47 = vadd.f32 %v2992_v35, %v2800_v9  ;;  %v2802_v28 = vadd.f32 %v2801_v6, %v2609_v63  ;;  %v2625_v35 = vadd.f32 %v5647_v33, %v5801_v1  ;;  %v6300_v50 = vld [vmem:[#allocation17_spill] sm:$0xff] }
 0x244   : > { %v2805_v51 = vpop.f32.mrf.mxu0  ;;  %v2627_v24 = vadd.f32 %v5652_v27, %v5794_v21  ;;  %v6304_v27 = vld [vmem:[#allocation52_spill] sm:$0xff] }
 0x245   : > { %v2998_v42 = vpop.f32.mrf.mxu1  ;;  %v3781_v16 = vpack.c.bf16 %v3112_v41, %v3111_v19  ;;  %v3113_v57 = vmax.f32 %v6294_v23, %v2993_v47  ;;  %v2995_v38 = vadd.f32 %v2994_v25, %v2802_v28  ;;  %v2806_v12 = vadd.f32 %v2805_v51, %v2613_v10  ;;  %v6301_v41 = vld [vmem:[#allocation18_spill] sm:$0xff] }
 0x246   : > { %v2807_v62 = vpop.f32.mrf.mxu0 }
 0x247   : > { %v3000_v20 = vpop.f32.mrf.mxu1  ;;  %3358 = vst.msk [vmem:[%s5829_s20 + $0x60] sm:$0xff] %vm5832_vm2, %v3781_v16  ;;  %v3114_v3 = vmax.f32 %v6295_v34, %v2995_v38  ;;  %v2999_v0 = vadd.f32 %v2998_v42, %v2806_v12  ;;  %v2808_v32 = vadd.f32 %v2807_v62, %v2615_v13  ;;  %v6302_v13 = vld [vmem:[#allocation51_spill] sm:$0xff]  ;;  %v2633_v34 = vadd.f32 %v6304_v27, %v5794_v21 }
 0x248   : > { %v2809_v7 = vpop.f32.mrf.mxu0  ;;  %v2629_v51 = vadd.f32 %v6302_v13, %v5801_v1 }
 0x249   : > { %v3002_v4 = vpop.f32.mrf.mxu1  ;;  %v3782_v14 = vpack.c.bf16 %v3114_v3, %v3113_v57  ;;  %v3115_v61 = vmax.f32 %v6297_v36, %v2999_v0  ;;  %v3001_v30 = vadd.f32 %v3000_v20, %v2808_v32  ;;  %v2810_v40 = vadd.f32 %v2809_v7, %v2617_v8  ;;  %v6303_v57 = vld [vmem:[#allocation49_spill] sm:$0xff]  ;;  %v6305_v3 = vld [vmem:[#allocation50_spill] sm:$0xff]  ;;  %v6306_v36 = vld [vmem:[#allocation19_spill] sm:$0xff] }
 0x24a   : > { %v2811_v52 = vpop.f32.mrf.mxu0 }
 0x24b   : > { %v3004_v59 = vpop.f32.mrf.mxu1  ;;  %3359 = vst.msk [vmem:[%s5829_s20 + $0x68] sm:$0xff] %vm5832_vm2, %v3782_v14  ;;  %v3116_v58 = vmax.f32 %v6299_v22, %v3001_v30  ;;  %v3003_v63 = vadd.f32 %v3002_v4, %v2810_v40  ;;  %v2812_v2 = vadd.f32 %v2811_v52, %v2619_v43  ;;  %v2635_v43 = vadd.f32 %v5667_v48, %v5801_v1 }
 0x24c   : > { %v2815_v29 = vpop.f32.mrf.mxu0 }
 0x24d   : > { %v3008_v49 = vpop.f32.mrf.mxu1  ;;  %v3783_v19 = vpack.c.bf16 %v3116_v58, %v3115_v61  ;;  %v3117_v9 = vmax.f32 %v6300_v50, %v3003_v63  ;;  %v3005_v6 = vadd.f32 %v3004_v59, %v2812_v2  ;;  %v2816_v25 = vadd.f32 %v2815_v29, %v2623_v55  ;;  %v6307_v55 = vld [vmem:[#allocation20_spill] sm:$0xff]  ;;  %v6308_v63 = vld [vmem:[#allocation55_spill] sm:$0xff] }
 0x24e   : > { %v2817_v18 = vpop.f32.mrf.mxu0  ;;  %v2639_v2 = vadd.f32 %v6308_v63, %v5801_v1 }
 0x24f   : > { %v3010_v10 = vpop.f32.mrf.mxu1  ;;  %3360 = vst.msk [vmem:[%s5829_s20 + $0x70] sm:$0xff] %vm5832_vm2, %v3783_v19  ;;  %v3118_v47 = vmax.f32 %v6301_v41, %v3005_v6  ;;  %v3009_v28 = vadd.f32 %v3008_v49, %v2816_v25  ;;  %v2818_v33 = vadd.f32 %v2817_v18, %v2625_v35  ;;  %v6309_v19 = vld [vmem:[#allocation53_spill] sm:$0xff] }
 0x250   : > { %v2819_v42 = vpop.f32.mrf.mxu0 }
 0x251   : > { %v3012_v16 = vpop.f32.mrf.mxu1  ;;  %v3784_v23 = vpack.c.bf16 %v3118_v47, %v3117_v9  ;;  %v3119_v38 = vmax.f32 %v6303_v57, %v3009_v28  ;;  %v3011_v12 = vadd.f32 %v3010_v10, %v2818_v33  ;;  %v2820_v62 = vadd.f32 %v2819_v42, %v2627_v24  ;;  %v6311_v24 = vld [vmem:[#allocation54_spill] sm:$0xff] }
 0x252   : > { %v2821_v20 = vpop.f32.mrf.mxu0  ;;  %v2643_v10 = vadd.f32 %v6310_v56, %v5794_v21  ;;  %v2645_v33 = vadd.f32 %v5687_v45, %v5801_v1  ;;  %v6320_v56 = vld [vmem:[#allocation63_spill] sm:$0xff] }
 0x253   : > { %v3014_v8 = vpop.f32.mrf.mxu1  ;;  %3361 = vst.msk [vmem:[%s5829_s20 + $0x78] sm:$0xff] %vm5832_vm2, %v3784_v23  ;;  %v3120_v0 = vmax.f32 %v6305_v3, %v3011_v12  ;;  %v3013_v32 = vadd.f32 %v3012_v16, %v2820_v62  ;;  %v2822_v46 = vadd.f32 %v2821_v20, %v2629_v51  ;;  %v6312_v16 = vld [vmem:[#allocation21_spill] sm:$0xff]  ;;  %v2647_v20 = vadd.f32 %v5692_v60, %v5794_v21  ;;  %v6314_v3 = vld [vmem:[#allocation59_spill] sm:$0xff]  ;;  %v6316_v60 = vld [vmem:[#allocation60_spill] sm:$0xff] }
 0x254   : > { %v2825_v7 = vpop.f32.mrf.mxu0 }
 0x255   : > { %v3018_v4 = vpop.f32.mrf.mxu1  ;;  %v3785_v14 = vpack.c.bf16 %v3120_v0, %v3119_v38  ;;  %v3121_v61 = vmax.f32 %v6306_v36, %v3013_v32  ;;  %v3015_v30 = vadd.f32 %v3014_v8, %v2822_v46  ;;  %v2826_v40 = vadd.f32 %v2825_v7, %v2633_v34  ;;  %v6313_v8 = vld [vmem:[#allocation22_spill] sm:$0xff]  ;;  %v6315_v7 = vld [vmem:[#allocation57_spill] sm:$0xff] }
 0x256   : > { %v2827_v52 = vpop.f32.mrf.mxu0  ;;  %v2649_v0 = vadd.f32 %v6314_v3, %v5801_v1 }
 0x257   : > { %v3020_v59 = vpop.f32.mrf.mxu1  ;;  %3362 = vst.msk [vmem:[%s5829_s20 + $0x80] sm:$0xff] %vm5832_vm2, %v3785_v14  ;;  %v3122_v22 = vmax.f32 %v6307_v55, %v3015_v30  ;;  %v3019_v58 = vadd.f32 %v3018_v4, %v2826_v40  ;;  %v2828_v48 = vadd.f32 %v2827_v52, %v2635_v43  ;;  %v2653_v40 = vadd.f32 %v6316_v60, %v5794_v21  ;;  %v6317_v52 = vld [vmem:[#allocation58_spill] sm:$0xff] }
 0x258   : > { %v2829_v35 = vpop.f32.mrf.mxu0 }
 0x259   : > { %v3022_v29 = vpop.f32.mrf.mxu1  ;;  %v3786_v49 = vpack.c.bf16 %v3122_v22, %v3121_v61  ;;  %v3123_v50 = vmax.f32 %v6309_v19, %v3019_v58  ;;  %v3021_v9 = vadd.f32 %v3020_v59, %v2828_v48  ;;  %v2830_v6 = vadd.f32 %v2829_v35, %v2637_v26 }
 0x25a   : > { %v2831_v25 = vpop.f32.mrf.mxu0  ;;  %v2655_v22 = vadd.f32 %v5707_v39, %v5801_v1 }
 0x25b   : > { %v3024_v18 = vpop.f32.mrf.mxu1  ;;  %3363 = vst.msk [vmem:[%s5829_s20 + $0x88] sm:$0xff] %vm5832_vm2, %v3786_v49  ;;  %v3124_v41 = vmax.f32 %v6311_v24, %v3021_v9  ;;  %v3023_v47 = vadd.f32 %v3022_v29, %v2830_v6  ;;  %v2832_v28 = vadd.f32 %v2831_v25, %v2639_v2  ;;  %v6318_v2 = vld [vmem:[#allocation23_spill] sm:$0xff]  ;;  %v2657_v9 = vadd.f32 %v5712_v44, %v5794_v21  ;;  %v6319_v6 = vld [vmem:[#allocation24_spill] sm:$0xff] }
 0x25c   : > { %v2835_v13 = vpop.f32.mrf.mxu0  ;;  %v6322_v44 = vld [vmem:[#allocation64_spill] sm:$0xff] }
 0x25d   : > { %v3028_v51 = vpop.f32.mrf.mxu1  ;;  %v3787_v42 = vpack.c.bf16 %v3124_v41, %v3123_v50  ;;  %v3125_v23 = vmax.f32 %v6312_v16, %v3023_v47  ;;  %v3025_v57 = vadd.f32 %v3024_v18, %v2832_v28  ;;  %v2836_v38 = vadd.f32 %v2835_v13, %v2643_v10  ;;  %v6321_v28 = vld [vmem:[#allocation61_spill] sm:$0xff] }
 0x25e   : > { %v2837_v12 = vpop.f32.mrf.mxu0  ;;  %v2659_v10 = vadd.f32 %v6320_v56, %v5801_v1 }
 0x25f   : > { %v3030_v62 = vpop.f32.mrf.mxu1  ;;  %3364 = vst.msk [vmem:[%s5829_s20 + $0x90] sm:$0xff] %vm5832_vm2, %v3787_v42  ;;  %v3126_v27 = vmax.f32 %v6313_v8, %v3025_v57  ;;  %v3029_v34 = vadd.f32 %v3028_v51, %v2836_v38  ;;  %v2838_v45 = vadd.f32 %v2837_v12, %v2645_v33  ;;  %v6323_v57 = vld [vmem:[#allocation62_spill] sm:$0xff] }
 0x260   : > { %v2839_v32 = vpop.f32.mrf.mxu0 }
 0x261   : > { %v3032_v46 = vpop.f32.mrf.mxu1  ;;  %v3788_v43 = vpack.c.bf16 %v3126_v27, %v3125_v23  ;;  %v3127_v4 = vmax.f32 %v6315_v7, %v3029_v34  ;;  %v3031_v14 = vadd.f32 %v3030_v62, %v2838_v45  ;;  %v2840_v36 = vadd.f32 %v2839_v32, %v2647_v20  ;;  %v6324_v45 = vld [vmem:[#allocation25_spill] sm:$0xff] }
 0x262   : > { %v2841_v61 = vpop.f32.mrf.mxu0  ;;  %v2663_v23 = vadd.f32 %v6322_v44, %v5794_v21  ;;  %v2665_v20 = vadd.f32 %v5727_v53, %v5801_v1  ;;  %v2667_v7 = vadd.f32 %v5732_v15, %v5794_v21  ;;  %v6328_v15 = vld [vmem:[#allocation68_spill] sm:$0xff] }
 0x263   : > { %v3034_v30 = vpop.f32.mrf.mxu1  ;;  %3365 = vst.msk [vmem:[%s5829_s20 + $0x98] sm:$0xff] %vm5832_vm2, %v3788_v43  ;;  %v3128_v59 = vmax.f32 %v6317_v52, %v3031_v14  ;;  %v3033_v26 = vadd.f32 %v3032_v46, %v2840_v36  ;;  %v2842_v55 = vadd.f32 %v2841_v61, %v2649_v0  ;;  %v6326_v61 = vld [vmem:[#allocation67_spill] sm:$0xff] }
 0x264   : > { %v2845_v58 = vpop.f32.mrf.mxu0 }
 0x265   : > { %v3038_v48 = vpop.f32.mrf.mxu1  ;;  %v3789_v63 = vpack.c.bf16 %v3128_v59, %v3127_v4  ;;  %v3129_v35 = vmax.f32 %v6318_v2, %v3033_v26  ;;  %v3035_v29 = vadd.f32 %v3034_v30, %v2842_v55  ;;  %v2846_v49 = vadd.f32 %v2845_v58, %v2653_v40  ;;  %v6325_v4 = vld [vmem:[#allocation26_spill] sm:$0xff]  ;;  %v6327_v59 = vld [vmem:[#allocation65_spill] sm:$0xff] }
 0x266   : > { %v2847_v19 = vpop.f32.mrf.mxu0  ;;  %v2669_v30 = vadd.f32 %v6326_v61, %v5801_v1  ;;  %v6329_v2 = vld [vmem:[#allocation66_spill] sm:$0xff] }
 0x267   : > { %v3040_v50 = vpop.f32.mrf.mxu1  ;;  %3366 = vst.msk [vmem:[%s5829_s20 + $0xa0] sm:$0xff] %vm5832_vm2, %v3789_v63  ;;  %v3130_v25 = vmax.f32 %v6319_v6, %v3035_v29  ;;  %v3039_v18 = vadd.f32 %v3038_v48, %v2846_v49  ;;  %v2848_v39 = vadd.f32 %v2847_v19, %v2655_v22  ;;  %v2673_v63 = vadd.f32 %v6328_v15, %v5794_v21 }
 0x268   : > { %v2849_v24 = vpop.f32.mrf.mxu0  ;;  %v2675_v19 = vadd.f32 %v5747_v5, %v5801_v1 }
 0x269   : > { %v3042_v41 = vpop.f32.mrf.mxu1  ;;  %v3790_v47 = vpack.c.bf16 %v3130_v25, %v3129_v35  ;;  %v3131_v33 = vmax.f32 %v6321_v28, %v3039_v18  ;;  %v3041_v13 = vadd.f32 %v3040_v50, %v2848_v39  ;;  %v2850_v51 = vadd.f32 %v2849_v24, %v2657_v9  ;;  %v6330_v25 = vld [vmem:[#allocation27_spill] sm:$0xff] }
 0x26a   : > { %v2851_v42 = vpop.f32.mrf.mxu0 }
 0x26b   : > { %v3044_v16 = vpop.f32.mrf.mxu1  ;;  %3367 = vst.msk [vmem:[%s5829_s20 + $0xa8] sm:$0xff] %vm5832_vm2, %v3790_v47  ;;  %v3132_v38 = vmax.f32 %v6323_v57, %v3041_v13  ;;  %v3043_v12 = vadd.f32 %v3042_v41, %v2850_v51  ;;  %v2852_v62 = vadd.f32 %v2851_v42, %v2659_v10  ;;  %v2677_v41 = vadd.f32 %v5752_v54, %v5794_v21  ;;  %v6331_v47 = vld [vmem:[#allocation28_spill] sm:$0xff]  ;;  %v6332_v13 = vld [vmem:[#allocation71_spill] sm:$0xff] }
 0x26c   : > { %v2855_v8 = vpop.f32.mrf.mxu0  ;;  %v2679_v51 = vadd.f32 %v6332_v13, %v5801_v1  ;;  %v6334_v54 = vld [vmem:[#allocation72_spill] sm:$0xff]  ;;  %v6344_v13 = vld [vmem:[#allocation2_spill] sm:$0xff] }
 0x26d   : > { %v3048_v27 = vpop.f32.mrf.mxu1  ;;  %v3791_v34 = vpack.c.bf16 %v3132_v38, %v3131_v33  ;;  %v3133_v3 = vmax.f32 %v6324_v45, %v3043_v12  ;;  %v3045_v0 = vadd.f32 %v3044_v16, %v2852_v62  ;;  %v2856_v32 = vadd.f32 %v2855_v8, %v2663_v23  ;;  %v6333_v23 = vld [vmem:[#allocation69_spill] sm:$0xff] }
 0x26e   : > { %v2857_v46 = vpop.f32.mrf.mxu0  ;;  %v2683_v8 = vadd.f32 %v6334_v54, %v5794_v21 }
 0x26f   : > { %v3050_v43 = vpop.f32.mrf.mxu1  ;;  %3368 = vst.msk [vmem:[%s5829_s20 + $0xb0] sm:$0xff] %vm5832_vm2, %v3791_v34  ;;  %v3134_v14 = vmax.f32 %v6325_v4, %v3045_v0  ;;  %v3049_v36 = vadd.f32 %v3048_v27, %v2856_v32  ;;  %v2858_v53 = vadd.f32 %v2857_v46, %v2665_v20  ;;  %v6335_v27 = vld [vmem:[#allocation70_spill] sm:$0xff]  ;;  %v2685_v0 = vadd.f32 %v5767_v31, %v5801_v1 }
 0x270   : > { %v2859_v60 = vpop.f32.mrf.mxu0 }
 0x271   : > { %v3052_v40 = vpop.f32.mrf.mxu1  ;;  %v3792_v52 = vpack.c.bf16 %v3134_v14, %v3133_v3  ;;  %v3135_v26 = vmax.f32 %v6327_v59, %v3049_v36  ;;  %v3051_v55 = vadd.f32 %v3050_v43, %v2858_v53  ;;  %v2860_v22 = vadd.f32 %v2859_v60, %v2667_v7  ;;  %v6336_v7 = vld [vmem:[#allocation29_spill] sm:$0xff] }
 0x272   : > { %v2861_v58 = vpop.f32.mrf.mxu0 }
 0x273   : > { %v3054_v48 = vpop.f32.mrf.mxu1  ;;  %3369 = vst.msk [vmem:[%s5829_s20 + $0xb8] sm:$0xff] %vm5832_vm2, %v3792_v52  ;;  %v3136_v35 = vmax.f32 %v6329_v2, %v3051_v55  ;;  %v3053_v29 = vadd.f32 %v3052_v40, %v2860_v22  ;;  %v2862_v49 = vadd.f32 %v2861_v58, %v2669_v30  ;;  %v6337_v30 = vld [vmem:[#allocation75_spill] sm:$0xff]  ;;  %v6338_v40 = vld [vmem:[#allocation30_spill] sm:$0xff] }
 0x274   : > { %v2865_v50 = vpop.f32.mrf.mxu0  ;;  %v2687_v60 = vadd.f32 %v6337_v30, %v5794_v21 }
 0x275   : > { %v3058_v9 = vpop.f32.mrf.mxu1  ;;  %v3793_v6 = vpack.c.bf16 %v3136_v35, %v3135_v26  ;;  %v3137_v18 = vmax.f32 %v6330_v25, %v3053_v29  ;;  %v3055_v39 = vadd.f32 %v3054_v48, %v2862_v49  ;;  %v2866_v56 = vadd.f32 %v2865_v50, %v2673_v63  ;;  %v6339_v48 = vld [vmem:[#allocation73_spill] sm:$0xff] }
 0x276   : > { %v2867_v10 = vpop.f32.mrf.mxu0  ;;  %v2689_v26 = vadd.f32 %v5777_v17, %v5801_v1  ;;  %v2693_v49 = vadd.f32 %v5783_v11, %v5794_v21 }
 0x277   : > { %v3060_v24 = vpop.f32.mrf.mxu1  ;;  %3370 = vst.msk [vmem:[%s5829_s20 + $0xc0] sm:$0xff] %vm5832_vm2, %v3793_v6  ;;  %v3138_v28 = vmax.f32 %v6331_v47, %v3055_v39  ;;  %v3059_v33 = vadd.f32 %v3058_v9, %v2866_v56  ;;  %v2868_v5 = vadd.f32 %v2867_v10, %v2675_v19  ;;  %v6340_v19 = vld [vmem:[#allocation74_spill] sm:$0xff]  ;;  %v6341_v6 = vld [vmem:[#allocation77_spill] sm:$0xff]  ;;  %v6342_v10 = vld [vmem:[#allocation76_spill] sm:$0xff] }
 0x278   : > { %v2869_v42 = vpop.f32.mrf.mxu0  ;;  %v2695_v25 = vadd.f32 %v6341_v6, %v5801_v1 }
 0x279   : > { %v3062_v16 = vpop.f32.mrf.mxu1  ;;  %v3794_v44 = vpack.c.bf16 %v3138_v28, %v3137_v18  ;;  %v3139_v57 = vmax.f32 %v6333_v23, %v3059_v33  ;;  %v3061_v38 = vadd.f32 %v3060_v24, %v2868_v5  ;;  %v2870_v12 = vadd.f32 %v2869_v42, %v2677_v41  ;;  %v6343_v33 = vld [vmem:[#allocation79_spill] sm:$0xff] }
 0x27a   : > { %v2871_v62 = vpop.f32.mrf.mxu0  ;;  %v2697_v5 = vadd.f32 %v6343_v33, %v5794_v21 }
 0x27b   : > { %v3064_v20 = vpop.f32.mrf.mxu1  ;;  %3371 = vst.msk [vmem:[%s5829_s20 + $0xc8] sm:$0xff] %vm5832_vm2, %v3794_v44  ;;  %v3140_v34 = vmax.f32 %v6335_v27, %v3061_v38  ;;  %v3063_v45 = vadd.f32 %v3062_v16, %v2870_v12  ;;  %v2872_v3 = vadd.f32 %v2871_v62, %v2679_v51  ;;  %v6345_v44 = vld [vmem:[#allocation81_spill] sm:$0xff]  ;;  %v6346_v62 = vld [vmem:[#allocation31_spill] sm:$0xff]  ;;  %v6347_v27 = vld [vmem:[#allocation78_spill] sm:$0xff] }
 0x27c   : > { %v2875_v32 = vpop.f32.mrf.mxu0  ;;  %v2699_v23 = vadd.f32 %v6345_v44, %v5801_v1  ;;  %v6348_v1 = vld [vmem:[#allocation80_spill] sm:$0xff] }
 0x27d   : > { %v3068_v46 = vpop.f32.mrf.mxu1  ;;  %v3795_v43 = vpack.c.bf16 %v3140_v34, %v3139_v57  ;;  %v3141_v4 = vmax.f32 %v6336_v7, %v3063_v45  ;;  %v3065_v14 = vadd.f32 %v3064_v20, %v2872_v3  ;;  %v2876_v36 = vadd.f32 %v2875_v32, %v2683_v8  ;;  %v6349_v7 = vld [vmem:[#allocation82_spill] sm:$0xff] }
 0x27e   : > { %v2877_v53 = vpop.f32.mrf.mxu0 }
 0x27f   : > { %v3070_v61 = vpop.f32.mrf.mxu1  ;;  %3372 = vst.msk [vmem:[%s5829_s20 + $0xd0] sm:$0xff] %vm5832_vm2, %v3795_v43  ;;  %v3142_v52 = vmax.f32 %v6338_v40, %v3065_v14  ;;  %v3069_v59 = vadd.f32 %v3068_v46, %v2876_v36  ;;  %v2878_v31 = vadd.f32 %v2877_v53, %v2685_v0 }
 0x280   : > { %v2879_v55 = vpop.f32.mrf.mxu0 }
 0x281   : > { %v3072_v22 = vpop.f32.mrf.mxu1  ;;  %v3796_v58 = vpack.c.bf16 %v3142_v52, %v3141_v4  ;;  %v3143_v15 = vmax.f32 %v6339_v48, %v3069_v59  ;;  %v3071_v63 = vadd.f32 %v3070_v61, %v2878_v31  ;;  %v2880_v2 = vadd.f32 %v2879_v55, %v2687_v60 }
 0x282   : > { %v2881_v35 = vpop.f32.mrf.mxu0 }
 0x283   : > { %v3074_v29 = vpop.f32.mrf.mxu1  ;;  %3373 = vst.msk [vmem:[%s5829_s20 + $0xd8] sm:$0xff] %vm5832_vm2, %v3796_v58  ;;  %v3144_v50 = vmax.f32 %v6340_v19, %v3071_v63  ;;  %v3073_v9 = vadd.f32 %v3072_v22, %v2880_v2  ;;  %v2882_v17 = vadd.f32 %v2881_v35, %v2689_v26 }
 0x284   : > { %v2885_v18 = vpop.f32.mrf.mxu0 }
 0x285   : > { %v3078_v39 = vpop.f32.mrf.mxu1  ;;  %v3797_v56 = vpack.c.bf16 %v3144_v50, %v3143_v15  ;;  %v3145_v24 = vmax.f32 %v6342_v10, %v3073_v9  ;;  %v3075_v41 = vadd.f32 %v3074_v29, %v2882_v17  ;;  %v2886_v47 = vadd.f32 %v2885_v18, %v2693_v49 }
 0x286   : > { %v2887_v28 = vpop.f32.mrf.mxu0 }
 0x287   : > { %v3080_v11 = vpop.f32.mrf.mxu1  ;;  %3374 = vst.msk [vmem:[%s5829_s20 + $0xe0] sm:$0xff] %vm5832_vm2, %v3797_v56  ;;  %v3146_v51 = vmax.f32 %v6344_v13, %v3075_v41  ;;  %v3079_v42 = vadd.f32 %v3078_v39, %v2886_v47  ;;  %v2888_v16 = vadd.f32 %v2887_v28, %v2695_v25 }
 0x288   : > { %v2889_v57 = vpop.f32.mrf.mxu0 }
 0x289   : > { %v3082_v38 = vpop.f32.mrf.mxu1  ;;  %v3798_v12 = vpack.c.bf16 %v3146_v51, %v3145_v24  ;;  %v3147_v20 = vmax.f32 %v6346_v62, %v3079_v42  ;;  %v3081_v54 = vadd.f32 %v3080_v11, %v2888_v16  ;;  %v2890_v8 = vadd.f32 %v2889_v57, %v2697_v5 }
 0x28a   : > { %v2891_v21 = vpop.f32.mrf.mxu0 }
 0x28b   : > { %3375 = vst.msk [vmem:[%s5829_s20 + $0xe8] sm:$0xff] %vm5832_vm2, %v3798_v12  ;;  %v3148_v34 = vmax.f32 %v6347_v27, %v3081_v54  ;;  %v3083_v45 = vadd.f32 %v3082_v38, %v2890_v8  ;;  %v2892_v3 = vadd.f32 %v2891_v21, %v2699_v23  ;;  %v3084_v0 = vpop.f32.mrf.mxu1 }
 0x28d   : > { %v3799_v32 = vpack.c.bf16 %v3148_v34, %v3147_v20  ;;  %v3149_v46 = vmax.f32 %v6348_v1, %v3083_v45  ;;  %v3085_v43 = vadd.f32 %v3084_v0, %v2892_v3 }
 0x28f   : > { %3376 = vst.msk [vmem:[%s5829_s20 + $0xf0] sm:$0xff] %vm5832_vm2, %v3799_v32  ;;  %v3150_v4 = vmax.f32 %v6349_v7, %v3085_v43 }
 0x291   : > { %v3800_v14 = vpack.c.bf16 %v3150_v4, %v3149_v46 }
 0x293   : > { %3377 = vst.msk [vmem:[%s5829_s20 + $0xf8] sm:$0xff] %vm5832_vm2, %v3800_v14 }
 0x294 PF: > { %s13_s12 = sadd.s32 1, %s4282_s12  }
 0x295   : > { %p10_p4 = scmp.ge.s32.totalorder %s13_s12, 6  }
 0x297   :  { %12 = sbr.rel (!%p10_p4) target bundleno = 1 (0x1), region = 62 }

// kernel: two_path_cnn_forward.6
= control target key start
LH: loop header
LB: loop body
LE: loop exit
PB: predicated region body
PF: predicated region fallthrough
CT: control target
= control target key end

     0   :  { %s1414_s12 = smov 0   ;;  %s1654_s0 = inlined_call_operand.vmem [shape: bf16[1536,256], index: 0, kind: input, shape index: {}]   ;;  %s1655_s1 = inlined_call_operand.vmem [shape: bf16[256,256], index: 1, kind: input, shape index: {}]   ;;  %s1656_s2 = inlined_call_operand.vmem [shape: f32[1,256], index: 2, kind: input, shape index: {}]   ;;  %s1657_s3 = inlined_call_operand.vmem [shape: bf16[1536,128], index: 3, kind: output, shape index: {}]  }
   0x1 LB: > { %s1014_s13 = sadd.s32 4294967295, %s1392_s12   ;;  %p1018_p0 = scmp.ge.s32.totalorder %s1392_s12, 1  ;;  %s1392_s12 = sphi %s1414_s12, %s13_s12  }
   0x2   : > { %p139_p1 = scmp.lt.s32.totalorder %s1392_s12, 7 }
   0x4   : > { %p140_p2 = pnand %p1018_p0, %p139_p1 }
   0x5   : > { %s1019_s24 = sshll.u32 (!%p140_p2), %s1014_s13, 5 }
   0x6   : > { %143 = sbr.rel (%p140_p2) target bundleno = 338 (0x152), region = 32  ;;  %p165_p3 = scmp.lt.s32.totalorder (!%p140_p2), %s1019_s24, 191 }
   0xb   : > { %v1290_v0 = vld [vmem:[%s1655_s1 + $0x74] ss:$8 sps:$4 sm:$0xff]   ;;  %v1292_v1 = vld [vmem:[%s1655_s1 + $0x70] ss:$8 sps:$4 sm:$0xff]   ;;  %v1293_v2 = vld [vmem:[%s1655_s1 + $0x64] ss:$8 sps:$4 sm:$0xff]  }
   0xc   : > { %573 = vmatprep.subr.bf16.mxu0 %v1290_v0  ;;  %1250 = vmatprep.subr.bf16.mxu1 %v1290_v0  ;;  %v1295_v3 = vld [vmem:[%s1655_s1 + $0x60] ss:$8 sps:$4 sm:$0xff]   ;;  %v1296_v4 = vld [vmem:[%s1655_s1 + $0x54] ss:$8 sps:$4 sm:$0xff]   ;;  %v1298_v5 = vld [vmem:[%s1655_s1 + $0x50] ss:$8 sps:$4 sm:$0xff]   ;;  %v243_v0 = vlaneseq }
   0xd   : > { %574 = vmatpush1.bf16.msra.mxu0 %v1292_v1  ;;  %1266 = vmatpush1.bf16.msra.mxu1 %v1292_v1  ;;  %v1299_v6 = vld [vmem:[%s1655_s1 + $0x44] ss:$8 sps:$4 sm:$0xff]   ;;  %v1301_v7 = vld [vmem:[%s1655_s1 + $0x40] ss:$8 sps:$4 sm:$0xff]   ;;  %v1302_v8 = vld [vmem:[%s1655_s1 + $0x34] ss:$8 sps:$4 sm:$0xff]  }
   0xe   : > { %575 = vmatprep.subr.bf16.mxu0 %v1293_v2  ;;  %1251 = vmatprep.subr.bf16.mxu1 %v1293_v2  ;;  %s1659_s24 = smov (!%p165_p3, %s1019_s24), 191  ;;  %v1304_v9 = vld [vmem:[%s1655_s1 + $0x30] ss:$8 sps:$4 sm:$0xff]   ;;  %v1305_v10 = vld [vmem:[%s1655_s1 + $0x24] ss:$8 sps:$4 sm:$0xff]   ;;  %v244_v1 = vshrl.u32 %v243_v0, 7 }
   0xf   : > { %s1122_s10 = sshll.u32 %s1659_s24, 3  ;;  %v1307_v11 = vld [vmem:[%s1655_s1 + $0x20] ss:$8 sps:$4 sm:$0xff]   ;;  %v1308_v12 = vld [vmem:[%s1655_s1 + $0x14] ss:$8 sps:$4 sm:$0xff]  }
  0x10   : > { %s1464_s16 = scalar_lea.vmem %s1654_s0, %s1122_s10  ;;  %v1310_v14 = vld [vmem:[%s1655_s1 + $0x10] ss:$8 sps:$4 sm:$0xff]   ;;  %v1311_v16 = vld [vmem:[%s1655_s1 + $0x4] ss:$8 sps:$4 sm:$0xff]   ;;  %v1313_v17 = vld [vmem:[%s1655_s1] ss:$8 sps:$4 sm:$0xff]  }
  0x11   : > { %576 = vmatpush1.bf16.msra.mxu0 %v1295_v3  ;;  %1267 = vmatpush1.bf16.msra.mxu1 %v1295_v3  ;;  %v1340_v13 = vld [vmem:[%s1464_s16 + $0x4] ss:$8 sps:$4 sm:$0xff]   ;;  %v1314_v18 = vld [vmem:[%s1655_s1 + $0xf4] ss:$8 sps:$4 sm:$0xff]   ;;  %v1316_v19 = vld [vmem:[%s1655_s1 + $0xf0] ss:$8 sps:$4 sm:$0xff]  }
  0x12   : > { %577 = vmatprep.subr.bf16.mxu0 %v1296_v4  ;;  %1252 = vmatprep.subr.bf16.mxu1 %v1296_v4  ;;  %v1343_v15 = vld [vmem:[%s1464_s16 + $0x84] ss:$8 sps:$4 sm:$0xff]   ;;  %v1319_v21 = vld [vmem:[%s1655_s1 + $0xe0] ss:$8 sps:$4 sm:$0xff]   ;;  %v1320_v22 = vld [vmem:[%s1655_s1 + $0xd4] ss:$8 sps:$4 sm:$0xff]  }
  0x13   : > { %605 = vmatprep.mubr.bf16.mxu0 %v1340_v13  ;;  %685 = vmatprep.mubr.bf16.mxu1 %v1343_v15  ;;  %v1317_v20 = vld [vmem:[%s1655_s1 + $0xe4] ss:$8 sps:$4 sm:$0xff]   ;;  %v1322_v23 = vld [vmem:[%s1655_s1 + $0xd0] ss:$8 sps:$4 sm:$0xff]   ;;  %v1325_v25 = vld [vmem:[%s1655_s1 + $0xc0] ss:$8 sps:$4 sm:$0xff]  }
  0x14   : > { %v1323_v24 = vld [vmem:[%s1655_s1 + $0xc4] ss:$8 sps:$4 sm:$0xff]   ;;  %v1326_v26 = vld [vmem:[%s1655_s1 + $0xb4] ss:$8 sps:$4 sm:$0xff]   ;;  %v1328_v27 = vld [vmem:[%s1655_s1 + $0xb0] ss:$8 sps:$4 sm:$0xff]  }
  0x15   : > { %578 = vmatpush1.bf16.msra.mxu0 %v1298_v5  ;;  %1268 = vmatpush1.bf16.msra.mxu1 %v1298_v5  ;;  %v1329_v28 = vld [vmem:[%s1655_s1 + $0xa4] ss:$8 sps:$4 sm:$0xff]   ;;  %v1331_v29 = vld [vmem:[%s1655_s1 + $0xa0] ss:$8 sps:$4 sm:$0xff]   ;;  %v1332_v30 = vld [vmem:[%s1655_s1 + $0x94] ss:$8 sps:$4 sm:$0xff]  }
  0x16   : > { %579 = vmatprep.subr.bf16.mxu0 %v1299_v6  ;;  %1253 = vmatprep.subr.bf16.mxu1 %v1299_v6  ;;  %v1334_v31 = vld [vmem:[%s1655_s1 + $0x90] ss:$8 sps:$4 sm:$0xff]   ;;  %v1335_v32 = vld [vmem:[%s1655_s1 + $0x84] ss:$8 sps:$4 sm:$0xff]   ;;  %v1337_v33 = vld [vmem:[%s1655_s1 + $0x80] ss:$8 sps:$4 sm:$0xff]  }
  0x17   : > { %v1338_v34 = vld [vmem:[%s1464_s16] ss:$8 sps:$4 sm:$0xff]   ;;  %v1344_v36 = vld [vmem:[%s1464_s16 + $0x14] ss:$8 sps:$4 sm:$0xff]   ;;  %v1348_v38 = vld [vmem:[%s1464_s16 + $0x10] ss:$8 sps:$4 sm:$0xff]  }
  0x18   : > { %v1341_v35 = vld [vmem:[%s1464_s16 + $0x80] ss:$8 sps:$4 sm:$0xff]   ;;  %v1346_v37 = vld [vmem:[%s1464_s16 + $0x94] ss:$8 sps:$4 sm:$0xff]   ;;  %v1349_v39 = vld [vmem:[%s1464_s16 + $0x90] ss:$8 sps:$4 sm:$0xff]  }
  0x19   : > { %580 = vmatpush1.bf16.msra.mxu0 %v1301_v7  ;;  %1269 = vmatpush1.bf16.msra.mxu1 %v1301_v7  ;;  %v1350_v40 = vld [vmem:[%s1464_s16 + $0x24] ss:$8 sps:$4 sm:$0xff]   ;;  %v1354_v42 = vld [vmem:[%s1464_s16 + $0x20] ss:$8 sps:$4 sm:$0xff]   ;;  %v1356_v44 = vld [vmem:[%s1464_s16 + $0x34] ss:$8 sps:$4 sm:$0xff]  }
  0x1a   : > { %581 = vmatprep.subr.bf16.mxu0 %v1302_v8  ;;  %1254 = vmatprep.subr.bf16.mxu1 %v1302_v8  ;;  %v1352_v41 = vld [vmem:[%s1464_s16 + $0xa4] ss:$8 sps:$4 sm:$0xff]   ;;  %v1355_v43 = vld [vmem:[%s1464_s16 + $0xa0] ss:$8 sps:$4 sm:$0xff]   ;;  %v1358_v45 = vld [vmem:[%s1464_s16 + $0xb4] ss:$8 sps:$4 sm:$0xff]  }
  0x1b   : > { %v1360_v46 = vld [vmem:[%s1464_s16 + $0x30] ss:$8 sps:$4 sm:$0xff]   ;;  %v1362_v48 = vld [vmem:[%s1464_s16 + $0x44] ss:$8 sps:$4 sm:$0xff]   ;;  %v1366_v50 = vld [vmem:[%s1464_s16 + $0x40] ss:$8 sps:$4 sm:$0xff]  }
  0x1c   : > { %v1361_v47 = vld [vmem:[%s1464_s16 + $0xb0] ss:$8 sps:$4 sm:$0xff]   ;;  %v1364_v49 = vld [vmem:[%s1464_s16 + $0xc4] ss:$8 sps:$4 sm:$0xff]   ;;  %v1367_v51 = vld [vmem:[%s1464_s16 + $0xc0] ss:$8 sps:$4 sm:$0xff]  }
  0x1d   : > { %582 = vmatpush1.bf16.msra.mxu0 %v1304_v9  ;;  %1270 = vmatpush1.bf16.msra.mxu1 %v1304_v9  ;;  %v1368_v52 = vld [vmem:[%s1464_s16 + $0x54] ss:$8 sps:$4 sm:$0xff]   ;;  %v1372_v54 = vld [vmem:[%s1464_s16 + $0x50] ss:$8 sps:$4 sm:$0xff]   ;;  %v1374_v56 = vld [vmem:[%s1464_s16 + $0x64] ss:$8 sps:$4 sm:$0xff]  }
  0x1e   : > { %583 = vmatprep.subr.bf16.mxu0 %v1305_v10  ;;  %1255 = vmatprep.subr.bf16.mxu1 %v1305_v10  ;;  %v1370_v53 = vld [vmem:[%s1464_s16 + $0xd4] ss:$8 sps:$4 sm:$0xff]   ;;  %v1373_v55 = vld [vmem:[%s1464_s16 + $0xd0] ss:$8 sps:$4 sm:$0xff]   ;;  %v1376_v57 = vld [vmem:[%s1464_s16 + $0xe4] ss:$8 sps:$4 sm:$0xff]  }
  0x1f   : > { %v1378_v58 = vld [vmem:[%s1464_s16 + $0x60] ss:$8 sps:$4 sm:$0xff]   ;;  %v1380_v60 = vld [vmem:[%s1464_s16 + $0x74] ss:$8 sps:$4 sm:$0xff]   ;;  %v1384_v62 = vld [vmem:[%s1464_s16 + $0x70] ss:$8 sps:$4 sm:$0xff]  }
  0x20   : > { %v1379_v59 = vld [vmem:[%s1464_s16 + $0xe0] ss:$8 sps:$4 sm:$0xff]   ;;  %v1382_v61 = vld [vmem:[%s1464_s16 + $0xf4] ss:$8 sps:$4 sm:$0xff]   ;;  %v1385_v63 = vld [vmem:[%s1464_s16 + $0xf0] ss:$8 sps:$4 sm:$0xff]  }
  0x21   : > { %584 = vmatpush1.bf16.msra.mxu0 %v1307_v11  ;;  %1271 = vmatpush1.bf16.msra.mxu1 %v1307_v11  ;;  %v249_v2 = vsub.s32 1, %v244_v1  ;;  %v245_v3 = vsub.s32 0, %v244_v1  ;;  %v241_v4 = vld [vmem:[%s1656_s2] sm:$0x3]  ;;  %s1023_s16 = sshll.u32 %s1659_s24, 2 }
  0x22   : > { %585 = vmatprep.subr.bf16.mxu0 %v1308_v12  ;;  %1256 = vmatprep.subr.bf16.mxu1 %v1308_v12  ;;  %s1577_s11 = scalar_lea.vmem %s1657_s3, %s1023_s16 }
  0x23   : > { %v1561_v7 = vrot.slane %v241_v4, %v249_v2  ;;  %v1563_v8 = vrot.slane %v241_v4, %v245_v3 }
  0x25   : > { %586 = vmatpush1.bf16.msra.mxu0 %v1310_v14  ;;  %1272 = vmatpush1.bf16.msra.mxu1 %v1310_v14 }
  0x26   : > { %587 = vmatprep.subr.bf16.mxu0 %v1311_v16  ;;  %1257 = vmatprep.subr.bf16.mxu1 %v1311_v16 }
  0x29   : > { %588 = vmatpush1.bf16.msra.mxu0 %v1313_v17  ;;  %1273 = vmatpush1.bf16.msra.mxu1 %v1313_v17 }
  0x2a   : > { %589 = vmatprep.subr.bf16.mxu0 %v1314_v18  ;;  %1258 = vmatprep.subr.bf16.mxu1 %v1314_v18 }
  0x2d   : > { %590 = vmatpush2.bf16.msra.mxu0 %v1316_v19  ;;  %1274 = vmatpush2.bf16.msra.mxu1 %v1316_v19 }
  0x2e   : > { %591 = vmatprep.subr.bf16.mxu0 %v1317_v20  ;;  %1259 = vmatprep.subr.bf16.mxu1 %v1317_v20 }
  0x31   : > { %592 = vmatpush2.bf16.msra.mxu0 %v1319_v21  ;;  %1275 = vmatpush2.bf16.msra.mxu1 %v1319_v21 }
  0x32   : > { %593 = vmatprep.subr.bf16.mxu0 %v1320_v22  ;;  %1260 = vmatprep.subr.bf16.mxu1 %v1320_v22 }
  0x35   : > { %594 = vmatpush2.bf16.msra.mxu0 %v1322_v23  ;;  %1276 = vmatpush2.bf16.msra.mxu1 %v1322_v23 }
  0x36   : > { %595 = vmatprep.subr.bf16.mxu0 %v1323_v24  ;;  %1261 = vmatprep.subr.bf16.mxu1 %v1323_v24 }
  0x39   : > { %596 = vmatpush2.bf16.msra.mxu0 %v1325_v25  ;;  %1277 = vmatpush2.bf16.msra.mxu1 %v1325_v25 }
  0x3a   : > { %597 = vmatprep.subr.bf16.mxu0 %v1326_v26  ;;  %1262 = vmatprep.subr.bf16.mxu1 %v1326_v26 }
  0x3d   : > { %598 = vmatpush2.bf16.msra.mxu0 %v1328_v27  ;;  %1278 = vmatpush2.bf16.msra.mxu1 %v1328_v27 }
  0x3e   : > { %599 = vmatprep.subr.bf16.mxu0 %v1329_v28  ;;  %1263 = vmatprep.subr.bf16.mxu1 %v1329_v28 }
  0x41   : > { %600 = vmatpush2.bf16.msra.mxu0 %v1331_v29  ;;  %1279 = vmatpush2.bf16.msra.mxu1 %v1331_v29 }
  0x42   : > { %601 = vmatprep.subr.bf16.mxu0 %v1332_v30  ;;  %1264 = vmatprep.subr.bf16.mxu1 %v1332_v30 }
  0x45   : > { %602 = vmatpush2.bf16.msra.mxu0 %v1334_v31  ;;  %1280 = vmatpush2.bf16.msra.mxu1 %v1334_v31 }
  0x46   : > { %603 = vmatprep.subr.bf16.mxu0 %v1335_v32  ;;  %1265 = vmatprep.subr.bf16.mxu1 %v1335_v32 }
  0x49   : > { %604 = vmatpush2.bf16.msra.mxu0 %v1337_v33  ;;  %1281 = vmatpush2.bf16.msra.mxu1 %v1337_v33 }
  0x4c   : > { %606 = vmatmul.mubr.bf16.vlgmr.msra.gmra.mxu0 %v1338_v34  ;;  %686 = vmatmul.mubr.bf16.vlgmr.msra.gmra.mxu1 %v1341_v35 }
  0x4d   : > { %615 = vmatprep.mubr.bf16.mxu0 %v1344_v36  ;;  %695 = vmatprep.mubr.bf16.mxu1 %v1346_v37 }
  0x54   : > { %616 = vmatmul.mubr.bf16.gmra.mxu0 %v1348_v38  ;;  %696 = vmatmul.mubr.bf16.gmra.mxu1 %v1349_v39 }
  0x55   : > { %625 = vmatprep.mubr.bf16.mxu0 %v1350_v40  ;;  %705 = vmatprep.mubr.bf16.mxu1 %v1352_v41 }
  0x5c   : > { %626 = vmatmul.mubr.bf16.gmra.mxu0 %v1354_v42  ;;  %706 = vmatmul.mubr.bf16.gmra.mxu1 %v1355_v43 }
  0x5d   : > { %635 = vmatprep.mubr.bf16.mxu0 %v1356_v44  ;;  %715 = vmatprep.mubr.bf16.mxu1 %v1358_v45 }
  0x64   : > { %636 = vmatmul.mubr.bf16.gmra.mxu0 %v1360_v46  ;;  %716 = vmatmul.mubr.bf16.gmra.mxu1 %v1361_v47 }
  0x65   : > { %645 = vmatprep.mubr.bf16.mxu0 %v1362_v48  ;;  %725 = vmatprep.mubr.bf16.mxu1 %v1364_v49 }
  0x6c   : > { %646 = vmatmul.mubr.bf16.gmra.mxu0 %v1366_v50  ;;  %726 = vmatmul.mubr.bf16.gmra.mxu1 %v1367_v51 }
  0x6d   : > { %655 = vmatprep.mubr.bf16.mxu0 %v1368_v52  ;;  %735 = vmatprep.mubr.bf16.mxu1 %v1370_v53 }
  0x74   : > { %656 = vmatmul.mubr.bf16.gmra.mxu0 %v1372_v54  ;;  %736 = vmatmul.mubr.bf16.gmra.mxu1 %v1373_v55 }
  0x75   : > { %665 = vmatprep.mubr.bf16.mxu0 %v1374_v56  ;;  %745 = vmatprep.mubr.bf16.mxu1 %v1376_v57 }
  0x7c   : > { %666 = vmatmul.mubr.bf16.gmra.mxu0 %v1378_v58  ;;  %746 = vmatmul.mubr.bf16.gmra.mxu1 %v1379_v59 }
  0x7d   : > { %675 = vmatprep.mubr.bf16.mxu0 %v1380_v60  ;;  %755 = vmatprep.mubr.bf16.mxu1 %v1382_v61 }
  0x84   : > { %676 = vmatmul.mubr.bf16.gmra.mxu0 %v1384_v62  ;;  %756 = vmatmul.mubr.bf16.gmra.mxu1 %v1385_v63 }
 0x10c   : > { %v607_v5 = vpop.f32.mrf.mxu0  ;;  %v687_v6 = vpop.f32.mrf.mxu1 }
 0x10d   : > { %v608_v15 = vadd.f32 %v607_v5, %v1563_v8  ;;  %v688_v16 = vadd.f32 %v687_v6, %v1563_v8 }
 0x10e   : > { %v609_v9 = vpop.f32.mrf.mxu0  ;;  %v689_v10 = vpop.f32.mrf.mxu1 }
 0x10f   : > { %v610_v13 = vadd.f32 %v609_v9, %v1561_v7  ;;  %v690_v14 = vadd.f32 %v689_v10, %v1561_v7 }
 0x110   : > { %v611_v11 = vpop.f32.mrf.mxu0  ;;  %v691_v12 = vpop.f32.mrf.mxu1 }
 0x111   : > { %v612_v19 = vadd.f32 %v611_v11, %v1563_v8  ;;  %v692_v20 = vadd.f32 %v691_v12, %v1563_v8  ;;  %v766_v25 = vmax.f32 %v608_v15, %v610_v13  ;;  %v782_v26 = vmax.f32 %v688_v16, %v690_v14 }
 0x112   : > { %v613_v17 = vpop.f32.mrf.mxu0  ;;  %v693_v18 = vpop.f32.mrf.mxu1 }
 0x113   : > { %v614_v21 = vadd.f32 %v613_v17, %v1561_v7  ;;  %v694_v22 = vadd.f32 %v693_v18, %v1561_v7 }
 0x114   : > { %v617_v23 = vpop.f32.mrf.mxu0  ;;  %v697_v24 = vpop.f32.mrf.mxu1 }
 0x115   : > { %v767_v27 = vmax.f32 %v612_v19, %v614_v21  ;;  %v783_v28 = vmax.f32 %v692_v20, %v694_v22  ;;  %v618_v37 = vadd.f32 %v617_v23, %v1563_v8  ;;  %v698_v38 = vadd.f32 %v697_v24, %v1563_v8 }
 0x116   : > { %v619_v29 = vpop.f32.mrf.mxu0  ;;  %v699_v30 = vpop.f32.mrf.mxu1 }
 0x117   : > { %v1158_v31 = vpack.c.bf16 %v767_v27, %v766_v25  ;;  %v1198_v32 = vpack.c.bf16 %v783_v28, %v782_v26  ;;  %v620_v35 = vadd.f32 %v619_v29, %v1561_v7  ;;  %v700_v36 = vadd.f32 %v699_v30, %v1561_v7 }
 0x118   : > { %v621_v33 = vpop.f32.mrf.mxu0  ;;  %v701_v34 = vpop.f32.mrf.mxu1 }
 0x119   : > { %1159 = vst [vmem:[%s1577_s11] sm:$0xff] %v1158_v31   ;;  %1242 = vst [vmem:[%s1577_s11 + $0x40] sm:$0xff] %v1198_v32   ;;  %v622_v41 = vadd.f32 %v621_v33, %v1563_v8  ;;  %v702_v42 = vadd.f32 %v701_v34, %v1563_v8  ;;  %v768_v47 = vmax.f32 %v618_v37, %v620_v35 }
 0x11a   : > { %v623_v39 = vpop.f32.mrf.mxu0  ;;  %v703_v40 = vpop.f32.mrf.mxu1  ;;  %v784_v48 = vmax.f32 %v698_v38, %v700_v36 }
 0x11b   : > { %v624_v43 = vadd.f32 %v623_v39, %v1561_v7  ;;  %v704_v44 = vadd.f32 %v703_v40, %v1561_v7 }
 0x11c   : > { %v627_v45 = vpop.f32.mrf.mxu0  ;;  %v707_v46 = vpop.f32.mrf.mxu1 }
 0x11d   : > { %v769_v49 = vmax.f32 %v622_v41, %v624_v43  ;;  %v785_v50 = vmax.f32 %v702_v42, %v704_v44  ;;  %v628_v59 = vadd.f32 %v627_v45, %v1563_v8  ;;  %v708_v60 = vadd.f32 %v707_v46, %v1563_v8 }
 0x11e   : > { %v629_v51 = vpop.f32.mrf.mxu0  ;;  %v709_v52 = vpop.f32.mrf.mxu1 }
 0x11f   : > { %v1163_v53 = vpack.c.bf16 %v769_v49, %v768_v47  ;;  %v1203_v54 = vpack.c.bf16 %v785_v50, %v784_v48  ;;  %v630_v57 = vadd.f32 %v629_v51, %v1561_v7  ;;  %v710_v58 = vadd.f32 %v709_v52, %v1561_v7 }
 0x120   : > { %v631_v55 = vpop.f32.mrf.mxu0  ;;  %v711_v56 = vpop.f32.mrf.mxu1 }
 0x121   : > { %1235 = vst [vmem:[%s1577_s11 + $0x8] sm:$0xff] %v1163_v53   ;;  %1243 = vst [vmem:[%s1577_s11 + $0x48] sm:$0xff] %v1203_v54   ;;  %v632_v63 = vadd.f32 %v631_v55, %v1563_v8  ;;  %v712_v0 = vadd.f32 %v711_v56, %v1563_v8  ;;  %v770_v5 = vmax.f32 %v628_v59, %v630_v57 }
 0x122   : > { %v633_v61 = vpop.f32.mrf.mxu0  ;;  %v713_v62 = vpop.f32.mrf.mxu1  ;;  %v786_v6 = vmax.f32 %v708_v60, %v710_v58 }
 0x123   : > { %v634_v1 = vadd.f32 %v633_v61, %v1561_v7  ;;  %v714_v2 = vadd.f32 %v713_v62, %v1561_v7 }
 0x124   : > { %v637_v3 = vpop.f32.mrf.mxu0  ;;  %v717_v4 = vpop.f32.mrf.mxu1 }
 0x125   : > { %v771_v9 = vmax.f32 %v632_v63, %v634_v1  ;;  %v787_v10 = vmax.f32 %v712_v0, %v714_v2  ;;  %v638_v19 = vadd.f32 %v637_v3, %v1563_v8  ;;  %v718_v20 = vadd.f32 %v717_v4, %v1563_v8 }
 0x126   : > { %v639_v11 = vpop.f32.mrf.mxu0  ;;  %v719_v12 = vpop.f32.mrf.mxu1 }
 0x127   : > { %v1168_v13 = vpack.c.bf16 %v771_v9, %v770_v5  ;;  %v1208_v14 = vpack.c.bf16 %v787_v10, %v786_v6  ;;  %v640_v17 = vadd.f32 %v639_v11, %v1561_v7  ;;  %v720_v18 = vadd.f32 %v719_v12, %v1561_v7 }
 0x128   : > { %v641_v15 = vpop.f32.mrf.mxu0  ;;  %v721_v16 = vpop.f32.mrf.mxu1 }
 0x129   : > { %1236 = vst [vmem:[%s1577_s11 + $0x10] sm:$0xff] %v1168_v13   ;;  %1244 = vst [vmem:[%s1577_s11 + $0x50] sm:$0xff] %v1208_v14   ;;  %v642_v23 = vadd.f32 %v641_v15, %v1563_v8  ;;  %v722_v24 = vadd.f32 %v721_v16, %v1563_v8  ;;  %v772_v29 = vmax.f32 %v638_v19, %v640_v17 }
 0x12a   : > { %v643_v21 = vpop.f32.mrf.mxu0  ;;  %v723_v22 = vpop.f32.mrf.mxu1  ;;  %v788_v30 = vmax.f32 %v718_v20, %v720_v18 }
 0x12b   : > { %v644_v25 = vadd.f32 %v643_v21, %v1561_v7  ;;  %v724_v26 = vadd.f32 %v723_v22, %v1561_v7 }
 0x12c   : > { %v647_v27 = vpop.f32.mrf.mxu0  ;;  %v727_v28 = vpop.f32.mrf.mxu1 }
 0x12d   : > { %v773_v31 = vmax.f32 %v642_v23, %v644_v25  ;;  %v789_v32 = vmax.f32 %v722_v24, %v724_v26  ;;  %v648_v41 = vadd.f32 %v647_v27, %v1563_v8  ;;  %v728_v42 = vadd.f32 %v727_v28, %v1563_v8 }
 0x12e   : > { %v649_v33 = vpop.f32.mrf.mxu0  ;;  %v729_v34 = vpop.f32.mrf.mxu1 }
 0x12f   : > { %v1173_v35 = vpack.c.bf16 %v773_v31, %v772_v29  ;;  %v1213_v36 = vpack.c.bf16 %v789_v32, %v788_v30  ;;  %v650_v39 = vadd.f32 %v649_v33, %v1561_v7  ;;  %v730_v40 = vadd.f32 %v729_v34, %v1561_v7 }
 0x130   : > { %v651_v37 = vpop.f32.mrf.mxu0  ;;  %v731_v38 = vpop.f32.mrf.mxu1 }
 0x131   : > { %1237 = vst [vmem:[%s1577_s11 + $0x18] sm:$0xff] %v1173_v35   ;;  %1245 = vst [vmem:[%s1577_s11 + $0x58] sm:$0xff] %v1213_v36   ;;  %v652_v45 = vadd.f32 %v651_v37, %v1563_v8  ;;  %v732_v46 = vadd.f32 %v731_v38, %v1563_v8  ;;  %v774_v51 = vmax.f32 %v648_v41, %v650_v39 }
 0x132   : > { %v653_v43 = vpop.f32.mrf.mxu0  ;;  %v733_v44 = vpop.f32.mrf.mxu1  ;;  %v790_v52 = vmax.f32 %v728_v42, %v730_v40 }
 0x133   : > { %v654_v47 = vadd.f32 %v653_v43, %v1561_v7  ;;  %v734_v48 = vadd.f32 %v733_v44, %v1561_v7 }
 0x134   : > { %v657_v49 = vpop.f32.mrf.mxu0  ;;  %v737_v50 = vpop.f32.mrf.mxu1 }
 0x135   : > { %v775_v53 = vmax.f32 %v652_v45, %v654_v47  ;;  %v791_v54 = vmax.f32 %v732_v46, %v734_v48  ;;  %v658_v63 = vadd.f32 %v657_v49, %v1563_v8  ;;  %v738_v0 = vadd.f32 %v737_v50, %v1563_v8 }
 0x136   : > { %v659_v55 = vpop.f32.mrf.mxu0  ;;  %v739_v56 = vpop.f32.mrf.mxu1 }
 0x137   : > { %v1178_v57 = vpack.c.bf16 %v775_v53, %v774_v51  ;;  %v1218_v58 = vpack.c.bf16 %v791_v54, %v790_v52  ;;  %v660_v61 = vadd.f32 %v659_v55, %v1561_v7  ;;  %v740_v62 = vadd.f32 %v739_v56, %v1561_v7 }
 0x138   : > { %v661_v59 = vpop.f32.mrf.mxu0  ;;  %v741_v60 = vpop.f32.mrf.mxu1 }
 0x139   : > { %1238 = vst [vmem:[%s1577_s11 + $0x20] sm:$0xff] %v1178_v57   ;;  %1246 = vst [vmem:[%s1577_s11 + $0x60] sm:$0xff] %v1218_v58   ;;  %v662_v3 = vadd.f32 %v661_v59, %v1563_v8  ;;  %v742_v4 = vadd.f32 %v741_v60, %v1563_v8  ;;  %v776_v11 = vmax.f32 %v658_v63, %v660_v61 }
 0x13a   : > { %v663_v1 = vpop.f32.mrf.mxu0  ;;  %v743_v2 = vpop.f32.mrf.mxu1  ;;  %v792_v12 = vmax.f32 %v738_v0, %v740_v62 }
 0x13b   : > { %v664_v5 = vadd.f32 %v663_v1, %v1561_v7  ;;  %v744_v6 = vadd.f32 %v743_v2, %v1561_v7 }
 0x13c   : > { %v667_v9 = vpop.f32.mrf.mxu0  ;;  %v747_v10 = vpop.f32.mrf.mxu1 }
 0x13d   : > { %v777_v13 = vmax.f32 %v662_v3, %v664_v5  ;;  %v793_v14 = vmax.f32 %v742_v4, %v744_v6  ;;  %v668_v23 = vadd.f32 %v667_v9, %v1563_v8  ;;  %v748_v24 = vadd.f32 %v747_v10, %v1563_v8 }
 0x13e   : > { %v669_v15 = vpop.f32.mrf.mxu0  ;;  %v749_v16 = vpop.f32.mrf.mxu1 }
 0x13f   : > { %v1183_v17 = vpack.c.bf16 %v777_v13, %v776_v11  ;;  %v1223_v18 = vpack.c.bf16 %v793_v14, %v792_v12  ;;  %v670_v21 = vadd.f32 %v669_v15, %v1561_v7  ;;  %v750_v22 = vadd.f32 %v749_v16, %v1561_v7 }
 0x140   : > { %v671_v19 = vpop.f32.mrf.mxu0  ;;  %v751_v20 = vpop.f32.mrf.mxu1 }
 0x141   : > { %1239 = vst [vmem:[%s1577_s11 + $0x28] sm:$0xff] %v1183_v17   ;;  %1247 = vst [vmem:[%s1577_s11 + $0x68] sm:$0xff] %v1223_v18   ;;  %v672_v27 = vadd.f32 %v671_v19, %v1563_v8  ;;  %v752_v28 = vadd.f32 %v751_v20, %v1563_v8  ;;  %v778_v33 = vmax.f32 %v668_v23, %v670_v21 }
 0x142   : > { %v673_v25 = vpop.f32.mrf.mxu0  ;;  %v753_v26 = vpop.f32.mrf.mxu1  ;;  %v794_v34 = vmax.f32 %v748_v24, %v750_v22 }
 0x143   : > { %v674_v29 = vadd.f32 %v673_v25, %v1561_v7  ;;  %v754_v30 = vadd.f32 %v753_v26, %v1561_v7 }
 0x144   : > { %v677_v31 = vpop.f32.mrf.mxu0  ;;  %v757_v32 = vpop.f32.mrf.mxu1 }
 0x145   : > { %v779_v35 = vmax.f32 %v672_v27, %v674_v29  ;;  %v795_v36 = vmax.f32 %v752_v28, %v754_v30  ;;  %v678_v45 = vadd.f32 %v677_v31, %v1563_v8  ;;  %v758_v46 = vadd.f32 %v757_v32, %v1563_v8 }
 0x146   : > { %v679_v37 = vpop.f32.mrf.mxu0  ;;  %v759_v38 = vpop.f32.mrf.mxu1 }
 0x147   : > { %v1188_v39 = vpack.c.bf16 %v779_v35, %v778_v33  ;;  %v1228_v40 = vpack.c.bf16 %v795_v36, %v794_v34  ;;  %v680_v43 = vadd.f32 %v679_v37, %v1561_v7  ;;  %v760_v44 = vadd.f32 %v759_v38, %v1561_v7 }
 0x148   : > { %v681_v41 = vpop.f32.mrf.mxu0  ;;  %v761_v42 = vpop.f32.mrf.mxu1 }
 0x149   : > { %1240 = vst [vmem:[%s1577_s11 + $0x30] sm:$0xff] %v1188_v39   ;;  %1248 = vst [vmem:[%s1577_s11 + $0x70] sm:$0xff] %v1228_v40   ;;  %v682_v49 = vadd.f32 %v681_v41, %v1563_v8  ;;  %v762_v50 = vadd.f32 %v761_v42, %v1563_v8  ;;  %v780_v53 = vmax.f32 %v678_v45, %v680_v43 }
 0x14a   : > { %v683_v47 = vpop.f32.mrf.mxu0  ;;  %v763_v48 = vpop.f32.mrf.mxu1  ;;  %v796_v54 = vmax.f32 %v758_v46, %v760_v44 }
 0x14b   : > { %v684_v51 = vadd.f32 %v683_v47, %v1561_v7  ;;  %v764_v52 = vadd.f32 %v763_v48, %v1561_v7 }
 0x14d   : > { %v781_v55 = vmax.f32 %v682_v49, %v684_v51  ;;  %v797_v56 = vmax.f32 %v762_v50, %v764_v52 }
 0x14f   : > { %v1193_v57 = vpack.c.bf16 %v781_v55, %v780_v53  ;;  %v1233_v58 = vpack.c.bf16 %v797_v56, %v796_v54 }
 0x151   : > { %1241 = vst [vmem:[%s1577_s11 + $0x38] sm:$0xff] %v1193_v57   ;;  %1249 = vst [vmem:[%s1577_s11 + $0x78] sm:$0xff] %v1233_v58  }
 0x152 PF: > { %s13_s12 = sadd.s32 1, %s1392_s12  }
 0x153   : > { %p10_p4 = scmp.ge.s32.totalorder %s13_s12, 8  }
 0x155   :  { %12 = sbr.rel (!%p10_p4) target bundleno = 1 (0x1), region = 62 }

// kernel: two_path_cnn_forward.7
= control target key start
LH: loop header
LB: loop body
LE: loop exit
PB: predicated region body
PF: predicated region fallthrough
CT: control target
= control target key end

     0   :  { %s3025_s6 = smov 0   ;;  %s4381_s0 = inlined_call_operand.vmem [shape: bf16[2,27,27,128], index: 0, kind: input, shape index: {}]   ;;  %s4382_s1 = inlined_call_operand.vmem [shape: bf16[2,24,24,128], index: 1, kind: output, shape index: {}]  }
   0x1 LB: > { %s2713_s7 = sadd.s32 4294967295, %s3013_s6   ;;  %p2717_p0 = scmp.ge.s32.totalorder %s3013_s6, 1  ;;  %s3013_s6 = sphi %s3025_s6, %s11_s6  }
   0x2   : > { %p87_p1 = scmp.lt.s32.totalorder %s3013_s6, 3 }
   0x4   : > { %p88_p2 = pnand %p2717_p0, %p87_p1 }
   0x5   : > { %p107_p3 = scmp.lt.s32.totalorder (!%p88_p2), %s2713_s7, 1 }
   0x6   : > { %91 = sbr.rel (%p88_p2) target bundleno = 468 (0x1d4), region = 24 }
   0xb   : > { %s4390_s7 = smov (!%p107_p3, %s2713_s7), 1  ;;  %vm1572_vm0 = vcmask 1042432   ;;  %vm513_vm1 = vsmask.f32 3328  ;;  %vm514_vm2 = vsmask.f32 7440 }
   0xc   : > { %s2997_s8 = smul.u32 432, %s4390_s7  ;;  %vm1573_vm3 = vcmask 1046532   ;;  %vm1959_vm4 = vsmask.f32 2304  ;;  %vm1960_vm5 = vsmask.f32 6416  ;;  %vm3121_vm7 = vmor %vm513_vm1, %vm514_vm2 }
   0xd   : > { %vm3110_vm6 = vmor %vm1572_vm0, %vm1573_vm3  ;;  %s2998_s12 = smul.u32 288, %s4390_s7 }
   0xe   : > { %s3039_s11 = scalar_lea.vmem %s4381_s0, %s2997_s8  ;;  %vm3134_vm8 = vmor %vm1959_vm4, %vm1960_vm5 }
   0xf   : > { %v117_v0 = vld [vmem:[%s3039_s11] sm:$0xf]  ;;  %v118_v1 = vld [vmem:[%s3039_s11 + $0x4] sm:$0xf]  ;;  %v119_v2 = vld [vmem:[%s3039_s11 + $0x8] sm:$0xf]  ;;  %s3150_s15 = scalar_lea.vmem %s4382_s1, %s2998_s12 }
  0x10   : > { %v121_v3 = vld [vmem:[%s3039_s11 + $0x10] sm:$0xf]  ;;  %v122_v4 = vld [vmem:[%s3039_s11 + $0x14] sm:$0xf]  ;;  %v123_v5 = vld [vmem:[%s3039_s11 + $0x18] sm:$0xf] }
  0x11   : > { %v3048_v6 = vld [vmem:[%s3039_s11 + $0x20] sm:$0xf]  ;;  %v3051_v7 = vld [vmem:[%s3039_s11 + $0x24] sm:$0xf]  ;;  %v3054_v8 = vld [vmem:[%s3039_s11 + $0x28] sm:$0xf]  ;;  %v225_v9 = vmax.bf16 %v121_v3, %v117_v0  ;;  %v226_v10 = vmax.bf16 %v122_v4, %v118_v1  ;;  %v227_v11 = vmax.bf16 %v123_v5, %v119_v2 }
  0x12   : > { %v3057_v12 = vld [vmem:[%s3039_s11 + $0x30] sm:$0xf]  ;;  %v3060_v13 = vld [vmem:[%s3039_s11 + $0x34] sm:$0xf]  ;;  %v230_v14 = vmax.bf16 %v3051_v7, %v122_v4  ;;  %v229_v15 = vmax.bf16 %v3048_v6, %v121_v3  ;;  %v231_v16 = vmax.bf16 %v3054_v8, %v123_v5  ;;  %v120_v20 = vld [vmem:[%s3039_s11 + $0xc] sm:$0x3] }
  0x13   : > { %v321_v17 = vmax.bf16 %v225_v9, %v3048_v6  ;;  %v322_v18 = vmax.bf16 %v226_v10, %v3051_v7  ;;  %v323_v19 = vmax.bf16 %v227_v11, %v3054_v8  ;;  %v124_v21 = vld [vmem:[%s3039_s11 + $0x1c] sm:$0x3]  ;;  %v3071_v22 = vld [vmem:[%s3039_s11 + $0x2c] sm:$0x3]  ;;  %v233_v23 = vmax.bf16 %v3057_v12, %v3048_v6  ;;  %v3076_v24 = vld [vmem:[%s3039_s11 + $0x38] sm:$0xf] }
  0x14   : > { %v228_v25 = vmax.bf16 %v124_v21, %v120_v20  ;;  %v325_v26 = vmax.bf16 %v229_v15, %v3057_v12  ;;  %v326_v27 = vmax.bf16 %v230_v14, %v3060_v13  ;;  %v232_v28 = vmax.bf16 %v3071_v22, %v124_v21  ;;  %v3087_v32 = vld [vmem:[%s3039_s11 + $0x3c] sm:$0x3]  ;;  %v3090_v33 = vld [vmem:[%s3039_s11 + $0x40] sm:$0xf]  ;;  %v3093_v34 = vld [vmem:[%s3039_s11 + $0x44] sm:$0xf] }
  0x15   : > { %v417_v29 = vmax.bf16 %v321_v17, %v3057_v12  ;;  %v418_v30 = vmax.bf16 %v322_v18, %v3060_v13  ;;  %v3084_v31 = vmax.bf16 %v323_v19, %v3076_v24  ;;  %v3096_v35 = vmax.bf16 %v231_v16, %v3076_v24 }
  0x16   : > { %v324_v36 = vmax.bf16 %v228_v25, %v3071_v22  ;;  %v3100_v37 = vmax.bf16 %v325_v26, %v3090_v33  ;;  %v3103_v38 = vmax.bf16 %v326_v27, %v3093_v34  ;;  %v3106_v39 = vmax.bf16 %v232_v28, %v3087_v32 }
  0x17   : > { %v517_v40 = vshrl.u32 %v417_v29, 16  ;;  %v520_v41 = vshll.u32 %v417_v29, 16  ;;  %v526_v42 = vshll.u32 %v418_v30, 16  ;;  %v530_v43 = vshrl.u32 %v418_v30, 16 }
  0x18   : > { %v536_v45 = vshll.u32 %v3084_v31, 16  ;;  %v540_v46 = vshrl.u32 %v3084_v31, 16  ;;  %v2720_v47 = vrot.slane %v417_v29, 9  ;;  %v1577_v48 = vrot.slane %v418_v30, 5 }
  0x19   : > { %v519_v49 = vrot.slane %v517_v40, 4  ;;  %v522_v50 = vrot.slane %v520_v41, 5  ;;  %v528_v51 = vrot.slane %v526_v42, 5  ;;  %v532_v52 = vrot.slane %v530_v43, 4 }
  0x1a   : > { %v538_v53 = vrot.slane %v536_v45, 5  ;;  %v542_v54 = vrot.slane %v540_v46, 4  ;;  %v1578_v55 = vsel %vm3110_vm6, %v2720_v47, %v1577_v48  ;;  %v1579_v56 = vrot.slane %v1577_v48, 4 }
  0x1b   : > { %v523_v57 = vor.u32 %v522_v50, %v519_v49  ;;  %v533_v58 = vor.u32 %v532_v52, %v528_v51  ;;  %v1580_v59 = vrot.slane %v3084_v31, 5  ;;  %v1962_v60 = vrot.slane %v517_v40, 5 }
  0x1c   : > { %v1963_v62 = vrot.slane %v520_v41, 6  ;;  %v1966_v63 = vrot.slane %v530_v43, 5  ;;  %v1967_v0 = vrot.slane %v526_v42, 6  ;;  %v1971_v1 = vrot.slane %v540_v46, 5 }
  0x1d   : > { %v524_v2 = vrot.slane %v523_v57, 4  ;;  %v534_v3 = vrot.slane %v533_v58, 4  ;;  %v1581_v4 = vsel %vm3110_vm6, %v1579_v56, %v1580_v59  ;;  %v1972_v5 = vrot.slane %v536_v45, 6 }
  0x1e   : > { %v1964_v9 = vor.u32 %v1963_v62, %v1962_v60  ;;  %v1968_v10 = vor.u32 %v1967_v0, %v1966_v63  ;;  %v420_v11 = vmax.bf16 %v324_v36, %v3087_v32  ;;  %v543_v14 = vor.u32 %v542_v54, %v538_v53 }
  0x1f   : > { %v529_v15 = vsel %vm3121_vm7, %v524_v2, %v528_v51  ;;  %v539_v16 = vsel %vm3121_vm7, %v534_v3, %v538_v53  ;;  %v1973_v18 = vor.u32 %v1972_v5, %v1971_v1  ;;  %v551_v19 = vshrl.u32 %v3100_v37, 16 }
  0x20   : > { %v1404_v20 = vmax.bf16 %v529_v15, %v417_v29  ;;  %v1405_v21 = vmax.bf16 %v539_v16, %v418_v30  ;;  %v1965_v25 = vrot.slane %v1964_v9, 4  ;;  %v1970_v26 = vrot.slane %v1968_v10, 4 }
  0x21   : > { %v544_v27 = vrot.slane %v543_v14, 4  ;;  %v546_v28 = vshll.u32 %v420_v11, 16  ;;  %v553_v36 = vrot.slane %v551_v19, 4  ;;  %v554_v40 = vshll.u32 %v3100_v37, 16  ;;  %v3165_v14 = vld [vmem:[%s3039_s11 + $0x48] sm:$0xf] }
  0x22   : > { %v1887_v41 = vmax.bf16 %v1578_v55, %v1404_v20  ;;  %v1888_v42 = vmax.bf16 %v1581_v4, %v1405_v21  ;;  %v1969_v43 = vsel %vm3134_vm8, %v1965_v25, %v1968_v10  ;;  %v1974_v45 = vsel %vm3134_vm8, %v1970_v26, %v1973_v18 }
  0x23   : > { %v548_v46 = vrot.slane %v546_v28, 5  ;;  %v556_v47 = vrot.slane %v554_v40, 5  ;;  %v560_v29 = vshll.u32 %v3103_v38, 16  ;;  %v564_v30 = vshrl.u32 %v3103_v38, 16 }
  0x24   : > { %v2514_v48 = vmax.bf16 %v1969_v43, %v1887_v41  ;;  %v2515_v49 = vmax.bf16 %v1974_v45, %v1888_v42  ;;  %v1582_v50 = vrot.slane %v1580_v59, 4  ;;  %v1583_v51 = vrot.slane %v420_v11, 5 }
  0x25   : > { %v549_v52 = vsel %vm3121_vm7, %v544_v27, %v548_v46  ;;  %v557_v53 = vor.u32 %v556_v47, %v553_v36  ;;  %v562_v54 = vrot.slane %v560_v29, 5  ;;  %v566_v55 = vrot.slane %v564_v30, 4 }
  0x26   : > { %v2926_v56 = vcombine.low %v2514_v48, %v2515_v49  ;;  %v1406_v57 = vmax.bf16 %v549_v52, %v3084_v31  ;;  %v1584_v58 = vsel %vm3110_vm6, %v1582_v50, %v1583_v51  ;;  %v2721_v59 = vrot.slane %v3100_v37, 9 }
  0x27   : > { %v558_v60 = vrot.slane %v557_v53, 4  ;;  %v1587_v62 = vrot.slane %v3103_v38, 5  ;;  %v1975_v63 = vrot.slane %v1973_v18, 4  ;;  %v1976_v0 = vshrl.u32 %v420_v11, 16  ;;  %v3169_v11 = vld [vmem:[%s3039_s11 + $0x4c] sm:$0x3] }
  0x28   : > { %2750 = vst [vmem:[%s3150_s15] sm:$0xff] %v2926_v56   ;;  %v1889_v1 = vmax.bf16 %v1584_v58, %v1406_v57  ;;  %v1979_v2 = vrot.slane %v546_v28, 6  ;;  %v1982_v3 = vrot.slane %v551_v19, 5  ;;  %v1983_v4 = vrot.slane %v554_v40, 6 }
  0x29   : > { %v563_v31 = vsel %vm3121_vm7, %v558_v60, %v562_v54  ;;  %v1588_v5 = vsel %vm3110_vm6, %v2721_v59, %v1587_v62  ;;  %v1978_v9 = vrot.slane %v1976_v0, 5  ;;  %v1986_v10 = vrot.slane %v564_v30, 5 }
  0x2a   : > { %v1407_v15 = vmax.bf16 %v563_v31, %v3100_v37  ;;  %v1984_v16 = vor.u32 %v1983_v4, %v1982_v3  ;;  %v1987_v18 = vrot.slane %v560_v29, 6  ;;  %v423_v19 = vmax.bf16 %v3096_v35, %v3165_v14 }
  0x2b   : > { %v1980_v20 = vor.u32 %v1979_v2, %v1978_v9  ;;  %v424_v21 = vmax.bf16 %v3106_v39, %v3169_v11  ;;  %v567_v25 = vor.u32 %v566_v55, %v562_v54  ;;  %v1589_v26 = vrot.slane %v1587_v62, 4 }
  0x2c   : > { %v1890_v27 = vmax.bf16 %v1588_v5, %v1407_v15  ;;  %v1985_v28 = vrot.slane %v1984_v16, 4  ;;  %v1988_v36 = vor.u32 %v1987_v18, %v1986_v10  ;;  %v570_v40 = vshll.u32 %v423_v19, 16  ;;  %v3200_v5 = vld [vmem:[%s3039_s11 + $0x50] sm:$0xf]  ;;  %v3209_v16 = vld [vmem:[%s3039_s11 + $0x54] sm:$0xf] }
  0x2d   : > { %v1981_v37 = vsel %vm3134_vm8, %v1975_v63, %v1980_v20  ;;  %v568_v41 = vrot.slane %v567_v25, 4  ;;  %v574_v42 = vshrl.u32 %v423_v19, 16  ;;  %v580_v43 = vshll.u32 %v424_v21, 16 }
  0x2e   : > { %v1989_v45 = vsel %vm3134_vm8, %v1985_v28, %v1988_v36  ;;  %v2516_v35 = vmax.bf16 %v1981_v37, %v1889_v1  ;;  %v572_v46 = vrot.slane %v570_v40, 5  ;;  %v1590_v47 = vrot.slane %v423_v19, 5 }
  0x2f   : > { %v2517_v29 = vmax.bf16 %v1989_v45, %v1890_v27  ;;  %v576_v39 = vrot.slane %v574_v42, 4  ;;  %v582_v30 = vrot.slane %v580_v43, 5  ;;  %v1593_v48 = vrot.slane %v424_v21, 5 }
  0x30   : > { %v573_v49 = vsel %vm3121_vm7, %v568_v41, %v572_v46  ;;  %v1591_v50 = vsel %vm3110_vm6, %v1589_v26, %v1590_v47  ;;  %v1592_v51 = vrot.slane %v1590_v47, 4  ;;  %v1990_v52 = vrot.slane %v1988_v36, 4 }
  0x31   : > { %v2927_v53 = vcombine.low %v2516_v35, %v2517_v29  ;;  %v577_v54 = vor.u32 %v576_v39, %v572_v46  ;;  %v1408_v55 = vmax.bf16 %v573_v49, %v3103_v38  ;;  %v1991_v56 = vrot.slane %v574_v42, 5 }
  0x32   : > { %v1594_v57 = vsel %vm3110_vm6, %v1592_v51, %v1593_v48  ;;  %v1992_v58 = vrot.slane %v570_v40, 6  ;;  %v1996_v59 = vshrl.u32 %v424_v21, 16  ;;  %v1999_v60 = vrot.slane %v580_v43, 6 }
  0x33   : > { %2928 = vst [vmem:[%s3150_s15 + $0x8] sm:$0xff] %v2927_v53   ;;  %v578_v62 = vrot.slane %v577_v54, 4  ;;  %v1891_v63 = vmax.bf16 %v1591_v50, %v1408_v55  ;;  %v234_v0 = vmax.bf16 %v3060_v13, %v3051_v7  ;;  %v235_v1 = vmax.bf16 %v3076_v24, %v3054_v8 }
  0x34   : > { %v1993_v38 = vor.u32 %v1992_v58, %v1991_v56  ;;  %v1998_v2 = vrot.slane %v1996_v59, 5  ;;  %v329_v3 = vmax.bf16 %v233_v23, %v3090_v33  ;;  %v236_v4 = vmax.bf16 %v3087_v32, %v3071_v22  ;;  %v3212_v22 = vld [vmem:[%s3039_s11 + $0x58] sm:$0xf] }
  0x35   : > { %v583_v31 = vsel %vm3121_vm7, %v578_v62, %v582_v30  ;;  %v330_v7 = vmax.bf16 %v234_v0, %v3093_v34  ;;  %v331_v9 = vmax.bf16 %v235_v1, %v3165_v14  ;;  %v237_v8 = vmax.bf16 %v3090_v33, %v3057_v12 }
  0x36   : > { %v1409_v10 = vmax.bf16 %v583_v31, %v423_v19  ;;  %v1994_v6 = vsel %vm3134_vm8, %v1990_v52, %v1993_v38  ;;  %v1995_v23 = vrot.slane %v1993_v38, 4  ;;  %v2000_v15 = vor.u32 %v1999_v60, %v1998_v2 }
  0x37   : > { %v2518_v18 = vmax.bf16 %v1994_v6, %v1891_v63  ;;  %v425_v20 = vmax.bf16 %v329_v3, %v3200_v5  ;;  %v426_v21 = vmax.bf16 %v330_v7, %v3209_v16  ;;  %v3217_v25 = vmax.bf16 %v331_v9, %v3212_v22 }
  0x38   : > { %v1892_v26 = vmax.bf16 %v1594_v57, %v1409_v10  ;;  %v2001_v12 = vsel %vm3134_vm8, %v1995_v23, %v2000_v15  ;;  %v238_v19 = vmax.bf16 %v3093_v34, %v3060_v13  ;;  %v332_v27 = vmax.bf16 %v236_v4, %v3169_v11  ;;  %v3238_v4 = vld [vmem:[%s3039_s11 + $0x5c] sm:$0x3]  ;;  %v3244_v23 = vld [vmem:[%s3039_s11 + $0x60] sm:$0xf]  ;;  %v3247_v15 = vld [vmem:[%s3039_s11 + $0x64] sm:$0xf] }
  0x39   : > { %v585_v28 = vshrl.u32 %v425_v20, 16  ;;  %v588_v36 = vshll.u32 %v425_v20, 16  ;;  %v594_v40 = vshll.u32 %v426_v21, 16  ;;  %v598_v37 = vshrl.u32 %v426_v21, 16 }
  0x3a   : > { %v2519_v41 = vmax.bf16 %v2001_v12, %v1892_v26  ;;  %v604_v42 = vshll.u32 %v3217_v25, 16  ;;  %v608_v43 = vshrl.u32 %v3217_v25, 16  ;;  %v2722_v45 = vrot.slane %v425_v20, 9 }
  0x3b   : > { %v587_v35 = vrot.slane %v585_v28, 4  ;;  %v590_v46 = vrot.slane %v588_v36, 5  ;;  %v596_v47 = vrot.slane %v594_v40, 5  ;;  %v600_v29 = vrot.slane %v598_v37, 4 }
  0x3c   : > { %v2929_v39 = vcombine.low %v2518_v18, %v2519_v41  ;;  %v606_v30 = vrot.slane %v604_v42, 5  ;;  %v610_v13 = vrot.slane %v608_v43, 4  ;;  %v1597_v48 = vrot.slane %v426_v21, 5 }
  0x3d   : > { %v591_v49 = vor.u32 %v590_v46, %v587_v35  ;;  %v601_v50 = vor.u32 %v600_v29, %v596_v47  ;;  %v1600_v51 = vrot.slane %v3217_v25, 5  ;;  %v2002_v52 = vrot.slane %v585_v28, 5 }
  0x3e   : > { %2930 = vst [vmem:[%s3150_s15 + $0x10] sm:$0xff] %v2929_v39   ;;  %v1598_v53 = vsel %vm3110_vm6, %v2722_v45, %v1597_v48  ;;  %v1599_v54 = vrot.slane %v1597_v48, 4  ;;  %v2003_v55 = vrot.slane %v588_v36, 6  ;;  %v2006_v56 = vrot.slane %v598_v37, 5 }
  0x3f   : > { %v592_v57 = vrot.slane %v591_v49, 4  ;;  %v602_v58 = vrot.slane %v601_v50, 4  ;;  %v2007_v59 = vrot.slane %v594_v40, 6  ;;  %v2011_v60 = vrot.slane %v608_v43, 5 }
  0x40   : > { %v1601_v62 = vsel %vm3110_vm6, %v1599_v54, %v1600_v51  ;;  %v2004_v63 = vor.u32 %v2003_v55, %v2002_v52  ;;  %v2012_v0 = vrot.slane %v604_v42, 6  ;;  %v333_v1 = vmax.bf16 %v237_v8, %v3200_v5 }
  0x41   : > { %v597_v38 = vsel %vm3121_vm7, %v592_v57, %v596_v47  ;;  %v607_v2 = vsel %vm3121_vm7, %v602_v58, %v606_v30  ;;  %v2008_v3 = vor.u32 %v2007_v59, %v2006_v56  ;;  %v334_v31 = vmax.bf16 %v238_v19, %v3209_v16 }
  0x42   : > { %v1410_v7 = vmax.bf16 %v597_v38, %v425_v20  ;;  %v1411_v9 = vmax.bf16 %v607_v2, %v426_v21  ;;  %v2005_v10 = vrot.slane %v2004_v63, 4  ;;  %v3241_v6 = vor.u32 %v2012_v0, %v2011_v60 }
  0x43   : > { %v2010_v8 = vrot.slane %v2008_v3, 4  ;;  %v428_v18 = vmax.bf16 %v332_v27, %v3238_v4  ;;  %v429_v26 = vmax.bf16 %v333_v1, %v3244_v23  ;;  %v3252_v12 = vmax.bf16 %v334_v31, %v3247_v15 }
  0x44   : > { %v1893_v28 = vmax.bf16 %v1598_v53, %v1410_v7  ;;  %v1894_v36 = vmax.bf16 %v1601_v62, %v1411_v9  ;;  %v2009_v20 = vsel %vm3134_vm8, %v2005_v10, %v2008_v3  ;;  %v611_v21 = vor.u32 %v610_v13, %v606_v30 }
  0x45   : > { %v2014_v19 = vsel %vm3134_vm8, %v2010_v8, %v3241_v6  ;;  %v614_v40 = vshll.u32 %v428_v18, 16  ;;  %v619_v37 = vshrl.u32 %v429_v26, 16  ;;  %v622_v41 = vshll.u32 %v429_v26, 16 }
  0x46   : > { %v2520_v42 = vmax.bf16 %v2009_v20, %v1893_v28  ;;  %v2521_v27 = vmax.bf16 %v2014_v19, %v1894_v36  ;;  %v612_v43 = vrot.slane %v611_v21, 4  ;;  %v628_v45 = vshll.u32 %v3252_v12, 16  ;;  %v3279_v21 = vld [vmem:[%s3039_s11 + $0x68] sm:$0xf] }
  0x47   : > { %v616_v35 = vrot.slane %v614_v40, 5  ;;  %v621_v46 = vrot.slane %v619_v37, 4  ;;  %v624_v47 = vrot.slane %v622_v41, 5  ;;  %v632_v29 = vshrl.u32 %v3252_v12, 16 }
  0x48   : > { %v2931_v39 = vcombine.low %v2520_v42, %v2521_v27  ;;  %v630_v30 = vrot.slane %v628_v45, 5  ;;  %v1602_v13 = vrot.slane %v1600_v51, 4  ;;  %v1603_v48 = vrot.slane %v428_v18, 5 }
  0x49   : > { %v617_v49 = vsel %vm3121_vm7, %v612_v43, %v616_v35  ;;  %v625_v50 = vor.u32 %v624_v47, %v621_v46  ;;  %v634_v52 = vrot.slane %v632_v29, 4  ;;  %v2723_v53 = vrot.slane %v429_v26, 9 }
  0x4a   : > { %2932 = vst [vmem:[%s3150_s15 + $0x18] sm:$0xff] %v2931_v39   ;;  %v1412_v54 = vmax.bf16 %v617_v49, %v3217_v25  ;;  %v1604_v55 = vsel %vm3110_vm6, %v1602_v13, %v1603_v48  ;;  %v1607_v56 = vrot.slane %v3252_v12, 5  ;;  %v2015_v57 = vrot.slane %v3241_v6, 4 }
  0x4b   : > { %v626_v58 = vrot.slane %v625_v50, 4  ;;  %v2016_v59 = vshrl.u32 %v428_v18, 16  ;;  %v2019_v51 = vrot.slane %v614_v40, 6  ;;  %v2022_v60 = vrot.slane %v619_v37, 5 }
  0x4c   : > { %v1608_v62 = vsel %vm3110_vm6, %v2723_v53, %v1607_v56  ;;  %v1895_v63 = vmax.bf16 %v1604_v55, %v1412_v54  ;;  %v2023_v0 = vrot.slane %v622_v41, 6  ;;  %v2026_v1 = vrot.slane %v632_v29, 5 }
  0x4d   : > { %v631_v25 = vsel %vm3121_vm7, %v626_v58, %v630_v30  ;;  %v2018_v38 = vrot.slane %v2016_v59, 5  ;;  %v2027_v2 = vrot.slane %v628_v45, 6  ;;  %v239_v3 = vmax.bf16 %v3165_v14, %v3076_v24 }
  0x4e   : > { %v1413_v31 = vmax.bf16 %v631_v25, %v429_v26  ;;  %v2024_v7 = vor.u32 %v2023_v0, %v2022_v60  ;;  %v240_v9 = vmax.bf16 %v3169_v11, %v3087_v32  ;;  %v635_v10 = vor.u32 %v634_v52, %v630_v30  ;;  %v3285_v26 = vld [vmem:[%s3039_s11 + $0x6c] sm:$0x3] }
  0x4f   : > { %v2020_v6 = vor.u32 %v2019_v51, %v2018_v38  ;;  %v2028_v8 = vor.u32 %v2027_v2, %v2026_v1  ;;  %v335_v18 = vmax.bf16 %v239_v3, %v3212_v22  ;;  %v1609_v28 = vrot.slane %v1607_v56, 4  ;;  %v3307_v1 = vld [vmem:[%s3039_s11 + $0x70] sm:$0xf] }
  0x50   : > { %v1896_v36 = vmax.bf16 %v1608_v62, %v1413_v31  ;;  %v2025_v20 = vrot.slane %v2024_v7, 4  ;;  %v336_v19 = vmax.bf16 %v240_v9, %v3238_v4  ;;  %v636_v40 = vrot.slane %v635_v10, 4  ;;  %v3317_v7 = vld [vmem:[%s3039_s11 + $0x78] sm:$0xf] }
  0x51   : > { %v2021_v24 = vsel %vm3134_vm8, %v2015_v57, %v2020_v6  ;;  %v431_v32 = vmax.bf16 %v335_v18, %v3279_v21  ;;  %v2030_v37 = vrot.slane %v2028_v8, 4  ;;  %v241_v41 = vmax.bf16 %v3200_v5, %v3090_v33 }
  0x52   : > { %v2029_v42 = vsel %vm3134_vm8, %v2025_v20, %v2028_v8  ;;  %v2522_v27 = vmax.bf16 %v2021_v24, %v1895_v63  ;;  %v432_v43 = vmax.bf16 %v336_v19, %v3285_v26  ;;  %v242_v45 = vmax.bf16 %v3209_v16, %v3093_v34 }
  0x53   : > { %v2523_v35 = vmax.bf16 %v2029_v42, %v1896_v36  ;;  %v638_v46 = vshll.u32 %v431_v32, 16  ;;  %v642_v47 = vshrl.u32 %v431_v32, 16  ;;  %v1610_v29 = vrot.slane %v431_v32, 5 }
  0x54   : > { %v648_v39 = vshll.u32 %v432_v43, 16  ;;  %v1613_v30 = vrot.slane %v432_v43, 5  ;;  %v2036_v13 = vshrl.u32 %v432_v43, 16  ;;  %v243_v33 = vmax.bf16 %v3212_v22, %v3165_v14 }
  0x55   : > { %v2933_v48 = vcombine.low %v2522_v27, %v2523_v35  ;;  %v640_v49 = vrot.slane %v638_v46, 5  ;;  %v644_v50 = vrot.slane %v642_v47, 4  ;;  %v1611_v52 = vsel %vm3110_vm6, %v1609_v28, %v1610_v29 }
  0x56   : > { %v650_v53 = vrot.slane %v648_v39, 5  ;;  %v1612_v34 = vrot.slane %v1610_v29, 4  ;;  %v2031_v54 = vrot.slane %v642_v47, 5  ;;  %v2032_v55 = vrot.slane %v638_v46, 6 }
  0x57   : > { %2934 = vst [vmem:[%s3150_s15 + $0x20] sm:$0xff] %v2933_v48   ;;  %v641_v56 = vsel %vm3121_vm7, %v636_v40, %v640_v49  ;;  %v645_v57 = vor.u32 %v644_v50, %v640_v49  ;;  %v2038_v58 = vrot.slane %v2036_v13, 5  ;;  %v2039_v14 = vrot.slane %v648_v39, 6 }
  0x58   : > { %v1414_v59 = vmax.bf16 %v641_v56, %v3252_v12  ;;  %v1614_v51 = vsel %vm3110_vm6, %v1612_v34, %v1613_v30  ;;  %v2033_v60 = vor.u32 %v2032_v55, %v2031_v54  ;;  %v337_v62 = vmax.bf16 %v241_v41, %v3244_v23  ;;  %v3314_v12 = vld [vmem:[%s3039_s11 + $0x74] sm:$0xf] }
  0x59   : > { %v646_v63 = vrot.slane %v645_v57, 4  ;;  %v2040_v0 = vor.u32 %v2039_v14, %v2038_v58  ;;  %v338_v25 = vmax.bf16 %v242_v45, %v3247_v15  ;;  %v339_v38 = vmax.bf16 %v243_v33, %v3279_v21 }
  0x5a   : > { %v1897_v2 = vmax.bf16 %v1611_v52, %v1414_v59  ;;  %v2034_v3 = vsel %vm3134_vm8, %v2030_v37, %v2033_v60  ;;  %v2035_v31 = vrot.slane %v2033_v60, 4  ;;  %v433_v9 = vmax.bf16 %v337_v62, %v3307_v1 }
  0x5b   : > { %v651_v10 = vsel %vm3121_vm7, %v646_v63, %v650_v53  ;;  %v434_v6 = vmax.bf16 %v338_v25, %v3314_v12  ;;  %v3324_v8 = vmax.bf16 %v339_v38, %v3317_v7  ;;  %v244_v18 = vmax.bf16 %v3238_v4, %v3169_v11 }
  0x5c   : > { %v1415_v28 = vmax.bf16 %v651_v10, %v431_v32  ;;  %v2041_v36 = vsel %vm3134_vm8, %v2035_v31, %v2040_v0  ;;  %v2524_v20 = vmax.bf16 %v2034_v3, %v1897_v2  ;;  %v653_v19 = vshrl.u32 %v433_v9, 16 }
  0x5d   : > { %v656_v40 = vshll.u32 %v433_v9, 16  ;;  %v662_v24 = vshll.u32 %v434_v6, 16  ;;  %v666_v37 = vshrl.u32 %v434_v6, 16  ;;  %v672_v41 = vshll.u32 %v3324_v8, 16 }
  0x5e   : > { %v1898_v42 = vmax.bf16 %v1614_v51, %v1415_v28  ;;  %v655_v27 = vrot.slane %v653_v19, 4  ;;  %v676_v43 = vshrl.u32 %v3324_v8, 16  ;;  %v2724_v45 = vrot.slane %v433_v9, 9 }
  0x5f   : > { %v658_v35 = vrot.slane %v656_v40, 5  ;;  %v664_v46 = vrot.slane %v662_v24, 5  ;;  %v668_v47 = vrot.slane %v666_v37, 4  ;;  %v674_v11 = vrot.slane %v672_v41, 5 }
  0x60   : > { %v2525_v32 = vmax.bf16 %v2041_v36, %v1898_v42  ;;  %v678_v29 = vrot.slane %v676_v43, 4  ;;  %v1617_v39 = vrot.slane %v434_v6, 5  ;;  %v1620_v30 = vrot.slane %v3324_v8, 5 }
  0x61   : > { %v659_v13 = vor.u32 %v658_v35, %v655_v27  ;;  %v669_v33 = vor.u32 %v668_v47, %v664_v46  ;;  %v2042_v48 = vrot.slane %v653_v19, 5  ;;  %v2043_v49 = vrot.slane %v656_v40, 6  ;;  %v3353_v19 = vld [vmem:[%s3039_s11 + $0x7c] sm:$0x3]  ;;  %v3356_v40 = vld [vmem:[%s3039_s11 + $0x80] sm:$0xf] }
  0x62   : > { %v2935_v50 = vcombine.low %v2524_v20, %v2525_v32  ;;  %v1618_v52 = vsel %vm3110_vm6, %v2724_v45, %v1617_v39  ;;  %v1619_v53 = vrot.slane %v1617_v39, 4  ;;  %v2046_v34 = vrot.slane %v666_v37, 5 }
  0x63   : > { %v660_v54 = vrot.slane %v659_v13, 4  ;;  %v670_v55 = vrot.slane %v669_v33, 4  ;;  %v2044_v56 = vor.u32 %v2043_v49, %v2042_v48  ;;  %v2047_v57 = vrot.slane %v662_v24, 6  ;;  %v3363_v24 = vld [vmem:[%s3039_s11 + $0x84] sm:$0xf] }
  0x64   : > { %2936 = vst [vmem:[%s3150_s15 + $0x28] sm:$0xff] %v2935_v50   ;;  %v1621_v58 = vsel %vm3110_vm6, %v1619_v53, %v1620_v30  ;;  %v2051_v14 = vrot.slane %v676_v43, 5  ;;  %v2052_v59 = vrot.slane %v672_v41, 6  ;;  %v245_v51 = vmax.bf16 %v3244_v23, %v3200_v5 }
  0x65   : > { %v665_v60 = vsel %vm3121_vm7, %v660_v54, %v664_v46  ;;  %v675_v62 = vsel %vm3121_vm7, %v670_v55, %v674_v11  ;;  %v2045_v63 = vrot.slane %v2044_v56, 4  ;;  %v2048_v0 = vor.u32 %v2047_v57, %v2046_v34 }
  0x66   : > { %v1416_v25 = vmax.bf16 %v665_v60, %v433_v9  ;;  %v1417_v38 = vmax.bf16 %v675_v62, %v434_v6  ;;  %v3344_v2 = vor.u32 %v2052_v59, %v2051_v14  ;;  %v246_v3 = vmax.bf16 %v3247_v15, %v3209_v16 }
  0x67   : > { %v2049_v5 = vsel %vm3134_vm8, %v2045_v63, %v2048_v0  ;;  %v2050_v31 = vrot.slane %v2048_v0, 4  ;;  %v340_v10 = vmax.bf16 %v244_v18, %v3285_v26  ;;  %v341_v28 = vmax.bf16 %v245_v51, %v3307_v1 }
  0x68   : > { %v1899_v36 = vmax.bf16 %v1618_v52, %v1416_v25  ;;  %v1900_v20 = vmax.bf16 %v1621_v58, %v1417_v38  ;;  %v342_v9 = vmax.bf16 %v246_v3, %v3314_v12  ;;  %v679_v6 = vor.u32 %v678_v29, %v674_v11 }
  0x69   : > { %v2054_v16 = vsel %vm3134_vm8, %v2050_v31, %v3344_v2  ;;  %v436_v37 = vmax.bf16 %v340_v10, %v3353_v19  ;;  %v437_v18 = vmax.bf16 %v341_v28, %v3356_v40  ;;  %v1622_v41 = vrot.slane %v1620_v30, 4 }
  0x6a   : > { %v2526_v42 = vmax.bf16 %v2049_v5, %v1899_v36  ;;  %v2527_v27 = vmax.bf16 %v2054_v16, %v1900_v20  ;;  %v3368_v43 = vmax.bf16 %v342_v9, %v3363_v24  ;;  %v680_v45 = vrot.slane %v679_v6, 4 }
  0x6b   : > { %v682_v35 = vshll.u32 %v436_v37, 16  ;;  %v687_v46 = vshrl.u32 %v437_v18, 16  ;;  %v690_v47 = vshll.u32 %v437_v18, 16  ;;  %v1623_v11 = vrot.slane %v436_v37, 5 }
  0x6c   : > { %v2937_v32 = vcombine.low %v2526_v42, %v2527_v27  ;;  %v696_v29 = vshll.u32 %v3368_v43, 16  ;;  %v700_v39 = vshrl.u32 %v3368_v43, 16  ;;  %v2725_v13 = vrot.slane %v437_v18, 9 }
  0x6d   : > { %v684_v33 = vrot.slane %v682_v35, 5  ;;  %v689_v48 = vrot.slane %v687_v46, 4  ;;  %v692_v30 = vrot.slane %v690_v47, 5  ;;  %v1624_v49 = vsel %vm3110_vm6, %v1622_v41, %v1623_v11 }
  0x6e   : > { %2938 = vst [vmem:[%s3150_s15 + $0x30] sm:$0xff] %v2937_v32   ;;  %v698_v50 = vrot.slane %v696_v29, 5  ;;  %v702_v52 = vrot.slane %v700_v39, 4  ;;  %v1627_v53 = vrot.slane %v3368_v43, 5  ;;  %v2055_v34 = vrot.slane %v3344_v2, 4 }
  0x6f   : > { %v685_v54 = vsel %vm3121_vm7, %v680_v45, %v684_v33  ;;  %v693_v55 = vor.u32 %v692_v30, %v689_v48  ;;  %v2056_v56 = vshrl.u32 %v436_v37, 16  ;;  %v2059_v57 = vrot.slane %v682_v35, 6  ;;  %v3398_v45 = vld [vmem:[%s3039_s11 + $0x8c] sm:$0x3] }
  0x70   : > { %v1418_v58 = vmax.bf16 %v685_v54, %v3324_v8  ;;  %v1628_v14 = vsel %vm3110_vm6, %v2725_v13, %v1627_v53  ;;  %v2062_v59 = vrot.slane %v687_v46, 5  ;;  %v2063_v51 = vrot.slane %v690_v47, 6 }
  0x71   : > { %v694_v60 = vrot.slane %v693_v55, 4  ;;  %v2058_v62 = vrot.slane %v2056_v56, 5  ;;  %v2066_v63 = vrot.slane %v700_v39, 5  ;;  %v2067_v0 = vrot.slane %v696_v29, 6 }
  0x72   : > { %v1901_v25 = vmax.bf16 %v1624_v49, %v1418_v58  ;;  %v2064_v38 = vor.u32 %v2063_v51, %v2062_v59  ;;  %v247_v2 = vmax.bf16 %v3279_v21, %v3212_v22  ;;  %v248_v3 = vmax.bf16 %v3285_v26, %v3238_v4  ;;  %v3393_v22 = vld [vmem:[%s3039_s11 + $0x88] sm:$0xf] }
  0x73   : > { %v699_v8 = vsel %vm3121_vm7, %v694_v60, %v698_v50  ;;  %v2060_v5 = vor.u32 %v2059_v57, %v2058_v62  ;;  %v2068_v31 = vor.u32 %v2067_v0, %v2066_v63  ;;  %v703_v10 = vor.u32 %v702_v52, %v698_v50  ;;  %v3418_v60 = vld [vmem:[%s3039_s11 + $0x90] sm:$0xf] }
  0x74   : > { %v1419_v28 = vmax.bf16 %v699_v8, %v437_v18  ;;  %v2065_v36 = vrot.slane %v2064_v38, 4  ;;  %v343_v20 = vmax.bf16 %v247_v2, %v3317_v7  ;;  %v344_v9 = vmax.bf16 %v248_v3, %v3353_v19 }
  0x75   : > { %v2061_v6 = vsel %vm3134_vm8, %v2055_v34, %v2060_v5  ;;  %v704_v16 = vrot.slane %v703_v10, 4  ;;  %v1629_v4 = vrot.slane %v1627_v53, 4  ;;  %v2070_v37 = vrot.slane %v2068_v31, 4  ;;  %v3429_v5 = vld [vmem:[%s3039_s11 + $0x98] sm:$0xf] }
  0x76   : > { %v1902_v41 = vmax.bf16 %v1628_v14, %v1419_v28  ;;  %v2069_v42 = vsel %vm3134_vm8, %v2065_v36, %v2068_v31  ;;  %v2528_v27 = vmax.bf16 %v2061_v6, %v1901_v25  ;;  %v439_v18 = vmax.bf16 %v343_v20, %v3393_v22  ;;  %v3422_v25 = vld [vmem:[%s3039_s11 + $0x94] sm:$0xf] }
  0x77   : > { %v440_v35 = vmax.bf16 %v344_v9, %v3398_v45  ;;  %v249_v46 = vmax.bf16 %v3307_v1, %v3244_v23  ;;  %v250_v47 = vmax.bf16 %v3314_v12, %v3247_v15  ;;  %v251_v11 = vmax.bf16 %v3317_v7, %v3279_v21 }
  0x78   : > { %v2529_v32 = vmax.bf16 %v2069_v42, %v1902_v41  ;;  %v706_v29 = vshll.u32 %v439_v18, 16  ;;  %v710_v39 = vshrl.u32 %v439_v18, 16  ;;  %v1630_v13 = vrot.slane %v439_v18, 5 }
  0x79   : > { %v716_v33 = vshll.u32 %v440_v35, 16  ;;  %v1633_v48 = vrot.slane %v440_v35, 5  ;;  %v2076_v30 = vshrl.u32 %v440_v35, 16  ;;  %v345_v49 = vmax.bf16 %v249_v46, %v3356_v40 }
  0x7a   : > { %v2939_v50 = vcombine.low %v2528_v27, %v2529_v32  ;;  %v708_v52 = vrot.slane %v706_v29, 5  ;;  %v712_v23 = vrot.slane %v710_v39, 4  ;;  %v1631_v15 = vsel %vm3110_vm6, %v1629_v4, %v1630_v13 }
  0x7b   : > { %v718_v53 = vrot.slane %v716_v33, 5  ;;  %v1632_v21 = vrot.slane %v1630_v13, 4  ;;  %v2071_v34 = vrot.slane %v710_v39, 5  ;;  %v2072_v54 = vrot.slane %v706_v29, 6 }
  0x7c   : > { %2940 = vst [vmem:[%s3150_s15 + $0x38] sm:$0xff] %v2939_v50   ;;  %v709_v55 = vsel %vm3121_vm7, %v704_v16, %v708_v52  ;;  %v713_v56 = vor.u32 %v712_v23, %v708_v52  ;;  %v2078_v57 = vrot.slane %v2076_v30, 5  ;;  %v2079_v58 = vrot.slane %v716_v33, 6 }
  0x7d   : > { %v1420_v14 = vmax.bf16 %v709_v55, %v3368_v43  ;;  %v1634_v59 = vsel %vm3110_vm6, %v1632_v21, %v1633_v48  ;;  %v2073_v51 = vor.u32 %v2072_v54, %v2071_v34  ;;  %v346_v62 = vmax.bf16 %v250_v47, %v3363_v24 }
  0x7e   : > { %v714_v63 = vrot.slane %v713_v56, 4  ;;  %v2080_v0 = vor.u32 %v2079_v58, %v2078_v57  ;;  %v347_v38 = vmax.bf16 %v251_v11, %v3393_v22  ;;  %v441_v2 = vmax.bf16 %v345_v49, %v3418_v60 }
  0x7f   : > { %v1903_v3 = vmax.bf16 %v1631_v15, %v1420_v14  ;;  %v2074_v43 = vsel %vm3134_vm8, %v2070_v37, %v2073_v51  ;;  %v2075_v8 = vrot.slane %v2073_v51, 4  ;;  %v442_v31 = vmax.bf16 %v346_v62, %v3422_v25 }
  0x80   : > { %v719_v10 = vsel %vm3121_vm7, %v714_v63, %v718_v53  ;;  %v3435_v28 = vmax.bf16 %v347_v38, %v3429_v5  ;;  %v721_v36 = vshrl.u32 %v441_v2, 16  ;;  %v724_v20 = vshll.u32 %v441_v2, 16 }
  0x81   : > { %v1421_v9 = vmax.bf16 %v719_v10, %v439_v18  ;;  %v2081_v6 = vsel %vm3134_vm8, %v2075_v8, %v2080_v0  ;;  %v2530_v16 = vmax.bf16 %v2074_v43, %v1903_v3  ;;  %v730_v4 = vshll.u32 %v442_v31, 16 }
  0x82   : > { %v723_v37 = vrot.slane %v721_v36, 4  ;;  %v726_v41 = vrot.slane %v724_v20, 5  ;;  %v734_v42 = vshrl.u32 %v442_v31, 16  ;;  %v740_v27 = vshll.u32 %v3435_v28, 16 }
  0x83   : > { %v1904_v35 = vmax.bf16 %v1634_v59, %v1421_v9  ;;  %v732_v46 = vrot.slane %v730_v4, 5  ;;  %v744_v47 = vshrl.u32 %v3435_v28, 16  ;;  %v2726_v11 = vrot.slane %v441_v2, 9 }
  0x84   : > { %v727_v32 = vor.u32 %v726_v41, %v723_v37  ;;  %v736_v29 = vrot.slane %v734_v42, 4  ;;  %v742_v39 = vrot.slane %v740_v27, 5  ;;  %v1637_v13 = vrot.slane %v442_v31, 5  ;;  %v3471_v41 = vld [vmem:[%s3039_s11 + $0xa4] sm:$0xf] }
  0x85   : > { %v2531_v18 = vmax.bf16 %v2081_v6, %v1904_v35  ;;  %v746_v33 = vrot.slane %v744_v47, 4  ;;  %v1640_v48 = vrot.slane %v3435_v28, 5  ;;  %v2082_v30 = vrot.slane %v721_v36, 5 }
  0x86   : > { %v728_v49 = vrot.slane %v727_v32, 4  ;;  %v737_v50 = vor.u32 %v736_v29, %v732_v46  ;;  %v1638_v52 = vsel %vm3110_vm6, %v2726_v11, %v1637_v13  ;;  %v1639_v23 = vrot.slane %v1637_v13, 4 }
  0x87   : > { %v2941_v15 = vcombine.low %v2530_v16, %v2531_v18  ;;  %v2083_v53 = vrot.slane %v724_v20, 6  ;;  %v2086_v21 = vrot.slane %v734_v42, 5  ;;  %v2087_v34 = vrot.slane %v730_v4, 6  ;;  %v3466_v16 = vld [vmem:[%s3039_s11 + $0xa0] sm:$0xf] }
  0x88   : > { %v733_v54 = vsel %vm3121_vm7, %v728_v49, %v732_v46  ;;  %v738_v55 = vrot.slane %v737_v50, 4  ;;  %v1641_v56 = vsel %vm3110_vm6, %v1639_v23, %v1640_v48  ;;  %v2091_v57 = vrot.slane %v744_v47, 5 }
  0x89   : > { %2942 = vst [vmem:[%s3150_s15 + $0x40] sm:$0xff] %v2941_v15   ;;  %v1422_v58 = vmax.bf16 %v733_v54, %v441_v2  ;;  %v2084_v14 = vor.u32 %v2083_v53, %v2082_v30  ;;  %v2088_v59 = vor.u32 %v2087_v34, %v2086_v21  ;;  %v2092_v51 = vrot.slane %v740_v27, 6 }
  0x8a   : > { %v743_v62 = vsel %vm3121_vm7, %v738_v55, %v742_v39  ;;  %v252_v63 = vmax.bf16 %v3353_v19, %v3285_v26  ;;  %v253_v0 = vmax.bf16 %v3356_v40, %v3307_v1  ;;  %v254_v38 = vmax.bf16 %v3363_v24, %v3314_v12  ;;  %v3463_v1 = vld [vmem:[%s3039_s11 + $0x9c] sm:$0x3] }
  0x8b   : > { %v1423_v3 = vmax.bf16 %v743_v62, %v442_v31  ;;  %v1905_v2 = vmax.bf16 %v1638_v52, %v1422_v58  ;;  %v2085_v43 = vrot.slane %v2084_v14, 4  ;;  %v2090_v8 = vrot.slane %v2088_v59, 4 }
  0x8c   : > { %v2093_v10 = vor.u32 %v2092_v51, %v2091_v57  ;;  %v348_v36 = vmax.bf16 %v252_v63, %v3398_v45  ;;  %v349_v20 = vmax.bf16 %v253_v0, %v3418_v60  ;;  %v350_v9 = vmax.bf16 %v254_v38, %v3422_v25 }
  0x8d   : > { %v1906_v6 = vmax.bf16 %v1641_v56, %v1423_v3  ;;  %v2089_v26 = vsel %vm3134_vm8, %v2085_v43, %v2088_v59  ;;  %v747_v12 = vor.u32 %v746_v33, %v742_v39  ;;  %v1642_v31 = vrot.slane %v1640_v48, 4 }
  0x8e   : > { %v2094_v4 = vsel %vm3134_vm8, %v2090_v8, %v2093_v10  ;;  %v2532_v37 = vmax.bf16 %v2089_v26, %v1905_v2  ;;  %v444_v42 = vmax.bf16 %v348_v36, %v3463_v1  ;;  %v445_v27 = vmax.bf16 %v349_v20, %v3466_v16 }
  0x8f   : > { %v2533_v35 = vmax.bf16 %v2094_v4, %v1906_v6  ;;  %v3476_v46 = vmax.bf16 %v350_v9, %v3471_v41  ;;  %v748_v47 = vrot.slane %v747_v12, 4  ;;  %v2095_v11 = vrot.slane %v2093_v10, 4  ;;  %v3499_v12 = vld [vmem:[%s3039_s11 + $0xa8] sm:$0xf]  ;;  %v3503_v4 = vld [vmem:[%s3039_s11 + $0xac] sm:$0x3] }
  0x90   : > { %v750_v32 = vshll.u32 %v444_v42, 16  ;;  %v755_v29 = vshrl.u32 %v445_v27, 16  ;;  %v758_v39 = vshll.u32 %v445_v27, 16  ;;  %v1643_v13 = vrot.slane %v444_v42, 5 }
  0x91   : > { %v2943_v18 = vcombine.low %v2532_v37, %v2533_v35  ;;  %v764_v33 = vshll.u32 %v3476_v46, 16  ;;  %v768_v48 = vshrl.u32 %v3476_v46, 16  ;;  %v2727_v30 = vrot.slane %v445_v27, 9 }
  0x92   : > { %v752_v49 = vrot.slane %v750_v32, 5  ;;  %v757_v50 = vrot.slane %v755_v29, 4  ;;  %v760_v52 = vrot.slane %v758_v39, 5  ;;  %v1644_v23 = vsel %vm3110_vm6, %v1642_v31, %v1643_v13 }
  0x93   : > { %2944 = vst [vmem:[%s3150_s15 + $0x48] sm:$0xff] %v2943_v18   ;;  %v766_v15 = vrot.slane %v764_v33, 5  ;;  %v770_v53 = vrot.slane %v768_v48, 4  ;;  %v1647_v21 = vrot.slane %v3476_v46, 5  ;;  %v2096_v34 = vshrl.u32 %v444_v42, 16 }
  0x94   : > { %v753_v54 = vsel %vm3121_vm7, %v748_v47, %v752_v49  ;;  %v761_v55 = vor.u32 %v760_v52, %v757_v50  ;;  %v2099_v56 = vrot.slane %v750_v32, 6  ;;  %v2102_v57 = vrot.slane %v755_v29, 5 }
  0x95   : > { %v1424_v58 = vmax.bf16 %v753_v54, %v3435_v28  ;;  %v1648_v14 = vsel %vm3110_vm6, %v2727_v30, %v1647_v21  ;;  %v2098_v59 = vrot.slane %v2096_v34, 5  ;;  %v2103_v51 = vrot.slane %v758_v39, 6 }
  0x96   : > { %v762_v62 = vrot.slane %v761_v55, 4  ;;  %v2106_v63 = vrot.slane %v768_v48, 5  ;;  %v2107_v0 = vrot.slane %v764_v33, 6  ;;  %v255_v38 = vmax.bf16 %v3393_v22, %v3317_v7 }
  0x97   : > { %v1907_v3 = vmax.bf16 %v1644_v23, %v1424_v58  ;;  %v2100_v2 = vor.u32 %v2099_v56, %v2098_v59  ;;  %v2104_v43 = vor.u32 %v2103_v51, %v2102_v57  ;;  %v256_v8 = vmax.bf16 %v3398_v45, %v3353_v19 }
  0x98   : > { %v767_v28 = vsel %vm3121_vm7, %v762_v62, %v766_v15  ;;  %v2108_v10 = vor.u32 %v2107_v0, %v2106_v63  ;;  %v351_v36 = vmax.bf16 %v255_v38, %v3429_v5  ;;  %v771_v20 = vor.u32 %v770_v53, %v766_v15 }
  0x99   : > { %v1425_v9 = vmax.bf16 %v767_v28, %v445_v27  ;;  %v2101_v6 = vsel %vm3134_vm8, %v2095_v11, %v2100_v2  ;;  %v2105_v26 = vrot.slane %v2104_v43, 4  ;;  %v352_v7 = vmax.bf16 %v256_v8, %v3463_v1  ;;  %v3529_v43 = vld [vmem:[%s3039_s11 + $0xb0] sm:$0xf] }
  0x9a   : > { %v2534_v31 = vmax.bf16 %v2101_v6, %v1907_v3  ;;  %v447_v19 = vmax.bf16 %v351_v36, %v3499_v12  ;;  %v772_v37 = vrot.slane %v771_v20, 4  ;;  %v1649_v42 = vrot.slane %v1647_v21, 4  ;;  %v3539_v20 = vld [vmem:[%s3039_s11 + $0xb4] sm:$0xf] }
  0x9b   : > { %v1908_v35 = vmax.bf16 %v1648_v14, %v1425_v9  ;;  %v2109_v47 = vsel %vm3134_vm8, %v2105_v26, %v2108_v10  ;;  %v448_v27 = vmax.bf16 %v352_v7, %v3503_v4  ;;  %v2110_v32 = vrot.slane %v2108_v10, 4  ;;  %v3542_v9 = vld [vmem:[%s3039_s11 + $0xb8] sm:$0xf] }
  0x9c   : > { %v774_v11 = vshll.u32 %v447_v19, 16  ;;  %v778_v29 = vshrl.u32 %v447_v19, 16  ;;  %v1650_v39 = vrot.slane %v447_v19, 5  ;;  %v257_v13 = vmax.bf16 %v3418_v60, %v3356_v40 }
  0x9d   : > { %v2535_v18 = vmax.bf16 %v2109_v47, %v1908_v35  ;;  %v784_v33 = vshll.u32 %v448_v27, 16  ;;  %v1653_v48 = vrot.slane %v448_v27, 5  ;;  %v2116_v30 = vshrl.u32 %v448_v27, 16 }
  0x9e   : > { %v776_v49 = vrot.slane %v774_v11, 5  ;;  %v780_v50 = vrot.slane %v778_v29, 4  ;;  %v1651_v52 = vsel %vm3110_vm6, %v1649_v42, %v1650_v39  ;;  %v1652_v23 = vrot.slane %v1650_v39, 4 }
  0x9f   : > { %v2945_v15 = vcombine.low %v2534_v31, %v2535_v18  ;;  %v786_v53 = vrot.slane %v784_v33, 5  ;;  %v2111_v21 = vrot.slane %v778_v29, 5  ;;  %v2112_v34 = vrot.slane %v774_v11, 6 }
  0xa0   : > { %v777_v54 = vsel %vm3121_vm7, %v772_v37, %v776_v49  ;;  %v781_v55 = vor.u32 %v780_v50, %v776_v49  ;;  %v1654_v40 = vsel %vm3110_vm6, %v1652_v23, %v1653_v48  ;;  %v2118_v56 = vrot.slane %v2116_v30, 5 }
  0xa1   : > { %2946 = vst [vmem:[%s3150_s15 + $0x50] sm:$0xff] %v2945_v15   ;;  %v1426_v57 = vmax.bf16 %v777_v54, %v3476_v46  ;;  %v2113_v58 = vor.u32 %v2112_v34, %v2111_v21  ;;  %v2119_v14 = vrot.slane %v784_v33, 6  ;;  %v258_v59 = vmax.bf16 %v3422_v25, %v3363_v24 }
  0xa2   : > { %v782_v51 = vrot.slane %v781_v55, 4  ;;  %v259_v62 = vmax.bf16 %v3429_v5, %v3393_v22  ;;  %v353_v63 = vmax.bf16 %v257_v13, %v3466_v16  ;;  %v260_v0 = vmax.bf16 %v3463_v1, %v3398_v45 }
  0xa3   : > { %v1909_v38 = vmax.bf16 %v1651_v52, %v1426_v57  ;;  %v2114_v46 = vsel %vm3134_vm8, %v2110_v32, %v2113_v58  ;;  %v2115_v3 = vrot.slane %v2113_v58, 4  ;;  %v2120_v2 = vor.u32 %v2119_v14, %v2118_v56 }
  0xa4   : > { %v787_v24 = vsel %vm3121_vm7, %v782_v51, %v786_v53  ;;  %v354_v8 = vmax.bf16 %v258_v59, %v3471_v41  ;;  %v355_v22 = vmax.bf16 %v259_v62, %v3499_v12  ;;  %v449_v28 = vmax.bf16 %v353_v63, %v3529_v43 }
  0xa5   : > { %v1427_v10 = vmax.bf16 %v787_v24, %v447_v19  ;;  %v2121_v45 = vsel %vm3134_vm8, %v2115_v3, %v2120_v2  ;;  %v2536_v36 = vmax.bf16 %v2114_v46, %v1909_v38  ;;  %v261_v6 = vmax.bf16 %v3466_v16, %v3418_v60 }
  0xa6   : > { %v450_v26 = vmax.bf16 %v354_v8, %v3539_v20  ;;  %v3548_v7 = vmax.bf16 %v355_v22, %v3542_v9  ;;  %v789_v31 = vshrl.u32 %v449_v28, 16  ;;  %v792_v37 = vshll.u32 %v449_v28, 16 }
  0xa7   : > { %v1910_v42 = vmax.bf16 %v1654_v40, %v1427_v10  ;;  %v2728_v19 = vrot.slane %v449_v28, 9  ;;  %v262_v35 = vmax.bf16 %v3471_v41, %v3422_v25  ;;  %v356_v47 = vmax.bf16 %v260_v0, %v3503_v4  ;;  %v3564_v0 = vld [vmem:[%s3039_s11 + $0xbc] sm:$0x3] }
  0xa8   : > { %v791_v27 = vrot.slane %v789_v31, 4  ;;  %v794_v32 = vrot.slane %v792_v37, 5  ;;  %v798_v11 = vshll.u32 %v450_v26, 16  ;;  %v802_v29 = vshrl.u32 %v450_v26, 16 }
  0xa9   : > { %v2537_v39 = vmax.bf16 %v2121_v45, %v1910_v42  ;;  %v808_v60 = vshll.u32 %v3548_v7, 16  ;;  %v812_v13 = vshrl.u32 %v3548_v7, 16  ;;  %v1657_v18 = vrot.slane %v450_v26, 5 }
  0xaa   : > { %v795_v33 = vor.u32 %v794_v32, %v791_v27  ;;  %v800_v48 = vrot.slane %v798_v11, 5  ;;  %v804_v30 = vrot.slane %v802_v29, 4  ;;  %v1660_v49 = vrot.slane %v3548_v7, 5 }
  0xab   : > { %v2947_v50 = vcombine.low %v2536_v36, %v2537_v39  ;;  %v810_v25 = vrot.slane %v808_v60, 5  ;;  %v814_v52 = vrot.slane %v812_v13, 4  ;;  %v1658_v23 = vsel %vm3110_vm6, %v2728_v19, %v1657_v18  ;;  %v3577_v36 = vld [vmem:[%s3039_s11 + $0xc4] sm:$0xf] }
  0xac   : > { %v796_v15 = vrot.slane %v795_v33, 4  ;;  %v805_v53 = vor.u32 %v804_v30, %v800_v48  ;;  %v1659_v21 = vrot.slane %v1657_v18, 4  ;;  %v2122_v34 = vrot.slane %v789_v31, 5 }
  0xad   : > { %2948 = vst [vmem:[%s3150_s15 + $0x58] sm:$0xff] %v2947_v50   ;;  %v2123_v54 = vrot.slane %v792_v37, 6  ;;  %v2126_v55 = vrot.slane %v802_v29, 5  ;;  %v2127_v40 = vrot.slane %v798_v11, 6  ;;  %v2131_v56 = vrot.slane %v812_v13, 5 }
  0xae   : > { %v801_v57 = vsel %vm3121_vm7, %v796_v15, %v800_v48  ;;  %v806_v58 = vrot.slane %v805_v53, 4  ;;  %v1661_v14 = vsel %vm3110_vm6, %v1659_v21, %v1660_v49  ;;  %v2132_v59 = vrot.slane %v808_v60, 6 }
  0xaf   : > { %v1428_v51 = vmax.bf16 %v801_v57, %v449_v28  ;;  %v2124_v62 = vor.u32 %v2123_v54, %v2122_v34  ;;  %v2128_v63 = vor.u32 %v2127_v40, %v2126_v55  ;;  %v357_v38 = vmax.bf16 %v261_v6, %v3529_v43  ;;  %v3574_v28 = vld [vmem:[%s3039_s11 + $0xc0] sm:$0xf] }
  0xb0   : > { %v811_v46 = vsel %vm3121_vm7, %v806_v58, %v810_v25  ;;  %v3569_v3 = vor.u32 %v2132_v59, %v2131_v56  ;;  %v358_v2 = vmax.bf16 %v262_v35, %v3539_v20  ;;  %v452_v24 = vmax.bf16 %v356_v47, %v3564_v0 }
  0xb1   : > { %v1429_v8 = vmax.bf16 %v811_v46, %v450_v26  ;;  %v1911_v22 = vmax.bf16 %v1658_v23, %v1428_v51  ;;  %v2125_v10 = vrot.slane %v2124_v62, 4  ;;  %v2130_v45 = vrot.slane %v2128_v63, 4 }
  0xb2   : > { %v453_v31 = vmax.bf16 %v357_v38, %v3574_v28  ;;  %v3581_v6 = vmax.bf16 %v358_v2, %v3577_v36  ;;  %v815_v37 = vor.u32 %v814_v52, %v810_v25  ;;  %v818_v42 = vshll.u32 %v452_v24, 16 }
  0xb3   : > { %v1912_v19 = vmax.bf16 %v1661_v14, %v1429_v8  ;;  %v2129_v35 = vsel %vm3134_vm8, %v2125_v10, %v2128_v63  ;;  %v2134_v26 = vsel %vm3134_vm8, %v2130_v45, %v3569_v3  ;;  %v1662_v47 = vrot.slane %v1660_v49, 4 }
  0xb4   : > { %v2538_v27 = vmax.bf16 %v2129_v35, %v1911_v22  ;;  %v816_v32 = vrot.slane %v815_v37, 4  ;;  %v820_v11 = vrot.slane %v818_v42, 5  ;;  %v823_v29 = vshrl.u32 %v453_v31, 16 }
  0xb5   : > { %v2539_v39 = vmax.bf16 %v2134_v26, %v1912_v19  ;;  %v826_v60 = vshll.u32 %v453_v31, 16  ;;  %v832_v13 = vshll.u32 %v3581_v6, 16  ;;  %v836_v18 = vshrl.u32 %v3581_v6, 16 }
  0xb6   : > { %v821_v33 = vsel %vm3121_vm7, %v816_v32, %v820_v11  ;;  %v825_v48 = vrot.slane %v823_v29, 4  ;;  %v1663_v30 = vrot.slane %v452_v24, 5  ;;  %v2729_v50 = vrot.slane %v453_v31, 9 }
  0xb7   : > { %v2949_v25 = vcombine.low %v2538_v27, %v2539_v39  ;;  %v828_v52 = vrot.slane %v826_v60, 5  ;;  %v834_v49 = vrot.slane %v832_v13, 5  ;;  %v838_v23 = vrot.slane %v836_v18, 4 }
  0xb8   : > { %v1430_v15 = vmax.bf16 %v821_v33, %v3548_v7  ;;  %v1664_v53 = vsel %vm3110_vm6, %v1662_v47, %v1663_v30  ;;  %v1667_v21 = vrot.slane %v3581_v6, 5  ;;  %v2135_v34 = vrot.slane %v3569_v3, 4 }
  0xb9   : > { %2950 = vst [vmem:[%s3150_s15 + $0x60] sm:$0xff] %v2949_v25   ;;  %v829_v54 = vor.u32 %v828_v52, %v825_v48  ;;  %v2136_v55 = vshrl.u32 %v452_v24, 16  ;;  %v2139_v40 = vrot.slane %v818_v42, 6  ;;  %v2142_v56 = vrot.slane %v823_v29, 5  ;;  %v3608_v42 = vld [vmem:[%s3039_s11 + $0xc8] sm:$0xf] }
  0xba   : > { %v1668_v57 = vsel %vm3110_vm6, %v2729_v50, %v1667_v21  ;;  %v1913_v58 = vmax.bf16 %v1664_v53, %v1430_v15  ;;  %v2143_v14 = vrot.slane %v826_v60, 6  ;;  %v2146_v59 = vrot.slane %v836_v18, 5 }
  0xbb   : > { %v830_v7 = vrot.slane %v829_v54, 4  ;;  %v2138_v51 = vrot.slane %v2136_v55, 5  ;;  %v2147_v62 = vrot.slane %v832_v13, 6  ;;  %v263_v63 = vmax.bf16 %v3499_v12, %v3429_v5 }
  0xbc   : > { %v2144_v38 = vor.u32 %v2143_v14, %v2142_v56  ;;  %v264_v46 = vmax.bf16 %v3503_v4, %v3463_v1  ;;  %v839_v3 = vor.u32 %v838_v23, %v834_v49  ;;  %v1669_v2 = vrot.slane %v1667_v21, 4  ;;  %v3614_v1 = vld [vmem:[%s3039_s11 + $0xcc] sm:$0x3] }
  0xbd   : > { %v835_v24 = vsel %vm3121_vm7, %v830_v7, %v834_v49  ;;  %v2140_v8 = vor.u32 %v2139_v40, %v2138_v51  ;;  %v2148_v22 = vor.u32 %v2147_v62, %v2146_v59  ;;  %v359_v10 = vmax.bf16 %v263_v63, %v3542_v9 }
  0xbe   : > { %v1431_v45 = vmax.bf16 %v835_v24, %v453_v31  ;;  %v2145_v37 = vrot.slane %v2144_v38, 4  ;;  %v360_v19 = vmax.bf16 %v264_v46, %v3564_v0  ;;  %v840_v5 = vrot.slane %v839_v3, 4  ;;  %v3641_v46 = vld [vmem:[%s3039_s11 + $0xd0] sm:$0xf]  ;;  %v3644_v3 = vld [vmem:[%s3039_s11 + $0xd4] sm:$0xf] }
  0xbf   : > { %v2141_v35 = vsel %vm3134_vm8, %v2135_v34, %v2140_v8  ;;  %v455_v26 = vmax.bf16 %v359_v10, %v3608_v42  ;;  %v2150_v47 = vrot.slane %v2148_v22, 4  ;;  %v265_v27 = vmax.bf16 %v3529_v43, %v3466_v16 }
  0xc0   : > { %v1914_v32 = vmax.bf16 %v1668_v57, %v1431_v45  ;;  %v2149_v31 = vsel %vm3134_vm8, %v2145_v37, %v2148_v22  ;;  %v2540_v11 = vmax.bf16 %v2141_v35, %v1913_v58  ;;  %v456_v29 = vmax.bf16 %v360_v19, %v3614_v1  ;;  %v3654_v45 = vld [vmem:[%s3039_s11 + $0xd8] sm:$0xf] }
  0xc1   : > { %v842_v39 = vshll.u32 %v455_v26, 16  ;;  %v846_v60 = vshrl.u32 %v455_v26, 16  ;;  %v1670_v13 = vrot.slane %v455_v26, 5  ;;  %v266_v18 = vmax.bf16 %v3539_v20, %v3471_v41 }
  0xc2   : > { %v2541_v33 = vmax.bf16 %v2149_v31, %v1914_v32  ;;  %v852_v48 = vshll.u32 %v456_v29, 16  ;;  %v1673_v30 = vrot.slane %v456_v29, 5  ;;  %v2156_v50 = vshrl.u32 %v456_v29, 16 }
  0xc3   : > { %v844_v25 = vrot.slane %v842_v39, 5  ;;  %v848_v16 = vrot.slane %v846_v60, 4  ;;  %v1671_v52 = vsel %vm3110_vm6, %v1669_v2, %v1670_v13  ;;  %v1672_v49 = vrot.slane %v1670_v13, 4 }
  0xc4   : > { %v2951_v23 = vcombine.low %v2540_v11, %v2541_v33  ;;  %v854_v15 = vrot.slane %v852_v48, 5  ;;  %v2151_v53 = vrot.slane %v846_v60, 5  ;;  %v2152_v21 = vrot.slane %v842_v39, 6 }
  0xc5   : > { %v845_v34 = vsel %vm3121_vm7, %v840_v5, %v844_v25  ;;  %v849_v54 = vor.u32 %v848_v16, %v844_v25  ;;  %v1674_v41 = vsel %vm3110_vm6, %v1672_v49, %v1673_v30  ;;  %v2158_v55 = vrot.slane %v2156_v50, 5 }
  0xc6   : > { %2952 = vst [vmem:[%s3150_s15 + $0x68] sm:$0xff] %v2951_v23   ;;  %v1432_v40 = vmax.bf16 %v845_v34, %v3581_v6  ;;  %v2153_v56 = vor.u32 %v2152_v21, %v2151_v53  ;;  %v2159_v57 = vrot.slane %v852_v48, 6  ;;  %v267_v58 = vmax.bf16 %v3542_v9, %v3499_v12 }
  0xc7   : > { %v850_v14 = vrot.slane %v849_v54, 4  ;;  %v361_v59 = vmax.bf16 %v265_v27, %v3574_v28  ;;  %v362_v7 = vmax.bf16 %v266_v18, %v3577_v36  ;;  %v268_v51 = vmax.bf16 %v3564_v0, %v3503_v4 }
  0xc8   : > { %v1915_v62 = vmax.bf16 %v1671_v52, %v1432_v40  ;;  %v2154_v63 = vsel %vm3134_vm8, %v2150_v47, %v2153_v56  ;;  %v2155_v38 = vrot.slane %v2153_v56, 4  ;;  %v2160_v6 = vor.u32 %v2159_v57, %v2158_v55 }
  0xc9   : > { %v855_v12 = vsel %vm3121_vm7, %v850_v14, %v854_v15  ;;  %v363_v2 = vmax.bf16 %v267_v58, %v3608_v42  ;;  %v457_v24 = vmax.bf16 %v361_v59, %v3641_v46  ;;  %v458_v8 = vmax.bf16 %v362_v7, %v3644_v3 }
  0xca   : > { %v1433_v4 = vmax.bf16 %v855_v12, %v455_v26  ;;  %v2161_v22 = vsel %vm3134_vm8, %v2155_v38, %v2160_v6  ;;  %v2542_v10 = vmax.bf16 %v2154_v63, %v1915_v62  ;;  %v269_v37 = vmax.bf16 %v3574_v28, %v3529_v43  ;;  %v3679_v12 = vld [vmem:[%s3039_s11 + $0xdc] sm:$0x3] }
  0xcb   : > { %v3659_v19 = vmax.bf16 %v363_v2, %v3654_v45  ;;  %v857_v5 = vshrl.u32 %v457_v24, 16  ;;  %v860_v35 = vshll.u32 %v457_v24, 16  ;;  %v866_v47 = vshll.u32 %v458_v8, 16 }
  0xcc   : > { %v1916_v27 = vmax.bf16 %v1674_v41, %v1433_v4  ;;  %v870_v32 = vshrl.u32 %v458_v8, 16  ;;  %v2730_v31 = vrot.slane %v457_v24, 9  ;;  %v1677_v11 = vrot.slane %v458_v8, 5 }
  0xcd   : > { %v859_v26 = vrot.slane %v857_v5, 4  ;;  %v862_v29 = vrot.slane %v860_v35, 5  ;;  %v868_v39 = vrot.slane %v866_v47, 5  ;;  %v876_v60 = vshll.u32 %v3659_v19, 16 }
  0xce   : > { %v2543_v13 = vmax.bf16 %v2161_v22, %v1916_v27  ;;  %v872_v18 = vrot.slane %v870_v32, 4  ;;  %v880_v43 = vshrl.u32 %v3659_v19, 16  ;;  %v1678_v33 = vsel %vm3110_vm6, %v2730_v31, %v1677_v11 }
  0xcf   : > { %v863_v48 = vor.u32 %v862_v29, %v859_v26  ;;  %v878_v30 = vrot.slane %v876_v60, 5  ;;  %v1679_v50 = vrot.slane %v1677_v11, 4  ;;  %v1680_v25 = vrot.slane %v3659_v19, 5 }
  0xd0   : > { %v2953_v16 = vcombine.low %v2542_v10, %v2543_v13  ;;  %v873_v52 = vor.u32 %v872_v18, %v868_v39  ;;  %v882_v49 = vrot.slane %v880_v43, 4  ;;  %v2162_v23 = vrot.slane %v857_v5, 5 }
  0xd1   : > { %v864_v15 = vrot.slane %v863_v48, 4  ;;  %v1681_v53 = vsel %vm3110_vm6, %v1679_v50, %v1680_v25  ;;  %v2163_v21 = vrot.slane %v860_v35, 6  ;;  %v2166_v34 = vrot.slane %v870_v32, 5 }
  0xd2   : > { %2954 = vst [vmem:[%s3150_s15 + $0x70] sm:$0xff] %v2953_v16   ;;  %v874_v54 = vrot.slane %v873_v52, 4  ;;  %v2167_v41 = vrot.slane %v866_v47, 6  ;;  %v2171_v55 = vrot.slane %v880_v43, 5  ;;  %v2172_v40 = vrot.slane %v876_v60, 6 }
  0xd3   : > { %v869_v56 = vsel %vm3121_vm7, %v864_v15, %v868_v39  ;;  %v2164_v57 = vor.u32 %v2163_v21, %v2162_v23  ;;  %v270_v58 = vmax.bf16 %v3577_v36, %v3539_v20  ;;  %v364_v14 = vmax.bf16 %v268_v51, %v3614_v1  ;;  %v3684_v20 = vld [vmem:[%s3039_s11 + $0xe0] sm:$0xf]  ;;  %v3687_v51 = vld [vmem:[%s3039_s11 + $0xe4] sm:$0xf] }
  0xd4   : > { %v879_v59 = vsel %vm3121_vm7, %v874_v54, %v878_v30  ;;  %v1434_v7 = vmax.bf16 %v869_v56, %v457_v24  ;;  %v2168_v62 = vor.u32 %v2167_v41, %v2166_v34  ;;  %v3676_v63 = vor.u32 %v2172_v40, %v2171_v55 }
  0xd5   : > { %v1435_v38 = vmax.bf16 %v879_v59, %v458_v8  ;;  %v2165_v6 = vrot.slane %v2164_v57, 4  ;;  %v365_v2 = vmax.bf16 %v269_v37, %v3641_v46  ;;  %v366_v4 = vmax.bf16 %v270_v58, %v3644_v3 }
  0xd6   : > { %v1917_v22 = vmax.bf16 %v1678_v33, %v1434_v7  ;;  %v2170_v10 = vrot.slane %v2168_v62, 4  ;;  %v460_v5 = vmax.bf16 %v364_v14, %v3679_v12  ;;  %v883_v24 = vor.u32 %v882_v49, %v878_v30 }
  0xd7   : > { %v1918_v35 = vmax.bf16 %v1681_v53, %v1435_v38  ;;  %v2169_v8 = vsel %vm3134_vm8, %v2165_v6, %v2168_v62  ;;  %v461_v47 = vmax.bf16 %v365_v2, %v3684_v20  ;;  %v3694_v27 = vmax.bf16 %v366_v4, %v3687_v51 }
  0xd8   : > { %v2174_v37 = vsel %vm3134_vm8, %v2170_v10, %v3676_v63  ;;  %v2544_v32 = vmax.bf16 %v2169_v8, %v1917_v22  ;;  %v884_v31 = vrot.slane %v883_v24, 4  ;;  %v886_v11 = vshll.u32 %v460_v5, 16 }
  0xd9   : > { %v2545_v26 = vmax.bf16 %v2174_v37, %v1918_v35  ;;  %v891_v29 = vshrl.u32 %v461_v47, 16  ;;  %v894_v39 = vshll.u32 %v461_v47, 16  ;;  %v900_v60 = vshll.u32 %v3694_v27, 16 }
  0xda   : > { %v888_v13 = vrot.slane %v886_v11, 5  ;;  %v904_v18 = vshrl.u32 %v3694_v27, 16  ;;  %v1682_v43 = vrot.slane %v1680_v25, 4  ;;  %v1683_v33 = vrot.slane %v460_v5, 5 }
  0xdb   : > { %v2955_v48 = vcombine.low %v2544_v32, %v2545_v26  ;;  %v893_v30 = vrot.slane %v891_v29, 4  ;;  %v896_v50 = vrot.slane %v894_v39, 5  ;;  %v902_v16 = vrot.slane %v900_v60, 5 }
  0xdc   : > { %v889_v52 = vsel %vm3121_vm7, %v884_v31, %v888_v13  ;;  %v906_v49 = vrot.slane %v904_v18, 4  ;;  %v1684_v23 = vsel %vm3110_vm6, %v1682_v43, %v1683_v33  ;;  %v2731_v15 = vrot.slane %v461_v47, 9  ;;  %v3726_v31 = vld [vmem:[%s3039_s11 + $0xe8] sm:$0xf] }
  0xdd   : > { %2956 = vst [vmem:[%s3150_s15 + $0x78] sm:$0xff] %v2955_v48   ;;  %v897_v53 = vor.u32 %v896_v50, %v893_v30  ;;  %v1436_v21 = vmax.bf16 %v889_v52, %v3659_v19  ;;  %v1687_v34 = vrot.slane %v3694_v27, 5  ;;  %v2175_v25 = vrot.slane %v3676_v63, 4 }
  0xde   : > { %v2176_v54 = vshrl.u32 %v460_v5, 16  ;;  %v2179_v41 = vrot.slane %v886_v11, 6  ;;  %v2182_v55 = vrot.slane %v891_v29, 5  ;;  %v2183_v40 = vrot.slane %v894_v39, 6 }
  0xdf   : > { %v898_v56 = vrot.slane %v897_v53, 4  ;;  %v1688_v57 = vsel %vm3110_vm6, %v2731_v15, %v1687_v34  ;;  %v1919_v58 = vmax.bf16 %v1684_v23, %v1436_v21  ;;  %v2186_v14 = vrot.slane %v904_v18, 5 }
  0xe0   : > { %v2178_v59 = vrot.slane %v2176_v54, 5  ;;  %v2184_v7 = vor.u32 %v2183_v40, %v2182_v55  ;;  %v2187_v62 = vrot.slane %v900_v60, 6  ;;  %v271_v19 = vmax.bf16 %v3608_v42, %v3542_v9 }
  0xe1   : > { %v903_v63 = vsel %vm3121_vm7, %v898_v56, %v902_v16  ;;  %v272_v38 = vmax.bf16 %v3614_v1, %v3564_v0  ;;  %v907_v6 = vor.u32 %v906_v49, %v902_v16  ;;  %v1689_v2 = vrot.slane %v1687_v34, 4  ;;  %v3747_v56 = vld [vmem:[%s3039_s11 + $0xf0] sm:$0xf] }
  0xe2   : > { %v1437_v4 = vmax.bf16 %v903_v63, %v461_v47  ;;  %v2180_v22 = vor.u32 %v2179_v41, %v2178_v59  ;;  %v2185_v10 = vrot.slane %v2184_v7, 4  ;;  %v2188_v5 = vor.u32 %v2187_v62, %v2186_v14  ;;  %v3729_v47 = vld [vmem:[%s3039_s11 + $0xec] sm:$0x3]  ;;  %v3754_v7 = vld [vmem:[%s3039_s11 + $0xf4] sm:$0xf] }
  0xe3   : > { %v367_v24 = vmax.bf16 %v271_v19, %v3654_v45  ;;  %v368_v35 = vmax.bf16 %v272_v38, %v3679_v12  ;;  %v908_v8 = vrot.slane %v907_v6, 4  ;;  %v273_v9 = vmax.bf16 %v3641_v46, %v3574_v28  ;;  %v3757_v62 = vld [vmem:[%s3039_s11 + $0xf8] sm:$0xf] }
  0xe4   : > { %v1920_v37 = vmax.bf16 %v1688_v57, %v1437_v4  ;;  %v2181_v32 = vsel %vm3134_vm8, %v2175_v25, %v2180_v22  ;;  %v2189_v0 = vsel %vm3134_vm8, %v2185_v10, %v2188_v5  ;;  %v2190_v11 = vrot.slane %v2188_v5, 4 }
  0xe5   : > { %v2546_v26 = vmax.bf16 %v2181_v32, %v1919_v58  ;;  %v463_v29 = vmax.bf16 %v367_v24, %v3726_v31  ;;  %v464_v39 = vmax.bf16 %v368_v35, %v3729_v47  ;;  %v274_v28 = vmax.bf16 %v3644_v3, %v3577_v36 }
  0xe6   : > { %v2547_v60 = vmax.bf16 %v2189_v0, %v1920_v37  ;;  %v275_v13 = vmax.bf16 %v3654_v45, %v3608_v42  ;;  %v369_v18 = vmax.bf16 %v273_v9, %v3684_v20  ;;  %v276_v43 = vmax.bf16 %v3679_v12, %v3614_v1 }
  0xe7   : > { %v910_v33 = vshll.u32 %v463_v29, 16  ;;  %v914_v48 = vshrl.u32 %v463_v29, 16  ;;  %v920_v30 = vshll.u32 %v464_v39, 16  ;;  %v1690_v50 = vrot.slane %v463_v29, 5 }
  0xe8   : > { %v2957_v16 = vcombine.low %v2546_v26, %v2547_v60  ;;  %v1693_v52 = vrot.slane %v464_v39, 5  ;;  %v2196_v49 = vshrl.u32 %v464_v39, 16  ;;  %v370_v36 = vmax.bf16 %v274_v28, %v3687_v51 }
  0xe9   : > { %v912_v23 = vrot.slane %v910_v33, 5  ;;  %v916_v15 = vrot.slane %v914_v48, 4  ;;  %v922_v53 = vrot.slane %v920_v30, 5  ;;  %v1691_v42 = vsel %vm3110_vm6, %v1689_v2, %v1690_v50 }
  0xea   : > { %2958 = vst [vmem:[%s3150_s15 + $0x80] sm:$0xff] %v2957_v16   ;;  %v1692_v21 = vrot.slane %v1690_v50, 4  ;;  %v2191_v34 = vrot.slane %v914_v48, 5  ;;  %v2192_v25 = vrot.slane %v910_v33, 6  ;;  %v2198_v54 = vrot.slane %v2196_v49, 5 }
  0xeb   : > { %v913_v41 = vsel %vm3121_vm7, %v908_v8, %v912_v23  ;;  %v917_v55 = vor.u32 %v916_v15, %v912_v23  ;;  %v2199_v40 = vrot.slane %v920_v30, 6  ;;  %v371_v57 = vmax.bf16 %v275_v13, %v3726_v31 }
  0xec   : > { %v1438_v58 = vmax.bf16 %v913_v41, %v3694_v27  ;;  %v1694_v14 = vsel %vm3110_vm6, %v1692_v21, %v1693_v52  ;;  %v2193_v59 = vor.u32 %v2192_v25, %v2191_v34  ;;  %v465_v19 = vmax.bf16 %v369_v18, %v3747_v56 }
  0xed   : > { %v918_v63 = vrot.slane %v917_v55, 4  ;;  %v2200_v38 = vor.u32 %v2199_v40, %v2198_v54  ;;  %v466_v6 = vmax.bf16 %v370_v36, %v3754_v7  ;;  %v3762_v2 = vmax.bf16 %v371_v57, %v3757_v62 }
  0xee   : > { %v1921_v4 = vmax.bf16 %v1691_v42, %v1438_v58  ;;  %v2194_v27 = vsel %vm3134_vm8, %v2190_v11, %v2193_v59  ;;  %v2195_v22 = vrot.slane %v2193_v59, 4  ;;  %v925_v10 = vshrl.u32 %v465_v19, 16 }
  0xef   : > { %v923_v5 = vsel %vm3121_vm7, %v918_v63, %v922_v53  ;;  %v928_v24 = vshll.u32 %v465_v19, 16  ;;  %v934_v35 = vshll.u32 %v466_v6, 16  ;;  %v938_v8 = vshrl.u32 %v466_v6, 16 }
  0xf0   : > { %v1439_v9 = vmax.bf16 %v923_v5, %v463_v29  ;;  %v2201_v37 = vsel %vm3134_vm8, %v2195_v22, %v2200_v38  ;;  %v2548_v32 = vmax.bf16 %v2194_v27, %v1921_v4  ;;  %v927_v0 = vrot.slane %v925_v10, 4 }
  0xf1   : > { %v930_v26 = vrot.slane %v928_v24, 5  ;;  %v936_v39 = vrot.slane %v934_v35, 5  ;;  %v940_v28 = vrot.slane %v938_v8, 4  ;;  %v944_v60 = vshll.u32 %v3762_v2, 16 }
  0xf2   : > { %v1922_v11 = vmax.bf16 %v1694_v14, %v1439_v9  ;;  %v948_v13 = vshrl.u32 %v3762_v2, 16  ;;  %v2732_v18 = vrot.slane %v465_v19, 9  ;;  %v1697_v33 = vrot.slane %v466_v6, 5 }
  0xf3   : > { %v931_v48 = vor.u32 %v930_v26, %v927_v0  ;;  %v941_v30 = vor.u32 %v940_v28, %v936_v39  ;;  %v946_v50 = vrot.slane %v944_v60, 5  ;;  %v1700_v29 = vrot.slane %v3762_v2, 5 }
  0xf4   : > { %v2549_v16 = vmax.bf16 %v2201_v37, %v1922_v11  ;;  %v950_v52 = vrot.slane %v948_v13, 4  ;;  %v1698_v49 = vsel %vm3110_vm6, %v2732_v18, %v1697_v33  ;;  %v1699_v36 = vrot.slane %v1697_v33, 4  ;;  %v3804_v37 = vld [vmem:[%s3039_s11 + $0x104] sm:$0xf] }
  0xf5   : > { %v932_v23 = vrot.slane %v931_v48, 4  ;;  %v942_v15 = vrot.slane %v941_v30, 4  ;;  %v2202_v53 = vrot.slane %v925_v10, 5  ;;  %v2203_v42 = vrot.slane %v928_v24, 6  ;;  %v3791_v24 = vld [vmem:[%s3039_s11 + $0xfc] sm:$0x3] }
  0xf6   : > { %v2959_v21 = vcombine.low %v2548_v32, %v2549_v16  ;;  %v1701_v34 = vsel %vm3110_vm6, %v1699_v36, %v1700_v29  ;;  %v2206_v25 = vrot.slane %v938_v8, 5  ;;  %v2207_v54 = vrot.slane %v934_v35, 6 }
  0xf7   : > { %v937_v41 = vsel %vm3121_vm7, %v932_v23, %v936_v39  ;;  %v947_v55 = vsel %vm3121_vm7, %v942_v15, %v946_v50  ;;  %v2204_v40 = vor.u32 %v2203_v42, %v2202_v53  ;;  %v2211_v57 = vrot.slane %v948_v13, 5 }
  0xf8   : > { %2960 = vst [vmem:[%s3150_s15 + $0x88] sm:$0xff] %v2959_v21   ;;  %v1440_v58 = vmax.bf16 %v937_v41, %v465_v19  ;;  %v1441_v14 = vmax.bf16 %v947_v55, %v466_v6  ;;  %v2208_v59 = vor.u32 %v2207_v54, %v2206_v25  ;;  %v2212_v63 = vrot.slane %v944_v60, 6 }
  0xf9   : > { %v2205_v38 = vrot.slane %v2204_v40, 4  ;;  %v277_v4 = vmax.bf16 %v3684_v20, %v3641_v46  ;;  %v278_v27 = vmax.bf16 %v3687_v51, %v3644_v3  ;;  %v372_v22 = vmax.bf16 %v276_v43, %v3729_v47  ;;  %v3801_v43 = vld [vmem:[%s3039_s11 + $0x100] sm:$0xf] }
  0xfa   : > { %v1923_v10 = vmax.bf16 %v1698_v49, %v1440_v58  ;;  %v1924_v5 = vmax.bf16 %v1701_v34, %v1441_v14  ;;  %v2210_v19 = vrot.slane %v2208_v59, 4  ;;  %v2213_v6 = vor.u32 %v2212_v63, %v2211_v57 }
  0xfb   : > { %v2209_v35 = vsel %vm3134_vm8, %v2205_v38, %v2208_v59  ;;  %v373_v8 = vmax.bf16 %v277_v4, %v3747_v56  ;;  %v374_v46 = vmax.bf16 %v278_v27, %v3754_v7  ;;  %v468_v3 = vmax.bf16 %v372_v22, %v3791_v24 }
  0xfc   : > { %v2214_v9 = vsel %vm3134_vm8, %v2210_v19, %v2213_v6  ;;  %v2550_v1 = vmax.bf16 %v2209_v35, %v1923_v10  ;;  %v951_v32 = vor.u32 %v950_v52, %v946_v50  ;;  %v1702_v0 = vrot.slane %v1700_v29, 4 }
  0xfd   : > { %v2551_v26 = vmax.bf16 %v2214_v9, %v1924_v5  ;;  %v469_v39 = vmax.bf16 %v373_v8, %v3801_v43  ;;  %v3808_v28 = vmax.bf16 %v374_v46, %v3804_v37  ;;  %v954_v60 = vshll.u32 %v468_v3, 16 }
  0xfe   : > { %v952_v11 = vrot.slane %v951_v32, 4  ;;  %v1703_v13 = vrot.slane %v468_v3, 5  ;;  %v2215_v18 = vrot.slane %v2213_v6, 4  ;;  %v2216_v33 = vshrl.u32 %v468_v3, 16 }
  0xff   : > { %v2961_v48 = vcombine.low %v2550_v1, %v2551_v26  ;;  %v956_v30 = vrot.slane %v954_v60, 5  ;;  %v959_v16 = vshrl.u32 %v469_v39, 16  ;;  %v962_v49 = vshll.u32 %v469_v39, 16  ;;  %v3832_v1 = vld [vmem:[%s3039_s11 + $0x108] sm:$0xf] }
 0x100   : > { %v968_v36 = vshll.u32 %v3808_v28, 16  ;;  %v972_v50 = vshrl.u32 %v3808_v28, 16  ;;  %v1704_v29 = vsel %vm3110_vm6, %v1702_v0, %v1703_v13  ;;  %v2733_v52 = vrot.slane %v469_v39, 9 }
 0x101   : > { %2962 = vst [vmem:[%s3150_s15 + $0x90] sm:$0xff] %v2961_v48   ;;  %v957_v23 = vsel %vm3121_vm7, %v952_v11, %v956_v30  ;;  %v961_v15 = vrot.slane %v959_v16, 4  ;;  %v964_v53 = vrot.slane %v962_v49, 5  ;;  %v1707_v42 = vrot.slane %v3808_v28, 5 }
 0x102   : > { %v970_v21 = vrot.slane %v968_v36, 5  ;;  %v974_v34 = vrot.slane %v972_v50, 4  ;;  %v1442_v25 = vmax.bf16 %v957_v23, %v3762_v2  ;;  %v2218_v54 = vrot.slane %v2216_v33, 5 }
 0x103   : > { %v965_v41 = vor.u32 %v964_v53, %v961_v15  ;;  %v1708_v55 = vsel %vm3110_vm6, %v2733_v52, %v1707_v42  ;;  %v2219_v40 = vrot.slane %v954_v60, 6  ;;  %v2222_v57 = vrot.slane %v959_v16, 5 }
 0x104   : > { %v1925_v58 = vmax.bf16 %v1704_v29, %v1442_v25  ;;  %v2223_v14 = vrot.slane %v962_v49, 6  ;;  %v2226_v59 = vrot.slane %v972_v50, 5  ;;  %v2227_v63 = vrot.slane %v968_v36, 6 }
 0x105   : > { %v966_v38 = vrot.slane %v965_v41, 4  ;;  %v2220_v4 = vor.u32 %v2219_v40, %v2218_v54  ;;  %v279_v27 = vmax.bf16 %v3726_v31, %v3654_v45  ;;  %v280_v2 = vmax.bf16 %v3729_v47, %v3679_v12  ;;  %v3835_v12 = vld [vmem:[%s3039_s11 + $0x10c] sm:$0x3] }
 0x106   : > { %v2224_v22 = vor.u32 %v2223_v14, %v2222_v57  ;;  %v2228_v10 = vor.u32 %v2227_v63, %v2226_v59  ;;  %v975_v5 = vor.u32 %v974_v34, %v970_v21  ;;  %v1709_v19 = vrot.slane %v1707_v42, 4 }
 0x107   : > { %v971_v6 = vsel %vm3121_vm7, %v966_v38, %v970_v21  ;;  %v2221_v35 = vsel %vm3134_vm8, %v2215_v18, %v2220_v4  ;;  %v375_v8 = vmax.bf16 %v279_v27, %v3757_v62  ;;  %v376_v46 = vmax.bf16 %v280_v2, %v3791_v24  ;;  %v3861_v38 = vld [vmem:[%s3039_s11 + $0x114] sm:$0xf] }
 0x108   : > { %v1443_v3 = vmax.bf16 %v971_v6, %v469_v39  ;;  %v2225_v9 = vrot.slane %v2224_v22, 4  ;;  %v2552_v45 = vmax.bf16 %v2221_v35, %v1925_v58  ;;  %v976_v32 = vrot.slane %v975_v5, 4  ;;  %v3857_v58 = vld [vmem:[%s3039_s11 + $0x110] sm:$0xf] }
 0x109   : > { %v471_v0 = vmax.bf16 %v375_v8, %v3832_v1  ;;  %v472_v26 = vmax.bf16 %v376_v46, %v3835_v12  ;;  %v2230_v60 = vrot.slane %v2228_v10, 4  ;;  %v281_v11 = vmax.bf16 %v3747_v56, %v3684_v20 }
 0x10a   : > { %v1926_v13 = vmax.bf16 %v1708_v55, %v1443_v3  ;;  %v2229_v18 = vsel %vm3134_vm8, %v2225_v9, %v2228_v10  ;;  %v282_v39 = vmax.bf16 %v3754_v7, %v3687_v51  ;;  %v283_v33 = vmax.bf16 %v3757_v62, %v3726_v31  ;;  %v3868_v10 = vld [vmem:[%s3039_s11 + $0x118] sm:$0xf] }
 0x10b   : > { %v978_v48 = vshll.u32 %v471_v0, 16  ;;  %v982_v30 = vshrl.u32 %v471_v0, 16  ;;  %v988_v16 = vshll.u32 %v472_v26, 16  ;;  %v1710_v49 = vrot.slane %v471_v0, 5 }
 0x10c   : > { %v2553_v36 = vmax.bf16 %v2229_v18, %v1926_v13  ;;  %v1713_v50 = vrot.slane %v472_v26, 5  ;;  %v2236_v29 = vshrl.u32 %v472_v26, 16  ;;  %v377_v20 = vmax.bf16 %v281_v11, %v3801_v43 }
 0x10d   : > { %v980_v52 = vrot.slane %v978_v48, 5  ;;  %v984_v23 = vrot.slane %v982_v30, 4  ;;  %v990_v15 = vrot.slane %v988_v16, 5  ;;  %v1711_v51 = vsel %vm3110_vm6, %v1709_v19, %v1710_v49 }
 0x10e   : > { %v2963_v53 = vcombine.low %v2552_v45, %v2553_v36  ;;  %v1712_v31 = vrot.slane %v1710_v49, 4  ;;  %v2231_v42 = vrot.slane %v982_v30, 5  ;;  %v2232_v21 = vrot.slane %v978_v48, 6 }
 0x10f   : > { %v981_v34 = vsel %vm3121_vm7, %v976_v32, %v980_v52  ;;  %v985_v25 = vor.u32 %v984_v23, %v980_v52  ;;  %v2238_v54 = vrot.slane %v2236_v29, 5  ;;  %v2239_v41 = vrot.slane %v988_v16, 6 }
 0x110   : > { %2964 = vst [vmem:[%s3150_s15 + $0x98] sm:$0xff] %v2963_v53   ;;  %v1444_v55 = vmax.bf16 %v981_v34, %v3808_v28  ;;  %v1714_v40 = vsel %vm3110_vm6, %v1712_v31, %v1713_v50  ;;  %v2233_v57 = vor.u32 %v2232_v21, %v2231_v42  ;;  %v378_v14 = vmax.bf16 %v282_v39, %v3804_v37 }
 0x111   : > { %v986_v59 = vrot.slane %v985_v25, 4  ;;  %v2240_v63 = vor.u32 %v2239_v41, %v2238_v54  ;;  %v379_v4 = vmax.bf16 %v283_v33, %v3832_v1  ;;  %v473_v27 = vmax.bf16 %v377_v20, %v3857_v58 }
 0x112   : > { %v1927_v2 = vmax.bf16 %v1711_v51, %v1444_v55  ;;  %v2234_v28 = vsel %vm3134_vm8, %v2230_v60, %v2233_v57  ;;  %v2235_v22 = vrot.slane %v2233_v57, 4  ;;  %v474_v5 = vmax.bf16 %v378_v14, %v3861_v38 }
 0x113   : > { %v991_v19 = vsel %vm3121_vm7, %v986_v59, %v990_v15  ;;  %v3874_v6 = vmax.bf16 %v379_v4, %v3868_v10  ;;  %v993_v35 = vshrl.u32 %v473_v27, 16  ;;  %v996_v8 = vshll.u32 %v473_v27, 16 }
 0x114   : > { %v1445_v46 = vmax.bf16 %v991_v19, %v471_v0  ;;  %v2241_v3 = vsel %vm3134_vm8, %v2235_v22, %v2240_v63  ;;  %v2554_v9 = vmax.bf16 %v2234_v28, %v1927_v2  ;;  %v1002_v45 = vshll.u32 %v474_v5, 16 }
 0x115   : > { %v995_v32 = vrot.slane %v993_v35, 4  ;;  %v998_v26 = vrot.slane %v996_v8, 5  ;;  %v1006_v60 = vshrl.u32 %v474_v5, 16  ;;  %v1012_v11 = vshll.u32 %v3874_v6, 16 }
 0x116   : > { %v1928_v13 = vmax.bf16 %v1714_v40, %v1445_v46  ;;  %v1004_v18 = vrot.slane %v1002_v45, 5  ;;  %v1016_v39 = vshrl.u32 %v3874_v6, 16  ;;  %v2734_v33 = vrot.slane %v473_v27, 9 }
 0x117   : > { %v999_v48 = vor.u32 %v998_v26, %v995_v32  ;;  %v1008_v30 = vrot.slane %v1006_v60, 4  ;;  %v1014_v16 = vrot.slane %v1012_v11, 5  ;;  %v1717_v49 = vrot.slane %v474_v5, 5  ;;  %v3910_v26 = vld [vmem:[%s3039_s11 + $0x124] sm:$0xf] }
 0x118   : > { %v2555_v0 = vmax.bf16 %v2241_v3, %v1928_v13  ;;  %v1018_v36 = vrot.slane %v1016_v39, 4  ;;  %v1720_v50 = vrot.slane %v3874_v6, 5  ;;  %v2242_v29 = vrot.slane %v993_v35, 5 }
 0x119   : > { %v1000_v20 = vrot.slane %v999_v48, 4  ;;  %v1009_v52 = vor.u32 %v1008_v30, %v1004_v18  ;;  %v1718_v23 = vsel %vm3110_vm6, %v2734_v33, %v1717_v49  ;;  %v1719_v15 = vrot.slane %v1717_v49, 4 }
 0x11a   : > { %v2965_v51 = vcombine.low %v2554_v9, %v2555_v0  ;;  %v2243_v53 = vrot.slane %v996_v8, 6  ;;  %v2246_v31 = vrot.slane %v1006_v60, 5  ;;  %v2247_v42 = vrot.slane %v1002_v45, 6  ;;  %v3905_v9 = vld [vmem:[%s3039_s11 + $0x120] sm:$0xf] }
 0x11b   : > { %v1005_v21 = vsel %vm3121_vm7, %v1000_v20, %v1004_v18  ;;  %v1010_v34 = vrot.slane %v1009_v52, 4  ;;  %v1721_v25 = vsel %vm3110_vm6, %v1719_v15, %v1720_v50  ;;  %v2251_v54 = vrot.slane %v1016_v39, 5 }
 0x11c   : > { %2966 = vst [vmem:[%s3150_s15 + $0xa0] sm:$0xff] %v2965_v51   ;;  %v1446_v41 = vmax.bf16 %v1005_v21, %v473_v27  ;;  %v2244_v55 = vor.u32 %v2243_v53, %v2242_v29  ;;  %v2248_v40 = vor.u32 %v2247_v42, %v2246_v31  ;;  %v2252_v57 = vrot.slane %v1012_v11, 6 }
 0x11d   : > { %v1015_v14 = vsel %vm3121_vm7, %v1010_v34, %v1014_v16  ;;  %v284_v59 = vmax.bf16 %v3791_v24, %v3729_v47  ;;  %v285_v63 = vmax.bf16 %v3801_v43, %v3747_v56  ;;  %v286_v4 = vmax.bf16 %v3804_v37, %v3754_v7  ;;  %v3902_v56 = vld [vmem:[%s3039_s11 + $0x11c] sm:$0x3] }
 0x11e   : > { %v1447_v2 = vmax.bf16 %v1015_v14, %v474_v5  ;;  %v1929_v27 = vmax.bf16 %v1718_v23, %v1446_v41  ;;  %v2245_v28 = vrot.slane %v2244_v55, 4  ;;  %v2250_v22 = vrot.slane %v2248_v40, 4 }
 0x11f   : > { %v2253_v19 = vor.u32 %v2252_v57, %v2251_v54  ;;  %v380_v35 = vmax.bf16 %v284_v59, %v3835_v12  ;;  %v381_v8 = vmax.bf16 %v285_v63, %v3857_v58  ;;  %v382_v46 = vmax.bf16 %v286_v4, %v3861_v38 }
 0x120   : > { %v1930_v3 = vmax.bf16 %v1721_v25, %v1447_v2  ;;  %v2249_v47 = vsel %vm3134_vm8, %v2245_v28, %v2248_v40  ;;  %v1019_v7 = vor.u32 %v1018_v36, %v1014_v16  ;;  %v1722_v5 = vrot.slane %v1720_v50, 4 }
 0x121   : > { %v2254_v45 = vsel %vm3134_vm8, %v2250_v22, %v2253_v19  ;;  %v2556_v32 = vmax.bf16 %v2249_v47, %v1929_v27  ;;  %v476_v60 = vmax.bf16 %v380_v35, %v3902_v56  ;;  %v477_v11 = vmax.bf16 %v381_v8, %v3905_v9 }
 0x122   : > { %v2557_v13 = vmax.bf16 %v2254_v45, %v1930_v3  ;;  %v3915_v18 = vmax.bf16 %v382_v46, %v3910_v26  ;;  %v1020_v39 = vrot.slane %v1019_v7, 4  ;;  %v2255_v33 = vrot.slane %v2253_v19, 4  ;;  %v3938_v7 = vld [vmem:[%s3039_s11 + $0x128] sm:$0xf]  ;;  %v3942_v45 = vld [vmem:[%s3039_s11 + $0x12c] sm:$0x3] }
 0x123   : > { %v1022_v48 = vshll.u32 %v476_v60, 16  ;;  %v1027_v30 = vshrl.u32 %v477_v11, 16  ;;  %v1030_v16 = vshll.u32 %v477_v11, 16  ;;  %v1723_v49 = vrot.slane %v476_v60, 5 }
 0x124   : > { %v2967_v0 = vcombine.low %v2556_v32, %v2557_v13  ;;  %v1036_v36 = vshll.u32 %v3915_v18, 16  ;;  %v1040_v50 = vshrl.u32 %v3915_v18, 16  ;;  %v2735_v29 = vrot.slane %v477_v11, 9 }
 0x125   : > { %v1024_v20 = vrot.slane %v1022_v48, 5  ;;  %v1029_v52 = vrot.slane %v1027_v30, 4  ;;  %v1032_v23 = vrot.slane %v1030_v16, 5  ;;  %v1724_v15 = vsel %vm3110_vm6, %v1722_v5, %v1723_v49 }
 0x126   : > { %2968 = vst [vmem:[%s3150_s15 + $0xa8] sm:$0xff] %v2967_v0   ;;  %v1038_v51 = vrot.slane %v1036_v36, 5  ;;  %v1042_v53 = vrot.slane %v1040_v50, 4  ;;  %v1727_v31 = vrot.slane %v3915_v18, 5  ;;  %v2256_v42 = vshrl.u32 %v476_v60, 16 }
 0x127   : > { %v1025_v21 = vsel %vm3121_vm7, %v1020_v39, %v1024_v20  ;;  %v1033_v34 = vor.u32 %v1032_v23, %v1029_v52  ;;  %v2259_v25 = vrot.slane %v1022_v48, 6  ;;  %v2262_v54 = vrot.slane %v1027_v30, 5 }
 0x128   : > { %v1448_v41 = vmax.bf16 %v1025_v21, %v3874_v6  ;;  %v1728_v55 = vsel %vm3110_vm6, %v2735_v29, %v1727_v31  ;;  %v2258_v40 = vrot.slane %v2256_v42, 5  ;;  %v2263_v57 = vrot.slane %v1030_v16, 6 }
 0x129   : > { %v1034_v14 = vrot.slane %v1033_v34, 4  ;;  %v2266_v59 = vrot.slane %v1040_v50, 5  ;;  %v2267_v63 = vrot.slane %v1036_v36, 6  ;;  %v287_v4 = vmax.bf16 %v3832_v1, %v3757_v62 }
 0x12a   : > { %v1931_v2 = vmax.bf16 %v1724_v15, %v1448_v41  ;;  %v2260_v27 = vor.u32 %v2259_v25, %v2258_v40  ;;  %v2264_v28 = vor.u32 %v2263_v57, %v2262_v54  ;;  %v288_v22 = vmax.bf16 %v3835_v12, %v3791_v24 }
 0x12b   : > { %v1039_v6 = vsel %vm3121_vm7, %v1034_v14, %v1038_v51  ;;  %v2268_v19 = vor.u32 %v2267_v63, %v2266_v59  ;;  %v383_v35 = vmax.bf16 %v287_v4, %v3868_v10  ;;  %v1043_v8 = vor.u32 %v1042_v53, %v1038_v51 }
 0x12c   : > { %v1449_v46 = vmax.bf16 %v1039_v6, %v477_v11  ;;  %v2261_v3 = vsel %vm3134_vm8, %v2255_v33, %v2260_v27  ;;  %v2265_v47 = vrot.slane %v2264_v28, 4  ;;  %v384_v62 = vmax.bf16 %v288_v22, %v3902_v56  ;;  %v3968_v28 = vld [vmem:[%s3039_s11 + $0x130] sm:$0xf] }
 0x12d   : > { %v2558_v5 = vmax.bf16 %v2261_v3, %v1931_v2  ;;  %v479_v24 = vmax.bf16 %v383_v35, %v3938_v7  ;;  %v1044_v32 = vrot.slane %v1043_v8, 4  ;;  %v1729_v60 = vrot.slane %v1727_v31, 4  ;;  %v3978_v8 = vld [vmem:[%s3039_s11 + $0x134] sm:$0xf] }
 0x12e   : > { %v1932_v13 = vmax.bf16 %v1728_v55, %v1449_v46  ;;  %v2269_v39 = vsel %vm3134_vm8, %v2265_v47, %v2268_v19  ;;  %v480_v11 = vmax.bf16 %v384_v62, %v3942_v45  ;;  %v2270_v48 = vrot.slane %v2268_v19, 4  ;;  %v3981_v46 = vld [vmem:[%s3039_s11 + $0x138] sm:$0xf] }
 0x12f   : > { %v1046_v33 = vshll.u32 %v479_v24, 16  ;;  %v1050_v30 = vshrl.u32 %v479_v24, 16  ;;  %v1730_v16 = vrot.slane %v479_v24, 5  ;;  %v289_v49 = vmax.bf16 %v3857_v58, %v3801_v43 }
 0x130   : > { %v2559_v0 = vmax.bf16 %v2269_v39, %v1932_v13  ;;  %v1056_v36 = vshll.u32 %v480_v11, 16  ;;  %v1733_v50 = vrot.slane %v480_v11, 5  ;;  %v2276_v29 = vshrl.u32 %v480_v11, 16 }
 0x131   : > { %v1048_v20 = vrot.slane %v1046_v33, 5  ;;  %v1052_v52 = vrot.slane %v1050_v30, 4  ;;  %v1731_v23 = vsel %vm3110_vm6, %v1729_v60, %v1730_v16  ;;  %v1732_v15 = vrot.slane %v1730_v16, 4 }
 0x132   : > { %v2969_v51 = vcombine.low %v2558_v5, %v2559_v0  ;;  %v1058_v53 = vrot.slane %v1056_v36, 5  ;;  %v2271_v31 = vrot.slane %v1050_v30, 5  ;;  %v2272_v42 = vrot.slane %v1046_v33, 6 }
 0x133   : > { %v1049_v21 = vsel %vm3121_vm7, %v1044_v32, %v1048_v20  ;;  %v1053_v34 = vor.u32 %v1052_v52, %v1048_v20  ;;  %v1734_v43 = vsel %vm3110_vm6, %v1732_v15, %v1733_v50  ;;  %v2278_v25 = vrot.slane %v2276_v29, 5 }
 0x134   : > { %2970 = vst [vmem:[%s3150_s15 + $0xb0] sm:$0xff] %v2969_v51   ;;  %v1450_v54 = vmax.bf16 %v1049_v21, %v3915_v18  ;;  %v2273_v41 = vor.u32 %v2272_v42, %v2271_v31  ;;  %v2279_v55 = vrot.slane %v1056_v36, 6  ;;  %v290_v40 = vmax.bf16 %v3861_v38, %v3804_v37 }
 0x135   : > { %v1054_v57 = vrot.slane %v1053_v34, 4  ;;  %v291_v14 = vmax.bf16 %v3868_v10, %v3832_v1  ;;  %v385_v59 = vmax.bf16 %v289_v49, %v3905_v9  ;;  %v292_v63 = vmax.bf16 %v3902_v56, %v3835_v12 }
 0x136   : > { %v1933_v4 = vmax.bf16 %v1731_v23, %v1450_v54  ;;  %v2274_v18 = vsel %vm3134_vm8, %v2270_v48, %v2273_v41  ;;  %v2275_v2 = vrot.slane %v2273_v41, 4  ;;  %v2280_v27 = vor.u32 %v2279_v55, %v2278_v25 }
 0x137   : > { %v1059_v37 = vsel %vm3121_vm7, %v1054_v57, %v1058_v53  ;;  %v386_v22 = vmax.bf16 %v290_v40, %v3910_v26  ;;  %v387_v1 = vmax.bf16 %v291_v14, %v3938_v7  ;;  %v481_v6 = vmax.bf16 %v385_v59, %v3968_v28 }
 0x138   : > { %v1451_v19 = vmax.bf16 %v1059_v37, %v479_v24  ;;  %v2281_v12 = vsel %vm3134_vm8, %v2275_v2, %v2280_v27  ;;  %v2560_v35 = vmax.bf16 %v2274_v18, %v1933_v4  ;;  %v293_v3 = vmax.bf16 %v3905_v9, %v3857_v58 }
 0x139   : > { %v482_v47 = vmax.bf16 %v386_v22, %v3978_v8  ;;  %v3987_v62 = vmax.bf16 %v387_v1, %v3981_v46  ;;  %v1061_v5 = vshrl.u32 %v481_v6, 16  ;;  %v1064_v32 = vshll.u32 %v481_v6, 16 }
 0x13a   : > { %v1934_v60 = vmax.bf16 %v1734_v43, %v1451_v19  ;;  %v2736_v24 = vrot.slane %v481_v6, 9  ;;  %v294_v13 = vmax.bf16 %v3910_v26, %v3861_v38  ;;  %v388_v39 = vmax.bf16 %v292_v63, %v3942_v45  ;;  %v4003_v63 = vld [vmem:[%s3039_s11 + $0x13c] sm:$0x3] }
 0x13b   : > { %v1063_v11 = vrot.slane %v1061_v5, 4  ;;  %v1066_v48 = vrot.slane %v1064_v32, 5  ;;  %v1070_v33 = vshll.u32 %v482_v47, 16  ;;  %v1074_v30 = vshrl.u32 %v482_v47, 16 }
 0x13c   : > { %v2561_v16 = vmax.bf16 %v2281_v12, %v1934_v60  ;;  %v1080_v58 = vshll.u32 %v3987_v62, 16  ;;  %v1084_v49 = vshrl.u32 %v3987_v62, 16  ;;  %v1737_v0 = vrot.slane %v482_v47, 5 }
 0x13d   : > { %v1067_v36 = vor.u32 %v1066_v48, %v1063_v11  ;;  %v1072_v50 = vrot.slane %v1070_v33, 5  ;;  %v1076_v29 = vrot.slane %v1074_v30, 4  ;;  %v1740_v20 = vrot.slane %v3987_v62, 5 }
 0x13e   : > { %v2971_v52 = vcombine.low %v2560_v35, %v2561_v16  ;;  %v1082_v38 = vrot.slane %v1080_v58, 5  ;;  %v1086_v23 = vrot.slane %v1084_v49, 4  ;;  %v1738_v15 = vsel %vm3110_vm6, %v2736_v24, %v1737_v0  ;;  %v4016_v35 = vld [vmem:[%s3039_s11 + $0x144] sm:$0xf] }
 0x13f   : > { %v1068_v51 = vrot.slane %v1067_v36, 4  ;;  %v1077_v53 = vor.u32 %v1076_v29, %v1072_v50  ;;  %v1739_v31 = vrot.slane %v1737_v0, 4  ;;  %v2282_v42 = vrot.slane %v1061_v5, 5 }
 0x140   : > { %2972 = vst [vmem:[%s3150_s15 + $0xb8] sm:$0xff] %v2971_v52   ;;  %v2283_v21 = vrot.slane %v1064_v32, 6  ;;  %v2286_v34 = vrot.slane %v1074_v30, 5  ;;  %v2287_v43 = vrot.slane %v1070_v33, 6  ;;  %v2291_v25 = vrot.slane %v1084_v49, 5 }
 0x141   : > { %v1073_v54 = vsel %vm3121_vm7, %v1068_v51, %v1072_v50  ;;  %v1078_v41 = vrot.slane %v1077_v53, 4  ;;  %v1741_v55 = vsel %vm3110_vm6, %v1739_v31, %v1740_v20  ;;  %v2292_v40 = vrot.slane %v1080_v58, 6 }
 0x142   : > { %v1452_v57 = vmax.bf16 %v1073_v54, %v481_v6  ;;  %v2284_v14 = vor.u32 %v2283_v21, %v2282_v42  ;;  %v2288_v59 = vor.u32 %v2287_v43, %v2286_v34  ;;  %v389_v4 = vmax.bf16 %v293_v3, %v3968_v28  ;;  %v4013_v6 = vld [vmem:[%s3039_s11 + $0x140] sm:$0xf] }
 0x143   : > { %v1083_v18 = vsel %vm3121_vm7, %v1078_v41, %v1082_v38  ;;  %v4008_v2 = vor.u32 %v2292_v40, %v2291_v25  ;;  %v390_v27 = vmax.bf16 %v294_v13, %v3978_v8  ;;  %v484_v37 = vmax.bf16 %v388_v39, %v4003_v63 }
 0x144   : > { %v1453_v22 = vmax.bf16 %v1083_v18, %v482_v47  ;;  %v1935_v1 = vmax.bf16 %v1738_v15, %v1452_v57  ;;  %v2285_v19 = vrot.slane %v2284_v14, 4  ;;  %v2290_v12 = vrot.slane %v2288_v59, 4 }
 0x145   : > { %v485_v5 = vmax.bf16 %v389_v4, %v4013_v6  ;;  %v4020_v3 = vmax.bf16 %v390_v27, %v4016_v35  ;;  %v1087_v32 = vor.u32 %v1086_v23, %v1082_v38  ;;  %v1090_v60 = vshll.u32 %v484_v37, 16 }
 0x146   : > { %v1936_v24 = vmax.bf16 %v1741_v55, %v1453_v22  ;;  %v2289_v13 = vsel %vm3134_vm8, %v2285_v19, %v2288_v59  ;;  %v2294_v47 = vsel %vm3134_vm8, %v2290_v12, %v4008_v2  ;;  %v1742_v39 = vrot.slane %v1740_v20, 4 }
 0x147   : > { %v2562_v11 = vmax.bf16 %v2289_v13, %v1935_v1  ;;  %v1088_v48 = vrot.slane %v1087_v32, 4  ;;  %v1092_v33 = vrot.slane %v1090_v60, 5  ;;  %v1095_v30 = vshrl.u32 %v485_v5, 16 }
 0x148   : > { %v2563_v16 = vmax.bf16 %v2294_v47, %v1936_v24  ;;  %v1098_v58 = vshll.u32 %v485_v5, 16  ;;  %v1104_v49 = vshll.u32 %v4020_v3, 16  ;;  %v1108_v0 = vshrl.u32 %v4020_v3, 16 }
 0x149   : > { %v1093_v36 = vsel %vm3121_vm7, %v1088_v48, %v1092_v33  ;;  %v1097_v50 = vrot.slane %v1095_v30, 4  ;;  %v1743_v29 = vrot.slane %v484_v37, 5  ;;  %v2737_v52 = vrot.slane %v485_v5, 9 }
 0x14a   : > { %v2973_v38 = vcombine.low %v2562_v11, %v2563_v16  ;;  %v1100_v23 = vrot.slane %v1098_v58, 5  ;;  %v1106_v20 = vrot.slane %v1104_v49, 5  ;;  %v1110_v15 = vrot.slane %v1108_v0, 4 }
 0x14b   : > { %v1454_v51 = vmax.bf16 %v1093_v36, %v3987_v62  ;;  %v1744_v53 = vsel %vm3110_vm6, %v1742_v39, %v1743_v29  ;;  %v1747_v31 = vrot.slane %v4020_v3, 5  ;;  %v2295_v42 = vrot.slane %v4008_v2, 4 }
 0x14c   : > { %2974 = vst [vmem:[%s3150_s15 + $0xc0] sm:$0xff] %v2973_v38   ;;  %v1101_v21 = vor.u32 %v1100_v23, %v1097_v50  ;;  %v2296_v34 = vshrl.u32 %v484_v37, 16  ;;  %v2299_v43 = vrot.slane %v1090_v60, 6  ;;  %v2302_v25 = vrot.slane %v1095_v30, 5  ;;  %v4047_v60 = vld [vmem:[%s3039_s11 + $0x148] sm:$0xf] }
 0x14d   : > { %v1748_v54 = vsel %vm3110_vm6, %v2737_v52, %v1747_v31  ;;  %v1937_v41 = vmax.bf16 %v1744_v53, %v1454_v51  ;;  %v2303_v55 = vrot.slane %v1098_v58, 6  ;;  %v2306_v40 = vrot.slane %v1108_v0, 5 }
 0x14e   : > { %v1102_v62 = vrot.slane %v1101_v21, 4  ;;  %v2298_v57 = vrot.slane %v2296_v34, 5  ;;  %v2307_v14 = vrot.slane %v1104_v49, 6  ;;  %v295_v59 = vmax.bf16 %v3938_v7, %v3868_v10 }
 0x14f   : > { %v2304_v4 = vor.u32 %v2303_v55, %v2302_v25  ;;  %v296_v18 = vmax.bf16 %v3942_v45, %v3902_v56  ;;  %v1111_v2 = vor.u32 %v1110_v15, %v1106_v20  ;;  %v1749_v27 = vrot.slane %v1747_v31, 4  ;;  %v4053_v56 = vld [vmem:[%s3039_s11 + $0x14c] sm:$0x3] }
 0x150   : > { %v1107_v37 = vsel %vm3121_vm7, %v1102_v62, %v1106_v20  ;;  %v2300_v22 = vor.u32 %v2299_v43, %v2298_v57  ;;  %v2308_v1 = vor.u32 %v2307_v14, %v2306_v40  ;;  %v391_v19 = vmax.bf16 %v295_v59, %v3981_v46 }
 0x151   : > { %v1455_v12 = vmax.bf16 %v1107_v37, %v485_v5  ;;  %v2305_v32 = vrot.slane %v2304_v4, 4  ;;  %v392_v24 = vmax.bf16 %v296_v18, %v4003_v63  ;;  %v1112_v10 = vrot.slane %v1111_v2, 4  ;;  %v4080_v18 = vld [vmem:[%s3039_s11 + $0x150] sm:$0xf]  ;;  %v4083_v2 = vld [vmem:[%s3039_s11 + $0x154] sm:$0xf] }
 0x152   : > { %v2301_v13 = vsel %vm3134_vm8, %v2295_v42, %v2300_v22  ;;  %v487_v47 = vmax.bf16 %v391_v19, %v4047_v60  ;;  %v2310_v39 = vrot.slane %v2308_v1, 4  ;;  %v297_v11 = vmax.bf16 %v3968_v28, %v3905_v9 }
 0x153   : > { %v1938_v48 = vmax.bf16 %v1748_v54, %v1455_v12  ;;  %v2309_v5 = vsel %vm3134_vm8, %v2305_v32, %v2308_v1  ;;  %v2564_v33 = vmax.bf16 %v2301_v13, %v1937_v41  ;;  %v488_v30 = vmax.bf16 %v392_v24, %v4053_v56  ;;  %v4093_v12 = vld [vmem:[%s3039_s11 + $0x158] sm:$0xf] }
 0x154   : > { %v1114_v16 = vshll.u32 %v487_v47, 16  ;;  %v1118_v58 = vshrl.u32 %v487_v47, 16  ;;  %v1750_v49 = vrot.slane %v487_v47, 5  ;;  %v298_v0 = vmax.bf16 %v3978_v8, %v3910_v26 }
 0x155   : > { %v2565_v36 = vmax.bf16 %v2309_v5, %v1938_v48  ;;  %v1124_v50 = vshll.u32 %v488_v30, 16  ;;  %v1753_v29 = vrot.slane %v488_v30, 5  ;;  %v2316_v52 = vshrl.u32 %v488_v30, 16 }
 0x156   : > { %v1116_v38 = vrot.slane %v1114_v16, 5  ;;  %v1120_v9 = vrot.slane %v1118_v58, 4  ;;  %v1751_v23 = vsel %vm3110_vm6, %v1749_v27, %v1750_v49  ;;  %v1752_v20 = vrot.slane %v1750_v49, 4 }
 0x157   : > { %v2975_v15 = vcombine.low %v2564_v33, %v2565_v36  ;;  %v1126_v51 = vrot.slane %v1124_v50, 5  ;;  %v2311_v53 = vrot.slane %v1118_v58, 5  ;;  %v2312_v31 = vrot.slane %v1114_v16, 6 }
 0x158   : > { %v1117_v42 = vsel %vm3121_vm7, %v1112_v10, %v1116_v38  ;;  %v1121_v21 = vor.u32 %v1120_v9, %v1116_v38  ;;  %v1754_v26 = vsel %vm3110_vm6, %v1752_v20, %v1753_v29  ;;  %v2318_v34 = vrot.slane %v2316_v52, 5 }
 0x159   : > { %2976 = vst [vmem:[%s3150_s15 + $0xc8] sm:$0xff] %v2975_v15   ;;  %v1456_v43 = vmax.bf16 %v1117_v42, %v4020_v3  ;;  %v2313_v25 = vor.u32 %v2312_v31, %v2311_v53  ;;  %v2319_v54 = vrot.slane %v1124_v50, 6  ;;  %v299_v41 = vmax.bf16 %v3981_v46, %v3938_v7 }
 0x15a   : > { %v1122_v55 = vrot.slane %v1121_v21, 4  ;;  %v393_v40 = vmax.bf16 %v297_v11, %v4013_v6  ;;  %v394_v62 = vmax.bf16 %v298_v0, %v4016_v35  ;;  %v300_v57 = vmax.bf16 %v4003_v63, %v3942_v45 }
 0x15b   : > { %v1939_v14 = vmax.bf16 %v1751_v23, %v1456_v43  ;;  %v2314_v59 = vsel %vm3134_vm8, %v2310_v39, %v2313_v25  ;;  %v2315_v4 = vrot.slane %v2313_v25, 4  ;;  %v2320_v3 = vor.u32 %v2319_v54, %v2318_v34 }
 0x15c   : > { %v1127_v7 = vsel %vm3121_vm7, %v1122_v55, %v1126_v51  ;;  %v395_v27 = vmax.bf16 %v299_v41, %v4047_v60  ;;  %v489_v37 = vmax.bf16 %v393_v40, %v4080_v18  ;;  %v490_v22 = vmax.bf16 %v394_v62, %v4083_v2 }
 0x15d   : > { %v1457_v45 = vmax.bf16 %v1127_v7, %v487_v47  ;;  %v2321_v1 = vsel %vm3134_vm8, %v2315_v4, %v2320_v3  ;;  %v2566_v19 = vmax.bf16 %v2314_v59, %v1939_v14  ;;  %v301_v32 = vmax.bf16 %v4013_v6, %v3968_v28  ;;  %v4118_v7 = vld [vmem:[%s3039_s11 + $0x15c] sm:$0x3] }
 0x15e   : > { %v4098_v24 = vmax.bf16 %v395_v27, %v4093_v12  ;;  %v1129_v10 = vshrl.u32 %v489_v37, 16  ;;  %v1132_v13 = vshll.u32 %v489_v37, 16  ;;  %v1138_v39 = vshll.u32 %v490_v22, 16 }
 0x15f   : > { %v1940_v11 = vmax.bf16 %v1754_v26, %v1457_v45  ;;  %v1142_v48 = vshrl.u32 %v490_v22, 16  ;;  %v2738_v5 = vrot.slane %v489_v37, 9  ;;  %v1757_v33 = vrot.slane %v490_v22, 5 }
 0x160   : > { %v1131_v47 = vrot.slane %v1129_v10, 4  ;;  %v1134_v30 = vrot.slane %v1132_v13, 5  ;;  %v1140_v16 = vrot.slane %v1138_v39, 5  ;;  %v1148_v58 = vshll.u32 %v4098_v24, 16 }
 0x161   : > { %v2567_v49 = vmax.bf16 %v2321_v1, %v1940_v11  ;;  %v1144_v0 = vrot.slane %v1142_v48, 4  ;;  %v1152_v28 = vshrl.u32 %v4098_v24, 16  ;;  %v1758_v36 = vsel %vm3110_vm6, %v2738_v5, %v1757_v33 }
 0x162   : > { %v1135_v50 = vor.u32 %v1134_v30, %v1131_v47  ;;  %v1150_v29 = vrot.slane %v1148_v58, 5  ;;  %v1759_v52 = vrot.slane %v1757_v33, 4  ;;  %v1760_v38 = vrot.slane %v4098_v24, 5 }
 0x163   : > { %v2977_v9 = vcombine.low %v2566_v19, %v2567_v49  ;;  %v1145_v23 = vor.u32 %v1144_v0, %v1140_v16  ;;  %v1154_v20 = vrot.slane %v1152_v28, 4  ;;  %v2322_v15 = vrot.slane %v1129_v10, 5 }
 0x164   : > { %v1136_v51 = vrot.slane %v1135_v50, 4  ;;  %v1761_v53 = vsel %vm3110_vm6, %v1759_v52, %v1760_v38  ;;  %v2323_v31 = vrot.slane %v1132_v13, 6  ;;  %v2326_v42 = vrot.slane %v1142_v48, 5 }
 0x165   : > { %2978 = vst [vmem:[%s3150_s15 + $0xd0] sm:$0xff] %v2977_v9   ;;  %v1146_v21 = vrot.slane %v1145_v23, 4  ;;  %v2327_v26 = vrot.slane %v1138_v39, 6  ;;  %v2331_v34 = vrot.slane %v1152_v28, 5  ;;  %v2332_v43 = vrot.slane %v1148_v58, 6 }
 0x166   : > { %v1141_v25 = vsel %vm3121_vm7, %v1136_v51, %v1140_v16  ;;  %v2324_v54 = vor.u32 %v2323_v31, %v2322_v15  ;;  %v302_v41 = vmax.bf16 %v4016_v35, %v3978_v8  ;;  %v396_v55 = vmax.bf16 %v300_v57, %v4053_v56  ;;  %v4123_v8 = vld [vmem:[%s3039_s11 + $0x160] sm:$0xf]  ;;  %v4126_v57 = vld [vmem:[%s3039_s11 + $0x164] sm:$0xf] }
 0x167   : > { %v1151_v40 = vsel %vm3121_vm7, %v1146_v21, %v1150_v29  ;;  %v1458_v62 = vmax.bf16 %v1141_v25, %v489_v37  ;;  %v2328_v14 = vor.u32 %v2327_v26, %v2326_v42  ;;  %v4115_v59 = vor.u32 %v2332_v43, %v2331_v34 }
 0x168   : > { %v1459_v4 = vmax.bf16 %v1151_v40, %v490_v22  ;;  %v2325_v3 = vrot.slane %v2324_v54, 4  ;;  %v397_v27 = vmax.bf16 %v301_v32, %v4080_v18  ;;  %v398_v45 = vmax.bf16 %v302_v41, %v4083_v2 }
 0x169   : > { %v1941_v1 = vmax.bf16 %v1758_v36, %v1458_v62  ;;  %v2330_v19 = vrot.slane %v2328_v14, 4  ;;  %v492_v10 = vmax.bf16 %v396_v55, %v4118_v7  ;;  %v1155_v37 = vor.u32 %v1154_v20, %v1150_v29 }
 0x16a   : > { %v1942_v13 = vmax.bf16 %v1761_v53, %v1459_v4  ;;  %v2329_v22 = vsel %vm3134_vm8, %v2325_v3, %v2328_v14  ;;  %v493_v39 = vmax.bf16 %v397_v27, %v4123_v8  ;;  %v4133_v11 = vmax.bf16 %v398_v45, %v4126_v57 }
 0x16b   : > { %v2334_v32 = vsel %vm3134_vm8, %v2330_v19, %v4115_v59  ;;  %v2568_v48 = vmax.bf16 %v2329_v22, %v1941_v1  ;;  %v1156_v5 = vrot.slane %v1155_v37, 4  ;;  %v1158_v33 = vshll.u32 %v492_v10, 16 }
 0x16c   : > { %v2569_v47 = vmax.bf16 %v2334_v32, %v1942_v13  ;;  %v1163_v30 = vshrl.u32 %v493_v39, 16  ;;  %v1166_v16 = vshll.u32 %v493_v39, 16  ;;  %v1172_v58 = vshll.u32 %v4133_v11, 16 }
 0x16d   : > { %v1160_v49 = vrot.slane %v1158_v33, 5  ;;  %v1176_v0 = vshrl.u32 %v4133_v11, 16  ;;  %v1762_v28 = vrot.slane %v1760_v38, 4  ;;  %v1763_v36 = vrot.slane %v492_v10, 5 }
 0x16e   : > { %v2979_v50 = vcombine.low %v2568_v48, %v2569_v47  ;;  %v1165_v29 = vrot.slane %v1163_v30, 4  ;;  %v1168_v52 = vrot.slane %v1166_v16, 5  ;;  %v1174_v9 = vrot.slane %v1172_v58, 5 }
 0x16f   : > { %v1161_v23 = vsel %vm3121_vm7, %v1156_v5, %v1160_v49  ;;  %v1178_v20 = vrot.slane %v1176_v0, 4  ;;  %v1764_v15 = vsel %vm3110_vm6, %v1762_v28, %v1763_v36  ;;  %v2739_v51 = vrot.slane %v493_v39, 9  ;;  %v4165_v5 = vld [vmem:[%s3039_s11 + $0x168] sm:$0xf] }
 0x170   : > { %2980 = vst [vmem:[%s3150_s15 + $0xd8] sm:$0xff] %v2979_v50   ;;  %v1169_v53 = vor.u32 %v1168_v52, %v1165_v29  ;;  %v1460_v31 = vmax.bf16 %v1161_v23, %v4098_v24  ;;  %v1767_v42 = vrot.slane %v4133_v11, 5  ;;  %v2335_v38 = vrot.slane %v4115_v59, 4 }
 0x171   : > { %v2336_v21 = vshrl.u32 %v492_v10, 16  ;;  %v2339_v26 = vrot.slane %v1158_v33, 6  ;;  %v2342_v34 = vrot.slane %v1163_v30, 5  ;;  %v2343_v43 = vrot.slane %v1166_v16, 6 }
 0x172   : > { %v1170_v25 = vrot.slane %v1169_v53, 4  ;;  %v1768_v54 = vsel %vm3110_vm6, %v2739_v51, %v1767_v42  ;;  %v1943_v41 = vmax.bf16 %v1764_v15, %v1460_v31  ;;  %v2346_v55 = vrot.slane %v1176_v0, 5 }
 0x173   : > { %v2338_v40 = vrot.slane %v2336_v21, 5  ;;  %v2344_v62 = vor.u32 %v2343_v43, %v2342_v34  ;;  %v2347_v14 = vrot.slane %v1172_v58, 6  ;;  %v303_v24 = vmax.bf16 %v4047_v60, %v3981_v46 }
 0x174   : > { %v1175_v59 = vsel %vm3121_vm7, %v1170_v25, %v1174_v9  ;;  %v304_v4 = vmax.bf16 %v4053_v56, %v4003_v63  ;;  %v1179_v3 = vor.u32 %v1178_v20, %v1174_v9  ;;  %v1769_v27 = vrot.slane %v1767_v42, 4  ;;  %v4186_v25 = vld [vmem:[%s3039_s11 + $0x170] sm:$0xf] }
 0x175   : > { %v1461_v45 = vmax.bf16 %v1175_v59, %v493_v39  ;;  %v2340_v1 = vor.u32 %v2339_v26, %v2338_v40  ;;  %v2345_v19 = vrot.slane %v2344_v62, 4  ;;  %v2348_v10 = vor.u32 %v2347_v14, %v2346_v55  ;;  %v4168_v39 = vld [vmem:[%s3039_s11 + $0x16c] sm:$0x3]  ;;  %v4193_v62 = vld [vmem:[%s3039_s11 + $0x174] sm:$0xf] }
 0x176   : > { %v399_v37 = vmax.bf16 %v303_v24, %v4093_v12  ;;  %v400_v13 = vmax.bf16 %v304_v4, %v4118_v7  ;;  %v1180_v22 = vrot.slane %v1179_v3, 4  ;;  %v305_v46 = vmax.bf16 %v4080_v18, %v4013_v6  ;;  %v4196_v14 = vld [vmem:[%s3039_s11 + $0x178] sm:$0xf] }
 0x177   : > { %v1944_v32 = vmax.bf16 %v1768_v54, %v1461_v45  ;;  %v2341_v48 = vsel %vm3134_vm8, %v2335_v38, %v2340_v1  ;;  %v2349_v63 = vsel %vm3134_vm8, %v2345_v19, %v2348_v10  ;;  %v2350_v33 = vrot.slane %v2348_v10, 4 }
 0x178   : > { %v2570_v47 = vmax.bf16 %v2341_v48, %v1943_v41  ;;  %v495_v30 = vmax.bf16 %v399_v37, %v4165_v5  ;;  %v496_v16 = vmax.bf16 %v400_v13, %v4168_v39  ;;  %v306_v6 = vmax.bf16 %v4083_v2, %v4016_v35 }
 0x179   : > { %v2571_v58 = vmax.bf16 %v2349_v63, %v1944_v32  ;;  %v307_v49 = vmax.bf16 %v4093_v12, %v4047_v60  ;;  %v401_v0 = vmax.bf16 %v305_v46, %v4123_v8  ;;  %v308_v28 = vmax.bf16 %v4118_v7, %v4053_v56 }
 0x17a   : > { %v1182_v36 = vshll.u32 %v495_v30, 16  ;;  %v1186_v50 = vshrl.u32 %v495_v30, 16  ;;  %v1192_v29 = vshll.u32 %v496_v16, 16  ;;  %v1770_v52 = vrot.slane %v495_v30, 5 }
 0x17b   : > { %v2981_v9 = vcombine.low %v2570_v47, %v2571_v58  ;;  %v1773_v23 = vrot.slane %v496_v16, 5  ;;  %v2356_v20 = vshrl.u32 %v496_v16, 16  ;;  %v402_v35 = vmax.bf16 %v306_v6, %v4126_v57 }
 0x17c   : > { %v1184_v15 = vrot.slane %v1182_v36, 5  ;;  %v1188_v51 = vrot.slane %v1186_v50, 4  ;;  %v1194_v53 = vrot.slane %v1192_v29, 5  ;;  %v1771_v60 = vsel %vm3110_vm6, %v1769_v27, %v1770_v52 }
 0x17d   : > { %2982 = vst [vmem:[%s3150_s15 + $0xe0] sm:$0xff] %v2981_v9   ;;  %v1772_v31 = vrot.slane %v1770_v52, 4  ;;  %v2351_v42 = vrot.slane %v1186_v50, 5  ;;  %v2352_v38 = vrot.slane %v1182_v36, 6  ;;  %v2358_v21 = vrot.slane %v2356_v20, 5 }
 0x17e   : > { %v1185_v26 = vsel %vm3121_vm7, %v1180_v22, %v1184_v15  ;;  %v1189_v34 = vor.u32 %v1188_v51, %v1184_v15  ;;  %v2359_v43 = vrot.slane %v1192_v29, 6  ;;  %v403_v54 = vmax.bf16 %v307_v49, %v4165_v5 }
 0x17f   : > { %v1462_v41 = vmax.bf16 %v1185_v26, %v4133_v11  ;;  %v1774_v55 = vsel %vm3110_vm6, %v1772_v31, %v1773_v23  ;;  %v2353_v40 = vor.u32 %v2352_v38, %v2351_v42  ;;  %v497_v24 = vmax.bf16 %v401_v0, %v4186_v25 }
 0x180   : > { %v1190_v59 = vrot.slane %v1189_v34, 4  ;;  %v2360_v4 = vor.u32 %v2359_v43, %v2358_v21  ;;  %v498_v3 = vmax.bf16 %v402_v35, %v4193_v62  ;;  %v4201_v27 = vmax.bf16 %v403_v54, %v4196_v14 }
 0x181   : > { %v1945_v45 = vmax.bf16 %v1771_v60, %v1462_v41  ;;  %v2354_v11 = vsel %vm3134_vm8, %v2350_v33, %v2353_v40  ;;  %v2355_v1 = vrot.slane %v2353_v40, 4  ;;  %v1197_v19 = vshrl.u32 %v497_v24, 16 }
 0x182   : > { %v1195_v10 = vsel %vm3121_vm7, %v1190_v59, %v1194_v53  ;;  %v1200_v37 = vshll.u32 %v497_v24, 16  ;;  %v1206_v13 = vshll.u32 %v498_v3, 16  ;;  %v1210_v22 = vshrl.u32 %v498_v3, 16 }
 0x183   : > { %v1463_v46 = vmax.bf16 %v1195_v10, %v495_v30  ;;  %v2361_v32 = vsel %vm3134_vm8, %v2355_v1, %v2360_v4  ;;  %v2572_v48 = vmax.bf16 %v2354_v11, %v1945_v45  ;;  %v1199_v63 = vrot.slane %v1197_v19, 4 }
 0x184   : > { %v1202_v47 = vrot.slane %v1200_v37, 5  ;;  %v1208_v16 = vrot.slane %v1206_v13, 5  ;;  %v1212_v6 = vrot.slane %v1210_v22, 4  ;;  %v1216_v58 = vshll.u32 %v4201_v27, 16 }
 0x185   : > { %v1946_v33 = vmax.bf16 %v1774_v55, %v1463_v46  ;;  %v1220_v49 = vshrl.u32 %v4201_v27, 16  ;;  %v2740_v0 = vrot.slane %v497_v24, 9  ;;  %v1777_v36 = vrot.slane %v498_v3, 5 }
 0x186   : > { %v1203_v50 = vor.u32 %v1202_v47, %v1199_v63  ;;  %v1213_v29 = vor.u32 %v1212_v6, %v1208_v16  ;;  %v1218_v52 = vrot.slane %v1216_v58, 5  ;;  %v1780_v30 = vrot.slane %v4201_v27, 5 }
 0x187   : > { %v2573_v9 = vmax.bf16 %v2361_v32, %v1946_v33  ;;  %v1222_v23 = vrot.slane %v1220_v49, 4  ;;  %v1778_v20 = vsel %vm3110_vm6, %v2740_v0, %v1777_v36  ;;  %v1779_v35 = vrot.slane %v1777_v36, 4  ;;  %v4243_v32 = vld [vmem:[%s3039_s11 + $0x184] sm:$0xf] }
 0x188   : > { %v1204_v15 = vrot.slane %v1203_v50, 4  ;;  %v1214_v51 = vrot.slane %v1213_v29, 4  ;;  %v2362_v53 = vrot.slane %v1197_v19, 5  ;;  %v2363_v60 = vrot.slane %v1200_v37, 6  ;;  %v4230_v37 = vld [vmem:[%s3039_s11 + $0x17c] sm:$0x3] }
 0x189   : > { %v2983_v31 = vcombine.low %v2572_v48, %v2573_v9  ;;  %v1781_v42 = vsel %vm3110_vm6, %v1779_v35, %v1780_v30  ;;  %v2366_v38 = vrot.slane %v1210_v22, 5  ;;  %v2367_v21 = vrot.slane %v1206_v13, 6 }
 0x18a   : > { %v1209_v26 = vsel %vm3121_vm7, %v1204_v15, %v1208_v16  ;;  %v1219_v34 = vsel %vm3121_vm7, %v1214_v51, %v1218_v52  ;;  %v2364_v43 = vor.u32 %v2363_v60, %v2362_v53  ;;  %v2371_v54 = vrot.slane %v1220_v49, 5 }
 0x18b   : > { %2984 = vst [vmem:[%s3150_s15 + $0xe8] sm:$0xff] %v2983_v31   ;;  %v1464_v41 = vmax.bf16 %v1209_v26, %v497_v24  ;;  %v1465_v55 = vmax.bf16 %v1219_v34, %v498_v3  ;;  %v2368_v40 = vor.u32 %v2367_v21, %v2366_v38  ;;  %v2372_v59 = vrot.slane %v1216_v58, 6 }
 0x18c   : > { %v2365_v4 = vrot.slane %v2364_v43, 4  ;;  %v309_v45 = vmax.bf16 %v4123_v8, %v4080_v18  ;;  %v310_v11 = vmax.bf16 %v4126_v57, %v4083_v2  ;;  %v404_v1 = vmax.bf16 %v308_v28, %v4168_v39  ;;  %v4240_v28 = vld [vmem:[%s3039_s11 + $0x180] sm:$0xf] }
 0x18d   : > { %v1947_v19 = vmax.bf16 %v1778_v20, %v1464_v41  ;;  %v1948_v10 = vmax.bf16 %v1781_v42, %v1465_v55  ;;  %v2370_v24 = vrot.slane %v2368_v40, 4  ;;  %v2373_v3 = vor.u32 %v2372_v59, %v2371_v54 }
 0x18e   : > { %v2369_v13 = vsel %vm3134_vm8, %v2365_v4, %v2368_v40  ;;  %v405_v22 = vmax.bf16 %v309_v45, %v4186_v25  ;;  %v406_v18 = vmax.bf16 %v310_v11, %v4193_v62  ;;  %v500_v2 = vmax.bf16 %v404_v1, %v4230_v37 }
 0x18f   : > { %v2374_v46 = vsel %vm3134_vm8, %v2370_v24, %v2373_v3  ;;  %v2574_v56 = vmax.bf16 %v2369_v13, %v1947_v19  ;;  %v1223_v48 = vor.u32 %v1222_v23, %v1218_v52  ;;  %v1782_v63 = vrot.slane %v1780_v30, 4 }
 0x190   : > { %v2575_v47 = vmax.bf16 %v2374_v46, %v1948_v10  ;;  %v501_v16 = vmax.bf16 %v405_v22, %v4240_v28  ;;  %v4247_v6 = vmax.bf16 %v406_v18, %v4243_v32  ;;  %v1226_v58 = vshll.u32 %v500_v2, 16  ;;  %v4271_v22 = vld [vmem:[%s3039_s11 + $0x188] sm:$0xf] }
 0x191   : > { %v1224_v33 = vrot.slane %v1223_v48, 4  ;;  %v1783_v49 = vrot.slane %v500_v2, 5  ;;  %v2375_v0 = vrot.slane %v2373_v3, 4  ;;  %v2376_v36 = vshrl.u32 %v500_v2, 16 }
 0x192   : > { %v2985_v50 = vcombine.low %v2574_v56, %v2575_v47  ;;  %v1228_v29 = vrot.slane %v1226_v58, 5  ;;  %v1231_v9 = vshrl.u32 %v501_v16, 16  ;;  %v1234_v20 = vshll.u32 %v501_v16, 16  ;;  %v4276_v56 = vld [vmem:[%s3039_s11 + $0x18c] sm:$0x3] }
 0x193   : > { %v1240_v35 = vshll.u32 %v4247_v6, 16  ;;  %v1244_v52 = vshrl.u32 %v4247_v6, 16  ;;  %v1784_v30 = vsel %vm3110_vm6, %v1782_v63, %v1783_v49  ;;  %v2741_v23 = vrot.slane %v501_v16, 9 }
 0x194   : > { %2986 = vst [vmem:[%s3150_s15 + $0xf0] sm:$0xff] %v2985_v50   ;;  %v1229_v15 = vsel %vm3121_vm7, %v1224_v33, %v1228_v29  ;;  %v1233_v51 = vrot.slane %v1231_v9, 4  ;;  %v1236_v53 = vrot.slane %v1234_v20, 5  ;;  %v1787_v60 = vrot.slane %v4247_v6, 5 }
 0x195   : > { %v1242_v31 = vrot.slane %v1240_v35, 5  ;;  %v1246_v42 = vrot.slane %v1244_v52, 4  ;;  %v1466_v38 = vmax.bf16 %v1229_v15, %v4201_v27  ;;  %v2378_v21 = vrot.slane %v2376_v36, 5 }
 0x196   : > { %v1237_v26 = vor.u32 %v1236_v53, %v1233_v51  ;;  %v1788_v34 = vsel %vm3110_vm6, %v2741_v23, %v1787_v60  ;;  %v2379_v43 = vrot.slane %v1226_v58, 6  ;;  %v2382_v54 = vrot.slane %v1231_v9, 5 }
 0x197   : > { %v1949_v41 = vmax.bf16 %v1784_v30, %v1466_v38  ;;  %v2383_v55 = vrot.slane %v1234_v20, 6  ;;  %v2386_v40 = vrot.slane %v1244_v52, 5  ;;  %v2387_v59 = vrot.slane %v1240_v35, 6 }
 0x198   : > { %v1238_v4 = vrot.slane %v1237_v26, 4  ;;  %v2380_v45 = vor.u32 %v2379_v43, %v2378_v21  ;;  %v311_v11 = vmax.bf16 %v4165_v5, %v4093_v12  ;;  %v312_v27 = vmax.bf16 %v4168_v39, %v4118_v7  ;;  %v218_v43 = vld [vmem:[%s3039_s11 + $0x194] sm:$0xf] }
 0x199   : > { %v2384_v1 = vor.u32 %v2383_v55, %v2382_v54  ;;  %v2388_v19 = vor.u32 %v2387_v59, %v2386_v40  ;;  %v315_v10 = vmax.bf16 %v4196_v14, %v4165_v5  ;;  %v1247_v24 = vor.u32 %v1246_v42, %v1242_v31 }
 0x19a   : > { %v1243_v3 = vsel %vm3121_vm7, %v1238_v4, %v1242_v31  ;;  %v2381_v13 = vsel %vm3134_vm8, %v2375_v0, %v2380_v45  ;;  %v407_v18 = vmax.bf16 %v311_v11, %v4196_v14  ;;  %v408_v12 = vmax.bf16 %v312_v27, %v4230_v37 }
 0x19b   : > { %v1467_v2 = vmax.bf16 %v1243_v3, %v501_v16  ;;  %v2385_v7 = vrot.slane %v2384_v1, 4  ;;  %v2576_v46 = vmax.bf16 %v2381_v13, %v1949_v41  ;;  %v411_v5 = vmax.bf16 %v315_v10, %v4271_v22 }
 0x19c   : > { %v503_v48 = vmax.bf16 %v407_v18, %v4271_v22  ;;  %v504_v63 = vmax.bf16 %v408_v12, %v4276_v56  ;;  %v1248_v47 = vrot.slane %v1247_v24, 4  ;;  %v1789_v58 = vrot.slane %v1787_v60, 4 }
 0x19d   : > { %v1950_v33 = vmax.bf16 %v1788_v34, %v1467_v2  ;;  %v2389_v49 = vsel %vm3134_vm8, %v2385_v7, %v2388_v19  ;;  %v2390_v0 = vrot.slane %v2388_v19, 4  ;;  %v313_v16 = vmax.bf16 %v4186_v25, %v4123_v8  ;;  %v217_v19 = vld [vmem:[%s3039_s11 + $0x190] sm:$0xf] }
 0x19e   : > { %v1250_v36 = vshll.u32 %v503_v48, 16  ;;  %v1254_v50 = vshrl.u32 %v503_v48, 16  ;;  %v1260_v29 = vshll.u32 %v504_v63, 16  ;;  %v1790_v9 = vrot.slane %v503_v48, 5 }
 0x19f   : > { %v2577_v20 = vmax.bf16 %v2389_v49, %v1950_v33  ;;  %v1793_v35 = vrot.slane %v504_v63, 5  ;;  %v2396_v52 = vshrl.u32 %v504_v63, 16  ;;  %v314_v30 = vmax.bf16 %v4193_v62, %v4126_v57 }
 0x1a0   : > { %v1252_v23 = vrot.slane %v1250_v36, 5  ;;  %v1256_v15 = vrot.slane %v1254_v50, 4  ;;  %v1262_v51 = vrot.slane %v1260_v29, 5  ;;  %v1791_v53 = vsel %vm3110_vm6, %v1789_v58, %v1790_v9 }
 0x1a1   : > { %v2987_v60 = vcombine.low %v2576_v46, %v2577_v20  ;;  %v1792_v8 = vrot.slane %v1790_v9, 4  ;;  %v2391_v31 = vrot.slane %v1254_v50, 5  ;;  %v2392_v42 = vrot.slane %v1250_v36, 6 }
 0x1a2   : > { %v1253_v38 = vsel %vm3121_vm7, %v1248_v47, %v1252_v23  ;;  %v1257_v21 = vor.u32 %v1256_v15, %v1252_v23  ;;  %v2398_v26 = vrot.slane %v2396_v52, 5  ;;  %v2399_v34 = vrot.slane %v1260_v29, 6 }
 0x1a3   : > { %2988 = vst [vmem:[%s3150_s15 + $0xf8] sm:$0xff] %v2987_v60   ;;  %v1468_v57 = vmax.bf16 %v1253_v38, %v4247_v6  ;;  %v1794_v54 = vsel %vm3110_vm6, %v1792_v8, %v1793_v35  ;;  %v2393_v41 = vor.u32 %v2392_v42, %v2391_v31  ;;  %v318_v55 = vmax.bf16 %v4243_v32, %v4193_v62  ;;  %v4304_v6 = vld [vmem:[%s3039_s11 + $0x198] sm:$0xf] }
 0x1a4   : > { %v1258_v40 = vrot.slane %v1257_v21, 4  ;;  %v2400_v59 = vor.u32 %v2399_v34, %v2398_v26  ;;  %v409_v4 = vmax.bf16 %v313_v16, %v4240_v28  ;;  %v410_v45 = vmax.bf16 %v314_v30, %v4243_v32 }
 0x1a5   : > { %v1951_v11 = vmax.bf16 %v1791_v53, %v1468_v57  ;;  %v2394_v27 = vsel %vm3134_vm8, %v2390_v0, %v2393_v41  ;;  %v2395_v1 = vrot.slane %v2393_v41, 4  ;;  %v414_v10 = vmax.bf16 %v318_v55, %v218_v43 }
 0x1a6   : > { %v1263_v24 = vsel %vm3121_vm7, %v1258_v40, %v1262_v51  ;;  %v505_v3 = vmax.bf16 %v409_v4, %v217_v19  ;;  %v506_v62 = vmax.bf16 %v410_v45, %v218_v43  ;;  %v4309_v13 = vmax.bf16 %v411_v5, %v4304_v6  ;;  %v222_v43 = vld [vmem:[%s3039_s11 + $0x1a4] sm:$0xf] }
 0x1a7   : > { %v1469_v18 = vmax.bf16 %v1263_v24, %v503_v48  ;;  %v2401_v32 = vsel %vm3134_vm8, %v2395_v1, %v2400_v59  ;;  %v2578_v12 = vmax.bf16 %v2394_v27, %v1951_v11  ;;  %v316_v2 = vmax.bf16 %v4230_v37, %v4168_v39  ;;  %v221_v11 = vld [vmem:[%s3039_s11 + $0x1a0] sm:$0xf] }
 0x1a8   : > { %v1265_v7 = vshrl.u32 %v505_v3, 16  ;;  %v1268_v46 = vshll.u32 %v505_v3, 16  ;;  %v1274_v63 = vshll.u32 %v506_v62, 16  ;;  %v1278_v47 = vshrl.u32 %v506_v62, 16 }
 0x1a9   : > { %v1952_v58 = vmax.bf16 %v1794_v54, %v1469_v18  ;;  %v1284_v33 = vshll.u32 %v4309_v13, 16  ;;  %v1288_v49 = vshrl.u32 %v4309_v13, 16  ;;  %v2742_v0 = vrot.slane %v505_v3, 9 }
 0x1aa   : > { %v1267_v5 = vrot.slane %v1265_v7, 4  ;;  %v1270_v16 = vrot.slane %v1268_v46, 5  ;;  %v1276_v48 = vrot.slane %v1274_v63, 5  ;;  %v1280_v36 = vrot.slane %v1278_v47, 4 }
 0x1ab   : > { %v2579_v50 = vmax.bf16 %v2401_v32, %v1952_v58  ;;  %v1286_v29 = vrot.slane %v1284_v33, 5  ;;  %v1290_v9 = vrot.slane %v1288_v49, 4  ;;  %v1797_v20 = vrot.slane %v506_v62, 5 }
 0x1ac   : > { %v1271_v39 = vor.u32 %v1270_v16, %v1267_v5  ;;  %v1281_v35 = vor.u32 %v1280_v36, %v1276_v48  ;;  %v1800_v52 = vrot.slane %v4309_v13, 5  ;;  %v2402_v30 = vrot.slane %v1265_v7, 5 }
 0x1ad   : > { %v2989_v23 = vcombine.low %v2578_v12, %v2579_v50  ;;  %v1798_v15 = vsel %vm3110_vm6, %v2742_v0, %v1797_v20  ;;  %v1799_v51 = vrot.slane %v1797_v20, 4  ;;  %v2403_v53 = vrot.slane %v1268_v46, 6  ;;  %v220_v46 = vld [vmem:[%s3039_s11 + $0x19c] sm:$0x3] }
 0x1ae   : > { %v1272_v60 = vrot.slane %v1271_v39, 4  ;;  %v1282_v8 = vrot.slane %v1281_v35, 4  ;;  %v2406_v31 = vrot.slane %v1278_v47, 5  ;;  %v2407_v42 = vrot.slane %v1274_v63, 6 }
 0x1af   : > { %2990 = vst [vmem:[%s3150_s15 + $0x100] sm:$0xff] %v2989_v23   ;;  %v1801_v38 = vsel %vm3110_vm6, %v1799_v51, %v1800_v52  ;;  %v2404_v21 = vor.u32 %v2403_v53, %v2402_v30  ;;  %v2411_v26 = vrot.slane %v1288_v49, 5  ;;  %v2412_v34 = vrot.slane %v1284_v33, 6 }
 0x1b0   : > { %v1277_v57 = vsel %vm3121_vm7, %v1272_v60, %v1276_v48  ;;  %v1287_v54 = vsel %vm3121_vm7, %v1282_v8, %v1286_v29  ;;  %v2408_v41 = vor.u32 %v2407_v42, %v2406_v31  ;;  %v317_v55 = vmax.bf16 %v4240_v28, %v4186_v25 }
 0x1b1   : > { %v1470_v40 = vmax.bf16 %v1277_v57, %v505_v3  ;;  %v1471_v59 = vmax.bf16 %v1287_v54, %v506_v62  ;;  %v2405_v4 = vrot.slane %v2404_v21, 4  ;;  %v2413_v45 = vor.u32 %v2412_v34, %v2411_v26 }
 0x1b2   : > { %v2410_v27 = vrot.slane %v2408_v41, 4  ;;  %v412_v1 = vmax.bf16 %v316_v2, %v4276_v56  ;;  %v413_v24 = vmax.bf16 %v317_v55, %v217_v19  ;;  %v4332_v18 = vmax.bf16 %v414_v10, %v222_v43 }
 0x1b3   : > { %v1953_v32 = vmax.bf16 %v1798_v15, %v1470_v40  ;;  %v1954_v12 = vmax.bf16 %v1801_v38, %v1471_v59  ;;  %v2409_v7 = vsel %vm3134_vm8, %v2405_v4, %v2408_v41  ;;  %v1291_v63 = vor.u32 %v1290_v9, %v1286_v29  ;;  %v223_v41 = vld [vmem:[%s3039_s11 + $0x1a8] sm:$0xf]  ;;  %v224_v59 = vld [vmem:[%s3039_s11 + $0x1ac] sm:$0x3] }
 0x1b4   : > { %v2414_v25 = vsel %vm3134_vm8, %v2410_v27, %v2413_v45  ;;  %v508_v28 = vmax.bf16 %v412_v1, %v220_v46  ;;  %v509_v3 = vmax.bf16 %v413_v24, %v221_v11  ;;  %v1308_v62 = vshll.u32 %v4332_v18, 16 }
 0x1b5   : > { %v2580_v47 = vmax.bf16 %v2409_v7, %v1953_v32  ;;  %v2581_v2 = vmax.bf16 %v2414_v25, %v1954_v12  ;;  %v1292_v19 = vrot.slane %v1291_v63, 4  ;;  %v1312_v10 = vshrl.u32 %v4332_v18, 16 }
 0x1b6   : > { %v1294_v58 = vshll.u32 %v508_v28, 16  ;;  %v1299_v33 = vshrl.u32 %v509_v3, 16  ;;  %v1302_v49 = vshll.u32 %v509_v3, 16  ;;  %v1310_v0 = vrot.slane %v1308_v62, 5 }
 0x1b7   : > { %v2991_v5 = vcombine.low %v2580_v47, %v2581_v2  ;;  %v1314_v16 = vrot.slane %v1312_v10, 4  ;;  %v1802_v48 = vrot.slane %v1800_v52, 4  ;;  %v1803_v36 = vrot.slane %v508_v28, 5 }
 0x1b8   : > { %v1296_v50 = vrot.slane %v1294_v58, 5  ;;  %v1301_v29 = vrot.slane %v1299_v33, 4  ;;  %v1304_v9 = vrot.slane %v1302_v49, 5  ;;  %v2743_v20 = vrot.slane %v509_v3, 9 }
 0x1b9   : > { %2992 = vst [vmem:[%s3150_s15 + $0x108] sm:$0xff] %v2991_v5   ;;  %v1804_v39 = vsel %vm3110_vm6, %v1802_v48, %v1803_v36  ;;  %v1807_v35 = vrot.slane %v4332_v18, 5  ;;  %v2415_v30 = vrot.slane %v2413_v45, 4  ;;  %v2416_v23 = vshrl.u32 %v508_v28, 16 }
 0x1ba   : > { %v1297_v15 = vsel %vm3121_vm7, %v1292_v19, %v1296_v50  ;;  %v1305_v51 = vor.u32 %v1304_v9, %v1301_v29  ;;  %v2419_v53 = vrot.slane %v1294_v58, 6  ;;  %v2422_v52 = vrot.slane %v1299_v33, 5 }
 0x1bb   : > { %v1472_v60 = vmax.bf16 %v1297_v15, %v4309_v13  ;;  %v1808_v8 = vsel %vm3110_vm6, %v2743_v20, %v1807_v35  ;;  %v2418_v31 = vrot.slane %v2416_v23, 5  ;;  %v2423_v42 = vrot.slane %v1302_v49, 6 }
 0x1bc   : > { %v1306_v38 = vrot.slane %v1305_v51, 4  ;;  %v2426_v21 = vrot.slane %v1312_v10, 5  ;;  %v2427_v26 = vrot.slane %v1308_v62, 6  ;;  %v319_v34 = vmax.bf16 %v4271_v22, %v4196_v14 }
 0x1bd   : > { %v1955_v43 = vmax.bf16 %v1804_v39, %v1472_v60  ;;  %v2420_v57 = vor.u32 %v2419_v53, %v2418_v31  ;;  %v2424_v54 = vor.u32 %v2423_v42, %v2422_v52  ;;  %v320_v55 = vmax.bf16 %v4276_v56, %v4230_v37 }
 0x1be   : > { %v1311_v13 = vsel %vm3121_vm7, %v1306_v38, %v1310_v0  ;;  %v2428_v40 = vor.u32 %v2427_v26, %v2426_v21  ;;  %v415_v4 = vmax.bf16 %v319_v34, %v4304_v6  ;;  %v1315_v45 = vor.u32 %v1314_v16, %v1310_v0 }
 0x1bf   : > { %v1473_v11 = vmax.bf16 %v1311_v13, %v509_v3  ;;  %v2421_v27 = vsel %vm3134_vm8, %v2415_v30, %v2420_v57  ;;  %v2425_v14 = vrot.slane %v2424_v54, 4  ;;  %v416_v22 = vmax.bf16 %v320_v55, %v220_v46 }
 0x1c0   : > { %v511_v1 = vmax.bf16 %v415_v4, %v223_v41  ;;  %v1809_v24 = vrot.slane %v1807_v35, 4  ;;  %v2582_v56 = vmax.bf16 %v2421_v27, %v1955_v43  ;;  %v1316_v7 = vrot.slane %v1315_v45, 4 }
 0x1c1   : > { %v1956_v32 = vmax.bf16 %v1808_v8, %v1473_v11  ;;  %v2429_v37 = vsel %vm3134_vm8, %v2425_v14, %v2428_v40  ;;  %v512_v12 = vmax.bf16 %v416_v22, %v224_v59  ;;  %v2430_v62 = vrot.slane %v2428_v40, 4 }
 0x1c2   : > { %v1318_v63 = vshll.u32 %v511_v1, 16  ;;  %v1322_v25 = vshrl.u32 %v511_v1, 16  ;;  %v1810_v28 = vrot.slane %v511_v1, 5 }
 0x1c3   : > { %v2583_v6 = vmax.bf16 %v2429_v37, %v1956_v32  ;;  %v1328_v3 = vshll.u32 %v512_v12, 16  ;;  %v2436_v47 = vshrl.u32 %v512_v12, 16  ;;  %v1813_v10 = vrot.slane %v512_v12, 5 }
 0x1c4   : > { %v1320_v2 = vrot.slane %v1318_v63, 5  ;;  %v1324_v19 = vrot.slane %v1322_v25, 4  ;;  %v1811_v46 = vsel %vm3110_vm6, %v1809_v24, %v1810_v28  ;;  %v1812_v33 = vrot.slane %v1810_v28, 4 }
 0x1c5   : > { %v2993_v58 = vcombine.low %v2582_v56, %v2583_v6  ;;  %v2431_v49 = vrot.slane %v1322_v25, 5  ;;  %v2432_v0 = vrot.slane %v1318_v63, 6  ;;  %v1330_v48 = vrot.slane %v1328_v3, 5 }
 0x1c6   : > { %v1321_v5 = vsel %vm3121_vm7, %v1316_v7, %v1320_v2  ;;  %v1325_v16 = vor.u32 %v1324_v19, %v1320_v2  ;;  %v2438_v36 = vrot.slane %v2436_v47, 5  ;;  %v2439_v9 = vrot.slane %v1328_v3, 6 }
 0x1c7   : > { %2994 = vst [vmem:[%s3150_s15 + $0x110] sm:$0xff] %v2993_v58   ;;  %v1474_v50 = vmax.bf16 %v1321_v5, %v4332_v18  ;;  %v2433_v29 = vor.u32 %v2432_v0, %v2431_v49  ;;  %v1814_v15 = vsel %vm3110_vm6, %v1812_v33, %v1813_v10 }
 0x1c8   : > { %v1326_v20 = vrot.slane %v1325_v16, 4  ;;  %v2440_v30 = vor.u32 %v2439_v9, %v2438_v36 }
 0x1c9   : > { %v1957_v39 = vmax.bf16 %v1811_v46, %v1474_v50  ;;  %v2435_v35 = vrot.slane %v2433_v29, 4  ;;  %v2434_v51 = vsel %vm3134_vm8, %v2430_v62, %v2433_v29 }
 0x1ca   : > { %v1331_v23 = vsel %vm3121_vm7, %v1326_v20, %v1330_v48 }
 0x1cb   : > { %v1475_v53 = vmax.bf16 %v1331_v23, %v511_v1  ;;  %v2441_v18 = vsel %vm3134_vm8, %v2435_v35, %v2440_v30  ;;  %v2584_v60 = vmax.bf16 %v2434_v51, %v1957_v39 }
 0x1cd   : > { %v1958_v52 = vmax.bf16 %v1814_v15, %v1475_v53 }
 0x1cf   : > { %v2585_v8 = vmax.bf16 %v2441_v18, %v1958_v52 }
 0x1d1   : > { %v2995_v31 = vcombine.low %v2584_v60, %v2585_v8 }
 0x1d3   : > { %2996 = vst [vmem:[%s3150_s15 + $0x118] sm:$0xff] %v2995_v31  }
 0x1d4 PF: > { %s11_s6 = sadd.s32 1, %s3013_s6  }
 0x1d5   : > { %p8_p4 = scmp.ge.s32.totalorder %s11_s6, 4  }
 0x1d7   :  { %10 = sbr.rel (!%p8_p4) target bundleno = 1 (0x1), region = 54 }

// kernel: two_path_cnn_forward.8
= control target key start
LH: loop header
LB: loop body
LE: loop exit
PB: predicated region body
PF: predicated region fallthrough
CT: control target
= control target key end

     0   :  { %s2642_s12 = smov 0   ;;  %s3282_s0 = inlined_call_operand.vmem [shape: bf16[1024,640], index: 0, kind: input, shape index: {}]   ;;  %s3283_s1 = inlined_call_operand.vmem [shape: bf16[640,256], index: 1, kind: input, shape index: {}]   ;;  %s3284_s2 = inlined_call_operand.vmem [shape: f32[1,256], index: 2, kind: input, shape index: {}]   ;;  %s3285_s3 = inlined_call_operand.vmem [shape: bf16[1024,128], index: 3, kind: output, shape index: {}]  }
   0x1 LB: > { %s2009_s13 = sadd.s32 4294967295, %s2619_s12   ;;  %p2013_p0 = scmp.ge.s32.totalorder %s2619_s12, 1  ;;  %s2619_s12 = sphi %s2642_s12, %s13_s12  }
   0x2   : > { %p139_p1 = scmp.lt.s32.totalorder %s2619_s12, 5 }
   0x4   : > { %p140_p2 = pnand %p2013_p0, %p139_p1 }
   0x6   : > { %143 = sbr.rel (%p140_p2) target bundleno = 468 (0x1d4), region = 32 }
   0xb   : > { %v2381_v0 = vld [vmem:[%s3283_s1 + $0x74] ss:$8 sps:$4 sm:$0xff]   ;;  %v2383_v1 = vld [vmem:[%s3283_s1 + $0x70] ss:$8 sps:$4 sm:$0xff]   ;;  %v2384_v2 = vld [vmem:[%s3283_s1 + $0x64] ss:$8 sps:$4 sm:$0xff]  }
   0xc   : > { %1182 = vmatprep.subr.bf16.mxu0 %v2381_v0  ;;  %2339 = vmatprep.subr.bf16.mxu1 %v2381_v0  ;;  %v2386_v3 = vld [vmem:[%s3283_s1 + $0x60] ss:$8 sps:$4 sm:$0xff]   ;;  %v2387_v4 = vld [vmem:[%s3283_s1 + $0x54] ss:$8 sps:$4 sm:$0xff]   ;;  %s2014_s24 = sshll.u32 %s2009_s13, 5 }
   0xd   : > { %1183 = vmatpush1.bf16.msra.mxu0 %v2383_v1  ;;  %2355 = vmatpush1.bf16.msra.mxu1 %v2383_v1  ;;  %v2389_v5 = vld [vmem:[%s3283_s1 + $0x50] ss:$8 sps:$4 sm:$0xff]   ;;  %p165_p3 = scmp.lt.s32.totalorder %s2014_s24, 127  ;;  %v2390_v6 = vld [vmem:[%s3283_s1 + $0x44] ss:$8 sps:$4 sm:$0xff]  }
   0xe   : > { %1184 = vmatprep.subr.bf16.mxu0 %v2384_v2  ;;  %2340 = vmatprep.subr.bf16.mxu1 %v2384_v2  ;;  %v2392_v7 = vld [vmem:[%s3283_s1 + $0x40] ss:$8 sps:$4 sm:$0xff]   ;;  %v2393_v8 = vld [vmem:[%s3283_s1 + $0x34] ss:$8 sps:$4 sm:$0xff]   ;;  %v2395_v9 = vld [vmem:[%s3283_s1 + $0x30] ss:$8 sps:$4 sm:$0xff]  }
   0xf   : > { %s3329_s24 = smov (!%p165_p3, %s2014_s24), 127  ;;  %v2396_v10 = vld [vmem:[%s3283_s1 + $0x24] ss:$8 sps:$4 sm:$0xff]   ;;  %v2398_v11 = vld [vmem:[%s3283_s1 + $0x20] ss:$8 sps:$4 sm:$0xff]  }
  0x10   : > { %s2371_s8 = smul.u32 20, %s3329_s24  ;;  %v2399_v12 = vld [vmem:[%s3283_s1 + $0x14] ss:$8 sps:$4 sm:$0xff]   ;;  %v2401_v14 = vld [vmem:[%s3283_s1 + $0x10] ss:$8 sps:$4 sm:$0xff]  }
  0x11   : > { %1185 = vmatpush1.bf16.msra.mxu0 %v2386_v3  ;;  %2356 = vmatpush1.bf16.msra.mxu1 %v2386_v3  ;;  %v2402_v16 = vld [vmem:[%s3283_s1 + $0x4] ss:$8 sps:$4 sm:$0xff]   ;;  %v2404_v17 = vld [vmem:[%s3283_s1] ss:$8 sps:$4 sm:$0xff]   ;;  %v2405_v18 = vld [vmem:[%s3283_s1 + $0xf4] ss:$8 sps:$4 sm:$0xff]  }
  0x12   : > { %1186 = vmatprep.subr.bf16.mxu0 %v2387_v4  ;;  %2341 = vmatprep.subr.bf16.mxu1 %v2387_v4  ;;  %s2692_s16 = scalar_lea.vmem %s3282_s0, %s2371_s8  ;;  %v2407_v19 = vld [vmem:[%s3283_s1 + $0xf0] ss:$8 sps:$4 sm:$0xff]   ;;  %v2408_v20 = vld [vmem:[%s3283_s1 + $0xe4] ss:$8 sps:$4 sm:$0xff]   ;;  %v2410_v21 = vld [vmem:[%s3283_s1 + $0xe0] ss:$8 sps:$4 sm:$0xff]  }
  0x13   : > { %v2431_v13 = vld [vmem:[%s2692_s16 + $0x4] ss:$20 sps:$4 sm:$0xff]   ;;  %v2411_v22 = vld [vmem:[%s3283_s1 + $0xd4] ss:$8 sps:$4 sm:$0xff]   ;;  %v2416_v25 = vld [vmem:[%s3283_s1 + $0xc0] ss:$8 sps:$4 sm:$0xff]  }
  0x14   : > { %v2434_v15 = vld [vmem:[%s2692_s16 + $0x144] ss:$20 sps:$4 sm:$0xff]   ;;  %1214 = vmatprep.mubr.bf16.mxu0 %v2431_v13  ;;  %v2417_v26 = vld [vmem:[%s3283_s1 + $0xb4] ss:$8 sps:$4 sm:$0xff]   ;;  %v2422_v29 = vld [vmem:[%s3283_s1 + $0xa0] ss:$8 sps:$4 sm:$0xff]  }
  0x15   : > { %1187 = vmatpush1.bf16.msra.mxu0 %v2389_v5  ;;  %2357 = vmatpush1.bf16.msra.mxu1 %v2389_v5  ;;  %v2413_v23 = vld [vmem:[%s3283_s1 + $0xd0] ss:$8 sps:$4 sm:$0xff]   ;;  %v2414_v24 = vld [vmem:[%s3283_s1 + $0xc4] ss:$8 sps:$4 sm:$0xff]   ;;  %v2423_v30 = vld [vmem:[%s3283_s1 + $0x94] ss:$8 sps:$4 sm:$0xff]  }
  0x16   : > { %1188 = vmatprep.subr.bf16.mxu0 %v2390_v6  ;;  %2342 = vmatprep.subr.bf16.mxu1 %v2390_v6  ;;  %v2419_v27 = vld [vmem:[%s3283_s1 + $0xb0] ss:$8 sps:$4 sm:$0xff]   ;;  %v2420_v28 = vld [vmem:[%s3283_s1 + $0xa4] ss:$8 sps:$4 sm:$0xff]   ;;  %v2428_v33 = vld [vmem:[%s3283_s1 + $0x80] ss:$8 sps:$4 sm:$0xff]  }
  0x17   : > { %1294 = vmatprep.mubr.bf16.mxu1 %v2434_v15  ;;  %v2425_v31 = vld [vmem:[%s3283_s1 + $0x90] ss:$8 sps:$4 sm:$0xff]   ;;  %v2426_v32 = vld [vmem:[%s3283_s1 + $0x84] ss:$8 sps:$4 sm:$0xff]   ;;  %v2437_v34 = vld [vmem:[%s3283_s1 + $0x174] ss:$8 sps:$4 sm:$0xff]  }
  0x18   : > { %v2429_v35 = vld [vmem:[%s2692_s16] ss:$20 sps:$4 sm:$0xff]   ;;  %v2435_v38 = vld [vmem:[%s3283_s1 + $0x170] ss:$8 sps:$4 sm:$0xff]   ;;  %v2443_v40 = vld [vmem:[%s3283_s1 + $0x164] ss:$8 sps:$4 sm:$0xff]  }
  0x19   : > { %1189 = vmatpush1.bf16.msra.mxu0 %v2392_v7  ;;  %2358 = vmatpush1.bf16.msra.mxu1 %v2392_v7  ;;  %v2440_v36 = vld [vmem:[%s3283_s1 + $0x274] ss:$8 sps:$4 sm:$0xff]   ;;  %v2438_v39 = vld [vmem:[%s3283_s1 + $0x270] ss:$8 sps:$4 sm:$0xff]   ;;  %v2444_v41 = vld [vmem:[%s2692_s16 + $0x2c] ss:$20 sps:$4 sm:$0xff]  }
  0x1a   : > { %1190 = vmatprep.subr.bf16.mxu0 %v2393_v8  ;;  %2343 = vmatprep.subr.bf16.mxu1 %v2393_v8  ;;  %v2432_v37 = vld [vmem:[%s2692_s16 + $0x140] ss:$20 sps:$4 sm:$0xff]   ;;  %v2455_v43 = vld [vmem:[%s3283_s1 + $0x264] ss:$8 sps:$4 sm:$0xff]   ;;  %v2448_v48 = vld [vmem:[%s2692_s16 + $0x28] ss:$20 sps:$4 sm:$0xff]  }
  0x1b   : > { %v2446_v42 = vld [vmem:[%s2692_s16 + $0x16c] ss:$20 sps:$4 sm:$0xff]   ;;  %v2452_v45 = vld [vmem:[%s3283_s1 + $0x154] ss:$8 sps:$4 sm:$0xff]   ;;  %v2450_v50 = vld [vmem:[%s3283_s1 + $0x150] ss:$8 sps:$4 sm:$0xff]  }
  0x1c   : > { %v2441_v44 = vld [vmem:[%s3283_s1 + $0x160] ss:$8 sps:$4 sm:$0xff]   ;;  %v2470_v47 = vld [vmem:[%s3283_s1 + $0x254] ss:$8 sps:$4 sm:$0xff]   ;;  %v2458_v51 = vld [vmem:[%s3283_s1 + $0x144] ss:$8 sps:$4 sm:$0xff]  }
  0x1d   : > { %1191 = vmatpush1.bf16.msra.mxu0 %v2395_v9  ;;  %2359 = vmatpush1.bf16.msra.mxu1 %v2395_v9  ;;  %v2453_v46 = vld [vmem:[%s3283_s1 + $0x260] ss:$8 sps:$4 sm:$0xff]   ;;  %v2468_v54 = vld [vmem:[%s3283_s1 + $0x250] ss:$8 sps:$4 sm:$0xff]   ;;  %v2485_v55 = vld [vmem:[%s3283_s1 + $0x244] ss:$8 sps:$4 sm:$0xff]  }
  0x1e   : > { %1192 = vmatprep.subr.bf16.mxu0 %v2396_v10  ;;  %2344 = vmatprep.subr.bf16.mxu1 %v2396_v10  ;;  %v2449_v49 = vld [vmem:[%s2692_s16 + $0x168] ss:$20 sps:$4 sm:$0xff]   ;;  %v2463_v57 = vld [vmem:[%s2692_s16 + $0x50] ss:$20 sps:$4 sm:$0xff]   ;;  %v2478_v5 = vld [vmem:[%s2692_s16 + $0x78] ss:$20 sps:$4 sm:$0xff]  }
  0x1f   : > { %v2459_v52 = vld [vmem:[%s2692_s16 + $0x54] ss:$20 sps:$4 sm:$0xff]   ;;  %v2464_v58 = vld [vmem:[%s2692_s16 + $0x190] ss:$20 sps:$4 sm:$0xff]   ;;  %v2479_v7 = vld [vmem:[%s2692_s16 + $0x1b8] ss:$20 sps:$4 sm:$0xff]  }
  0x20   : > { %v2461_v53 = vld [vmem:[%s2692_s16 + $0x194] ss:$20 sps:$4 sm:$0xff]   ;;  %v2465_v61 = vld [vmem:[%s3283_s1 + $0x130] ss:$8 sps:$4 sm:$0xff]   ;;  %v2473_v63 = vld [vmem:[%s3283_s1 + $0x124] ss:$8 sps:$4 sm:$0xff]  }
  0x21   : > { %1193 = vmatpush1.bf16.msra.mxu0 %v2398_v11  ;;  %2360 = vmatpush1.bf16.msra.mxu1 %v2398_v11  ;;  %v2456_v56 = vld [vmem:[%s3283_s1 + $0x140] ss:$8 sps:$4 sm:$0xff]   ;;  %v2467_v59 = vld [vmem:[%s3283_s1 + $0x134] ss:$8 sps:$4 sm:$0xff]   ;;  %v2498_v3 = vld [vmem:[%s3283_s1 + $0x230] ss:$8 sps:$4 sm:$0xff]  }
  0x22   : > { %1194 = vmatprep.subr.bf16.mxu0 %v2399_v12  ;;  %2345 = vmatprep.subr.bf16.mxu1 %v2399_v12  ;;  %v2483_v60 = vld [vmem:[%s3283_s1 + $0x240] ss:$8 sps:$4 sm:$0xff]   ;;  %v2474_v62 = vld [vmem:[%s2692_s16 + $0x7c] ss:$20 sps:$4 sm:$0xff]   ;;  %v2515_v4 = vld [vmem:[%s3283_s1 + $0x224] ss:$8 sps:$4 sm:$0xff]  }
  0x23   : > { %v2476_v0 = vld [vmem:[%s2692_s16 + $0x1bc] ss:$20 sps:$4 sm:$0xff]   ;;  %v2471_v2 = vld [vmem:[%s3283_s1 + $0x120] ss:$8 sps:$4 sm:$0xff]   ;;  %v2488_v9 = vld [vmem:[%s3283_s1 + $0x104] ss:$8 sps:$4 sm:$0xff]  }
  0x24   : > { %v2500_v1 = vld [vmem:[%s3283_s1 + $0x234] ss:$8 sps:$4 sm:$0xff]   ;;  %v2480_v8 = vld [vmem:[%s3283_s1 + $0x110] ss:$8 sps:$4 sm:$0xff]   ;;  %v2513_v12 = vld [vmem:[%s3283_s1 + $0x220] ss:$8 sps:$4 sm:$0xff]  }
  0x25   : > { %1195 = vmatpush1.bf16.msra.mxu0 %v2401_v14  ;;  %2361 = vmatpush1.bf16.msra.mxu1 %v2401_v14  ;;  %v2482_v6 = vld [vmem:[%s3283_s1 + $0x114] ss:$8 sps:$4 sm:$0xff]   ;;  %v2489_v10 = vld [vmem:[%s2692_s16 + $0xa4] ss:$20 sps:$4 sm:$0xff]   ;;  %v2486_v14 = vld [vmem:[%s3283_s1 + $0x100] ss:$8 sps:$4 sm:$0xff]  }
  0x26   : > { %1196 = vmatprep.subr.bf16.mxu0 %v2402_v16  ;;  %2346 = vmatprep.subr.bf16.mxu1 %v2402_v16  ;;  %v2491_v11 = vld [vmem:[%s2692_s16 + $0x1e4] ss:$20 sps:$4 sm:$0xff]   ;;  %v2530_v13 = vld [vmem:[%s3283_s1 + $0x214] ss:$8 sps:$4 sm:$0xff]  }
  0x27   : > { %v2493_v15 = vld [vmem:[%s2692_s16 + $0xa0] ss:$20 sps:$4 sm:$0xff]  }
  0x28   : > { %v2497_v16 = vld [vmem:[%s3283_s1 + $0x1f4] ss:$8 sps:$4 sm:$0xff]  }
  0x29   : > { %1197 = vmatpush1.bf16.msra.mxu0 %v2404_v17  ;;  %2362 = vmatpush1.bf16.msra.mxu1 %v2404_v17  ;;  %v2528_v17 = vld [vmem:[%s3283_s1 + $0x210] ss:$8 sps:$4 sm:$0xff]  }
  0x2a   : > { %1198 = vmatprep.subr.bf16.mxu0 %v2405_v18  ;;  %2347 = vmatprep.subr.bf16.mxu1 %v2405_v18  ;;  %v2494_v18 = vld [vmem:[%s2692_s16 + $0x1e0] ss:$20 sps:$4 sm:$0xff]  }
  0x2d   : > { %1199 = vmatpush2.bf16.msra.mxu0 %v2407_v19  ;;  %2363 = vmatpush2.bf16.msra.mxu1 %v2407_v19  ;;  %v2495_v19 = vld [vmem:[%s3283_s1 + $0x1f0] ss:$8 sps:$4 sm:$0xff]  }
  0x2e   : > { %1200 = vmatprep.subr.bf16.mxu0 %v2408_v20  ;;  %2348 = vmatprep.subr.bf16.mxu1 %v2408_v20  ;;  %v2504_v20 = vld [vmem:[%s2692_s16 + $0xcc] ss:$20 sps:$4 sm:$0xff]  }
  0x31   : > { %1201 = vmatpush2.bf16.msra.mxu0 %v2410_v21  ;;  %2364 = vmatpush2.bf16.msra.mxu1 %v2410_v21  ;;  %v2503_v21 = vld [vmem:[%s3283_s1 + $0x1e4] ss:$8 sps:$4 sm:$0xff]  }
  0x32   : > { %1202 = vmatprep.subr.bf16.mxu0 %v2411_v22  ;;  %2349 = vmatprep.subr.bf16.mxu1 %v2411_v22  ;;  %v2506_v22 = vld [vmem:[%s2692_s16 + $0x20c] ss:$20 sps:$4 sm:$0xff]  }
  0x35   : > { %1203 = vmatpush2.bf16.msra.mxu0 %v2413_v23  ;;  %2365 = vmatpush2.bf16.msra.mxu1 %v2413_v23  ;;  %v2545_v23 = vld [vmem:[%s3283_s1 + $0x204] ss:$8 sps:$4 sm:$0xff]  }
  0x36   : > { %1204 = vmatprep.subr.bf16.mxu0 %v2414_v24  ;;  %2350 = vmatprep.subr.bf16.mxu1 %v2414_v24  ;;  %v2543_v24 = vld [vmem:[%s3283_s1 + $0x200] ss:$8 sps:$4 sm:$0xff]  }
  0x39   : > { %1205 = vmatpush2.bf16.msra.mxu0 %v2416_v25  ;;  %2366 = vmatpush2.bf16.msra.mxu1 %v2416_v25  ;;  %v2501_v25 = vld [vmem:[%s3283_s1 + $0x1e0] ss:$8 sps:$4 sm:$0xff]  }
  0x3a   : > { %1206 = vmatprep.subr.bf16.mxu0 %v2417_v26  ;;  %2351 = vmatprep.subr.bf16.mxu1 %v2417_v26  ;;  %v2512_v26 = vld [vmem:[%s3283_s1 + $0x1d4] ss:$8 sps:$4 sm:$0xff]  }
  0x3d   : > { %1207 = vmatpush2.bf16.msra.mxu0 %v2419_v27  ;;  %2367 = vmatpush2.bf16.msra.mxu1 %v2419_v27  ;;  %v2508_v27 = vld [vmem:[%s2692_s16 + $0xc8] ss:$20 sps:$4 sm:$0xff]  }
  0x3e   : > { %1208 = vmatprep.subr.bf16.mxu0 %v2420_v28  ;;  %2352 = vmatprep.subr.bf16.mxu1 %v2420_v28  ;;  %v2509_v28 = vld [vmem:[%s2692_s16 + $0x208] ss:$20 sps:$4 sm:$0xff]  }
  0x41   : > { %1209 = vmatpush2.bf16.msra.mxu0 %v2422_v29  ;;  %2368 = vmatpush2.bf16.msra.mxu1 %v2422_v29  ;;  %v2510_v29 = vld [vmem:[%s3283_s1 + $0x1d0] ss:$8 sps:$4 sm:$0xff]  }
  0x42   : > { %1210 = vmatprep.subr.bf16.mxu0 %v2423_v30  ;;  %2353 = vmatprep.subr.bf16.mxu1 %v2423_v30  ;;  %v2518_v30 = vld [vmem:[%s3283_s1 + $0x1c4] ss:$8 sps:$4 sm:$0xff]  }
  0x45   : > { %1211 = vmatpush2.bf16.msra.mxu0 %v2425_v31  ;;  %2369 = vmatpush2.bf16.msra.mxu1 %v2425_v31  ;;  %v2519_v31 = vld [vmem:[%s2692_s16 + $0xf4] ss:$20 sps:$4 sm:$0xff]  }
  0x46   : > { %1212 = vmatprep.subr.bf16.mxu0 %v2426_v32  ;;  %2354 = vmatprep.subr.bf16.mxu1 %v2426_v32  ;;  %v2521_v32 = vld [vmem:[%s2692_s16 + $0x234] ss:$20 sps:$4 sm:$0xff]  }
  0x49   : > { %1213 = vmatpush2.bf16.msra.mxu0 %v2428_v33  ;;  %2370 = vmatpush2.bf16.msra.mxu1 %v2428_v33  ;;  %v2516_v33 = vld [vmem:[%s3283_s1 + $0x1c0] ss:$8 sps:$4 sm:$0xff]  }
  0x4a   : > { %1375 = vmatprep.subr.bf16.mxu1 %v2437_v34  ;;  %1568 = vmatprep.subr.bf16.mxu0 %v2440_v36  ;;  %v2523_v34 = vld [vmem:[%s2692_s16 + $0xf0] ss:$20 sps:$4 sm:$0xff]  }
  0x4b   : > { %v2524_v36 = vld [vmem:[%s2692_s16 + $0x230] ss:$20 sps:$4 sm:$0xff]  }
  0x4c   : > { %1215 = vmatmul.mubr.bf16.vlgmr.msra.gmra.mxu0 %v2429_v35  ;;  %1295 = vmatmul.mubr.bf16.vlgmr.msra.gmra.mxu1 %v2432_v37  ;;  %v2527_v35 = vld [vmem:[%s3283_s1 + $0x1b4] ss:$8 sps:$4 sm:$0xff]   ;;  %v2525_v37 = vld [vmem:[%s3283_s1 + $0x1b0] ss:$8 sps:$4 sm:$0xff]  }
  0x4d   : > { %1376 = vmatpush1.bf16.msra.mxu1 %v2435_v38  ;;  %1569 = vmatpush1.bf16.msra.mxu0 %v2438_v39  ;;  %v2534_v38 = vld [vmem:[%s2692_s16 + $0x11c] ss:$20 sps:$4 sm:$0xff]   ;;  %v2533_v39 = vld [vmem:[%s3283_s1 + $0x1a4] ss:$8 sps:$4 sm:$0xff]  }
  0x4e   : > { %1377 = vmatprep.subr.bf16.mxu1 %v2443_v40  ;;  %1224 = vmatprep.mubr.bf16.mxu0 %v2444_v41  ;;  %v2536_v40 = vld [vmem:[%s2692_s16 + $0x25c] ss:$20 sps:$4 sm:$0xff]   ;;  %v2531_v41 = vld [vmem:[%s3283_s1 + $0x1a0] ss:$8 sps:$4 sm:$0xff]  }
  0x4f   : > { %1304 = vmatprep.mubr.bf16.mxu1 %v2446_v42  ;;  %1570 = vmatprep.subr.bf16.mxu0 %v2455_v43  ;;  %v2542_v42 = vld [vmem:[%s3283_s1 + $0x194] ss:$8 sps:$4 sm:$0xff]   ;;  %v2538_v43 = vld [vmem:[%s2692_s16 + $0x118] ss:$20 sps:$4 sm:$0xff]  }
  0x51   : > { %1378 = vmatpush1.bf16.msra.mxu1 %v2441_v44  ;;  %1571 = vmatpush1.bf16.msra.mxu0 %v2453_v46  ;;  %v2539_v44 = vld [vmem:[%s2692_s16 + $0x258] ss:$20 sps:$4 sm:$0xff]  }
  0x52   : > { %1379 = vmatprep.subr.bf16.mxu1 %v2452_v45  ;;  %1572 = vmatprep.subr.bf16.mxu0 %v2470_v47  ;;  %v2540_v45 = vld [vmem:[%s3283_s1 + $0x190] ss:$8 sps:$4 sm:$0xff]   ;;  %v2551_v46 = vld [vmem:[%s2692_s16 + $0xc] ss:$20 sps:$4 sm:$0xff]  }
  0x53   : > { %v2548_v47 = vld [vmem:[%s3283_s1 + $0x184] ss:$8 sps:$4 sm:$0xff]  }
  0x54   : > { %1225 = vmatmul.mubr.bf16.gmra.mxu0 %v2448_v48  ;;  %1305 = vmatmul.mubr.bf16.gmra.mxu1 %v2449_v49  ;;  %v2546_v48 = vld [vmem:[%s3283_s1 + $0x180] ss:$8 sps:$4 sm:$0xff]   ;;  %v2621_v49 = vmov 0  }
  0x55   : > { %1380 = vmatpush1.bf16.msra.mxu1 %v2450_v50  ;;  %1234 = vmatprep.mubr.bf16.mxu0 %v2459_v52  ;;  %v2549_v50 = vld [vmem:[%s2692_s16 + $0x8] ss:$20 sps:$4 sm:$0xff]  }
  0x56   : > { %1381 = vmatprep.subr.bf16.mxu1 %v2458_v51  ;;  %1314 = vmatprep.mubr.bf16.mxu1 %v2461_v53  ;;  %v2552_v51 = vld [vmem:[%s2692_s16 + $0x10] ss:$20 sps:$4 sm:$0xff]   ;;  %v2553_v52 = vld [vmem:[%s2692_s16 + $0x34] ss:$20 sps:$4 sm:$0xff]  }
  0x57   : > { %1573 = vmatpush1.bf16.msra.mxu0 %v2468_v54  ;;  %v2555_v53 = vld [vmem:[%s2692_s16 + $0x30] ss:$20 sps:$4 sm:$0xff]   ;;  %v2556_v54 = vld [vmem:[%s2692_s16 + $0x38] ss:$20 sps:$4 sm:$0xff]  }
  0x58   : > { %1574 = vmatprep.subr.bf16.mxu0 %v2485_v55  ;;  %v2557_v55 = vld [vmem:[%s2692_s16 + $0x5c] ss:$20 sps:$4 sm:$0xff]  }
  0x59   : > { %1382 = vmatpush1.bf16.msra.mxu1 %v2456_v56  ;;  %v2559_v56 = vld [vmem:[%s2692_s16 + $0x58] ss:$20 sps:$4 sm:$0xff]  }
  0x5a   : > { %1383 = vmatprep.subr.bf16.mxu1 %v2467_v59  ;;  %v2563_v59 = vld [vmem:[%s2692_s16 + $0x80] ss:$20 sps:$4 sm:$0xff]  }
  0x5b   : > { %1575 = vmatpush1.bf16.msra.mxu0 %v2483_v60  ;;  %v2564_v60 = vld [vmem:[%s2692_s16 + $0x88] ss:$20 sps:$4 sm:$0xff]  }
  0x5c   : > { %1235 = vmatmul.mubr.bf16.gmra.mxu0 %v2463_v57  ;;  %1315 = vmatmul.mubr.bf16.gmra.mxu1 %v2464_v58  ;;  %v2560_v57 = vld [vmem:[%s2692_s16 + $0x60] ss:$20 sps:$4 sm:$0xff]   ;;  %v2561_v58 = vld [vmem:[%s2692_s16 + $0x84] ss:$20 sps:$4 sm:$0xff]  }
  0x5d   : > { %1384 = vmatpush1.bf16.msra.mxu1 %v2465_v61  ;;  %1244 = vmatprep.mubr.bf16.mxu0 %v2474_v62  ;;  %v2565_v61 = vld [vmem:[%s2692_s16 + $0xac] ss:$20 sps:$4 sm:$0xff]   ;;  %v2567_v62 = vld [vmem:[%s2692_s16 + $0xa8] ss:$20 sps:$4 sm:$0xff]  }
  0x5e   : > { %1385 = vmatprep.subr.bf16.mxu1 %v2473_v63  ;;  %1324 = vmatprep.mubr.bf16.mxu1 %v2476_v0  ;;  %v2568_v63 = vld [vmem:[%s2692_s16 + $0xb0] ss:$20 sps:$4 sm:$0xff]   ;;  %v2569_v0 = vld [vmem:[%s2692_s16 + $0xd4] ss:$20 sps:$4 sm:$0xff]  }
  0x5f   : > { %1576 = vmatprep.subr.bf16.mxu0 %v2500_v1  ;;  %v2571_v1 = vld [vmem:[%s2692_s16 + $0xd0] ss:$20 sps:$4 sm:$0xff]  }
  0x60   : > { %1577 = vmatpush1.bf16.msra.mxu0 %v2498_v3  ;;  %v2573_v3 = vld [vmem:[%s2692_s16 + $0xfc] ss:$20 sps:$4 sm:$0xff]  }
  0x61   : > { %1386 = vmatpush1.bf16.msra.mxu1 %v2471_v2  ;;  %1578 = vmatprep.subr.bf16.mxu0 %v2515_v4  ;;  %v2572_v2 = vld [vmem:[%s2692_s16 + $0xd8] ss:$20 sps:$4 sm:$0xff]  }
  0x62   : > { %1387 = vmatprep.subr.bf16.mxu1 %v2482_v6  ;;  %v2575_v4 = vld [vmem:[%s2692_s16 + $0xf8] ss:$20 sps:$4 sm:$0xff]  }
  0x63   : > { %v2577_v6 = vld [vmem:[%s2692_s16 + $0x124] ss:$20 sps:$4 sm:$0xff]  }
  0x64   : > { %1245 = vmatmul.mubr.bf16.gmra.mxu0 %v2478_v5  ;;  %1325 = vmatmul.mubr.bf16.gmra.mxu1 %v2479_v7  ;;  %v2576_v5 = vld [vmem:[%s2692_s16 + $0x100] ss:$20 sps:$4 sm:$0xff]  }
  0x65   : > { %1388 = vmatpush1.bf16.msra.mxu1 %v2480_v8  ;;  %1254 = vmatprep.mubr.bf16.mxu0 %v2489_v10  ;;  %v2579_v7 = vld [vmem:[%s2692_s16 + $0x120] ss:$20 sps:$4 sm:$0xff]   ;;  %v2580_v8 = vld [vmem:[%s2692_s16 + $0x128] ss:$20 sps:$4 sm:$0xff]  }
  0x66   : > { %1389 = vmatprep.subr.bf16.mxu1 %v2488_v9  ;;  %1334 = vmatprep.mubr.bf16.mxu1 %v2491_v11  ;;  %v2581_v9 = vld [vmem:[%s2692_s16 + $0x14c] ss:$20 sps:$4 sm:$0xff]   ;;  %v2583_v10 = vld [vmem:[%s2692_s16 + $0x148] ss:$20 sps:$4 sm:$0xff]   ;;  %v2584_v11 = vld [vmem:[%s2692_s16 + $0x150] ss:$20 sps:$4 sm:$0xff]  }
  0x67   : > { %1579 = vmatpush1.bf16.msra.mxu0 %v2513_v12  ;;  %v2585_v12 = vld [vmem:[%s2692_s16 + $0x174] ss:$20 sps:$4 sm:$0xff]  }
  0x68   : > { %1580 = vmatprep.subr.bf16.mxu0 %v2530_v13  ;;  %v2587_v13 = vld [vmem:[%s2692_s16 + $0x170] ss:$20 sps:$4 sm:$0xff]  }
  0x69   : > { %1390 = vmatpush1.bf16.msra.mxu1 %v2486_v14  ;;  %v2588_v14 = vld [vmem:[%s2692_s16 + $0x178] ss:$20 sps:$4 sm:$0xff]  }
  0x6a   : > { %1391 = vmatprep.subr.bf16.mxu1 %v2497_v16  ;;  %v2591_v16 = vld [vmem:[%s2692_s16 + $0x198] ss:$20 sps:$4 sm:$0xff]  }
  0x6b   : > { %1581 = vmatpush1.bf16.msra.mxu0 %v2528_v17  ;;  %v2592_v17 = vld [vmem:[%s2692_s16 + $0x1a0] ss:$20 sps:$4 sm:$0xff]  }
  0x6c   : > { %1255 = vmatmul.mubr.bf16.gmra.mxu0 %v2493_v15  ;;  %1335 = vmatmul.mubr.bf16.gmra.mxu1 %v2494_v18  ;;  %v2589_v15 = vld [vmem:[%s2692_s16 + $0x19c] ss:$20 sps:$4 sm:$0xff]   ;;  %v2593_v18 = vld [vmem:[%s2692_s16 + $0x1c4] ss:$20 sps:$4 sm:$0xff]  }
  0x6d   : > { %1392 = vmatpush2.bf16.msra.mxu1 %v2495_v19  ;;  %1264 = vmatprep.mubr.bf16.mxu0 %v2504_v20  ;;  %v2595_v19 = vld [vmem:[%s2692_s16 + $0x1c0] ss:$20 sps:$4 sm:$0xff]   ;;  %v2596_v20 = vld [vmem:[%s2692_s16 + $0x1c8] ss:$20 sps:$4 sm:$0xff]  }
  0x6e   : > { %1393 = vmatprep.subr.bf16.mxu1 %v2503_v21  ;;  %1344 = vmatprep.mubr.bf16.mxu1 %v2506_v22  ;;  %v2597_v21 = vld [vmem:[%s2692_s16 + $0x1ec] ss:$20 sps:$4 sm:$0xff]   ;;  %v2599_v22 = vld [vmem:[%s2692_s16 + $0x1e8] ss:$20 sps:$4 sm:$0xff]  }
  0x6f   : > { %1582 = vmatprep.subr.bf16.mxu0 %v2545_v23  ;;  %v2600_v23 = vld [vmem:[%s2692_s16 + $0x1f0] ss:$20 sps:$4 sm:$0xff]  }
  0x70   : > { %1583 = vmatpush1.bf16.msra.mxu0 %v2543_v24  ;;  %v2601_v24 = vld [vmem:[%s2692_s16 + $0x214] ss:$20 sps:$4 sm:$0xff]  }
  0x71   : > { %1394 = vmatpush2.bf16.msra.mxu1 %v2501_v25  ;;  %v2603_v25 = vld [vmem:[%s2692_s16 + $0x210] ss:$20 sps:$4 sm:$0xff]  }
  0x72   : > { %1395 = vmatprep.subr.bf16.mxu1 %v2512_v26  ;;  %v2604_v26 = vld [vmem:[%s2692_s16 + $0x218] ss:$20 sps:$4 sm:$0xff]  }
  0x74   : > { %1265 = vmatmul.mubr.bf16.gmra.mxu0 %v2508_v27  ;;  %1345 = vmatmul.mubr.bf16.gmra.mxu1 %v2509_v28  ;;  %v2605_v27 = vld [vmem:[%s2692_s16 + $0x23c] ss:$20 sps:$4 sm:$0xff]   ;;  %v2607_v28 = vld [vmem:[%s2692_s16 + $0x238] ss:$20 sps:$4 sm:$0xff]  }
  0x75   : > { %1396 = vmatpush2.bf16.msra.mxu1 %v2510_v29  ;;  %1274 = vmatprep.mubr.bf16.mxu0 %v2519_v31  ;;  %v2608_v29 = vld [vmem:[%s2692_s16 + $0x240] ss:$20 sps:$4 sm:$0xff]   ;;  %v356_v31 = vlaneseq }
  0x76   : > { %1397 = vmatprep.subr.bf16.mxu1 %v2518_v30  ;;  %1354 = vmatprep.mubr.bf16.mxu1 %v2521_v32  ;;  %v2609_v30 = vld [vmem:[%s2692_s16 + $0x264] ss:$20 sps:$4 sm:$0xff]   ;;  %v2611_v32 = vld [vmem:[%s2692_s16 + $0x260] ss:$20 sps:$4 sm:$0xff]  }
  0x79   : > { %1398 = vmatpush2.bf16.msra.mxu1 %v2516_v33  ;;  %v2612_v33 = vld [vmem:[%s2692_s16 + $0x268] ss:$20 sps:$4 sm:$0xff]   ;;  %s2017_s16 = sshll.u32 %s3329_s24, 2 }
  0x7a   : > { %1399 = vmatprep.subr.bf16.mxu1 %v2527_v35  ;;  %s3181_s11 = scalar_lea.vmem %s3285_s3, %s2017_s16 }
  0x7c   : > { %1275 = vmatmul.mubr.bf16.gmra.mxu0 %v2523_v34  ;;  %1355 = vmatmul.mubr.bf16.gmra.mxu1 %v2524_v36  ;;  %v357_v34 = vshrl.u32 %v356_v31, 7  ;;  %v354_v36 = vld [vmem:[%s3284_s2] sm:$0x3] }
  0x7d   : > { %1400 = vmatpush2.bf16.msra.mxu1 %v2525_v37  ;;  %1284 = vmatprep.mubr.bf16.mxu0 %v2534_v38 }
  0x7e   : > { %1401 = vmatprep.subr.bf16.mxu1 %v2533_v39  ;;  %1364 = vmatprep.mubr.bf16.mxu1 %v2536_v40  ;;  %v358_v35 = vsub.s32 0, %v357_v34  ;;  %v362_v37 = vsub.s32 1, %v357_v34 }
  0x80   : > { %v2997_v38 = vrot.slane %v354_v36, %v358_v35  ;;  %v2999_v39 = vrot.slane %v354_v36, %v362_v37 }
  0x81   : > { %1402 = vmatpush2.bf16.msra.mxu1 %v2531_v41 }
  0x82   : > { %1403 = vmatprep.subr.bf16.mxu1 %v2542_v42 }
  0x84   : > { %1285 = vmatmul.mubr.bf16.gmra.mxu0 %v2538_v43  ;;  %1365 = vmatmul.mubr.bf16.gmra.mxu1 %v2539_v44 }
  0x85   : > { %1404 = vmatpush2.bf16.msra.mxu1 %v2540_v45  ;;  %1407 = vmatprep.mubr.bf16.mxu1 %v2551_v46 }
  0x86   : > { %1405 = vmatprep.subr.bf16.mxu1 %v2548_v47  ;;  %1600 = vmatprep.mubr.bf16.mxu0 %v2621_v49 }
  0x89   : > { %1406 = vmatpush2.bf16.msra.mxu1 %v2546_v48 }
  0x8c   : > { %1408 = vmatmul.mubr.bf16.vlgmr.msra.gmra.mxu1 %v2549_v50  ;;  %1601 = vmatmul.mubr.bf16.vlgmr.msra.gmra.mxu0 %v2552_v51 }
  0x8d   : > { %1417 = vmatprep.mubr.bf16.mxu1 %v2553_v52  ;;  %1610 = vmatprep.mubr.bf16.mxu0 %v2621_v49 }
  0x94   : > { %1418 = vmatmul.mubr.bf16.gmra.mxu1 %v2555_v53  ;;  %1611 = vmatmul.mubr.bf16.gmra.mxu0 %v2556_v54 }
  0x95   : > { %1427 = vmatprep.mubr.bf16.mxu1 %v2557_v55  ;;  %1620 = vmatprep.mubr.bf16.mxu0 %v2621_v49 }
  0x9c   : > { %1428 = vmatmul.mubr.bf16.gmra.mxu1 %v2559_v56  ;;  %1621 = vmatmul.mubr.bf16.gmra.mxu0 %v2560_v57 }
  0x9d   : > { %1437 = vmatprep.mubr.bf16.mxu1 %v2561_v58  ;;  %1630 = vmatprep.mubr.bf16.mxu0 %v2621_v49 }
  0xa4   : > { %1438 = vmatmul.mubr.bf16.gmra.mxu1 %v2563_v59  ;;  %1631 = vmatmul.mubr.bf16.gmra.mxu0 %v2564_v60 }
  0xa5   : > { %1447 = vmatprep.mubr.bf16.mxu1 %v2565_v61  ;;  %1640 = vmatprep.mubr.bf16.mxu0 %v2621_v49 }
  0xac   : > { %1448 = vmatmul.mubr.bf16.gmra.mxu1 %v2567_v62  ;;  %1641 = vmatmul.mubr.bf16.gmra.mxu0 %v2568_v63 }
  0xad   : > { %1457 = vmatprep.mubr.bf16.mxu1 %v2569_v0  ;;  %1650 = vmatprep.mubr.bf16.mxu0 %v2621_v49 }
  0xb4   : > { %1458 = vmatmul.mubr.bf16.gmra.mxu1 %v2571_v1  ;;  %1651 = vmatmul.mubr.bf16.gmra.mxu0 %v2572_v2 }
  0xb5   : > { %1467 = vmatprep.mubr.bf16.mxu1 %v2573_v3  ;;  %1660 = vmatprep.mubr.bf16.mxu0 %v2621_v49 }
  0xbc   : > { %1468 = vmatmul.mubr.bf16.gmra.mxu1 %v2575_v4  ;;  %1661 = vmatmul.mubr.bf16.gmra.mxu0 %v2576_v5 }
  0xbd   : > { %1477 = vmatprep.mubr.bf16.mxu1 %v2577_v6  ;;  %1670 = vmatprep.mubr.bf16.mxu0 %v2621_v49 }
  0xc4   : > { %1478 = vmatmul.mubr.bf16.gmra.mxu1 %v2579_v7  ;;  %1671 = vmatmul.mubr.bf16.gmra.mxu0 %v2580_v8 }
  0xc5   : > { %1487 = vmatprep.mubr.bf16.mxu1 %v2581_v9  ;;  %1680 = vmatprep.mubr.bf16.mxu0 %v2621_v49 }
  0xcc   : > { %1488 = vmatmul.mubr.bf16.gmra.mxu1 %v2583_v10  ;;  %1681 = vmatmul.mubr.bf16.gmra.mxu0 %v2584_v11 }
  0xcd   : > { %1497 = vmatprep.mubr.bf16.mxu1 %v2585_v12  ;;  %1690 = vmatprep.mubr.bf16.mxu0 %v2621_v49 }
  0xd4   : > { %1498 = vmatmul.mubr.bf16.gmra.mxu1 %v2587_v13  ;;  %1691 = vmatmul.mubr.bf16.gmra.mxu0 %v2588_v14 }
  0xd5   : > { %1507 = vmatprep.mubr.bf16.mxu1 %v2589_v15  ;;  %1700 = vmatprep.mubr.bf16.mxu0 %v2621_v49 }
  0xdc   : > { %1508 = vmatmul.mubr.bf16.gmra.mxu1 %v2591_v16  ;;  %1701 = vmatmul.mubr.bf16.gmra.mxu0 %v2592_v17 }
  0xdd   : > { %1517 = vmatprep.mubr.bf16.mxu1 %v2593_v18  ;;  %1710 = vmatprep.mubr.bf16.mxu0 %v2621_v49 }
  0xe4   : > { %1518 = vmatmul.mubr.bf16.gmra.mxu1 %v2595_v19  ;;  %1711 = vmatmul.mubr.bf16.gmra.mxu0 %v2596_v20 }
  0xe5   : > { %1527 = vmatprep.mubr.bf16.mxu1 %v2597_v21  ;;  %1720 = vmatprep.mubr.bf16.mxu0 %v2621_v49 }
  0xec   : > { %1528 = vmatmul.mubr.bf16.gmra.mxu1 %v2599_v22  ;;  %1721 = vmatmul.mubr.bf16.gmra.mxu0 %v2600_v23 }
  0xed   : > { %1537 = vmatprep.mubr.bf16.mxu1 %v2601_v24  ;;  %1730 = vmatprep.mubr.bf16.mxu0 %v2621_v49 }
  0xf4   : > { %1538 = vmatmul.mubr.bf16.gmra.mxu1 %v2603_v25  ;;  %1731 = vmatmul.mubr.bf16.gmra.mxu0 %v2604_v26 }
  0xf5   : > { %1547 = vmatprep.mubr.bf16.mxu1 %v2605_v27  ;;  %1740 = vmatprep.mubr.bf16.mxu0 %v2621_v49 }
  0xfc   : > { %1548 = vmatmul.mubr.bf16.gmra.mxu1 %v2607_v28  ;;  %1741 = vmatmul.mubr.bf16.gmra.mxu0 %v2608_v29 }
  0xfd   : > { %1557 = vmatprep.mubr.bf16.mxu1 %v2609_v30  ;;  %1750 = vmatprep.mubr.bf16.mxu0 %v2621_v49 }
 0x104   : > { %1558 = vmatmul.mubr.bf16.gmra.mxu1 %v2611_v32  ;;  %1751 = vmatmul.mubr.bf16.gmra.mxu0 %v2612_v33 }
 0x10c   : > { %v3001_v40 = vpop.f32.mrf.mxu0  ;;  %v1296_v41 = vpop.f32.mrf.mxu1 }
 0x10d   : > { %v3004_v42 = vadd.f32 %v1296_v41, %v2997_v38 }
 0x10e   : > { %v3006_v43 = vpop.f32.mrf.mxu0  ;;  %v1298_v44 = vpop.f32.mrf.mxu1 }
 0x10f   : > { %v3009_v45 = vadd.f32 %v1298_v44, %v2999_v39 }
 0x110   : > { %v3011_v46 = vpop.f32.mrf.mxu0  ;;  %v1300_v47 = vpop.f32.mrf.mxu1 }
 0x111   : > { %v3014_v48 = vadd.f32 %v1300_v47, %v2997_v38 }
 0x112   : > { %v3016_v49 = vpop.f32.mrf.mxu0  ;;  %v1302_v50 = vpop.f32.mrf.mxu1 }
 0x113   : > { %v3019_v51 = vadd.f32 %v1302_v50, %v2999_v39 }
 0x114   : > { %v3021_v52 = vpop.f32.mrf.mxu0  ;;  %v1306_v53 = vpop.f32.mrf.mxu1 }
 0x115   : > { %v3024_v54 = vadd.f32 %v1306_v53, %v2997_v38 }
 0x116   : > { %v3026_v55 = vpop.f32.mrf.mxu0  ;;  %v1308_v56 = vpop.f32.mrf.mxu1 }
 0x117   : > { %v3029_v57 = vadd.f32 %v1308_v56, %v2999_v39 }
 0x118   : > { %v3031_v58 = vpop.f32.mrf.mxu0  ;;  %v1310_v59 = vpop.f32.mrf.mxu1 }
 0x119   : > { %v3034_v60 = vadd.f32 %v1310_v59, %v2997_v38 }
 0x11a   : > { %v3036_v61 = vpop.f32.mrf.mxu0  ;;  %v1312_v62 = vpop.f32.mrf.mxu1 }
 0x11b   : > { %v3039_v63 = vadd.f32 %v1312_v62, %v2999_v39 }
 0x11c   : > { %v3041_v0 = vpop.f32.mrf.mxu0  ;;  %v1316_v1 = vpop.f32.mrf.mxu1 }
 0x11d   : > { %v3044_v2 = vadd.f32 %v1316_v1, %v2997_v38 }
 0x11e   : > { %v3046_v3 = vpop.f32.mrf.mxu0  ;;  %v1318_v4 = vpop.f32.mrf.mxu1 }
 0x11f   : > { %v3049_v5 = vadd.f32 %v1318_v4, %v2999_v39 }
 0x120   : > { %v3051_v6 = vpop.f32.mrf.mxu0  ;;  %v1320_v7 = vpop.f32.mrf.mxu1 }
 0x121   : > { %v3054_v8 = vadd.f32 %v1320_v7, %v2997_v38 }
 0x122   : > { %v3056_v9 = vpop.f32.mrf.mxu0  ;;  %v1322_v10 = vpop.f32.mrf.mxu1 }
 0x123   : > { %v3059_v11 = vadd.f32 %v1322_v10, %v2999_v39 }
 0x124   : > { %v3061_v12 = vpop.f32.mrf.mxu0  ;;  %v1326_v13 = vpop.f32.mrf.mxu1 }
 0x125   : > { %3286 = vst [vmem:[#allocation2_spill] sm:$0xff] %v3059_v11  ;;  %v3064_v14 = vadd.f32 %v1326_v13, %v2997_v38 }
 0x126   : > { %v3066_v15 = vpop.f32.mrf.mxu0  ;;  %v1328_v16 = vpop.f32.mrf.mxu1 }
 0x127   : > { %3287 = vst [vmem:[#allocation3_spill] sm:$0xff] %v3064_v14  ;;  %v3069_v17 = vadd.f32 %v1328_v16, %v2999_v39 }
 0x128   : > { %v3071_v18 = vpop.f32.mrf.mxu0  ;;  %v1330_v19 = vpop.f32.mrf.mxu1 }
 0x129   : > { %3288 = vst [vmem:[#allocation4_spill] sm:$0xff] %v3069_v17  ;;  %v3074_v20 = vadd.f32 %v1330_v19, %v2997_v38 }
 0x12a   : > { %v3076_v21 = vpop.f32.mrf.mxu0  ;;  %v1332_v22 = vpop.f32.mrf.mxu1 }
 0x12b   : > { %3289 = vst [vmem:[#allocation5_spill] sm:$0xff] %v3074_v20  ;;  %v3079_v23 = vadd.f32 %v1332_v22, %v2999_v39 }
 0x12c   : > { %v3081_v24 = vpop.f32.mrf.mxu0  ;;  %v1336_v25 = vpop.f32.mrf.mxu1 }
 0x12d   : > { %3290 = vst [vmem:[#allocation6_spill] sm:$0xff] %v3079_v23  ;;  %v3084_v26 = vadd.f32 %v1336_v25, %v2997_v38 }
 0x12e   : > { %v3086_v27 = vpop.f32.mrf.mxu0  ;;  %v1338_v28 = vpop.f32.mrf.mxu1 }
 0x12f   : > { %3291 = vst [vmem:[#allocation7_spill] sm:$0xff] %v3084_v26  ;;  %v3089_v29 = vadd.f32 %v1338_v28, %v2999_v39 }
 0x130   : > { %v3091_v30 = vpop.f32.mrf.mxu0  ;;  %v1340_v31 = vpop.f32.mrf.mxu1 }
 0x131   : > { %3292 = vst [vmem:[#allocation8_spill] sm:$0xff] %v3089_v29  ;;  %v3094_v32 = vadd.f32 %v1340_v31, %v2997_v38 }
 0x132   : > { %v3096_v33 = vpop.f32.mrf.mxu0  ;;  %v1342_v34 = vpop.f32.mrf.mxu1 }
 0x133   : > { %3293 = vst [vmem:[#allocation9_spill] sm:$0xff] %v3094_v32  ;;  %v3099_v35 = vadd.f32 %v1342_v34, %v2999_v39 }
 0x134   : > { %v3101_v36 = vpop.f32.mrf.mxu0  ;;  %v1346_v37 = vpop.f32.mrf.mxu1 }
 0x135   : > { %3294 = vst [vmem:[#allocation10_spill] sm:$0xff] %v3099_v35  ;;  %v3104_v41 = vadd.f32 %v1346_v37, %v2997_v38 }
 0x136   : > { %v3106_v44 = vpop.f32.mrf.mxu0  ;;  %v1348_v47 = vpop.f32.mrf.mxu1 }
 0x137   : > { %3295 = vst [vmem:[#allocation11_spill] sm:$0xff] %v3104_v41  ;;  %v3109_v50 = vadd.f32 %v1348_v47, %v2999_v39 }
 0x138   : > { %v3111_v53 = vpop.f32.mrf.mxu0  ;;  %v1350_v56 = vpop.f32.mrf.mxu1 }
 0x139   : > { %3296 = vst [vmem:[#allocation12_spill] sm:$0xff] %v3109_v50  ;;  %v3114_v59 = vadd.f32 %v1350_v56, %v2997_v38 }
 0x13a   : > { %v3116_v62 = vpop.f32.mrf.mxu0  ;;  %v1352_v1 = vpop.f32.mrf.mxu1 }
 0x13b   : > { %3297 = vst [vmem:[#allocation13_spill] sm:$0xff] %v3114_v59  ;;  %v3119_v4 = vadd.f32 %v1352_v1, %v2999_v39  ;;  %v1217_v59 = vadd.f32 %v3001_v40, %v2997_v38  ;;  %v1223_v40 = vadd.f32 %v3016_v49, %v2999_v39 }
 0x13c   : > { %v3121_v7 = vpop.f32.mrf.mxu0  ;;  %v1356_v10 = vpop.f32.mrf.mxu1 }
 0x13d   : > { %3298 = vst [vmem:[#allocation14_spill] sm:$0xff] %v3119_v4  ;;  %v3124_v13 = vadd.f32 %v1356_v10, %v2997_v38 }
 0x13e   : > { %v3126_v16 = vpop.f32.mrf.mxu0  ;;  %v1358_v19 = vpop.f32.mrf.mxu1 }
 0x13f   : > { %3299 = vst [vmem:[#allocation15_spill] sm:$0xff] %v3124_v13  ;;  %v3129_v22 = vadd.f32 %v1358_v19, %v2999_v39 }
 0x140   : > { %v3131_v25 = vpop.f32.mrf.mxu0  ;;  %v1360_v28 = vpop.f32.mrf.mxu1 }
 0x141   : > { %3300 = vst [vmem:[#allocation16_spill] sm:$0xff] %v3129_v22  ;;  %v3134_v31 = vadd.f32 %v1360_v28, %v2997_v38 }
 0x142   : > { %v3136_v34 = vpop.f32.mrf.mxu0  ;;  %v1362_v37 = vpop.f32.mrf.mxu1 }
 0x143   : > { %3301 = vst [vmem:[#allocation17_spill] sm:$0xff] %v3134_v31  ;;  %v3139_v47 = vadd.f32 %v1362_v37, %v2999_v39 }
 0x144   : > { %v3141_v56 = vpop.f32.mrf.mxu0  ;;  %v1366_v1 = vpop.f32.mrf.mxu1 }
 0x145   : > { %3302 = vst [vmem:[#allocation18_spill] sm:$0xff] %v3139_v47  ;;  %v3144_v10 = vadd.f32 %v1366_v1, %v2997_v38 }
 0x146   : > { %v3146_v19 = vpop.f32.mrf.mxu0  ;;  %v1368_v22 = vpop.f32.mrf.mxu1 }
 0x147   : > { %3303 = vst [vmem:[#allocation19_spill] sm:$0xff] %v3144_v10  ;;  %v3149_v13 = vadd.f32 %v1368_v22, %v2999_v39  ;;  %v1219_v22 = vadd.f32 %v3006_v43, %v2999_v39  ;;  %v1227_v43 = vadd.f32 %v3021_v52, %v2997_v38  ;;  %v1233_v52 = vadd.f32 %v3036_v61, %v2999_v39 }
 0x148   : > { %v3151_v28 = vpop.f32.mrf.mxu0  ;;  %v1370_v31 = vpop.f32.mrf.mxu1 }
 0x149   : > { %3304 = vst [vmem:[#allocation20_spill] sm:$0xff] %v3149_v13  ;;  %v3154_v4 = vadd.f32 %v1370_v31, %v2997_v38  ;;  %v1221_v31 = vadd.f32 %v3011_v46, %v2997_v38  ;;  %v1229_v46 = vadd.f32 %v3026_v55, %v2999_v39 }
 0x14a   : > { %v3156_v37 = vpop.f32.mrf.mxu0  ;;  %v1372_v47 = vpop.f32.mrf.mxu1 }
 0x14b   : > { %3305 = vst [vmem:[#allocation21_spill] sm:$0xff] %v3154_v4  ;;  %v3161_v1 = vadd.f32 %v1372_v47, %v2999_v39 }
 0x14c   : > { %v1409_v10 = vpop.f32.mrf.mxu1  ;;  %v1602_v50 = vpop.f32.mrf.mxu0 }
 0x14d   : > { %3306 = vst [vmem:[#allocation22_spill] sm:$0xff] %v3161_v1  ;;  %v1410_v13 = vadd.f32 %v1409_v10, %v1217_v59 }
 0x14e   : > { %v1411_v41 = vpop.f32.mrf.mxu1  ;;  %v1604_v35 = vpop.f32.mrf.mxu0 }
 0x14f   : > { %v1412_v4 = vadd.f32 %v1411_v41, %v1219_v22  ;;  %v1603_v47 = vadd.f32 %v1602_v50, %v1410_v13 }
 0x150   : > { %v1413_v32 = vpop.f32.mrf.mxu1  ;;  %v1606_v29 = vpop.f32.mrf.mxu0 }
 0x151   : > { %v1605_v1 = vadd.f32 %v1604_v35, %v1412_v4  ;;  %v1414_v26 = vadd.f32 %v1413_v32, %v1221_v31  ;;  %v1231_v32 = vadd.f32 %v3031_v58, %v2997_v38  ;;  %v1237_v58 = vadd.f32 %v3041_v0, %v2997_v38 }
 0x152   : > { %v1415_v23 = vpop.f32.mrf.mxu1  ;;  %v1608_v20 = vpop.f32.mrf.mxu0  ;;  %v1243_v0 = vadd.f32 %v3056_v9, %v2999_v39 }
 0x153   : > { %v1761_v59 = vmax.f32 %v1603_v47, %v1605_v1  ;;  %v1416_v10 = vadd.f32 %v1415_v23, %v1223_v40  ;;  %v1607_v41 = vadd.f32 %v1606_v29, %v1414_v26 }
 0x154   : > { %v1419_v17 = vpop.f32.mrf.mxu1  ;;  %v1612_v14 = vpop.f32.mrf.mxu0 }
 0x155   : > { %v1609_v22 = vadd.f32 %v1608_v20, %v1416_v10  ;;  %v1420_v11 = vadd.f32 %v1419_v17, %v1227_v43  ;;  %v1239_v43 = vadd.f32 %v3046_v3, %v2999_v39 }
 0x156   : > { %v1421_v49 = vpop.f32.mrf.mxu1  ;;  %v1614_v50 = vpop.f32.mrf.mxu0 }
 0x157   : > { %v1762_v35 = vmax.f32 %v1607_v41, %v1609_v22  ;;  %v1422_v4 = vadd.f32 %v1421_v49, %v1229_v46  ;;  %v1613_v17 = vadd.f32 %v1612_v14, %v1420_v11 }
 0x158   : > { %v1423_v55 = vpop.f32.mrf.mxu1  ;;  %v1616_v23 = vpop.f32.mrf.mxu0 }
 0x159   : > { %v2247_v20 = vpack.c.bf16 %v1762_v35, %v1761_v59  ;;  %v1615_v26 = vadd.f32 %v1614_v50, %v1422_v4  ;;  %v1424_v29 = vadd.f32 %v1423_v55, %v1231_v32  ;;  %v1241_v59 = vadd.f32 %v3051_v6, %v2997_v38 }
 0x15a   : > { %v1425_v13 = vpop.f32.mrf.mxu1  ;;  %v1618_v1 = vpop.f32.mrf.mxu0 }
 0x15b   : > { %2248 = vst [vmem:[%s3181_s11] sm:$0xff] %v2247_v20   ;;  %v1763_v31 = vmax.f32 %v1613_v17, %v1615_v26  ;;  %v1426_v61 = vadd.f32 %v1425_v13, %v1233_v52  ;;  %v1617_v10 = vadd.f32 %v1616_v23, %v1424_v29  ;;  %v1247_v20 = vadd.f32 %v3061_v12, %v2997_v38 }
 0x15c   : > { %v1429_v40 = vpop.f32.mrf.mxu1  ;;  %v1622_v47 = vpop.f32.mrf.mxu0  ;;  %v1249_v13 = vadd.f32 %v3066_v15, %v2999_v39  ;;  %v1253_v12 = vadd.f32 %v3076_v21, %v2999_v39 }
 0x15d   : > { %v1619_v46 = vadd.f32 %v1618_v1, %v1426_v61  ;;  %v1430_v41 = vadd.f32 %v1429_v40, %v1237_v58  ;;  %v1251_v40 = vadd.f32 %v3071_v18, %v2997_v38 }
 0x15e   : > { %v1431_v11 = vpop.f32.mrf.mxu1  ;;  %v1624_v14 = vpop.f32.mrf.mxu0 }
 0x15f   : > { %v1764_v22 = vmax.f32 %v1617_v10, %v1619_v46  ;;  %v1432_v49 = vadd.f32 %v1431_v11, %v1239_v43  ;;  %v1623_v4 = vadd.f32 %v1622_v47, %v1430_v41 }
 0x160   : > { %v1433_v50 = vpop.f32.mrf.mxu1  ;;  %v1626_v32 = vpop.f32.mrf.mxu0 }
 0x161   : > { %v2252_v35 = vpack.c.bf16 %v1764_v22, %v1763_v31  ;;  %v1625_v52 = vadd.f32 %v1624_v14, %v1432_v49  ;;  %v1434_v3 = vadd.f32 %v1433_v50, %v1241_v59  ;;  %v1257_v49 = vadd.f32 %v3081_v24, %v2997_v38 }
 0x162   : > { %v1435_v55 = vpop.f32.mrf.mxu1  ;;  %v1628_v23 = vpop.f32.mrf.mxu0  ;;  %v1263_v24 = vadd.f32 %v3096_v33, %v2999_v39 }
 0x163   : > { %2324 = vst [vmem:[%s3181_s11 + $0x8] sm:$0xff] %v2252_v35   ;;  %v1765_v17 = vmax.f32 %v1623_v4, %v1625_v52  ;;  %v1436_v26 = vadd.f32 %v1435_v55, %v1243_v0  ;;  %v1627_v9 = vadd.f32 %v1626_v32, %v1434_v3  ;;  %v1259_v35 = vadd.f32 %v3086_v27, %v2999_v39 }
 0x164   : > { %v1439_v6 = vpop.f32.mrf.mxu1  ;;  %v1632_v29 = vpop.f32.mrf.mxu0 }
 0x165   : > { %v1629_v1 = vadd.f32 %v1628_v23, %v1436_v26  ;;  %v1440_v58 = vadd.f32 %v1439_v6, %v1247_v20  ;;  %v1261_v23 = vadd.f32 %v3091_v30, %v2997_v38 }
 0x166   : > { %v1441_v31 = vpop.f32.mrf.mxu1  ;;  %v1634_v61 = vpop.f32.mrf.mxu0 }
 0x167   : > { %v1766_v47 = vmax.f32 %v1627_v9, %v1629_v1  ;;  %v1442_v43 = vadd.f32 %v1441_v31, %v1249_v13  ;;  %v1633_v11 = vadd.f32 %v1632_v29, %v1440_v58  ;;  %v1267_v31 = vadd.f32 %v3101_v36, %v2997_v38 }
 0x168   : > { %v1443_v10 = vpop.f32.mrf.mxu1  ;;  %v1636_v46 = vpop.f32.mrf.mxu0  ;;  %v1273_v36 = vadd.f32 %v3116_v62, %v2999_v39 }
 0x169   : > { %v2257_v41 = vpack.c.bf16 %v1766_v47, %v1765_v17  ;;  %v1635_v14 = vadd.f32 %v1634_v61, %v1442_v43  ;;  %v1444_v15 = vadd.f32 %v1443_v10, %v1251_v40  ;;  %v1269_v43 = vadd.f32 %v3106_v44, %v2999_v39 }
 0x16a   : > { %v1445_v59 = vpop.f32.mrf.mxu1  ;;  %v1638_v22 = vpop.f32.mrf.mxu0 }
 0x16b   : > { %2325 = vst [vmem:[%s3181_s11 + $0x10] sm:$0xff] %v2257_v41   ;;  %v1767_v0 = vmax.f32 %v1633_v11, %v1635_v14  ;;  %v1446_v50 = vadd.f32 %v1445_v59, %v1253_v12  ;;  %v1637_v21 = vadd.f32 %v1636_v46, %v1444_v15  ;;  %v1271_v11 = vadd.f32 %v3111_v53, %v2997_v38 }
 0x16c   : > { %v1449_v18 = vpop.f32.mrf.mxu1  ;;  %v1642_v32 = vpop.f32.mrf.mxu0 }
 0x16d   : > { %v1639_v4 = vadd.f32 %v1638_v22, %v1446_v50  ;;  %v1450_v52 = vadd.f32 %v1449_v18, %v1257_v49 }
 0x16e   : > { %v1451_v3 = vpop.f32.mrf.mxu1  ;;  %v1644_v55 = vpop.f32.mrf.mxu0 }
 0x16f   : > { %v1768_v20 = vmax.f32 %v1637_v21, %v1639_v4  ;;  %v1452_v17 = vadd.f32 %v1451_v3, %v1259_v35  ;;  %v1643_v13 = vadd.f32 %v1642_v32, %v1450_v52  ;;  %v1277_v35 = vadd.f32 %v3121_v7, %v2997_v38 }
 0x170   : > { %v1453_v26 = vpop.f32.mrf.mxu1  ;;  %v1646_v6 = vpop.f32.mrf.mxu0  ;;  %v1279_v3 = vadd.f32 %v3126_v16, %v2999_v39  ;;  %v1283_v7 = vadd.f32 %v3136_v34, %v2999_v39 }
 0x171   : > { %v2262_v29 = vpack.c.bf16 %v1768_v20, %v1767_v0  ;;  %v1645_v9 = vadd.f32 %v1644_v55, %v1452_v17  ;;  %v1454_v27 = vadd.f32 %v1453_v26, %v1261_v23 }
 0x172   : > { %v1455_v1 = vpop.f32.mrf.mxu1  ;;  %v1648_v58 = vpop.f32.mrf.mxu0 }
 0x173   : > { %2326 = vst [vmem:[%s3181_s11 + $0x18] sm:$0xff] %v2262_v29   ;;  %v1769_v61 = vmax.f32 %v1643_v13, %v1645_v9  ;;  %v1456_v40 = vadd.f32 %v1455_v1, %v1263_v24  ;;  %v1647_v33 = vadd.f32 %v1646_v6, %v1454_v27  ;;  %v1281_v24 = vadd.f32 %v3131_v25, %v2997_v38 }
 0x174   : > { %v1459_v30 = vpop.f32.mrf.mxu1  ;;  %v1652_v47 = vpop.f32.mrf.mxu0 }
 0x175   : > { %v1649_v12 = vadd.f32 %v1648_v58, %v1456_v40  ;;  %v1460_v10 = vadd.f32 %v1459_v30, %v1267_v31 }
 0x176   : > { %v1461_v46 = vpop.f32.mrf.mxu1  ;;  %v1654_v41 = vpop.f32.mrf.mxu0 }
 0x177   : > { %v1770_v14 = vmax.f32 %v1647_v33, %v1649_v12  ;;  %v1462_v15 = vadd.f32 %v1461_v46, %v1269_v43  ;;  %v1653_v0 = vadd.f32 %v1652_v47, %v1460_v10  ;;  %v1289_v43 = vadd.f32 %v3146_v19, %v2999_v39 }
 0x178   : > { %v1463_v59 = vpop.f32.mrf.mxu1  ;;  %v1656_v22 = vpop.f32.mrf.mxu0 }
 0x179   : > { %v2267_v49 = vpack.c.bf16 %v1770_v14, %v1769_v61  ;;  %v1655_v50 = vadd.f32 %v1654_v41, %v1462_v15  ;;  %v1464_v44 = vadd.f32 %v1463_v59, %v1271_v11  ;;  %v1287_v61 = vadd.f32 %v3141_v56, %v2997_v38 }
 0x17a   : > { %v1465_v18 = vpop.f32.mrf.mxu1  ;;  %v1658_v32 = vpop.f32.mrf.mxu0  ;;  %v1291_v41 = vadd.f32 %v3151_v28, %v2997_v38  ;;  %v1293_v56 = vadd.f32 %v3156_v37, %v2999_v39 }
 0x17b   : > { %2327 = vst [vmem:[%s3181_s11 + $0x20] sm:$0xff] %v2267_v49   ;;  %v1771_v21 = vmax.f32 %v1653_v0, %v1655_v50  ;;  %v1466_v4 = vadd.f32 %v1465_v18, %v1273_v36  ;;  %v1657_v62 = vadd.f32 %v1656_v22, %v1464_v44 }
 0x17c   : > { %v1469_v53 = vpop.f32.mrf.mxu1  ;;  %v1662_v52 = vpop.f32.mrf.mxu0 }
 0x17d   : > { %v1659_v55 = vadd.f32 %v1658_v32, %v1466_v4  ;;  %v1470_v23 = vadd.f32 %v1469_v53, %v1277_v35 }
 0x17e   : > { %v1471_v20 = vpop.f32.mrf.mxu1  ;;  %v1664_v17 = vpop.f32.mrf.mxu0 }
 0x17f   : > { %v1772_v26 = vmax.f32 %v1657_v62, %v1659_v55  ;;  %v1472_v6 = vadd.f32 %v1471_v20, %v1279_v3  ;;  %v1663_v27 = vadd.f32 %v1662_v52, %v1470_v23 }
 0x180   : > { %v1473_v29 = vpop.f32.mrf.mxu1  ;;  %v1666_v13 = vpop.f32.mrf.mxu0 }
 0x181   : > { %v2272_v9 = vpack.c.bf16 %v1772_v26, %v1771_v21  ;;  %v1665_v1 = vadd.f32 %v1664_v17, %v1472_v6  ;;  %v1474_v16 = vadd.f32 %v1473_v29, %v1281_v24 }
 0x182   : > { %v1475_v58 = vpop.f32.mrf.mxu1  ;;  %v1668_v31 = vpop.f32.mrf.mxu0 }
 0x183   : > { %2328 = vst [vmem:[%s3181_s11 + $0x28] sm:$0xff] %v2272_v9   ;;  %v1773_v40 = vmax.f32 %v1663_v27, %v1665_v1  ;;  %v1476_v30 = vadd.f32 %v1475_v58, %v1283_v7  ;;  %v1667_v34 = vadd.f32 %v1666_v13, %v1474_v16 }
 0x184   : > { %v1479_v25 = vpop.f32.mrf.mxu1  ;;  %v1672_v47 = vpop.f32.mrf.mxu0 }
 0x185   : > { %v1669_v33 = vadd.f32 %v1668_v31, %v1476_v30  ;;  %v1480_v12 = vadd.f32 %v1479_v25, %v1287_v61 }
 0x186   : > { %v1481_v10 = vpop.f32.mrf.mxu1  ;;  %v1674_v46 = vpop.f32.mrf.mxu0 }
 0x187   : > { %v1774_v11 = vmax.f32 %v1667_v34, %v1669_v33  ;;  %v1482_v14 = vadd.f32 %v1481_v10, %v1289_v43  ;;  %v1673_v22 = vadd.f32 %v1672_v47, %v1480_v12 }
 0x188   : > { %v1483_v15 = vpop.f32.mrf.mxu1  ;;  %v1676_v36 = vpop.f32.mrf.mxu0 }
 0x189   : > { %v2277_v59 = vpack.c.bf16 %v1774_v11, %v1773_v40  ;;  %v1675_v49 = vadd.f32 %v1674_v46, %v1482_v14  ;;  %v1484_v19 = vadd.f32 %v1483_v15, %v1291_v41 }
 0x18a   : > { %v1485_v0 = vpop.f32.mrf.mxu1  ;;  %v1678_v50 = vpop.f32.mrf.mxu0 }
 0x18b   : > { %2329 = vst [vmem:[%s3181_s11 + $0x30] sm:$0xff] %v2277_v59   ;;  %v1775_v44 = vmax.f32 %v1673_v22, %v1675_v49  ;;  %v1486_v18 = vadd.f32 %v1485_v0, %v1293_v56  ;;  %v1677_v38 = vadd.f32 %v1676_v36, %v1484_v19  ;;  %v3307_v19 = vld [vmem:[#allocation2_spill] sm:$0xff] }
 0x18c   : > { %v1489_v32 = vpop.f32.mrf.mxu1  ;;  %v1682_v35 = vpop.f32.mrf.mxu0 }
 0x18d   : > { %v1679_v28 = vadd.f32 %v1678_v50, %v1486_v18  ;;  %v1490_v21 = vadd.f32 %v1489_v32, %v3004_v42  ;;  %v3308_v32 = vld [vmem:[#allocation3_spill] sm:$0xff] }
 0x18e   : > { %v1491_v4 = vpop.f32.mrf.mxu1  ;;  %v1684_v39 = vpop.f32.mrf.mxu0 }
 0x18f   : > { %v1776_v37 = vmax.f32 %v1677_v38, %v1679_v28  ;;  %v1492_v53 = vadd.f32 %v1491_v4, %v3009_v45  ;;  %v1683_v55 = vadd.f32 %v1682_v35, %v1490_v21  ;;  %v3309_v21 = vld [vmem:[#allocation4_spill] sm:$0xff] }
 0x190   : > { %v1493_v52 = vpop.f32.mrf.mxu1  ;;  %v1686_v3 = vpop.f32.mrf.mxu0 }
 0x191   : > { %v2282_v62 = vpack.c.bf16 %v1776_v37, %v1775_v44  ;;  %v1685_v23 = vadd.f32 %v1684_v39, %v1492_v53  ;;  %v1494_v20 = vadd.f32 %v1493_v52, %v3014_v48 }
 0x192   : > { %v1495_v17 = vpop.f32.mrf.mxu1  ;;  %v1688_v24 = vpop.f32.mrf.mxu0 }
 0x193   : > { %2330 = vst [vmem:[%s3181_s11 + $0x38] sm:$0xff] %v2282_v62   ;;  %v1777_v26 = vmax.f32 %v1683_v55, %v1685_v23  ;;  %v1496_v6 = vadd.f32 %v1495_v17, %v3019_v51  ;;  %v1687_v29 = vadd.f32 %v1686_v3, %v1494_v20  ;;  %v3310_v3 = vld [vmem:[#allocation5_spill] sm:$0xff]  ;;  %v3311_v17 = vld [vmem:[#allocation6_spill] sm:$0xff] }
 0x194   : > { %v1499_v7 = vpop.f32.mrf.mxu1  ;;  %v1692_v42 = vpop.f32.mrf.mxu0 }
 0x195   : > { %v1689_v13 = vadd.f32 %v1688_v24, %v1496_v6  ;;  %v1500_v45 = vadd.f32 %v1499_v7, %v3024_v54 }
 0x196   : > { %v1501_v9 = vpop.f32.mrf.mxu1  ;;  %v1694_v27 = vpop.f32.mrf.mxu0 }
 0x197   : > { %v1778_v1 = vmax.f32 %v1687_v29, %v1689_v13  ;;  %v1502_v16 = vadd.f32 %v1501_v9, %v3029_v57  ;;  %v1693_v61 = vadd.f32 %v1692_v42, %v1500_v45  ;;  %v3312_v29 = vld [vmem:[#allocation7_spill] sm:$0xff] }
 0x198   : > { %v1503_v58 = vpop.f32.mrf.mxu1  ;;  %v1696_v48 = vpop.f32.mrf.mxu0 }
 0x199   : > { %v2287_v31 = vpack.c.bf16 %v1778_v1, %v1777_v26  ;;  %v1695_v40 = vadd.f32 %v1694_v27, %v1502_v16  ;;  %v1504_v30 = vadd.f32 %v1503_v58, %v3034_v60  ;;  %v3313_v1 = vld [vmem:[#allocation8_spill] sm:$0xff] }
 0x19a   : > { %v1505_v51 = vpop.f32.mrf.mxu1  ;;  %v1698_v25 = vpop.f32.mrf.mxu0 }
 0x19b   : > { %2331 = vst [vmem:[%s3181_s11 + $0x40] sm:$0xff] %v2287_v31   ;;  %v1779_v47 = vmax.f32 %v1693_v61, %v1695_v40  ;;  %v1506_v43 = vadd.f32 %v1505_v51, %v3039_v63  ;;  %v1697_v33 = vadd.f32 %v1696_v48, %v1504_v30  ;;  %v3314_v30 = vld [vmem:[#allocation9_spill] sm:$0xff] }
 0x19c   : > { %v1509_v34 = vpop.f32.mrf.mxu1  ;;  %v1702_v54 = vpop.f32.mrf.mxu0 }
 0x19d   : > { %v1699_v12 = vadd.f32 %v1698_v25, %v1506_v43  ;;  %v1510_v57 = vadd.f32 %v1509_v34, %v3044_v2  ;;  %v3315_v34 = vld [vmem:[#allocation10_spill] sm:$0xff] }
 0x19e   : > { %v1511_v10 = vpop.f32.mrf.mxu1  ;;  %v1704_v46 = vpop.f32.mrf.mxu0 }
 0x19f   : > { %v1780_v41 = vmax.f32 %v1697_v33, %v1699_v12  ;;  %v1512_v11 = vadd.f32 %v1511_v10, %v3049_v5  ;;  %v1703_v15 = vadd.f32 %v1702_v54, %v1510_v57 }
 0x1a0   : > { %v1513_v14 = vpop.f32.mrf.mxu1  ;;  %v1706_v60 = vpop.f32.mrf.mxu0 }
 0x1a1   : > { %v2292_v56 = vpack.c.bf16 %v1780_v41, %v1779_v47  ;;  %v1705_v36 = vadd.f32 %v1704_v46, %v1512_v11  ;;  %v1514_v59 = vadd.f32 %v1513_v14, %v3054_v8  ;;  %v3316_v46 = vld [vmem:[#allocation11_spill] sm:$0xff] }
 0x1a2   : > { %v1515_v63 = vpop.f32.mrf.mxu1  ;;  %v1708_v22 = vpop.f32.mrf.mxu0 }
 0x1a3   : > { %2332 = vst [vmem:[%s3181_s11 + $0x48] sm:$0xff] %v2292_v56   ;;  %v1781_v49 = vmax.f32 %v1703_v15, %v1705_v36  ;;  %v1516_v0 = vadd.f32 %v1515_v63, %v3307_v19  ;;  %v1707_v44 = vadd.f32 %v1706_v60, %v1514_v59  ;;  %v3317_v56 = vld [vmem:[#allocation12_spill] sm:$0xff]  ;;  %v3318_v19 = vld [vmem:[#allocation13_spill] sm:$0xff] }
 0x1a4   : > { %v1519_v50 = vpop.f32.mrf.mxu1  ;;  %v1712_v2 = vpop.f32.mrf.mxu0 }
 0x1a5   : > { %v1709_v18 = vadd.f32 %v1708_v22, %v1516_v0  ;;  %v1520_v5 = vadd.f32 %v1519_v50, %v3308_v32 }
 0x1a6   : > { %v1521_v35 = vpop.f32.mrf.mxu1  ;;  %v1714_v38 = vpop.f32.mrf.mxu0 }
 0x1a7   : > { %v1782_v28 = vmax.f32 %v1707_v44, %v1709_v18  ;;  %v1522_v4 = vadd.f32 %v1521_v35, %v3309_v21  ;;  %v1713_v53 = vadd.f32 %v1712_v2, %v1520_v5  ;;  %v3319_v18 = vld [vmem:[#allocation14_spill] sm:$0xff]  ;;  %v3320_v21 = vld [vmem:[#allocation15_spill] sm:$0xff] }
 0x1a8   : > { %v1523_v39 = vpop.f32.mrf.mxu1  ;;  %v1716_v8 = vpop.f32.mrf.mxu0 }
 0x1a9   : > { %v2297_v37 = vpack.c.bf16 %v1782_v28, %v1781_v49  ;;  %v1715_v52 = vadd.f32 %v1714_v38, %v1522_v4  ;;  %v1524_v62 = vadd.f32 %v1523_v39, %v3310_v3 }
 0x1aa   : > { %v1525_v55 = vpop.f32.mrf.mxu1  ;;  %v1718_v23 = vpop.f32.mrf.mxu0 }
 0x1ab   : > { %2333 = vst [vmem:[%s3181_s11 + $0x50] sm:$0xff] %v2297_v37   ;;  %v1783_v20 = vmax.f32 %v1713_v53, %v1715_v52  ;;  %v1526_v24 = vadd.f32 %v1525_v55, %v3311_v17  ;;  %v1717_v7 = vadd.f32 %v1716_v8, %v1524_v62  ;;  %v3321_v53 = vld [vmem:[#allocation16_spill] sm:$0xff]  ;;  %v3322_v17 = vld [vmem:[#allocation17_spill] sm:$0xff] }
 0x1ac   : > { %v1529_v26 = vpop.f32.mrf.mxu1  ;;  %v1722_v6 = vpop.f32.mrf.mxu0 }
 0x1ad   : > { %v1719_v42 = vadd.f32 %v1718_v23, %v1526_v24  ;;  %v1530_v13 = vadd.f32 %v1529_v26, %v3312_v29 }
 0x1ae   : > { %v1531_v45 = vpop.f32.mrf.mxu1  ;;  %v1724_v9 = vpop.f32.mrf.mxu0 }
 0x1af   : > { %v1784_v27 = vmax.f32 %v1717_v7, %v1719_v42  ;;  %v1532_v16 = vadd.f32 %v1531_v45, %v3313_v1  ;;  %v1723_v61 = vadd.f32 %v1722_v6, %v1530_v13  ;;  %v3323_v42 = vld [vmem:[#allocation18_spill] sm:$0xff]  ;;  %v3324_v1 = vld [vmem:[#allocation19_spill] sm:$0xff] }
 0x1b0   : > { %v1533_v58 = vpop.f32.mrf.mxu1  ;;  %v1726_v48 = vpop.f32.mrf.mxu0 }
 0x1b1   : > { %v2302_v31 = vpack.c.bf16 %v1784_v27, %v1783_v20  ;;  %v1725_v40 = vadd.f32 %v1724_v9, %v1532_v16  ;;  %v1534_v51 = vadd.f32 %v1533_v58, %v3314_v30 }
 0x1b2   : > { %v1535_v25 = vpop.f32.mrf.mxu1  ;;  %v1728_v47 = vpop.f32.mrf.mxu0 }
 0x1b3   : > { %2334 = vst [vmem:[%s3181_s11 + $0x58] sm:$0xff] %v2302_v31   ;;  %v1785_v43 = vmax.f32 %v1723_v61, %v1725_v40  ;;  %v1536_v54 = vadd.f32 %v1535_v25, %v3315_v34  ;;  %v1727_v57 = vadd.f32 %v1726_v48, %v1534_v51  ;;  %v3325_v61 = vld [vmem:[#allocation20_spill] sm:$0xff]  ;;  %v3326_v34 = vld [vmem:[#allocation21_spill] sm:$0xff] }
 0x1b4   : > { %v1539_v33 = vpop.f32.mrf.mxu1  ;;  %v1732_v12 = vpop.f32.mrf.mxu0 }
 0x1b5   : > { %v1729_v10 = vadd.f32 %v1728_v47, %v1536_v54  ;;  %v1540_v41 = vadd.f32 %v1539_v33, %v3316_v46 }
 0x1b6   : > { %v1541_v11 = vpop.f32.mrf.mxu1  ;;  %v1734_v14 = vpop.f32.mrf.mxu0 }
 0x1b7   : > { %v1786_v60 = vmax.f32 %v1727_v57, %v1729_v10  ;;  %v1542_v15 = vadd.f32 %v1541_v11, %v3317_v56  ;;  %v1733_v22 = vadd.f32 %v1732_v12, %v1540_v41  ;;  %v3327_v57 = vld [vmem:[#allocation22_spill] sm:$0xff] }
 0x1b8   : > { %v1543_v36 = vpop.f32.mrf.mxu1  ;;  %v1736_v59 = vpop.f32.mrf.mxu0 }
 0x1b9   : > { %v2307_v63 = vpack.c.bf16 %v1786_v60, %v1785_v43  ;;  %v1735_v49 = vadd.f32 %v1734_v14, %v1542_v15  ;;  %v1544_v0 = vadd.f32 %v1543_v36, %v3318_v19 }
 0x1ba   : > { %v1545_v50 = vpop.f32.mrf.mxu1  ;;  %v1738_v2 = vpop.f32.mrf.mxu0 }
 0x1bb   : > { %2335 = vst [vmem:[%s3181_s11 + $0x60] sm:$0xff] %v2307_v63   ;;  %v1787_v44 = vmax.f32 %v1733_v22, %v1735_v49  ;;  %v1546_v32 = vadd.f32 %v1545_v50, %v3319_v18  ;;  %v1737_v38 = vadd.f32 %v1736_v59, %v1544_v0 }
 0x1bc   : > { %v1549_v5 = vpop.f32.mrf.mxu1  ;;  %v1742_v35 = vpop.f32.mrf.mxu0 }
 0x1bd   : > { %v1739_v28 = vadd.f32 %v1738_v2, %v1546_v32  ;;  %v1550_v4 = vadd.f32 %v1549_v5, %v3320_v21 }
 0x1be   : > { %v1551_v39 = vpop.f32.mrf.mxu1  ;;  %v1744_v8 = vpop.f32.mrf.mxu0 }
 0x1bf   : > { %v1788_v37 = vmax.f32 %v1737_v38, %v1739_v28  ;;  %v1552_v52 = vadd.f32 %v1551_v39, %v3321_v53  ;;  %v1743_v23 = vadd.f32 %v1742_v35, %v1550_v4 }
 0x1c0   : > { %v1553_v3 = vpop.f32.mrf.mxu1  ;;  %v1746_v62 = vpop.f32.mrf.mxu0 }
 0x1c1   : > { %v2312_v55 = vpack.c.bf16 %v1788_v37, %v1787_v44  ;;  %v1745_v20 = vadd.f32 %v1744_v8, %v1552_v52  ;;  %v1554_v24 = vadd.f32 %v1553_v3, %v3322_v17 }
 0x1c2   : > { %v1555_v26 = vpop.f32.mrf.mxu1  ;;  %v1748_v6 = vpop.f32.mrf.mxu0 }
 0x1c3   : > { %2336 = vst [vmem:[%s3181_s11 + $0x68] sm:$0xff] %v2312_v55   ;;  %v1789_v7 = vmax.f32 %v1743_v23, %v1745_v20  ;;  %v1556_v29 = vadd.f32 %v1555_v26, %v3323_v42  ;;  %v1747_v9 = vadd.f32 %v1746_v62, %v1554_v24 }
 0x1c4   : > { %v1559_v13 = vpop.f32.mrf.mxu1  ;;  %v1752_v45 = vpop.f32.mrf.mxu0 }
 0x1c5   : > { %v1749_v27 = vadd.f32 %v1748_v6, %v1556_v29  ;;  %v1560_v16 = vadd.f32 %v1559_v13, %v3324_v1 }
 0x1c6   : > { %v1561_v58 = vpop.f32.mrf.mxu1  ;;  %v1754_v48 = vpop.f32.mrf.mxu0 }
 0x1c7   : > { %v1790_v31 = vmax.f32 %v1747_v9, %v1749_v27  ;;  %v1562_v40 = vadd.f32 %v1561_v58, %v3325_v61  ;;  %v1753_v47 = vadd.f32 %v1752_v45, %v1560_v16 }
 0x1c8   : > { %v1563_v30 = vpop.f32.mrf.mxu1  ;;  %v1756_v51 = vpop.f32.mrf.mxu0 }
 0x1c9   : > { %v2317_v25 = vpack.c.bf16 %v1790_v31, %v1789_v7  ;;  %v1755_v43 = vadd.f32 %v1754_v48, %v1562_v40  ;;  %v1564_v54 = vadd.f32 %v1563_v30, %v3326_v34 }
 0x1ca   : > { %v1565_v33 = vpop.f32.mrf.mxu1  ;;  %v1758_v46 = vpop.f32.mrf.mxu0 }
 0x1cb   : > { %2337 = vst [vmem:[%s3181_s11 + $0x70] sm:$0xff] %v2317_v25   ;;  %v1791_v12 = vmax.f32 %v1753_v47, %v1755_v43  ;;  %v1566_v10 = vadd.f32 %v1565_v33, %v3327_v57  ;;  %v1757_v41 = vadd.f32 %v1756_v51, %v1564_v54 }
 0x1cd   : > { %v1759_v11 = vadd.f32 %v1758_v46, %v1566_v10 }
 0x1cf   : > { %v1792_v14 = vmax.f32 %v1757_v41, %v1759_v11 }
 0x1d1   : > { %v2322_v60 = vpack.c.bf16 %v1792_v14, %v1791_v12 }
 0x1d3   : > { %2338 = vst [vmem:[%s3181_s11 + $0x78] sm:$0xff] %v2322_v60  }
 0x1d4 PF: > { %s13_s12 = sadd.s32 1, %s2619_s12  }
 0x1d5   : > { %p10_p4 = scmp.ge.s32.totalorder %s13_s12, 6  }
 0x1d7   :  { %12 = sbr.rel (!%p10_p4) target bundleno = 1 (0x1), region = 62 }

// kernel: two_path_cnn_forward.9
= control target key start
LH: loop header
LB: loop body
LE: loop exit
PB: predicated region body
PF: predicated region fallthrough
CT: control target
= control target key end

     0   :  { %s1260_s6 = smov 0   ;;  %s1773_s0 = inlined_call_operand.vmem [shape: bf16[2,22,22,128], index: 0, kind: input, shape index: {}]   ;;  %s1774_s1 = inlined_call_operand.vmem [shape: bf16[2,21,21,128], index: 1, kind: output, shape index: {}]  }
   0x1 LB: > { %s1147_s7 = sadd.s32 4294967295, %s1248_s6   ;;  %p1151_p0 = scmp.ge.s32.totalorder %s1248_s6, 1  ;;  %s1248_s6 = sphi %s1260_s6, %s11_s6  }
   0x2   : > { %p87_p1 = scmp.lt.s32.totalorder %s1248_s6, 3 }
   0x4   : > { %p88_p2 = pnand %p1151_p0, %p87_p1 }
   0x5   : > { %p107_p3 = scmp.lt.s32.totalorder (!%p88_p2), %s1147_s7, 1 }
   0x6   : > { %91 = sbr.rel (%p88_p2) target bundleno = 169 (0xa9), region = 24 }
   0xb   : > { %s1780_s7 = smov (!%p107_p3, %s1147_s7), 1  ;;  %vm246_vm0 = vsmask.f32 3328  ;;  %vm247_vm1 = vsmask.f32 7440  ;;  %vm986_vm2 = vcmask 1042432  }
   0xc   : > { %s1232_s8 = smul.u32 264, %s1780_s7  ;;  %vm987_vm3 = vsmask.f32 2304  ;;  %vm1305_vm4 = vmor %vm246_vm0, %vm247_vm1 }
   0xd   : > { %s1233_s12 = smul.u32 252, %s1780_s7  ;;  %vm1323_vm5 = vmand %vm986_vm2, %vm987_vm3 }
   0xe   : > { %s1274_s11 = scalar_lea.vmem %s1773_s0, %s1232_s8 }
   0xf   : > { %v117_v0 = vld [vmem:[%s1274_s11] sm:$0xf]  ;;  %v118_v1 = vld [vmem:[%s1274_s11 + $0x4] sm:$0xf]  ;;  %v119_v2 = vld [vmem:[%s1274_s11 + $0x8] sm:$0x7]  ;;  %s1301_s15 = scalar_lea.vmem %s1774_s1, %s1233_s12 }
  0x10   : > { %v120_v3 = vld [vmem:[%s1274_s11 + $0xc] sm:$0xf]  ;;  %v121_v4 = vld [vmem:[%s1274_s11 + $0x10] sm:$0xf]  ;;  %v122_v5 = vld [vmem:[%s1274_s11 + $0x14] sm:$0x7] }
  0x11   : > { %v124_v6 = vld [vmem:[%s1274_s11 + $0x1c] sm:$0xf]  ;;  %v183_v7 = vmax.bf16 %v120_v3, %v117_v0  ;;  %v184_v8 = vmax.bf16 %v121_v4, %v118_v1  ;;  %v1283_v9 = vmax.bf16 %v122_v5, %v119_v2  ;;  %v123_v10 = vld [vmem:[%s1274_s11 + $0x18] sm:$0xf]  ;;  %v125_v21 = vld [vmem:[%s1274_s11 + $0x20] sm:$0x7] }
  0x12   : > { %v1286_v11 = vmax.bf16 %v124_v6, %v121_v4  ;;  %v186_v12 = vmax.bf16 %v123_v10, %v120_v3  ;;  %v1293_v26 = vld [vmem:[%s1274_s11 + $0x24] sm:$0xf]  ;;  %v1296_v34 = vmax.bf16 %v125_v21, %v122_v5  ;;  %v127_v39 = vld [vmem:[%s1274_s11 + $0x28] sm:$0xf]  ;;  %v128_v49 = vld [vmem:[%s1274_s11 + $0x2c] sm:$0x7] }
  0x13   : > { %v250_v13 = vshrl.u32 %v183_v7, 16  ;;  %v253_v14 = vshll.u32 %v183_v7, 16  ;;  %v259_v15 = vshll.u32 %v184_v8, 16  ;;  %v263_v16 = vshrl.u32 %v184_v8, 16  ;;  %v989_v53 = vld [vmem:[%s1301_s15 + $0x8] sm:$0x7] }
  0x14   : > { %v269_v17 = vshll.u32 %v1283_v9, 16  ;;  %v273_v18 = vshrl.u32 %v1283_v9, 16  ;;  %v279_v19 = vshrl.u32 %v186_v12, 16  ;;  %v282_v20 = vshll.u32 %v186_v12, 16  ;;  %v1334_v63 = vld [vmem:[%s1274_s11 + $0x34] sm:$0xf] }
  0x15   : > { %v252_v22 = vrot.slane %v250_v13, 4  ;;  %v255_v23 = vrot.slane %v253_v14, 5  ;;  %v261_v24 = vrot.slane %v259_v15, 5  ;;  %v265_v25 = vrot.slane %v263_v16, 4 }
  0x16   : > { %v271_v27 = vrot.slane %v269_v17, 5  ;;  %v275_v28 = vrot.slane %v273_v18, 4  ;;  %v281_v29 = vrot.slane %v279_v19, 4  ;;  %v284_v30 = vrot.slane %v282_v20, 5  ;;  %v131_v19 = vld [vmem:[%s1274_s11 + $0x38] sm:$0x7] }
  0x17   : > { %v256_v31 = vor.u32 %v255_v23, %v252_v22  ;;  %v266_v32 = vor.u32 %v265_v25, %v261_v24  ;;  %v288_v33 = vshll.u32 %v1286_v11, 16  ;;  %v292_v38 = vshrl.u32 %v1286_v11, 16 }
  0x18   : > { %v276_v36 = vor.u32 %v275_v28, %v271_v27  ;;  %v285_v37 = vor.u32 %v284_v30, %v281_v29  ;;  %v1312_v40 = vmax.bf16 %v1293_v26, %v123_v10  ;;  %v298_v44 = vshll.u32 %v1296_v34, 16 }
  0x19   : > { %v257_v41 = vrot.slane %v256_v31, 4  ;;  %v267_v42 = vrot.slane %v266_v32, 4  ;;  %v290_v43 = vrot.slane %v288_v33, 5  ;;  %v294_v47 = vrot.slane %v292_v38, 4 }
  0x1a   : > { %v277_v45 = vrot.slane %v276_v36, 4  ;;  %v286_v46 = vrot.slane %v285_v37, 4  ;;  %v302_v48 = vshrl.u32 %v1296_v34, 16  ;;  %v300_v54 = vrot.slane %v298_v44, 5  ;;  %v999_v37 = vld [vmem:[%s1301_s15 + $0x20] sm:$0x7] }
  0x1b   : > { %v262_v50 = vsel %vm1305_vm4, %v257_v41, %v261_v24  ;;  %v272_v51 = vsel %vm1305_vm4, %v267_v42, %v271_v27  ;;  %v1328_v55 = vmax.bf16 %v127_v39, %v124_v6  ;;  %v295_v61 = vor.u32 %v294_v47, %v290_v43  ;;  %v129_v24 = vld [vmem:[%s1274_s11 + $0x30] sm:$0xf] }
  0x1c   : > { %v921_v56 = vmax.bf16 %v262_v50, %v183_v7  ;;  %v922_v57 = vmax.bf16 %v272_v51, %v184_v8  ;;  %v923_v58 = vmax.bf16 %v277_v45, %v1283_v9  ;;  %v291_v59 = vsel %vm1305_vm4, %v286_v46, %v290_v43  ;;  %v994_v9 = vld [vmem:[%s1301_s15 + $0x14] sm:$0x7]  ;;  %v132_v43 = vld [vmem:[%s1274_s11 + $0x3c] sm:$0xf] }
  0x1d   : > { %v924_v60 = vmax.bf16 %v291_v59, %v186_v12  ;;  %v304_v62 = vrot.slane %v302_v48, 4  ;;  %v1336_v0 = vmax.bf16 %v128_v49, %v125_v21  ;;  %v1341_v3 = vmax.bf16 %v1334_v63, %v127_v39  ;;  %v133_v48 = vld [vmem:[%s1274_s11 + $0x40] sm:$0xf] }
  0x1e   : > { %v1211_v1 = vcombine.low %v921_v56, %v922_v57  ;;  %v990_v2 = vsel %vm1323_vm5, %v923_v58, %v989_v53  ;;  %v308_v4 = vshrl.u32 %v1312_v40, 16  ;;  %v296_v5 = vrot.slane %v295_v61, 4 }
  0x1f   : > { %991 = vst [vmem:[%s1301_s15 + $0x8] sm:$0x7] %v990_v2  ;;  %992 = vst [vmem:[%s1301_s15 + $0xc] sm:$0xf] %v924_v60  ;;  %v305_v6 = vor.u32 %v304_v62, %v300_v54  ;;  %v311_v7 = vshll.u32 %v1312_v40, 16  ;;  %v317_v8 = vshll.u32 %v1328_v55, 16  ;;  %v192_v28 = vmax.bf16 %v129_v24, %v1293_v26 }
  0x20   : > { %1160 = vst [vmem:[%s1301_s15] sm:$0xff] %v1211_v1   ;;  %v310_v10 = vrot.slane %v308_v4, 4  ;;  %v321_v12 = vshrl.u32 %v1328_v55, 16  ;;  %v327_v13 = vshll.u32 %v1336_v0, 16  ;;  %v331_v14 = vshrl.u32 %v1336_v0, 16  ;;  %v1386_v4 = vld [vmem:[%s1274_s11 + $0x4c] sm:$0xf] }
  0x21   : > { %v301_v15 = vsel %vm1305_vm4, %v296_v5, %v300_v54  ;;  %v306_v16 = vrot.slane %v305_v6, 4  ;;  %v313_v17 = vrot.slane %v311_v7, 5  ;;  %v319_v18 = vrot.slane %v317_v8, 5  ;;  %v134_v54 = vld [vmem:[%s1274_s11 + $0x44] sm:$0x7] }
  0x22   : > { %v925_v20 = vmax.bf16 %v301_v15, %v1286_v11  ;;  %v323_v21 = vrot.slane %v321_v12, 4  ;;  %v329_v22 = vrot.slane %v327_v13, 5  ;;  %v333_v23 = vrot.slane %v331_v14, 4 }
  0x23   : > { %v926_v25 = vmax.bf16 %v306_v16, %v1296_v34  ;;  %v314_v27 = vor.u32 %v313_v17, %v310_v10  ;;  %v346_v29 = vshll.u32 %v1341_v3, 16  ;;  %v1362_v32 = vmax.bf16 %v131_v19, %v128_v49  ;;  %v137_v17 = vld [vmem:[%s1274_s11 + $0x50] sm:$0x7] }
  0x24   : > { %993 = vst [vmem:[%s1301_s15 + $0x10] sm:$0xf] %v925_v20  ;;  %v324_v30 = vor.u32 %v323_v21, %v319_v18  ;;  %v334_v31 = vor.u32 %v333_v23, %v329_v22  ;;  %v350_v11 = vshrl.u32 %v1341_v3, 16  ;;  %v337_v34 = vshrl.u32 %v192_v28, 16  ;;  %v1004_v23 = vld [vmem:[%s1301_s15 + $0x2c] sm:$0x7] }
  0x25   : > { %v995_v33 = vsel %vm1323_vm5, %v926_v25, %v994_v9  ;;  %v315_v36 = vrot.slane %v314_v27, 4  ;;  %v340_v38 = vshll.u32 %v192_v28, 16  ;;  %v348_v41 = vrot.slane %v346_v29, 5 }
  0x26   : > { %996 = vst [vmem:[%s1301_s15 + $0x14] sm:$0x7] %v995_v33  ;;  %v325_v26 = vrot.slane %v324_v30, 4  ;;  %v335_v39 = vrot.slane %v334_v31, 4  ;;  %v352_v42 = vrot.slane %v350_v11, 4  ;;  %v339_v45 = vrot.slane %v337_v34, 4 }
  0x27   : > { %v320_v44 = vsel %vm1305_vm4, %v315_v36, %v319_v18  ;;  %v342_v46 = vrot.slane %v340_v38, 5  ;;  %v356_v47 = vshll.u32 %v1362_v32, 16  ;;  %v360_v59 = vshrl.u32 %v1362_v32, 16 }
  0x28   : > { %v330_v49 = vsel %vm1305_vm4, %v325_v26, %v329_v22  ;;  %v927_v50 = vmax.bf16 %v320_v44, %v1312_v40  ;;  %v929_v51 = vmax.bf16 %v335_v39, %v1336_v0  ;;  %v353_v53 = vor.u32 %v352_v42, %v348_v41  ;;  %v135_v22 = vld [vmem:[%s1274_s11 + $0x48] sm:$0xf] }
  0x29   : > { %v928_v56 = vmax.bf16 %v330_v49, %v1328_v55  ;;  %v343_v57 = vor.u32 %v342_v46, %v339_v45  ;;  %v358_v58 = vrot.slane %v356_v47, 5  ;;  %v195_v62 = vmax.bf16 %v132_v43, %v129_v24  ;;  %v139_v45 = vld [vmem:[%s1274_s11 + $0x58] sm:$0xf] }
  0x2a   : > { %v1000_v60 = vsel %vm1323_vm5, %v929_v51, %v999_v37  ;;  %v354_v61 = vrot.slane %v353_v53, 4  ;;  %v196_v1 = vmax.bf16 %v133_v48, %v1334_v63  ;;  %v362_v0 = vrot.slane %v360_v59, 4  ;;  %v1009_v53 = vld [vmem:[%s1301_s15 + $0x38] sm:$0x7] }
  0x2b   : > { %v1212_v40 = vcombine.low %v927_v50, %v928_v56  ;;  %1001 = vst [vmem:[%s1301_s15 + $0x20] sm:$0x7] %v1000_v60  ;;  %v344_v2 = vrot.slane %v343_v57, 4  ;;  %v1388_v55 = vmax.bf16 %v134_v54, %v131_v19  ;;  %v1393_v6 = vmax.bf16 %v1386_v4, %v133_v48  ;;  %v140_v50 = vld [vmem:[%s1274_s11 + $0x5c] sm:$0x7] }
  0x2c   : > { %v359_v5 = vsel %vm1305_vm4, %v354_v61, %v358_v58  ;;  %v366_v7 = vshrl.u32 %v195_v62, 16  ;;  %v369_v8 = vshll.u32 %v195_v62, 16  ;;  %v363_v10 = vor.u32 %v362_v0, %v358_v58 }
  0x2d   : > { %1213 = vst [vmem:[%s1301_s15 + $0x18] sm:$0xff] %v1212_v40   ;;  %v349_v63 = vsel %vm1305_vm4, %v344_v2, %v348_v41  ;;  %v931_v9 = vmax.bf16 %v359_v5, %v1341_v3  ;;  %v375_v12 = vshll.u32 %v196_v1, 16  ;;  %v379_v16 = vshrl.u32 %v196_v1, 16  ;;  %v138_v41 = vld [vmem:[%s1274_s11 + $0x54] sm:$0xf] }
  0x2e   : > { %v930_v13 = vmax.bf16 %v349_v63, %v192_v28  ;;  %v368_v14 = vrot.slane %v366_v7, 4  ;;  %v371_v15 = vrot.slane %v369_v8, 5  ;;  %v364_v18 = vrot.slane %v363_v10, 4  ;;  %v1426_v2 = vld [vmem:[%s1274_s11 + $0x64] sm:$0xf] }
  0x2f   : > { %1003 = vst [vmem:[%s1301_s15 + $0x28] sm:$0xf] %v931_v9  ;;  %v377_v19 = vrot.slane %v375_v12, 5  ;;  %v385_v20 = vshll.u32 %v1388_v55, 16  ;;  %v389_v21 = vshrl.u32 %v1388_v55, 16  ;;  %v381_v3 = vrot.slane %v379_v16, 4 }
  0x30   : > { %1002 = vst [vmem:[%s1301_s15 + $0x24] sm:$0xf] %v930_v13  ;;  %v372_v24 = vor.u32 %v371_v15, %v368_v14  ;;  %v198_v25 = vmax.bf16 %v135_v22, %v132_v43  ;;  %v404_v27 = vshll.u32 %v1393_v6, 16  ;;  %v932_v28 = vmax.bf16 %v364_v18, %v1362_v32  ;;  %v1014_v14 = vld [vmem:[%s1301_s15 + $0x44] sm:$0x7] }
  0x31   : > { %v387_v29 = vrot.slane %v385_v20, 5  ;;  %v391_v30 = vrot.slane %v389_v21, 4  ;;  %v1408_v31 = vmax.bf16 %v137_v17, %v134_v54  ;;  %v382_v33 = vor.u32 %v381_v3, %v377_v19  ;;  %v143_v21 = vld [vmem:[%s1274_s11 + $0x68] sm:$0x7] }
  0x32   : > { %v373_v11 = vrot.slane %v372_v24, 4  ;;  %v395_v36 = vshrl.u32 %v198_v25, 16  ;;  %v398_v37 = vshll.u32 %v198_v25, 16  ;;  %v1005_v34 = vsel %vm1323_vm5, %v932_v28, %v1004_v23 }
  0x33   : > { %v392_v38 = vor.u32 %v391_v30, %v387_v29  ;;  %v406_v26 = vrot.slane %v404_v27, 5  ;;  %v408_v39 = vshrl.u32 %v1393_v6, 16  ;;  %1006 = vst [vmem:[%s1301_s15 + $0x2c] sm:$0x7] %v1005_v34  ;;  %v383_v42 = vrot.slane %v382_v33, 4 }
  0x34   : > { %v378_v32 = vsel %vm1305_vm4, %v373_v11, %v377_v19  ;;  %v397_v43 = vrot.slane %v395_v36, 4  ;;  %v400_v44 = vrot.slane %v398_v37, 5  ;;  %v414_v49 = vshll.u32 %v1408_v31, 16 }
  0x35   : > { %v933_v46 = vmax.bf16 %v378_v32, %v195_v62  ;;  %v393_v47 = vrot.slane %v392_v38, 4  ;;  %v410_v48 = vrot.slane %v408_v39, 4  ;;  %v388_v51 = vsel %vm1305_vm4, %v383_v42, %v387_v29  ;;  %v144_v42 = vld [vmem:[%s1274_s11 + $0x6c] sm:$0xf] }
  0x36   : > { %v401_v54 = vor.u32 %v400_v44, %v397_v43  ;;  %v418_v56 = vshrl.u32 %v1408_v31, 16  ;;  %v201_v57 = vmax.bf16 %v138_v41, %v135_v22  ;;  %v934_v58 = vmax.bf16 %v388_v51, %v196_v1 }
  0x37   : > { %v935_v59 = vmax.bf16 %v393_v47, %v1388_v55  ;;  %v411_v60 = vor.u32 %v410_v48, %v406_v26  ;;  %v416_v61 = vrot.slane %v414_v49, 5  ;;  %v202_v0 = vmax.bf16 %v139_v45, %v1386_v4  ;;  %v145_v47 = vld [vmem:[%s1274_s11 + $0x70] sm:$0xf] }
  0x38   : > { %v402_v62 = vrot.slane %v401_v54, 4  ;;  %v420_v40 = vrot.slane %v418_v56, 4  ;;  %v1429_v5 = vmax.bf16 %v140_v50, %v137_v17  ;;  %v1214_v7 = vcombine.low %v933_v46, %v934_v58  ;;  %v1019_v56 = vld [vmem:[%s1301_s15 + $0x50] sm:$0x7] }
  0x39   : > { %v1010_v8 = vsel %vm1323_vm5, %v935_v59, %v1009_v53  ;;  %v412_v63 = vrot.slane %v411_v60, 4  ;;  %v1434_v1 = vmax.bf16 %v1426_v2, %v139_v45  ;;  %v424_v10 = vshrl.u32 %v201_v57, 16  ;;  %v146_v53 = vld [vmem:[%s1274_s11 + $0x74] sm:$0x7] }
  0x3a   : > { %1011 = vst [vmem:[%s1301_s15 + $0x38] sm:$0x7] %v1010_v8  ;;  %v407_v55 = vsel %vm1305_vm4, %v402_v62, %v406_v26  ;;  %v421_v9 = vor.u32 %v420_v40, %v416_v61  ;;  %v427_v12 = vshll.u32 %v201_v57, 16  ;;  %1215 = vst [vmem:[%s1301_s15 + $0x30] sm:$0xff] %v1214_v7   ;;  %v433_v15 = vshll.u32 %v202_v0, 16 }
  0x3b   : > { %v936_v4 = vmax.bf16 %v407_v55, %v198_v25  ;;  %v417_v13 = vsel %vm1305_vm4, %v412_v63, %v416_v61  ;;  %v437_v16 = vshrl.u32 %v202_v0, 16  ;;  %v426_v19 = vrot.slane %v424_v10, 4  ;;  %v141_v25 = vld [vmem:[%s1274_s11 + $0x60] sm:$0xf]  ;;  %v1471_v55 = vld [vmem:[%s1274_s11 + $0x7c] sm:$0xf] }
  0x3c   : > { %v937_v17 = vmax.bf16 %v417_v13, %v1393_v6  ;;  %v422_v18 = vrot.slane %v421_v9, 4  ;;  %v429_v20 = vrot.slane %v427_v12, 5  ;;  %v435_v22 = vrot.slane %v433_v15, 5 }
  0x3d   : > { %1012 = vst [vmem:[%s1301_s15 + $0x3c] sm:$0xf] %v936_v4  ;;  %v439_v23 = vrot.slane %v437_v16, 4  ;;  %v443_v24 = vshll.u32 %v1429_v5, 16  ;;  %v447_v3 = vshrl.u32 %v1429_v5, 16  ;;  %v204_v29 = vmax.bf16 %v141_v25, %v138_v41 }
  0x3e   : > { %1013 = vst [vmem:[%s1301_s15 + $0x40] sm:$0xf] %v937_v17  ;;  %v938_v27 = vmax.bf16 %v422_v18, %v1408_v31  ;;  %v430_v28 = vor.u32 %v429_v20, %v426_v19  ;;  %v462_v6 = vshll.u32 %v1434_v1, 16  ;;  %v1452_v36 = vmax.bf16 %v143_v21, %v140_v50  ;;  %v149_v19 = vld [vmem:[%s1274_s11 + $0x80] sm:$0x7] }
  0x3f   : > { %v440_v30 = vor.u32 %v439_v23, %v435_v22  ;;  %v445_v11 = vrot.slane %v443_v24, 5  ;;  %v449_v33 = vrot.slane %v447_v3, 4  ;;  %v453_v38 = vshrl.u32 %v204_v29, 16  ;;  %v147_v24 = vld [vmem:[%s1274_s11 + $0x78] sm:$0xf] }
  0x40   : > { %v1015_v37 = vsel %vm1323_vm5, %v938_v27, %v1014_v14  ;;  %v431_v34 = vrot.slane %v430_v28, 4  ;;  %v456_v26 = vshll.u32 %v204_v29, 16  ;;  %v464_v41 = vrot.slane %v462_v6, 5  ;;  %v1024_v3 = vld [vmem:[%s1301_s15 + $0x5c] sm:$0x7] }
  0x41   : > { %1016 = vst [vmem:[%s1301_s15 + $0x44] sm:$0x7] %v1015_v37  ;;  %v441_v31 = vrot.slane %v440_v30, 4  ;;  %v450_v39 = vor.u32 %v449_v33, %v445_v11  ;;  %v466_v32 = vshrl.u32 %v1434_v1, 16  ;;  %v455_v44 = vrot.slane %v453_v38, 4 }
  0x42   : > { %v436_v43 = vsel %vm1305_vm4, %v431_v34, %v435_v22  ;;  %v458_v45 = vrot.slane %v456_v26, 5  ;;  %v472_v46 = vshll.u32 %v1452_v36, 16  ;;  %v476_v60 = vshrl.u32 %v1452_v36, 16 }
  0x43   : > { %v446_v48 = vsel %vm1305_vm4, %v441_v31, %v445_v11  ;;  %v939_v49 = vmax.bf16 %v436_v43, %v201_v57  ;;  %v451_v50 = vrot.slane %v450_v39, 4  ;;  %v468_v51 = vrot.slane %v466_v32, 4 }
  0x44   : > { %v940_v54 = vmax.bf16 %v446_v48, %v202_v0  ;;  %v459_v58 = vor.u32 %v458_v45, %v455_v44  ;;  %v474_v59 = vrot.slane %v472_v46, 5  ;;  %v207_v40 = vmax.bf16 %v144_v42, %v141_v25  ;;  %v150_v44 = vld [vmem:[%s1274_s11 + $0x84] sm:$0xf] }
  0x45   : > { %v941_v61 = vmax.bf16 %v451_v50, %v1429_v5  ;;  %v469_v62 = vor.u32 %v468_v51, %v464_v41  ;;  %v208_v7 = vmax.bf16 %v145_v47, %v1426_v2  ;;  %v478_v63 = vrot.slane %v476_v60, 4 }
  0x46   : > { %v1216_v8 = vcombine.low %v939_v49, %v940_v54  ;;  %v460_v57 = vrot.slane %v459_v58, 4  ;;  %v1473_v0 = vmax.bf16 %v146_v53, %v143_v21  ;;  %v1478_v12 = vmax.bf16 %v1471_v55, %v145_v47  ;;  %v151_v49 = vld [vmem:[%s1274_s11 + $0x88] sm:$0xf] }
  0x47   : > { %v1020_v9 = vsel %vm1323_vm5, %v941_v61, %v1019_v56  ;;  %v470_v10 = vrot.slane %v469_v62, 4  ;;  %v482_v5 = vshrl.u32 %v207_v40, 16  ;;  %v479_v4 = vor.u32 %v478_v63, %v474_v59  ;;  %v152_v56 = vld [vmem:[%s1274_s11 + $0x8c] sm:$0x7] }
  0x48   : > { %1217 = vst [vmem:[%s1301_s15 + $0x48] sm:$0xff] %v1216_v8   ;;  %1021 = vst [vmem:[%s1301_s15 + $0x50] sm:$0x7] %v1020_v9  ;;  %v465_v2 = vsel %vm1305_vm4, %v460_v57, %v464_v41  ;;  %v485_v13 = vshll.u32 %v207_v40, 16  ;;  %v491_v14 = vshll.u32 %v208_v7, 16  ;;  %v495_v18 = vshrl.u32 %v208_v7, 16 }
  0x49   : > { %v942_v15 = vmax.bf16 %v465_v2, %v204_v29  ;;  %v475_v16 = vsel %vm1305_vm4, %v470_v10, %v474_v59  ;;  %v484_v17 = vrot.slane %v482_v5, 4  ;;  %v480_v21 = vrot.slane %v479_v4, 4  ;;  %v1029_v59 = vld [vmem:[%s1301_s15 + $0x68] sm:$0x7]  ;;  %v1515_v2 = vld [vmem:[%s1274_s11 + $0x94] sm:$0xf] }
  0x4a   : > { %v943_v20 = vmax.bf16 %v475_v16, %v1434_v1  ;;  %v487_v22 = vrot.slane %v485_v13, 5  ;;  %v493_v23 = vrot.slane %v491_v14, 5  ;;  %v497_v25 = vrot.slane %v495_v18, 4 }
  0x4b   : > { %1022 = vst [vmem:[%s1301_s15 + $0x54] sm:$0xf] %v942_v15  ;;  %v501_v27 = vshll.u32 %v1473_v0, 16  ;;  %v505_v28 = vshrl.u32 %v1473_v0, 16  ;;  %v210_v29 = vmax.bf16 %v147_v24, %v144_v42  ;;  %v944_v6 = vmax.bf16 %v480_v21, %v1452_v36 }
  0x4c   : > { %1023 = vst [vmem:[%s1301_s15 + $0x58] sm:$0xf] %v943_v20  ;;  %v488_v30 = vor.u32 %v487_v22, %v484_v17  ;;  %v520_v1 = vshll.u32 %v1478_v12, 16  ;;  %v1496_v11 = vmax.bf16 %v149_v19, %v146_v53  ;;  %v498_v33 = vor.u32 %v497_v25, %v493_v23  ;;  %v1034_v20 = vld [vmem:[%s1301_s15 + $0x74] sm:$0x7] }
  0x4d   : > { %v503_v37 = vrot.slane %v501_v27, 5  ;;  %v507_v34 = vrot.slane %v505_v28, 4  ;;  %v511_v38 = vshrl.u32 %v210_v29, 16  ;;  %v1025_v26 = vsel %vm1323_vm5, %v944_v6, %v1024_v3  ;;  %v153_v28 = vld [vmem:[%s1274_s11 + $0x90] sm:$0xf] }
  0x4e   : > { %v489_v31 = vrot.slane %v488_v30, 4  ;;  %v514_v39 = vshll.u32 %v210_v29, 16  ;;  %v522_v41 = vrot.slane %v520_v1, 5  ;;  %1026 = vst [vmem:[%s1301_s15 + $0x5c] sm:$0x7] %v1025_v26  ;;  %v499_v36 = vrot.slane %v498_v33, 4 }
  0x4f   : > { %v508_v32 = vor.u32 %v507_v34, %v503_v37  ;;  %v513_v42 = vrot.slane %v511_v38, 4  ;;  %v524_v43 = vshrl.u32 %v1478_v12, 16  ;;  %v530_v47 = vshll.u32 %v1496_v11, 16 }
  0x50   : > { %v494_v45 = vsel %vm1305_vm4, %v489_v31, %v493_v23  ;;  %v516_v46 = vrot.slane %v514_v39, 5  ;;  %v534_v48 = vshrl.u32 %v1496_v11, 16  ;;  %v504_v50 = vsel %vm1305_vm4, %v499_v36, %v503_v37  ;;  %v155_v23 = vld [vmem:[%s1274_s11 + $0x98] sm:$0x7] }
  0x51   : > { %v945_v51 = vmax.bf16 %v494_v45, %v207_v40  ;;  %v509_v53 = vrot.slane %v508_v32, 4  ;;  %v526_v54 = vrot.slane %v524_v43, 4  ;;  %v946_v58 = vmax.bf16 %v504_v50, %v208_v7 }
  0x52   : > { %v517_v60 = vor.u32 %v516_v46, %v513_v42  ;;  %v532_v61 = vrot.slane %v530_v47, 5  ;;  %v536_v62 = vrot.slane %v534_v48, 4  ;;  %v213_v63 = vmax.bf16 %v150_v44, %v147_v24  ;;  %v156_v42 = vld [vmem:[%s1274_s11 + $0x9c] sm:$0xf]  ;;  %v157_v47 = vld [vmem:[%s1274_s11 + $0xa0] sm:$0xf] }
  0x53   : > { %v947_v8 = vmax.bf16 %v509_v53, %v1473_v0  ;;  %v527_v57 = vor.u32 %v526_v54, %v522_v41  ;;  %v214_v9 = vmax.bf16 %v151_v49, %v1471_v55  ;;  %v1218_v10 = vcombine.low %v945_v51, %v946_v58  ;;  %v158_v53 = vld [vmem:[%s1274_s11 + $0xa4] sm:$0x7] }
  0x54   : > { %v518_v5 = vrot.slane %v517_v60, 4  ;;  %v537_v40 = vor.u32 %v536_v62, %v532_v61  ;;  %v1517_v4 = vmax.bf16 %v152_v56, %v149_v19  ;;  %v1522_v14 = vmax.bf16 %v1515_v2, %v151_v49 }
  0x55   : > { %v1030_v7 = vsel %vm1323_vm5, %v947_v8, %v1029_v59  ;;  %v528_v13 = vrot.slane %v527_v57, 4  ;;  %v540_v0 = vshrl.u32 %v213_v63, 16  ;;  %1219 = vst [vmem:[%s1301_s15 + $0x60] sm:$0xff] %v1218_v10   ;;  %v543_v16 = vshll.u32 %v213_v63, 16 }
  0x56   : > { %1031 = vst [vmem:[%s1301_s15 + $0x68] sm:$0x7] %v1030_v7  ;;  %v523_v55 = vsel %vm1305_vm4, %v518_v5, %v522_v41  ;;  %v538_v15 = vrot.slane %v537_v40, 4  ;;  %v549_v17 = vshll.u32 %v214_v9, 16  ;;  %v553_v22 = vshrl.u32 %v214_v9, 16 }
  0x57   : > { %v948_v18 = vmax.bf16 %v523_v55, %v210_v29  ;;  %v533_v19 = vsel %vm1305_vm4, %v528_v13, %v532_v61  ;;  %v542_v21 = vrot.slane %v540_v0, 4  ;;  %v545_v25 = vrot.slane %v543_v16, 5  ;;  %v1039_v61 = vld [vmem:[%s1301_s15 + $0x80] sm:$0x7] }
  0x58   : > { %v949_v24 = vmax.bf16 %v533_v19, %v1478_v12  ;;  %v950_v3 = vmax.bf16 %v538_v15, %v1496_v11  ;;  %v551_v27 = vrot.slane %v549_v17, 5  ;;  %v555_v6 = vrot.slane %v553_v22, 4 }
  0x59   : > { %1032 = vst [vmem:[%s1301_s15 + $0x6c] sm:$0xf] %v948_v18  ;;  %v559_v29 = vshll.u32 %v1517_v4, 16  ;;  %v563_v30 = vshrl.u32 %v1517_v4, 16  ;;  %v216_v1 = vmax.bf16 %v153_v28, %v150_v44  ;;  %v546_v37 = vor.u32 %v545_v25, %v542_v21  ;;  %v161_v25 = vld [vmem:[%s1274_s11 + $0xb0] sm:$0x7] }
  0x5a   : > { %1033 = vst [vmem:[%s1301_s15 + $0x70] sm:$0xf] %v949_v24  ;;  %v1035_v33 = vsel %vm1323_vm5, %v950_v3, %v1034_v20  ;;  %v578_v12 = vshll.u32 %v1522_v14, 16  ;;  %v1542_v11 = vmax.bf16 %v155_v23, %v152_v56  ;;  %v556_v34 = vor.u32 %v555_v6, %v551_v27 }
  0x5b   : > { %1036 = vst [vmem:[%s1301_s15 + $0x74] sm:$0x7] %v1035_v33  ;;  %v561_v38 = vrot.slane %v559_v29, 5  ;;  %v565_v26 = vrot.slane %v563_v30, 4  ;;  %v569_v31 = vshrl.u32 %v216_v1, 16  ;;  %v547_v39 = vrot.slane %v546_v37, 4 }
  0x5c   : > { %v572_v41 = vshll.u32 %v216_v1, 16  ;;  %v580_v36 = vrot.slane %v578_v12, 5  ;;  %v582_v32 = vshrl.u32 %v1522_v14, 16  ;;  %v557_v43 = vrot.slane %v556_v34, 4  ;;  %v159_v30 = vld [vmem:[%s1274_s11 + $0xa8] sm:$0xf] }
  0x5d   : > { %v566_v44 = vor.u32 %v565_v26, %v561_v38  ;;  %v571_v45 = vrot.slane %v569_v31, 4  ;;  %v588_v46 = vshll.u32 %v1542_v11, 16  ;;  %v552_v48 = vsel %vm1305_vm4, %v547_v39, %v551_v27 }
  0x5e   : > { %v574_v49 = vrot.slane %v572_v41, 5  ;;  %v584_v50 = vrot.slane %v582_v32, 4  ;;  %v592_v51 = vshrl.u32 %v1542_v11, 16  ;;  %v562_v54 = vsel %vm1305_vm4, %v557_v43, %v561_v38 }
  0x5f   : > { %v951_v56 = vmax.bf16 %v552_v48, %v213_v63  ;;  %v567_v58 = vrot.slane %v566_v44, 4  ;;  %v590_v59 = vrot.slane %v588_v46, 5  ;;  %v952_v60 = vmax.bf16 %v562_v54, %v214_v9  ;;  %v160_v9 = vld [vmem:[%s1274_s11 + $0xac] sm:$0xf]  ;;  %v162_v44 = vld [vmem:[%s1274_s11 + $0xb4] sm:$0xf] }
  0x60   : > { %v575_v62 = vor.u32 %v574_v49, %v571_v45  ;;  %v585_v8 = vor.u32 %v584_v50, %v580_v36  ;;  %v594_v57 = vrot.slane %v592_v51, 4  ;;  %v219_v5 = vmax.bf16 %v156_v42, %v153_v28  ;;  %v163_v49 = vld [vmem:[%s1274_s11 + $0xb8] sm:$0xf]  ;;  %v1597_v50 = vld [vmem:[%s1274_s11 + $0xbc] sm:$0x7] }
  0x61   : > { %v953_v10 = vmax.bf16 %v567_v58, %v1517_v4  ;;  %v1558_v40 = vmax.bf16 %v157_v47, %v1515_v2  ;;  %v1560_v7 = vmax.bf16 %v158_v53, %v155_v23  ;;  %v1220_v13 = vcombine.low %v951_v56, %v952_v60  ;;  %v1044_v23 = vld [vmem:[%s1301_s15 + $0x8c] sm:$0x7] }
  0x62   : > { %v576_v63 = vrot.slane %v575_v62, 4  ;;  %v586_v0 = vrot.slane %v585_v8, 4  ;;  %v595_v55 = vor.u32 %v594_v57, %v590_v59  ;;  %v1565_v16 = vmax.bf16 %v160_v9, %v157_v47  ;;  %v1049_v8 = vld [vmem:[%s1301_s15 + $0x98] sm:$0x7] }
  0x63   : > { %v1040_v15 = vsel %vm1323_vm5, %v953_v10, %v1039_v61  ;;  %v598_v17 = vshrl.u32 %v219_v5, 16  ;;  %v601_v4 = vshll.u32 %v219_v5, 16  ;;  %1221 = vst [vmem:[%s1301_s15 + $0x78] sm:$0xff] %v1220_v13   ;;  %v607_v20 = vshll.u32 %v1558_v40, 16 }
  0x64   : > { %1041 = vst [vmem:[%s1301_s15 + $0x80] sm:$0x7] %v1040_v15  ;;  %v581_v2 = vsel %vm1305_vm4, %v576_v63, %v580_v36  ;;  %v591_v18 = vsel %vm1305_vm4, %v586_v0, %v590_v59  ;;  %v596_v19 = vrot.slane %v595_v55, 4  ;;  %v611_v6 = vshrl.u32 %v1558_v40, 16  ;;  %v166_v15 = vld [vmem:[%s1274_s11 + $0xc4] sm:$0xf] }
  0x65   : > { %v954_v21 = vmax.bf16 %v581_v2, %v216_v1  ;;  %v955_v22 = vmax.bf16 %v591_v18, %v1522_v14  ;;  %v600_v24 = vrot.slane %v598_v17, 4  ;;  %v603_v3 = vrot.slane %v601_v4, 5 }
  0x66   : > { %v956_v27 = vmax.bf16 %v596_v19, %v1542_v11  ;;  %v609_v28 = vrot.slane %v607_v20, 5  ;;  %v617_v29 = vshll.u32 %v1560_v7, 16  ;;  %v621_v1 = vshrl.u32 %v1560_v7, 16 }
  0x67   : > { %1042 = vst [vmem:[%s1301_s15 + $0x84] sm:$0xf] %v954_v21  ;;  %1043 = vst [vmem:[%s1301_s15 + $0x88] sm:$0xf] %v955_v22  ;;  %v604_v33 = vor.u32 %v603_v3, %v600_v24  ;;  %v222_v14 = vmax.bf16 %v159_v30, %v156_v42  ;;  %v636_v37 = vshll.u32 %v1565_v16, 16  ;;  %v613_v34 = vrot.slane %v611_v6, 4 }
  0x68   : > { %v1045_v12 = vsel %vm1323_vm5, %v956_v27, %v1044_v23  ;;  %v619_v11 = vrot.slane %v617_v29, 5  ;;  %v1587_v38 = vmax.bf16 %v161_v25, %v158_v53  ;;  %v623_v31 = vrot.slane %v621_v1, 4  ;;  %v1054_v6 = vld [vmem:[%s1301_s15 + $0xa4] sm:$0x7] }
  0x69   : > { %1046 = vst [vmem:[%s1301_s15 + $0x8c] sm:$0x7] %v1045_v12  ;;  %v605_v26 = vrot.slane %v604_v33, 4  ;;  %v627_v39 = vshrl.u32 %v222_v14, 16  ;;  %v630_v41 = vshll.u32 %v222_v14, 16  ;;  %v614_v36 = vor.u32 %v613_v34, %v609_v28 }
  0x6a   : > { %v638_v32 = vrot.slane %v636_v37, 5  ;;  %v640_v42 = vshrl.u32 %v1565_v16, 16  ;;  %v646_v43 = vshll.u32 %v1587_v38, 16  ;;  %v624_v46 = vor.u32 %v623_v31, %v619_v11  ;;  %v167_v34 = vld [vmem:[%s1274_s11 + $0xc8] sm:$0x7] }
  0x6b   : > { %v610_v45 = vsel %vm1305_vm4, %v605_v26, %v609_v28  ;;  %v629_v47 = vrot.slane %v627_v39, 4  ;;  %v632_v48 = vrot.slane %v630_v41, 5  ;;  %v615_v51 = vrot.slane %v614_v36, 4  ;;  %v165_v28 = vld [vmem:[%s1274_s11 + $0xc0] sm:$0xf] }
  0x6c   : > { %v957_v53 = vmax.bf16 %v610_v45, %v219_v5  ;;  %v642_v54 = vrot.slane %v640_v42, 4  ;;  %v648_v56 = vrot.slane %v646_v43, 5  ;;  %v625_v58 = vrot.slane %v624_v46, 4  ;;  %v168_v43 = vld [vmem:[%s1274_s11 + $0xcc] sm:$0xf] }
  0x6d   : > { %v633_v59 = vor.u32 %v632_v48, %v629_v47  ;;  %v650_v60 = vshrl.u32 %v1587_v38, 16  ;;  %v225_v61 = vmax.bf16 %v162_v44, %v159_v30  ;;  %v620_v62 = vsel %vm1305_vm4, %v615_v51, %v619_v11  ;;  %v169_v47 = vld [vmem:[%s1274_s11 + $0xd0] sm:$0xf] }
  0x6e   : > { %v643_v57 = vor.u32 %v642_v54, %v638_v32  ;;  %v1603_v10 = vmax.bf16 %v163_v49, %v160_v9  ;;  %v1606_v13 = vmax.bf16 %v1597_v50, %v161_v25  ;;  %v958_v5 = vmax.bf16 %v620_v62, %v1558_v40 }
  0x6f   : > { %v959_v63 = vmax.bf16 %v625_v58, %v1560_v7  ;;  %v634_v0 = vrot.slane %v633_v59, 4  ;;  %v652_v55 = vrot.slane %v650_v60, 4  ;;  %v1611_v4 = vmax.bf16 %v166_v15, %v163_v49  ;;  %v170_v59 = vld [vmem:[%s1274_s11 + $0xd4] sm:$0x7] }
  0x70   : > { %v644_v17 = vrot.slane %v643_v57, 4  ;;  %v656_v2 = vshrl.u32 %v225_v61, 16  ;;  %v659_v18 = vshll.u32 %v225_v61, 16  ;;  %v1222_v9 = vcombine.low %v957_v53, %v958_v5 }
  0x71   : > { %v1050_v19 = vsel %vm1323_vm5, %v959_v63, %v1049_v8  ;;  %v639_v40 = vsel %vm1305_vm4, %v634_v0, %v638_v32  ;;  %v653_v7 = vor.u32 %v652_v55, %v648_v56  ;;  %v665_v25 = vshll.u32 %v1603_v10, 16  ;;  %v1059_v8 = vld [vmem:[%s1301_s15 + $0xb0] sm:$0x7] }
  0x72   : > { %1051 = vst [vmem:[%s1301_s15 + $0x98] sm:$0x7] %v1050_v19  ;;  %v960_v20 = vmax.bf16 %v639_v40, %v222_v14  ;;  %v649_v21 = vsel %vm1305_vm4, %v644_v17, %v648_v56  ;;  %v658_v22 = vrot.slane %v656_v2, 4  ;;  %v661_v23 = vrot.slane %v659_v18, 5  ;;  %1223 = vst [vmem:[%s1301_s15 + $0x90] sm:$0xff] %v1222_v9  }
  0x73   : > { %v961_v24 = vmax.bf16 %v649_v21, %v1565_v16  ;;  %v654_v3 = vrot.slane %v653_v7, 4  ;;  %v669_v27 = vshrl.u32 %v1603_v10, 16  ;;  %v675_v30 = vshll.u32 %v1606_v13, 16  ;;  %v1653_v17 = vld [vmem:[%s1274_s11 + $0xdc] sm:$0xf] }
  0x74   : > { %1052 = vst [vmem:[%s1301_s15 + $0x9c] sm:$0xf] %v960_v20  ;;  %v662_v29 = vor.u32 %v661_v23, %v658_v22  ;;  %v679_v33 = vshrl.u32 %v1606_v13, 16  ;;  %v228_v1 = vmax.bf16 %v165_v28, %v162_v44  ;;  %v667_v14 = vrot.slane %v665_v25, 5 }
  0x75   : > { %1053 = vst [vmem:[%s1301_s15 + $0xa0] sm:$0xf] %v961_v24  ;;  %v962_v16 = vmax.bf16 %v654_v3, %v1587_v38  ;;  %v671_v37 = vrot.slane %v669_v27, 4  ;;  %v694_v12 = vshll.u32 %v1611_v4, 16  ;;  %v677_v26 = vrot.slane %v675_v30, 5 }
  0x76   : > { %v663_v11 = vrot.slane %v662_v29, 4  ;;  %v681_v31 = vrot.slane %v679_v33, 4  ;;  %v685_v39 = vshrl.u32 %v228_v1, 16  ;;  %v688_v32 = vshll.u32 %v228_v1, 16  ;;  %v1064_v3 = vld [vmem:[%s1301_s15 + $0xbc] sm:$0x7] }
  0x77   : > { %v1055_v41 = vsel %vm1323_vm5, %v962_v16, %v1054_v6  ;;  %v672_v36 = vor.u32 %v671_v37, %v667_v14  ;;  %v696_v42 = vrot.slane %v694_v12, 5  ;;  %v230_v46 = vmax.bf16 %v167_v34, %v1597_v50  ;;  %v173_v33 = vld [vmem:[%s1274_s11 + $0xe0] sm:$0x7]  ;;  %v171_v12 = vld [vmem:[%s1274_s11 + $0xd8] sm:$0xf] }
  0x78   : > { %1056 = vst [vmem:[%s1301_s15 + $0xa4] sm:$0x7] %v1055_v41  ;;  %v668_v38 = vsel %vm1305_vm4, %v663_v11, %v667_v14  ;;  %v682_v44 = vor.u32 %v681_v31, %v677_v26  ;;  %v687_v45 = vrot.slane %v685_v39, 4  ;;  %v690_v51 = vrot.slane %v688_v32, 5 }
  0x79   : > { %v673_v48 = vrot.slane %v672_v36, 4  ;;  %v963_v49 = vmax.bf16 %v668_v38, %v225_v61  ;;  %v698_v53 = vshrl.u32 %v1611_v4, 16  ;;  %v704_v56 = vshll.u32 %v230_v46, 16 }
  0x7a   : > { %v683_v54 = vrot.slane %v682_v44, 4  ;;  %v708_v58 = vshrl.u32 %v230_v46, 16  ;;  %v1643_v60 = vmax.bf16 %v168_v43, %v165_v28  ;;  %v691_v57 = vor.u32 %v690_v51, %v687_v45 }
  0x7b   : > { %v678_v62 = vsel %vm1305_vm4, %v673_v48, %v677_v26  ;;  %v700_v50 = vrot.slane %v698_v53, 4  ;;  %v1648_v5 = vmax.bf16 %v169_v47, %v166_v15  ;;  %v706_v0 = vrot.slane %v704_v56, 5  ;;  %v174_v48 = vld [vmem:[%s1274_s11 + $0xe4] sm:$0xf]  ;;  %v175_v56 = vld [vmem:[%s1274_s11 + $0xe8] sm:$0xf] }
  0x7c   : > { %v964_v61 = vmax.bf16 %v678_v62, %v1603_v10  ;;  %v965_v63 = vmax.bf16 %v683_v54, %v1606_v13  ;;  %v710_v55 = vrot.slane %v708_v58, 4  ;;  %v692_v2 = vrot.slane %v691_v57, 4  ;;  %v176_v57 = vld [vmem:[%s1274_s11 + $0xec] sm:$0x7] }
  0x7d   : > { %v701_v18 = vor.u32 %v700_v50, %v696_v42  ;;  %v1655_v9 = vmax.bf16 %v170_v59, %v167_v34  ;;  %v1658_v19 = vmax.bf16 %v1653_v17, %v169_v47  ;;  %v714_v13 = vshrl.u32 %v1643_v60, 16 }
  0x7e   : > { %v1224_v40 = vcombine.low %v963_v49, %v964_v61  ;;  %v1060_v15 = vsel %vm1323_vm5, %v965_v63, %v1059_v8  ;;  %v711_v10 = vor.u32 %v710_v55, %v706_v0  ;;  %v697_v7 = vsel %vm1305_vm4, %v692_v2, %v696_v42  ;;  %v1069_v61 = vld [vmem:[%s1301_s15 + $0xc8] sm:$0x7] }
  0x7f   : > { %1061 = vst [vmem:[%s1301_s15 + $0xb0] sm:$0x7] %v1060_v15  ;;  %v702_v20 = vrot.slane %v701_v18, 4  ;;  %v717_v21 = vshll.u32 %v1643_v60, 16  ;;  %v723_v22 = vshll.u32 %v1648_v5, 16  ;;  %v966_v23 = vmax.bf16 %v697_v7, %v228_v1 }
  0x80   : > { %1225 = vst [vmem:[%s1301_s15 + $0xa8] sm:$0xff] %v1224_v40   ;;  %v712_v24 = vrot.slane %v711_v10, 4  ;;  %v716_v25 = vrot.slane %v714_v13, 4  ;;  %v727_v27 = vshrl.u32 %v1648_v5, 16  ;;  %v733_v30 = vshll.u32 %v1655_v9, 16 }
  0x81   : > { %v707_v28 = vsel %vm1305_vm4, %v702_v20, %v706_v0  ;;  %v719_v6 = vrot.slane %v717_v21, 5  ;;  %v725_v29 = vrot.slane %v723_v22, 5  ;;  %1062 = vst [vmem:[%s1301_s15 + $0xb4] sm:$0xf] %v966_v23  ;;  %v737_v37 = vshrl.u32 %v1655_v9, 16 }
  0x82   : > { %v967_v16 = vmax.bf16 %v707_v28, %v1611_v4  ;;  %v968_v14 = vmax.bf16 %v712_v24, %v230_v46  ;;  %v729_v1 = vrot.slane %v727_v27, 4  ;;  %v735_v11 = vrot.slane %v733_v30, 5  ;;  %v1702_v7 = vld [vmem:[%s1274_s11 + $0xf4] sm:$0xf]  ;;  %v179_v30 = vld [vmem:[%s1274_s11 + $0xf8] sm:$0x7] }
  0x83   : > { %v720_v34 = vor.u32 %v719_v6, %v716_v25  ;;  %v234_v26 = vmax.bf16 %v171_v12, %v168_v43  ;;  %v752_v31 = vshll.u32 %v1658_v19, 16  ;;  %v739_v36 = vrot.slane %v737_v37, 4  ;;  %v1074_v28 = vld [vmem:[%s1301_s15 + $0xd4] sm:$0x7]  ;;  %v177_v37 = vld [vmem:[%s1274_s11 + $0xf0] sm:$0xf] }
  0x84   : > { %1063 = vst [vmem:[%s1301_s15 + $0xb8] sm:$0xf] %v967_v16  ;;  %v1065_v39 = vsel %vm1323_vm5, %v968_v14, %v1064_v3  ;;  %v730_v41 = vor.u32 %v729_v1, %v725_v29  ;;  %v1683_v32 = vmax.bf16 %v173_v33, %v170_v59  ;;  %v756_v46 = vshrl.u32 %v1658_v19, 16 }
  0x85   : > { %1066 = vst [vmem:[%s1301_s15 + $0xbc] sm:$0x7] %v1065_v39  ;;  %v721_v4 = vrot.slane %v720_v34, 4  ;;  %v743_v42 = vshrl.u32 %v234_v26, 16  ;;  %v746_v38 = vshll.u32 %v234_v26, 16  ;;  %v754_v44 = vrot.slane %v752_v31, 5 }
  0x86   : > { %v731_v45 = vrot.slane %v730_v41, 4  ;;  %v740_v43 = vor.u32 %v739_v36, %v735_v11  ;;  %v762_v47 = vshll.u32 %v1683_v32, 16  ;;  %v766_v54 = vshrl.u32 %v1683_v32, 16 }
  0x87   : > { %v726_v49 = vsel %vm1305_vm4, %v721_v4, %v725_v29  ;;  %v745_v51 = vrot.slane %v743_v42, 4  ;;  %v748_v53 = vrot.slane %v746_v38, 5  ;;  %v758_v8 = vrot.slane %v756_v46, 4  ;;  %v180_v46 = vld [vmem:[%s1274_s11 + $0xfc] sm:$0xf] }
  0x88   : > { %v736_v58 = vsel %vm1305_vm4, %v731_v45, %v735_v11  ;;  %v969_v59 = vmax.bf16 %v726_v49, %v1643_v60  ;;  %v741_v62 = vrot.slane %v740_v43, 4  ;;  %v764_v0 = vrot.slane %v762_v47, 5 }
  0x89   : > { %v970_v50 = vmax.bf16 %v736_v58, %v1648_v5  ;;  %v749_v63 = vor.u32 %v748_v53, %v745_v51  ;;  %v768_v55 = vrot.slane %v766_v54, 4  ;;  %v759_v18 = vor.u32 %v758_v8, %v754_v44  ;;  %v181_v53 = vld [vmem:[%s1274_s11 + $0x100] sm:$0xf] }
  0x8a   : > { %v971_v2 = vmax.bf16 %v741_v62, %v1655_v9  ;;  %v237_v40 = vmax.bf16 %v174_v48, %v171_v12  ;;  %v238_v15 = vmax.bf16 %v175_v56, %v1653_v17  ;;  %v1704_v20 = vmax.bf16 %v176_v57, %v173_v33  ;;  %v182_v62 = vld [vmem:[%s1274_s11 + $0x104] sm:$0x7] }
  0x8b   : > { %v1226_v10 = vcombine.low %v969_v59, %v970_v50  ;;  %v750_v60 = vrot.slane %v749_v63, 4  ;;  %v769_v13 = vor.u32 %v768_v55, %v764_v0  ;;  %v760_v21 = vrot.slane %v759_v18, 4 }
  0x8c   : > { %v1070_v5 = vsel %vm1323_vm5, %v971_v2, %v1069_v61  ;;  %v1709_v22 = vmax.bf16 %v1702_v7, %v175_v56  ;;  %v772_v9 = vshrl.u32 %v237_v40, 16  ;;  %v775_v24 = vshll.u32 %v237_v40, 16 }
  0x8d   : > { %1227 = vst [vmem:[%s1301_s15 + $0xc0] sm:$0xff] %v1226_v10   ;;  %1071 = vst [vmem:[%s1301_s15 + $0xc8] sm:$0x7] %v1070_v5  ;;  %v755_v17 = vsel %vm1305_vm4, %v750_v60, %v754_v44  ;;  %v770_v23 = vrot.slane %v769_v13, 4  ;;  %v781_v3 = vshll.u32 %v238_v15, 16  ;;  %v765_v27 = vsel %vm1305_vm4, %v760_v21, %v764_v0 }
  0x8e   : > { %v972_v25 = vmax.bf16 %v755_v17, %v234_v26  ;;  %v774_v6 = vrot.slane %v772_v9, 4  ;;  %v785_v29 = vshrl.u32 %v238_v15, 16  ;;  %v973_v33 = vmax.bf16 %v765_v27, %v1658_v19  ;;  %v1079_v0 = vld [vmem:[%s1301_s15 + $0xe0] sm:$0x7] }
  0x8f   : > { %v974_v16 = vmax.bf16 %v770_v23, %v1683_v32  ;;  %v777_v14 = vrot.slane %v775_v24, 5  ;;  %v783_v1 = vrot.slane %v781_v3, 5  ;;  %v791_v34 = vshll.u32 %v1704_v20, 16 }
  0x90   : > { %1072 = vst [vmem:[%s1301_s15 + $0xcc] sm:$0xf] %v972_v25  ;;  %v787_v12 = vrot.slane %v785_v29, 4  ;;  %v795_v11 = vshrl.u32 %v1704_v20, 16  ;;  %v240_v26 = vmax.bf16 %v177_v37, %v174_v48  ;;  %1073 = vst [vmem:[%s1301_s15 + $0xd0] sm:$0xf] %v973_v33  ;;  %v1729_v41 = vmax.bf16 %v179_v30, %v176_v57 }
  0x91   : > { %v1075_v31 = vsel %vm1323_vm5, %v974_v16, %v1074_v28  ;;  %v778_v39 = vor.u32 %v777_v14, %v774_v6  ;;  %v810_v19 = vshll.u32 %v1709_v22, 16  ;;  %v793_v32 = vrot.slane %v791_v34, 5  ;;  %v1084_v29 = vld [vmem:[%s1301_s15 + $0xec] sm:$0x7] }
  0x92   : > { %1076 = vst [vmem:[%s1301_s15 + $0xd4] sm:$0x7] %v1075_v31  ;;  %v788_v36 = vor.u32 %v787_v12, %v783_v1  ;;  %v797_v4 = vrot.slane %v795_v11, 4  ;;  %v801_v42 = vshrl.u32 %v240_v26, 16  ;;  %v804_v44 = vshll.u32 %v240_v26, 16 }
  0x93   : > { %v779_v38 = vrot.slane %v778_v39, 4  ;;  %v812_v45 = vrot.slane %v810_v19, 5  ;;  %v814_v43 = vshrl.u32 %v1709_v22, 16  ;;  %v820_v51 = vshll.u32 %v1729_v41, 16 }
  0x94   : > { %v789_v47 = vrot.slane %v788_v36, 4  ;;  %v798_v48 = vor.u32 %v797_v4, %v793_v32  ;;  %v803_v49 = vrot.slane %v801_v42, 4  ;;  %v806_v56 = vrot.slane %v804_v44, 5  ;;  %v1089_v44 = vld [vmem:[%s1301_s15 + $0xf8] sm:$0x7] }
  0x95   : > { %v784_v54 = vsel %vm1305_vm4, %v779_v38, %v783_v1  ;;  %v816_v58 = vrot.slane %v814_v43, 4  ;;  %v824_v59 = vshrl.u32 %v1729_v41, 16  ;;  %v822_v61 = vrot.slane %v820_v51, 5 }
  0x96   : > { %v794_v8 = vsel %vm1305_vm4, %v789_v47, %v793_v32  ;;  %v975_v57 = vmax.bf16 %v784_v54, %v237_v40  ;;  %v799_v50 = vrot.slane %v798_v48, 4  ;;  %v807_v55 = vor.u32 %v806_v56, %v803_v49 }
  0x97   : > { %v976_v63 = vmax.bf16 %v794_v8, %v238_v15  ;;  %v817_v2 = vor.u32 %v816_v58, %v812_v45  ;;  %v826_v18 = vrot.slane %v824_v59, 4  ;;  %v243_v60 = vmax.bf16 %v180_v46, %v177_v37 }
  0x98   : > { %v977_v10 = vmax.bf16 %v799_v50, %v1704_v20  ;;  %v244_v13 = vmax.bf16 %v181_v53, %v1702_v7  ;;  %v245_v5 = vmax.bf16 %v182_v62, %v179_v30  ;;  %v808_v9 = vrot.slane %v807_v55, 4 }
  0x99   : > { %v1228_v21 = vcombine.low %v975_v57, %v976_v63  ;;  %v818_v17 = vrot.slane %v817_v2, 4  ;;  %v827_v40 = vor.u32 %v826_v18, %v822_v61  ;;  %v830_v23 = vshrl.u32 %v243_v60, 16 }
  0x9a   : > { %v1080_v15 = vsel %vm1323_vm5, %v977_v10, %v1079_v0  ;;  %v833_v24 = vshll.u32 %v243_v60, 16  ;;  %v839_v3 = vshll.u32 %v244_v13, 16  ;;  %v813_v20 = vsel %vm1305_vm4, %v808_v9, %v812_v45 }
  0x9b   : > { %1229 = vst [vmem:[%s1301_s15 + $0xd8] sm:$0xff] %v1228_v21   ;;  %1081 = vst [vmem:[%s1301_s15 + $0xe0] sm:$0x7] %v1080_v15  ;;  %v823_v7 = vsel %vm1305_vm4, %v818_v17, %v822_v61  ;;  %v828_v25 = vrot.slane %v827_v40, 4  ;;  %v843_v27 = vshrl.u32 %v244_v13, 16  ;;  %v978_v28 = vmax.bf16 %v813_v20, %v240_v26 }
  0x9c   : > { %v979_v6 = vmax.bf16 %v823_v7, %v1709_v22  ;;  %v832_v30 = vrot.slane %v830_v23, 4  ;;  %v835_v33 = vrot.slane %v833_v24, 5  ;;  %v841_v14 = vrot.slane %v839_v3, 5 }
  0x9d   : > { %v980_v16 = vmax.bf16 %v828_v25, %v1729_v41  ;;  %v845_v1 = vrot.slane %v843_v27, 4  ;;  %v849_v37 = vshll.u32 %v245_v5, 16  ;;  %1082 = vst [vmem:[%s1301_s15 + $0xe4] sm:$0xf] %v978_v28  ;;  %v853_v34 = vshrl.u32 %v245_v5, 16 }
  0x9e   : > { %1083 = vst [vmem:[%s1301_s15 + $0xe8] sm:$0xf] %v979_v6  ;;  %v836_v12 = vor.u32 %v835_v33, %v832_v30 }
  0x9f   : > { %v1085_v11 = vsel %vm1323_vm5, %v980_v16, %v1084_v29  ;;  %v846_v26 = vor.u32 %v845_v1, %v841_v14  ;;  %v851_v31 = vrot.slane %v849_v37, 5  ;;  %v855_v39 = vrot.slane %v853_v34, 4 }
  0xa0   : > { %1086 = vst [vmem:[%s1301_s15 + $0xec] sm:$0x7] %v1085_v11  ;;  %v837_v22 = vrot.slane %v836_v12, 4 }
  0xa1   : > { %v847_v19 = vrot.slane %v846_v26, 4  ;;  %v856_v36 = vor.u32 %v855_v39, %v851_v31 }
  0xa2   : > { %v842_v41 = vsel %vm1305_vm4, %v837_v22, %v841_v14 }
  0xa3   : > { %v852_v32 = vsel %vm1305_vm4, %v847_v19, %v851_v31  ;;  %v981_v4 = vmax.bf16 %v842_v41, %v243_v60  ;;  %v857_v38 = vrot.slane %v856_v36, 4 }
  0xa4   : > { %v982_v42 = vmax.bf16 %v852_v32, %v244_v13 }
  0xa5   : > { %v983_v43 = vmax.bf16 %v857_v38, %v245_v5 }
  0xa6   : > { %v1230_v45 = vcombine.low %v981_v4, %v982_v42 }
  0xa7   : > { %v1090_v46 = vsel %vm1323_vm5, %v983_v43, %v1089_v44 }
  0xa8   : > { %1231 = vst [vmem:[%s1301_s15 + $0xf0] sm:$0xff] %v1230_v45   ;;  %1091 = vst [vmem:[%s1301_s15 + $0xf8] sm:$0x7] %v1090_v46 }
  0xa9 PF: > { %s11_s6 = sadd.s32 1, %s1248_s6  }
  0xaa   : > { %p8_p4 = scmp.ge.s32.totalorder %s11_s6, 4  }
  0xac   :  { %10 = sbr.rel (!%p8_p4) target bundleno = 1 (0x1), region = 54 }

// kernel: two_path_cnn_forward.11
= control target key start
LH: loop header
LB: loop body
LE: loop exit
PB: predicated region body
PF: predicated region fallthrough
CT: control target
= control target key end

     0   :  { %s4004_s12 = smov 0   ;;  %s4006_s13 = smov 0   ;;  %s4168_s0 = inlined_call_operand.vmem [shape: bf16[8,99456], index: 0, kind: input, shape index: {}]   ;;  %s4169_s1 = inlined_call_operand.vmem [shape: bf16[8,99456], index: 1, kind: input, shape index: {}]   ;;  %s4170_s2 = inlined_call_operand.vmem [shape: f32[1,8], index: 2, kind: input, shape index: {}]   ;;  %s4171_s3 = inlined_call_operand.vmem [shape: f32[8,8], index: 3, kind: output, shape index: {}]  }
   0x1   :  { %s4008_s14 = smov 0  }
   0x2 LB: > { %s22_s15 = sadd.s32 1, %s3975_s13  ;;  %p3465_p0 = scmp.ge.s32.totalorder %s3979_s14, 1  ;;  %s3979_s14 = sphi %s4008_s14, %s13_s14   ;;  %s3975_s13 = sphi %s4006_s13, %s4173_s13   ;;  %s3971_s12 = sphi %s4004_s12, %s4172_s12  }
   0x3   : > { %p23_p1 = scmp.ge.s32.totalorder %s22_s15, 7  ;;  %p167_p2 = scmp.lt.s32.totalorder %s3979_s14, 8 }
   0x5   : > { %s4175_s15 = smov (%p23_p1, %s22_s15), 0  ;;  %p168_p3 = pnand %p3465_p0, %p167_p2 }
   0x6   : > { %s199_s16 = smul.u32 (!%p168_p3), 111, %s3971_s12  ;;  %p3468_p5 = scmp.ne.s32.totalorder (!%p168_p3), %s3971_s12, 0 }
   0x7   : > { %171 = sbr.rel (%p168_p3) target bundleno = 768 (0x300), region = 32 }
   0x8   : > { %p202_p4 = scmp.lt.s32.totalorder (!%p168_p3), %s199_s16, 776 }
   0xc   : > { %s4177_s16 = smov (!%p202_p4, %s199_s16), 776  ;;  %223 = sbr.rel (%p3468_p5) target bundleno = 19 (0x13), region = 36 }
   0xd   : > { %s3466_s17 = sshll.u32 %s4177_s16, 2 }
   0xe   : > { %s4028_s20 = scalar_lea.vmem %s4168_s0, %s3466_s17  ;;  %s4033_s23 = scalar_lea.vmem %s4169_s1, %s3466_s17 }
  0x11   : > { %vm224_vm0 = vcmask 64512   ;;  %v3981_v0 = vmov 0.0  }
  0x12   : > { %225 = vst.msk [vmem:[#allocation2] sm:$0xff] %vm224_vm0, %v3981_v0 }
  0x13 PF: > { %v283_v1 = vld [vmem:[%s4033_s23] sm:$0xff]  ;;  %v284_v2 = vld [vmem:[%s4033_s23 + $0x8] sm:$0xff]  ;;  %v285_v9 = vld [vmem:[%s4033_s23 + $0x10] sm:$0xff]  ;;  %vm3983_vm1 = vmmov 0   ;;  %vm3358_vm2 = vcmask 64512   ;;  %p3691_p6 = scmp.ne.s32.totalorder %s3971_s12, 6 }
  0x14   : > { %v227_v3 = vld [vmem:[%s4028_s20] sm:$0xff]  ;;  %v3581_v4 = vcombine.high %v283_v1, %v283_v1  ;;  %v3583_v5 = vcombine.high %v284_v2, %v284_v2  ;;  %v3580_v6 = vcombine.low %v283_v1, %v283_v1  ;;  %v3582_v7 = vcombine.low %v284_v2, %v284_v2  ;;  %v228_v8 = vld [vmem:[%s4028_s20 + $0x8] sm:$0xff]  ;;  %v286_v10 = vld [vmem:[%s4033_s23 + $0x18] sm:$0xff] }
  0x15   : > { %v3470_v11 = vcombine.high %v227_v3, %v227_v3  ;;  %v3472_v12 = vcombine.high %v228_v8, %v228_v8  ;;  %v3585_v13 = vcombine.high %v285_v9, %v285_v9  ;;  %v3587_v14 = vcombine.high %v286_v10, %v286_v10  ;;  %v229_v15 = vld [vmem:[%s4028_s20 + $0x10] sm:$0xff]  ;;  %v230_v16 = vld [vmem:[%s4028_s20 + $0x18] sm:$0xff]  ;;  %v287_v19 = vld [vmem:[%s4033_s23 + $0x20] sm:$0xff] }
  0x16   : > { %1131 = vmatprep.subr.bf16.mxu0 %v3581_v4  ;;  %1171 = vmatprep.subr.bf16.mxu1 %v3583_v5  ;;  %v3469_v17 = vcombine.low %v227_v3, %v227_v3  ;;  %v3471_v18 = vcombine.low %v228_v8, %v228_v8  ;;  %v288_v20 = vld [vmem:[%s4033_s23 + $0x28] sm:$0xff]  ;;  %v3584_v21 = vcombine.low %v285_v9, %v285_v9  ;;  %v231_v27 = vld [vmem:[%s4028_s20 + $0x20] sm:$0xff]  ;;  %v289_v31 = vld [vmem:[%s4033_s23 + $0x30] sm:$0xff] }
  0x17   : > { %1132 = vmatpush1.bf16.xpose.msra.mxu0 %v3580_v6  ;;  %1172 = vmatpush1.bf16.xpose.msra.mxu1 %v3582_v7  ;;  %v3586_v22 = vcombine.low %v286_v10, %v286_v10  ;;  %v3474_v23 = vcombine.high %v229_v15, %v229_v15  ;;  %v3476_v24 = vcombine.high %v230_v16, %v230_v16  ;;  %v232_v28 = vld [vmem:[%s4028_s20 + $0x28] sm:$0xff]  ;;  %v290_v32 = vld [vmem:[%s4033_s23 + $0x38] sm:$0xff]  ;;  %v233_v39 = vld [vmem:[%s4028_s20 + $0x30] sm:$0xff] }
  0x18   : > { %1149 = vmatprep.mubr.bf16.mxu0 %v3470_v11  ;;  %1189 = vmatprep.mubr.bf16.mxu1 %v3472_v12  ;;  %v3589_v25 = vcombine.high %v287_v19, %v287_v19  ;;  %v3591_v26 = vcombine.high %v288_v20, %v288_v20  ;;  %v3473_v29 = vcombine.low %v229_v15, %v229_v15  ;;  %v234_v40 = vld [vmem:[%s4028_s20 + $0x38] sm:$0xff]  ;;  %v291_v43 = vld [vmem:[%s4033_s23 + $0x40] sm:$0xff]  ;;  %v292_v44 = vld [vmem:[%s4033_s23 + $0x48] sm:$0xff] }
  0x19   : > { %1211 = vmatprep.subr.bf16.mxu0 %v3585_v13  ;;  %1251 = vmatprep.subr.bf16.mxu1 %v3587_v14  ;;  %v3475_v30 = vcombine.low %v230_v16, %v230_v16  ;;  %v3588_v33 = vcombine.low %v287_v19, %v287_v19  ;;  %v3590_v34 = vcombine.low %v288_v20, %v288_v20  ;;  %v235_v51 = vld [vmem:[%s4028_s20 + $0x40] sm:$0xff]  ;;  %v236_v52 = vld [vmem:[%s4028_s20 + $0x48] sm:$0xff]  ;;  %v293_v55 = vld [vmem:[%s4033_s23 + $0x50] sm:$0xff] }
  0x1a   : > { %v3478_v35 = vcombine.high %v231_v27, %v231_v27  ;;  %v3480_v36 = vcombine.high %v232_v28, %v232_v28  ;;  %v3593_v37 = vcombine.high %v289_v31, %v289_v31  ;;  %v3595_v38 = vcombine.high %v290_v32, %v290_v32  ;;  %v294_v56 = vld [vmem:[%s4033_s23 + $0x58] sm:$0xff]  ;;  %v237_v63 = vld [vmem:[%s4028_s20 + $0x50] sm:$0xff]  ;;  %v295_v3 = vld [vmem:[%s4033_s23 + $0x60] sm:$0xff] }
  0x1b   : > { %v3477_v41 = vcombine.low %v231_v27, %v231_v27  ;;  %v3479_v42 = vcombine.low %v232_v28, %v232_v28  ;;  %v3592_v45 = vcombine.low %v289_v31, %v289_v31  ;;  %v3594_v46 = vcombine.low %v290_v32, %v290_v32  ;;  %v238_v0 = vld [vmem:[%s4028_s20 + $0x58] sm:$0xff]  ;;  %v296_v4 = vld [vmem:[%s4033_s23 + $0x68] sm:$0xff]  ;;  %v239_v11 = vld [vmem:[%s4028_s20 + $0x60] sm:$0xff] }
  0x1c   : > { %v3482_v47 = vcombine.high %v233_v39, %v233_v39  ;;  %v3484_v48 = vcombine.high %v234_v40, %v234_v40  ;;  %v3597_v49 = vcombine.high %v291_v43, %v291_v43  ;;  %v3599_v50 = vcombine.high %v292_v44, %v292_v44  ;;  %v240_v12 = vld [vmem:[%s4028_s20 + $0x68] sm:$0xff]  ;;  %v297_v15 = vld [vmem:[%s4033_s23 + $0x70] sm:$0xff]  ;;  %v298_v16 = vld [vmem:[%s4033_s23 + $0x78] sm:$0xff] }
  0x1d   : > { %v3481_v53 = vcombine.low %v233_v39, %v233_v39  ;;  %v3483_v54 = vcombine.low %v234_v40, %v234_v40  ;;  %v3596_v57 = vcombine.low %v291_v43, %v291_v43  ;;  %v3598_v58 = vcombine.low %v292_v44, %v292_v44  ;;  %v299_v27 = vld [vmem:[%s4033_s23 + $0x80] sm:$0xff]  ;;  %v300_v28 = vld [vmem:[%s4033_s23 + $0x88] sm:$0xff]  ;;  %v301_v39 = vld [vmem:[%s4033_s23 + $0x90] sm:$0xff] }
  0x1e   : > { %1150 = vmatmul.mubr.bf16.vlgmr.msra.gmra.mxu0 %v3469_v17  ;;  %1190 = vmatmul.mubr.bf16.vlgmr.msra.gmra.mxu1 %v3471_v18  ;;  %v3486_v59 = vcombine.high %v235_v51, %v235_v51  ;;  %v3488_v60 = vcombine.high %v236_v52, %v236_v52  ;;  %v3601_v61 = vcombine.high %v293_v55, %v293_v55  ;;  %v302_v40 = vld [vmem:[%s4033_s23 + $0x98] sm:$0xff] }
  0x1f   : > { %1212 = vmatpush1.bf16.xpose.msra.mxu0 %v3584_v21  ;;  %1252 = vmatpush1.bf16.xpose.msra.mxu1 %v3586_v22  ;;  %v3603_v62 = vcombine.high %v294_v56, %v294_v56  ;;  %v3485_v1 = vcombine.low %v235_v51, %v235_v51  ;;  %v3487_v2 = vcombine.low %v236_v52, %v236_v52  ;;  %v303_v51 = vld [vmem:[%s4033_s23 + $0xa0] sm:$0xff]  ;;  %v304_v52 = vld [vmem:[%s4033_s23 + $0xa8] sm:$0xff] }
  0x20   : > { %1229 = vmatprep.mubr.bf16.mxu0 %v3474_v23  ;;  %1269 = vmatprep.mubr.bf16.mxu1 %v3476_v24  ;;  %v3600_v5 = vcombine.low %v293_v55, %v293_v55  ;;  %v3602_v6 = vcombine.low %v294_v56, %v294_v56  ;;  %v3490_v7 = vcombine.high %v237_v63, %v237_v63  ;;  %v241_v23 = vld [vmem:[%s4028_s20 + $0x70] sm:$0xff]  ;;  %v242_v24 = vld [vmem:[%s4028_s20 + $0x78] sm:$0xff] }
  0x21   : > { %1291 = vmatprep.subr.bf16.mxu0 %v3589_v25  ;;  %1331 = vmatprep.subr.bf16.mxu1 %v3591_v26  ;;  %v3492_v8 = vcombine.high %v238_v0, %v238_v0  ;;  %v3605_v9 = vcombine.high %v295_v3, %v295_v3  ;;  %v3607_v10 = vcombine.high %v296_v4, %v296_v4 }
  0x22   : > { %v3489_v13 = vcombine.low %v237_v63, %v237_v63  ;;  %v3491_v14 = vcombine.low %v238_v0, %v238_v0  ;;  %v3604_v17 = vcombine.low %v295_v3, %v295_v3  ;;  %v3606_v18 = vcombine.low %v296_v4, %v296_v4  ;;  %v305_v63 = vld [vmem:[%s4033_s23 + $0xb0] sm:$0xff]  ;;  %v306_v0 = vld [vmem:[%s4033_s23 + $0xb8] sm:$0xff] }
  0x23   : > { %v3494_v19 = vcombine.high %v239_v11, %v239_v11  ;;  %v3496_v20 = vcombine.high %v240_v12, %v240_v12  ;;  %v3609_v21 = vcombine.high %v297_v15, %v297_v15  ;;  %v3611_v22 = vcombine.high %v298_v16, %v298_v16 }
  0x24   : > { %v3493_v25 = vcombine.low %v239_v11, %v239_v11  ;;  %v3495_v26 = vcombine.low %v240_v12, %v240_v12  ;;  %v3498_v31 = vcombine.high %v241_v23, %v241_v23  ;;  %v3500_v32 = vcombine.high %v242_v24, %v242_v24  ;;  %v307_v11 = vld [vmem:[%s4033_s23 + $0xc0] sm:$0xff]  ;;  %v308_v12 = vld [vmem:[%s4033_s23 + $0xc8] sm:$0xff] }
  0x26   : > { %1230 = vmatmul.mubr.bf16.vlgmr.msra.gmra.mxu0 %v3473_v29  ;;  %1270 = vmatmul.mubr.bf16.vlgmr.msra.gmra.mxu1 %v3475_v30  ;;  %v3608_v29 = vcombine.low %v297_v15, %v297_v15  ;;  %v3610_v30 = vcombine.low %v298_v16, %v298_v16 }
  0x27   : > { %1292 = vmatpush1.bf16.xpose.msra.mxu0 %v3588_v33  ;;  %1332 = vmatpush1.bf16.xpose.msra.mxu1 %v3590_v34  ;;  %v3613_v33 = vcombine.high %v299_v27, %v299_v27  ;;  %v3615_v34 = vcombine.high %v300_v28, %v300_v28 }
  0x28   : > { %1309 = vmatprep.mubr.bf16.mxu0 %v3478_v35  ;;  %1349 = vmatprep.mubr.bf16.mxu1 %v3480_v36  ;;  %v243_v35 = vld [vmem:[%s4028_s20 + $0x80] sm:$0xff]  ;;  %v244_v36 = vld [vmem:[%s4028_s20 + $0x88] sm:$0xff] }
  0x29   : > { %1371 = vmatprep.subr.bf16.mxu0 %v3593_v37  ;;  %1411 = vmatprep.subr.bf16.mxu1 %v3595_v38  ;;  %v3497_v37 = vcombine.low %v241_v23, %v241_v23  ;;  %v3499_v38 = vcombine.low %v242_v24, %v242_v24  ;;  %v3502_v43 = vcombine.high %v243_v35, %v243_v35  ;;  %v309_v23 = vld [vmem:[%s4033_s23 + $0xd0] sm:$0xff]  ;;  %v310_v24 = vld [vmem:[%s4033_s23 + $0xd8] sm:$0xff] }
  0x2a   : > { %v3504_v44 = vcombine.high %v244_v36, %v244_v36 }
  0x2e   : > { %1310 = vmatmul.mubr.bf16.vlgmr.msra.gmra.mxu0 %v3477_v41  ;;  %1350 = vmatmul.mubr.bf16.vlgmr.msra.gmra.mxu1 %v3479_v42  ;;  %v3612_v41 = vcombine.low %v299_v27, %v299_v27  ;;  %v3614_v42 = vcombine.low %v300_v28, %v300_v28 }
  0x2f   : > { %1372 = vmatpush1.bf16.xpose.msra.mxu0 %v3592_v45  ;;  %1412 = vmatpush1.bf16.xpose.msra.mxu1 %v3594_v46  ;;  %v3617_v45 = vcombine.high %v301_v39, %v301_v39  ;;  %v3619_v46 = vcombine.high %v302_v40, %v302_v40 }
  0x30   : > { %1389 = vmatprep.mubr.bf16.mxu0 %v3482_v47  ;;  %1429 = vmatprep.mubr.bf16.mxu1 %v3484_v48  ;;  %v245_v47 = vld [vmem:[%s4028_s20 + $0x90] sm:$0xff]  ;;  %v246_v48 = vld [vmem:[%s4028_s20 + $0x98] sm:$0xff] }
  0x31   : > { %1451 = vmatprep.subr.bf16.mxu0 %v3597_v49  ;;  %1491 = vmatprep.subr.bf16.mxu1 %v3599_v50  ;;  %v3501_v49 = vcombine.low %v243_v35, %v243_v35  ;;  %v3503_v50 = vcombine.low %v244_v36, %v244_v36  ;;  %v3506_v55 = vcombine.high %v245_v47, %v245_v47  ;;  %v311_v35 = vld [vmem:[%s4033_s23 + $0xe0] sm:$0xff]  ;;  %v312_v36 = vld [vmem:[%s4033_s23 + $0xe8] sm:$0xff] }
  0x32   : > { %v3508_v56 = vcombine.high %v246_v48, %v246_v48 }
  0x36   : > { %1390 = vmatmul.mubr.bf16.vlgmr.msra.gmra.mxu0 %v3481_v53  ;;  %1430 = vmatmul.mubr.bf16.vlgmr.msra.gmra.mxu1 %v3483_v54  ;;  %v3616_v53 = vcombine.low %v301_v39, %v301_v39  ;;  %v3618_v54 = vcombine.low %v302_v40, %v302_v40 }
  0x37   : > { %1452 = vmatpush1.bf16.xpose.msra.mxu0 %v3596_v57  ;;  %1492 = vmatpush1.bf16.xpose.msra.mxu1 %v3598_v58  ;;  %v3621_v57 = vcombine.high %v303_v51, %v303_v51  ;;  %v3623_v58 = vcombine.high %v304_v52, %v304_v52 }
  0x38   : > { %1469 = vmatprep.mubr.bf16.mxu0 %v3486_v59  ;;  %1509 = vmatprep.mubr.bf16.mxu1 %v3488_v60  ;;  %v247_v59 = vld [vmem:[%s4028_s20 + $0xa0] sm:$0xff]  ;;  %v248_v60 = vld [vmem:[%s4028_s20 + $0xa8] sm:$0xff] }
  0x39   : > { %1531 = vmatprep.subr.bf16.mxu0 %v3601_v61  ;;  %1571 = vmatprep.subr.bf16.mxu1 %v3603_v62  ;;  %v3505_v61 = vcombine.low %v245_v47, %v245_v47  ;;  %v3507_v62 = vcombine.low %v246_v48, %v246_v48  ;;  %v3510_v3 = vcombine.high %v247_v59, %v247_v59  ;;  %v313_v47 = vld [vmem:[%s4033_s23 + $0xf0] sm:$0xff]  ;;  %v314_v48 = vld [vmem:[%s4033_s23 + $0xf8] sm:$0xff] }
  0x3a   : > { %v3512_v4 = vcombine.high %v248_v60, %v248_v60 }
  0x3e   : > { %1470 = vmatmul.mubr.bf16.vlgmr.msra.gmra.mxu0 %v3485_v1  ;;  %1510 = vmatmul.mubr.bf16.vlgmr.msra.gmra.mxu1 %v3487_v2  ;;  %v3620_v1 = vcombine.low %v303_v51, %v303_v51  ;;  %v3622_v2 = vcombine.low %v304_v52, %v304_v52 }
  0x3f   : > { %1532 = vmatpush1.bf16.xpose.msra.mxu0 %v3600_v5  ;;  %1572 = vmatpush1.bf16.xpose.msra.mxu1 %v3602_v6  ;;  %v3625_v5 = vcombine.high %v305_v63, %v305_v63  ;;  %v3627_v6 = vcombine.high %v306_v0, %v306_v0 }
  0x40   : > { %1549 = vmatprep.mubr.bf16.mxu0 %v3490_v7  ;;  %1589 = vmatprep.mubr.bf16.mxu1 %v3492_v8  ;;  %v249_v7 = vld [vmem:[%s4028_s20 + $0xb0] sm:$0xff]  ;;  %v250_v8 = vld [vmem:[%s4028_s20 + $0xb8] sm:$0xff] }
  0x41   : > { %1611 = vmatprep.subr.bf16.mxu0 %v3605_v9  ;;  %1651 = vmatprep.subr.bf16.mxu1 %v3607_v10  ;;  %v3509_v9 = vcombine.low %v247_v59, %v247_v59  ;;  %v3511_v10 = vcombine.low %v248_v60, %v248_v60  ;;  %v3514_v15 = vcombine.high %v249_v7, %v249_v7  ;;  %v315_v59 = vld [vmem:[%s4033_s23 + $0x100] sm:$0xff]  ;;  %v316_v60 = vld [vmem:[%s4033_s23 + $0x108] sm:$0xff] }
  0x42   : > { %v3516_v16 = vcombine.high %v250_v8, %v250_v8 }
  0x46   : > { %1550 = vmatmul.mubr.bf16.vlgmr.msra.gmra.mxu0 %v3489_v13  ;;  %1590 = vmatmul.mubr.bf16.vlgmr.msra.gmra.mxu1 %v3491_v14  ;;  %v3624_v13 = vcombine.low %v305_v63, %v305_v63  ;;  %v3626_v14 = vcombine.low %v306_v0, %v306_v0 }
  0x47   : > { %1612 = vmatpush1.bf16.xpose.msra.mxu0 %v3604_v17  ;;  %1652 = vmatpush1.bf16.xpose.msra.mxu1 %v3606_v18  ;;  %v3629_v17 = vcombine.high %v307_v11, %v307_v11  ;;  %v3631_v18 = vcombine.high %v308_v12, %v308_v12 }
  0x48   : > { %1629 = vmatprep.mubr.bf16.mxu0 %v3494_v19  ;;  %1669 = vmatprep.mubr.bf16.mxu1 %v3496_v20  ;;  %v251_v19 = vld [vmem:[%s4028_s20 + $0xc0] sm:$0xff]  ;;  %v252_v20 = vld [vmem:[%s4028_s20 + $0xc8] sm:$0xff] }
  0x49   : > { %1691 = vmatprep.subr.bf16.mxu0 %v3609_v21  ;;  %1731 = vmatprep.subr.bf16.mxu1 %v3611_v22  ;;  %v3513_v21 = vcombine.low %v249_v7, %v249_v7  ;;  %v3515_v22 = vcombine.low %v250_v8, %v250_v8  ;;  %v3518_v27 = vcombine.high %v251_v19, %v251_v19  ;;  %v317_v7 = vld [vmem:[%s4033_s23 + $0x110] sm:$0xff]  ;;  %v318_v8 = vld [vmem:[%s4033_s23 + $0x118] sm:$0xff] }
  0x4a   : > { %v3520_v28 = vcombine.high %v252_v20, %v252_v20 }
  0x4e   : > { %1630 = vmatmul.mubr.bf16.vlgmr.msra.gmra.mxu0 %v3493_v25  ;;  %1670 = vmatmul.mubr.bf16.vlgmr.msra.gmra.mxu1 %v3495_v26  ;;  %v3628_v25 = vcombine.low %v307_v11, %v307_v11  ;;  %v3630_v26 = vcombine.low %v308_v12, %v308_v12 }
  0x4f   : > { %1692 = vmatpush1.bf16.xpose.msra.mxu0 %v3608_v29  ;;  %1732 = vmatpush1.bf16.xpose.msra.mxu1 %v3610_v30  ;;  %v3633_v29 = vcombine.high %v309_v23, %v309_v23  ;;  %v3635_v30 = vcombine.high %v310_v24, %v310_v24 }
  0x50   : > { %1709 = vmatprep.mubr.bf16.mxu0 %v3498_v31  ;;  %1749 = vmatprep.mubr.bf16.mxu1 %v3500_v32  ;;  %v253_v31 = vld [vmem:[%s4028_s20 + $0xd0] sm:$0xff]  ;;  %v254_v32 = vld [vmem:[%s4028_s20 + $0xd8] sm:$0xff] }
  0x51   : > { %1771 = vmatprep.subr.bf16.mxu0 %v3613_v33  ;;  %1811 = vmatprep.subr.bf16.mxu1 %v3615_v34  ;;  %v3517_v33 = vcombine.low %v251_v19, %v251_v19  ;;  %v3519_v34 = vcombine.low %v252_v20, %v252_v20  ;;  %v3522_v39 = vcombine.high %v253_v31, %v253_v31  ;;  %v319_v19 = vld [vmem:[%s4033_s23 + $0x120] sm:$0xff]  ;;  %v320_v20 = vld [vmem:[%s4033_s23 + $0x128] sm:$0xff] }
  0x52   : > { %v3524_v40 = vcombine.high %v254_v32, %v254_v32 }
  0x56   : > { %1710 = vmatmul.mubr.bf16.vlgmr.msra.gmra.mxu0 %v3497_v37  ;;  %1750 = vmatmul.mubr.bf16.vlgmr.msra.gmra.mxu1 %v3499_v38  ;;  %v3632_v37 = vcombine.low %v309_v23, %v309_v23  ;;  %v3634_v38 = vcombine.low %v310_v24, %v310_v24 }
  0x57   : > { %1772 = vmatpush1.bf16.xpose.msra.mxu0 %v3612_v41  ;;  %1812 = vmatpush1.bf16.xpose.msra.mxu1 %v3614_v42  ;;  %v3637_v41 = vcombine.high %v311_v35, %v311_v35  ;;  %v3639_v42 = vcombine.high %v312_v36, %v312_v36 }
  0x58   : > { %1789 = vmatprep.mubr.bf16.mxu0 %v3502_v43  ;;  %1829 = vmatprep.mubr.bf16.mxu1 %v3504_v44  ;;  %v255_v43 = vld [vmem:[%s4028_s20 + $0xe0] sm:$0xff]  ;;  %v256_v44 = vld [vmem:[%s4028_s20 + $0xe8] sm:$0xff] }
  0x59   : > { %1851 = vmatprep.subr.bf16.mxu0 %v3617_v45  ;;  %1891 = vmatprep.subr.bf16.mxu1 %v3619_v46  ;;  %v3521_v45 = vcombine.low %v253_v31, %v253_v31  ;;  %v3523_v46 = vcombine.low %v254_v32, %v254_v32  ;;  %v3526_v51 = vcombine.high %v255_v43, %v255_v43  ;;  %v321_v31 = vld [vmem:[%s4033_s23 + $0x130] sm:$0xff]  ;;  %v322_v32 = vld [vmem:[%s4033_s23 + $0x138] sm:$0xff] }
  0x5a   : > { %v3528_v52 = vcombine.high %v256_v44, %v256_v44 }
  0x5e   : > { %1790 = vmatmul.mubr.bf16.vlgmr.msra.gmra.mxu0 %v3501_v49  ;;  %1830 = vmatmul.mubr.bf16.vlgmr.msra.gmra.mxu1 %v3503_v50  ;;  %v3636_v49 = vcombine.low %v311_v35, %v311_v35  ;;  %v3638_v50 = vcombine.low %v312_v36, %v312_v36 }
  0x5f   : > { %1852 = vmatpush1.bf16.xpose.msra.mxu0 %v3616_v53  ;;  %1892 = vmatpush1.bf16.xpose.msra.mxu1 %v3618_v54  ;;  %v3641_v53 = vcombine.high %v313_v47, %v313_v47  ;;  %v3643_v54 = vcombine.high %v314_v48, %v314_v48 }
  0x60   : > { %1869 = vmatprep.mubr.bf16.mxu0 %v3506_v55  ;;  %1909 = vmatprep.mubr.bf16.mxu1 %v3508_v56  ;;  %v257_v55 = vld [vmem:[%s4028_s20 + $0xf0] sm:$0xff]  ;;  %v258_v56 = vld [vmem:[%s4028_s20 + $0xf8] sm:$0xff] }
  0x61   : > { %1931 = vmatprep.subr.bf16.mxu0 %v3621_v57  ;;  %1971 = vmatprep.subr.bf16.mxu1 %v3623_v58  ;;  %v3525_v57 = vcombine.low %v255_v43, %v255_v43  ;;  %v3527_v58 = vcombine.low %v256_v44, %v256_v44  ;;  %v3530_v63 = vcombine.high %v257_v55, %v257_v55  ;;  %v323_v43 = vld [vmem:[%s4033_s23 + $0x140] sm:$0xff]  ;;  %v324_v44 = vld [vmem:[%s4033_s23 + $0x148] sm:$0xff] }
  0x62   : > { %v3532_v0 = vcombine.high %v258_v56, %v258_v56 }
  0x66   : > { %1870 = vmatmul.mubr.bf16.vlgmr.msra.gmra.mxu0 %v3505_v61  ;;  %1910 = vmatmul.mubr.bf16.vlgmr.msra.gmra.mxu1 %v3507_v62  ;;  %v3640_v61 = vcombine.low %v313_v47, %v313_v47  ;;  %v3642_v62 = vcombine.low %v314_v48, %v314_v48 }
  0x67   : > { %1932 = vmatpush1.bf16.xpose.msra.mxu0 %v3620_v1  ;;  %1972 = vmatpush1.bf16.xpose.msra.mxu1 %v3622_v2  ;;  %v3645_v1 = vcombine.high %v315_v59, %v315_v59  ;;  %v3647_v2 = vcombine.high %v316_v60, %v316_v60 }
  0x68   : > { %1949 = vmatprep.mubr.bf16.mxu0 %v3510_v3  ;;  %1989 = vmatprep.mubr.bf16.mxu1 %v3512_v4  ;;  %v259_v3 = vld [vmem:[%s4028_s20 + $0x100] sm:$0xff]  ;;  %v260_v4 = vld [vmem:[%s4028_s20 + $0x108] sm:$0xff] }
  0x69   : > { %2011 = vmatprep.subr.bf16.mxu0 %v3625_v5  ;;  %2051 = vmatprep.subr.bf16.mxu1 %v3627_v6  ;;  %v3529_v5 = vcombine.low %v257_v55, %v257_v55  ;;  %v3531_v6 = vcombine.low %v258_v56, %v258_v56  ;;  %v3534_v11 = vcombine.high %v259_v3, %v259_v3  ;;  %v325_v55 = vld [vmem:[%s4033_s23 + $0x150] sm:$0xff]  ;;  %v326_v56 = vld [vmem:[%s4033_s23 + $0x158] sm:$0xff] }
  0x6a   : > { %v3536_v12 = vcombine.high %v260_v4, %v260_v4 }
  0x6e   : > { %1950 = vmatmul.mubr.bf16.vlgmr.msra.gmra.mxu0 %v3509_v9  ;;  %1990 = vmatmul.mubr.bf16.vlgmr.msra.gmra.mxu1 %v3511_v10  ;;  %v3644_v9 = vcombine.low %v315_v59, %v315_v59  ;;  %v3646_v10 = vcombine.low %v316_v60, %v316_v60 }
  0x6f   : > { %2012 = vmatpush1.bf16.xpose.msra.mxu0 %v3624_v13  ;;  %2052 = vmatpush1.bf16.xpose.msra.mxu1 %v3626_v14  ;;  %v3649_v13 = vcombine.high %v317_v7, %v317_v7  ;;  %v3651_v14 = vcombine.high %v318_v8, %v318_v8 }
  0x70   : > { %2029 = vmatprep.mubr.bf16.mxu0 %v3514_v15  ;;  %2069 = vmatprep.mubr.bf16.mxu1 %v3516_v16  ;;  %v261_v15 = vld [vmem:[%s4028_s20 + $0x110] sm:$0xff]  ;;  %v262_v16 = vld [vmem:[%s4028_s20 + $0x118] sm:$0xff] }
  0x71   : > { %2091 = vmatprep.subr.bf16.mxu0 %v3629_v17  ;;  %2131 = vmatprep.subr.bf16.mxu1 %v3631_v18  ;;  %v3533_v17 = vcombine.low %v259_v3, %v259_v3  ;;  %v3535_v18 = vcombine.low %v260_v4, %v260_v4  ;;  %v3538_v23 = vcombine.high %v261_v15, %v261_v15  ;;  %v327_v3 = vld [vmem:[%s4033_s23 + $0x160] sm:$0xff]  ;;  %v328_v4 = vld [vmem:[%s4033_s23 + $0x168] sm:$0xff] }
  0x72   : > { %v3540_v24 = vcombine.high %v262_v16, %v262_v16 }
  0x76   : > { %2030 = vmatmul.mubr.bf16.vlgmr.msra.gmra.mxu0 %v3513_v21  ;;  %2070 = vmatmul.mubr.bf16.vlgmr.msra.gmra.mxu1 %v3515_v22  ;;  %v3648_v21 = vcombine.low %v317_v7, %v317_v7  ;;  %v3650_v22 = vcombine.low %v318_v8, %v318_v8 }
  0x77   : > { %2092 = vmatpush1.bf16.xpose.msra.mxu0 %v3628_v25  ;;  %2132 = vmatpush1.bf16.xpose.msra.mxu1 %v3630_v26  ;;  %v3653_v25 = vcombine.high %v319_v19, %v319_v19  ;;  %v3655_v26 = vcombine.high %v320_v20, %v320_v20 }
  0x78   : > { %2109 = vmatprep.mubr.bf16.mxu0 %v3518_v27  ;;  %2149 = vmatprep.mubr.bf16.mxu1 %v3520_v28  ;;  %v263_v27 = vld [vmem:[%s4028_s20 + $0x120] sm:$0xff]  ;;  %v264_v28 = vld [vmem:[%s4028_s20 + $0x128] sm:$0xff] }
  0x79   : > { %2171 = vmatprep.subr.bf16.mxu0 %v3633_v29  ;;  %2211 = vmatprep.subr.bf16.mxu1 %v3635_v30  ;;  %v3537_v29 = vcombine.low %v261_v15, %v261_v15  ;;  %v3539_v30 = vcombine.low %v262_v16, %v262_v16  ;;  %v3542_v35 = vcombine.high %v263_v27, %v263_v27  ;;  %v329_v15 = vld [vmem:[%s4033_s23 + $0x170] sm:$0xff]  ;;  %v330_v16 = vld [vmem:[%s4033_s23 + $0x178] sm:$0xff] }
  0x7a   : > { %v3544_v36 = vcombine.high %v264_v28, %v264_v28 }
  0x7e   : > { %2110 = vmatmul.mubr.bf16.vlgmr.msra.gmra.mxu0 %v3517_v33  ;;  %2150 = vmatmul.mubr.bf16.vlgmr.msra.gmra.mxu1 %v3519_v34  ;;  %v3652_v33 = vcombine.low %v319_v19, %v319_v19  ;;  %v3654_v34 = vcombine.low %v320_v20, %v320_v20 }
  0x7f   : > { %2172 = vmatpush1.bf16.xpose.msra.mxu0 %v3632_v37  ;;  %2212 = vmatpush1.bf16.xpose.msra.mxu1 %v3634_v38  ;;  %v3657_v37 = vcombine.high %v321_v31, %v321_v31  ;;  %v3659_v38 = vcombine.high %v322_v32, %v322_v32 }
  0x80   : > { %2189 = vmatprep.mubr.bf16.mxu0 %v3522_v39  ;;  %2229 = vmatprep.mubr.bf16.mxu1 %v3524_v40  ;;  %v265_v39 = vld [vmem:[%s4028_s20 + $0x130] sm:$0xff]  ;;  %v266_v40 = vld [vmem:[%s4028_s20 + $0x138] sm:$0xff] }
  0x81   : > { %2251 = vmatprep.subr.bf16.mxu0 %v3637_v41  ;;  %2291 = vmatprep.subr.bf16.mxu1 %v3639_v42  ;;  %v3541_v41 = vcombine.low %v263_v27, %v263_v27  ;;  %v3543_v42 = vcombine.low %v264_v28, %v264_v28  ;;  %v3546_v47 = vcombine.high %v265_v39, %v265_v39  ;;  %v331_v27 = vld [vmem:[%s4033_s23 + $0x180] sm:$0xff]  ;;  %v332_v28 = vld [vmem:[%s4033_s23 + $0x188] sm:$0xff] }
  0x82   : > { %v3548_v48 = vcombine.high %v266_v40, %v266_v40 }
  0x86   : > { %2190 = vmatmul.mubr.bf16.vlgmr.msra.gmra.mxu0 %v3521_v45  ;;  %2230 = vmatmul.mubr.bf16.vlgmr.msra.gmra.mxu1 %v3523_v46  ;;  %v3656_v45 = vcombine.low %v321_v31, %v321_v31  ;;  %v3658_v46 = vcombine.low %v322_v32, %v322_v32 }
  0x87   : > { %2252 = vmatpush1.bf16.xpose.msra.mxu0 %v3636_v49  ;;  %2292 = vmatpush1.bf16.xpose.msra.mxu1 %v3638_v50  ;;  %v3661_v49 = vcombine.high %v323_v43, %v323_v43  ;;  %v3663_v50 = vcombine.high %v324_v44, %v324_v44 }
  0x88   : > { %2269 = vmatprep.mubr.bf16.mxu0 %v3526_v51  ;;  %2309 = vmatprep.mubr.bf16.mxu1 %v3528_v52  ;;  %v267_v51 = vld [vmem:[%s4028_s20 + $0x140] sm:$0xff]  ;;  %v268_v52 = vld [vmem:[%s4028_s20 + $0x148] sm:$0xff] }
  0x89   : > { %2331 = vmatprep.subr.bf16.mxu0 %v3641_v53  ;;  %2371 = vmatprep.subr.bf16.mxu1 %v3643_v54  ;;  %v3545_v53 = vcombine.low %v265_v39, %v265_v39  ;;  %v3547_v54 = vcombine.low %v266_v40, %v266_v40  ;;  %v3550_v59 = vcombine.high %v267_v51, %v267_v51  ;;  %v333_v39 = vld [vmem:[%s4033_s23 + $0x190] sm:$0xff]  ;;  %v334_v40 = vld [vmem:[%s4033_s23 + $0x198] sm:$0xff] }
  0x8a   : > { %v3552_v60 = vcombine.high %v268_v52, %v268_v52 }
  0x8e   : > { %2270 = vmatmul.mubr.bf16.vlgmr.msra.gmra.mxu0 %v3525_v57  ;;  %2310 = vmatmul.mubr.bf16.vlgmr.msra.gmra.mxu1 %v3527_v58  ;;  %v3660_v57 = vcombine.low %v323_v43, %v323_v43  ;;  %v3662_v58 = vcombine.low %v324_v44, %v324_v44 }
  0x8f   : > { %2332 = vmatpush1.bf16.xpose.msra.mxu0 %v3640_v61  ;;  %2372 = vmatpush1.bf16.xpose.msra.mxu1 %v3642_v62  ;;  %v3665_v61 = vcombine.high %v325_v55, %v325_v55  ;;  %v3667_v62 = vcombine.high %v326_v56, %v326_v56 }
  0x90   : > { %2349 = vmatprep.mubr.bf16.mxu0 %v3530_v63  ;;  %2389 = vmatprep.mubr.bf16.mxu1 %v3532_v0  ;;  %v269_v63 = vld [vmem:[%s4028_s20 + $0x150] sm:$0xff]  ;;  %v270_v0 = vld [vmem:[%s4028_s20 + $0x158] sm:$0xff] }
  0x91   : > { %2411 = vmatprep.subr.bf16.mxu0 %v3645_v1  ;;  %2451 = vmatprep.subr.bf16.mxu1 %v3647_v2  ;;  %v3549_v1 = vcombine.low %v267_v51, %v267_v51  ;;  %v3551_v2 = vcombine.low %v268_v52, %v268_v52  ;;  %v3554_v7 = vcombine.high %v269_v63, %v269_v63  ;;  %v335_v51 = vld [vmem:[%s4033_s23 + $0x1a0] sm:$0xff]  ;;  %v336_v52 = vld [vmem:[%s4033_s23 + $0x1a8] sm:$0xff] }
  0x92   : > { %v3556_v8 = vcombine.high %v270_v0, %v270_v0 }
  0x96   : > { %2350 = vmatmul.mubr.bf16.vlgmr.msra.gmra.mxu0 %v3529_v5  ;;  %2390 = vmatmul.mubr.bf16.vlgmr.msra.gmra.mxu1 %v3531_v6  ;;  %v3664_v5 = vcombine.low %v325_v55, %v325_v55  ;;  %v3666_v6 = vcombine.low %v326_v56, %v326_v56 }
  0x97   : > { %2412 = vmatpush1.bf16.xpose.msra.mxu0 %v3644_v9  ;;  %2452 = vmatpush1.bf16.xpose.msra.mxu1 %v3646_v10  ;;  %v3669_v9 = vcombine.high %v327_v3, %v327_v3  ;;  %v3671_v10 = vcombine.high %v328_v4, %v328_v4 }
  0x98   : > { %2429 = vmatprep.mubr.bf16.mxu0 %v3534_v11  ;;  %2469 = vmatprep.mubr.bf16.mxu1 %v3536_v12  ;;  %v271_v11 = vld [vmem:[%s4028_s20 + $0x160] sm:$0xff]  ;;  %v272_v12 = vld [vmem:[%s4028_s20 + $0x168] sm:$0xff] }
  0x99   : > { %2491 = vmatprep.subr.bf16.mxu0 %v3649_v13  ;;  %2531 = vmatprep.subr.bf16.mxu1 %v3651_v14  ;;  %v3553_v13 = vcombine.low %v269_v63, %v269_v63  ;;  %v3555_v14 = vcombine.low %v270_v0, %v270_v0  ;;  %v3558_v19 = vcombine.high %v271_v11, %v271_v11  ;;  %v279_v0 = vld [vmem:[%s4028_s20 + $0x1a0] sm:$0xff] }
  0x9a   : > { %v3560_v20 = vcombine.high %v272_v12, %v272_v12 }
  0x9e   : > { %2430 = vmatmul.mubr.bf16.vlgmr.msra.gmra.mxu0 %v3533_v17  ;;  %2470 = vmatmul.mubr.bf16.vlgmr.msra.gmra.mxu1 %v3535_v18  ;;  %v3668_v17 = vcombine.low %v327_v3, %v327_v3  ;;  %v3670_v18 = vcombine.low %v328_v4, %v328_v4 }
  0x9f   : > { %2492 = vmatpush1.bf16.xpose.msra.mxu0 %v3648_v21  ;;  %2532 = vmatpush1.bf16.xpose.msra.mxu1 %v3650_v22  ;;  %v3673_v21 = vcombine.high %v329_v15, %v329_v15  ;;  %v3675_v22 = vcombine.high %v330_v16, %v330_v16 }
  0xa0   : > { %2509 = vmatprep.mubr.bf16.mxu0 %v3538_v23  ;;  %2549 = vmatprep.mubr.bf16.mxu1 %v3540_v24  ;;  %v273_v23 = vld [vmem:[%s4028_s20 + $0x170] sm:$0xff]  ;;  %v274_v24 = vld [vmem:[%s4028_s20 + $0x178] sm:$0xff] }
  0xa1   : > { %2571 = vmatprep.subr.bf16.mxu0 %v3653_v25  ;;  %2611 = vmatprep.subr.bf16.mxu1 %v3655_v26  ;;  %v3557_v25 = vcombine.low %v271_v11, %v271_v11  ;;  %v3559_v26 = vcombine.low %v272_v12, %v272_v12  ;;  %v3562_v31 = vcombine.high %v273_v23, %v273_v23 }
  0xa2   : > { %v3564_v32 = vcombine.high %v274_v24, %v274_v24  ;;  %v3574_v11 = vcombine.high %v279_v0, %v279_v0 }
  0xa6   : > { %2510 = vmatmul.mubr.bf16.vlgmr.msra.gmra.mxu0 %v3537_v29  ;;  %2550 = vmatmul.mubr.bf16.vlgmr.msra.gmra.mxu1 %v3539_v30  ;;  %v3672_v29 = vcombine.low %v329_v15, %v329_v15  ;;  %v3674_v30 = vcombine.low %v330_v16, %v330_v16 }
  0xa7   : > { %2572 = vmatpush1.bf16.xpose.msra.mxu0 %v3652_v33  ;;  %2612 = vmatpush1.bf16.xpose.msra.mxu1 %v3654_v34  ;;  %v3677_v33 = vcombine.high %v331_v27, %v331_v27  ;;  %v3679_v34 = vcombine.high %v332_v28, %v332_v28 }
  0xa8   : > { %2589 = vmatprep.mubr.bf16.mxu0 %v3542_v35  ;;  %2629 = vmatprep.mubr.bf16.mxu1 %v3544_v36  ;;  %v275_v35 = vld [vmem:[%s4028_s20 + $0x180] sm:$0xff]  ;;  %v276_v36 = vld [vmem:[%s4028_s20 + $0x188] sm:$0xff] }
  0xa9   : > { %2651 = vmatprep.subr.bf16.mxu0 %v3657_v37  ;;  %2691 = vmatprep.subr.bf16.mxu1 %v3659_v38  ;;  %v3561_v37 = vcombine.low %v273_v23, %v273_v23  ;;  %v3563_v38 = vcombine.low %v274_v24, %v274_v24  ;;  %v3566_v43 = vcombine.high %v275_v35, %v275_v35 }
  0xaa   : > { %v3568_v44 = vcombine.high %v276_v36, %v276_v36  ;;  %v3573_v24 = vcombine.low %v279_v0, %v279_v0 }
  0xae   : > { %2590 = vmatmul.mubr.bf16.vlgmr.msra.gmra.mxu0 %v3541_v41  ;;  %2630 = vmatmul.mubr.bf16.vlgmr.msra.gmra.mxu1 %v3543_v42  ;;  %v3676_v41 = vcombine.low %v331_v27, %v331_v27  ;;  %v3678_v42 = vcombine.low %v332_v28, %v332_v28  ;;  %v3949_v27 = vld [vmem:[%s4033_s23 + $0x1b8] ss:$0 sps:$4 sm:$0xff]  }
  0xaf   : > { %2652 = vmatpush1.bf16.xpose.msra.mxu0 %v3656_v45  ;;  %2692 = vmatpush1.bf16.xpose.msra.mxu1 %v3658_v46  ;;  %v3681_v45 = vcombine.high %v333_v39, %v333_v39  ;;  %v3683_v46 = vcombine.high %v334_v40, %v334_v40 }
  0xb0   : > { %2669 = vmatprep.mubr.bf16.mxu0 %v3546_v47  ;;  %2709 = vmatprep.mubr.bf16.mxu1 %v3548_v48  ;;  %v277_v47 = vld [vmem:[%s4028_s20 + $0x190] sm:$0xff]  ;;  %v278_v48 = vld [vmem:[%s4028_s20 + $0x198] sm:$0xff] }
  0xb1   : > { %2731 = vmatprep.subr.bf16.mxu0 %v3661_v49  ;;  %2771 = vmatprep.subr.bf16.mxu1 %v3663_v50  ;;  %v3565_v49 = vcombine.low %v275_v35, %v275_v35  ;;  %v3567_v50 = vcombine.low %v276_v36, %v276_v36  ;;  %v3570_v55 = vcombine.high %v277_v47, %v277_v47 }
  0xb2   : > { %v3572_v56 = vcombine.high %v278_v48, %v278_v48  ;;  %v3569_v4 = vcombine.low %v277_v47, %v277_v47 }
  0xb6   : > { %2670 = vmatmul.mubr.bf16.vlgmr.msra.gmra.mxu0 %v3545_v53  ;;  %2710 = vmatmul.mubr.bf16.vlgmr.msra.gmra.mxu1 %v3547_v54  ;;  %v3680_v53 = vcombine.low %v333_v39, %v333_v39  ;;  %v3682_v54 = vcombine.low %v334_v40, %v334_v40  ;;  %v3952_v40 = vld [vmem:[%s4028_s20 + $0x1b8] ss:$0 sps:$4 sm:$0xff]  }
  0xb7   : > { %2732 = vmatpush1.bf16.xpose.msra.mxu0 %v3660_v57  ;;  %2772 = vmatpush1.bf16.xpose.msra.mxu1 %v3662_v58  ;;  %v3685_v57 = vcombine.high %v335_v51, %v335_v51  ;;  %v3687_v58 = vcombine.high %v336_v52, %v336_v52 }
  0xb8   : > { %2749 = vmatprep.mubr.bf16.mxu0 %v3550_v59  ;;  %2789 = vmatprep.mubr.bf16.mxu1 %v3552_v60 }
  0xb9   : > { %2811 = vmatprep.subr.bf16.mxu0 %v3665_v61  ;;  %2851 = vmatprep.subr.bf16.mxu1 %v3667_v62 }
  0xbe   : > { %2750 = vmatmul.mubr.bf16.vlgmr.msra.gmra.mxu0 %v3549_v1  ;;  %2790 = vmatmul.mubr.bf16.vlgmr.msra.gmra.mxu1 %v3551_v2  ;;  %v280_v1 = vld [vmem:[%s4028_s20 + $0x1a8] sm:$0xff] }
  0xbf   : > { %2812 = vmatpush1.bf16.xpose.msra.mxu0 %v3664_v5  ;;  %2852 = vmatpush1.bf16.xpose.msra.mxu1 %v3666_v6  ;;  %v3571_v5 = vcombine.low %v278_v48, %v278_v48  ;;  %v337_v6 = vld [vmem:[%s4033_s23 + $0x1b0] sm:$0xff]  ;;  %v3576_v12 = vcombine.high %v280_v1, %v280_v1 }
  0xc0   : > { %2829 = vmatprep.mubr.bf16.mxu0 %v3554_v7  ;;  %2869 = vmatprep.mubr.bf16.mxu1 %v3556_v8  ;;  %v3684_v7 = vcombine.low %v335_v51, %v335_v51  ;;  %v3686_v8 = vcombine.low %v336_v52, %v336_v52 }
  0xc1   : > { %2891 = vmatprep.subr.bf16.mxu0 %v3669_v9  ;;  %2931 = vmatprep.subr.bf16.mxu1 %v3671_v10 }
  0xc6   : > { %2830 = vmatmul.mubr.bf16.vlgmr.msra.gmra.mxu0 %v3553_v13  ;;  %2870 = vmatmul.mubr.bf16.vlgmr.msra.gmra.mxu1 %v3555_v14  ;;  %v3689_v13 = vcombine.high %v337_v6, %v337_v6 }
  0xc7   : > { %2892 = vmatpush1.bf16.xpose.msra.mxu0 %v3668_v17  ;;  %2932 = vmatpush1.bf16.xpose.msra.mxu1 %v3670_v18 }
  0xc8   : > { %2909 = vmatprep.mubr.bf16.mxu0 %v3558_v19  ;;  %2949 = vmatprep.mubr.bf16.mxu1 %v3560_v20  ;;  %v3982_v20 = vmov 0.0  }
  0xc9   : > { %2971 = vmatprep.subr.bf16.mxu0 %v3673_v21  ;;  %3011 = vmatprep.subr.bf16.mxu1 %v3675_v22  ;;  %v281_v21 = vld [vmem:[%s4028_s20 + $0x1b0] sm:$0xff] }
  0xca   : > { %v3577_v39 = vcombine.low %v281_v21, %v281_v21 }
  0xce   : > { %2910 = vmatmul.mubr.bf16.vlgmr.msra.gmra.mxu0 %v3557_v25  ;;  %2950 = vmatmul.mubr.bf16.vlgmr.msra.gmra.mxu1 %v3559_v26  ;;  %v3575_v25 = vcombine.low %v280_v1, %v280_v1  ;;  %v3688_v26 = vcombine.low %v337_v6, %v337_v6 }
  0xcf   : > { %2972 = vmatpush1.bf16.xpose.msra.mxu0 %v3672_v29  ;;  %3012 = vmatpush1.bf16.xpose.msra.mxu1 %v3674_v30  ;;  %v3578_v30 = vcombine.high %v281_v21, %v281_v21 }
  0xd0   : > { %2989 = vmatprep.mubr.bf16.mxu0 %v3562_v31  ;;  %3029 = vmatprep.mubr.bf16.mxu1 %v3564_v32 }
  0xd1   : > { %3051 = vmatprep.subr.bf16.mxu0 %v3677_v33  ;;  %3091 = vmatprep.subr.bf16.mxu1 %v3679_v34 }
  0xd6   : > { %2990 = vmatmul.mubr.bf16.vlgmr.msra.gmra.mxu0 %v3561_v37  ;;  %3030 = vmatmul.mubr.bf16.vlgmr.msra.gmra.mxu1 %v3563_v38 }
  0xd7   : > { %3052 = vmatpush1.bf16.xpose.msra.mxu0 %v3676_v41  ;;  %3092 = vmatpush1.bf16.xpose.msra.mxu1 %v3678_v42 }
  0xd8   : > { %3069 = vmatprep.mubr.bf16.mxu0 %v3566_v43  ;;  %3109 = vmatprep.mubr.bf16.mxu1 %v3568_v44 }
  0xd9   : > { %3131 = vmatprep.subr.bf16.mxu0 %v3681_v45  ;;  %3171 = vmatprep.subr.bf16.mxu1 %v3683_v46 }
  0xde   : > { %v1151_v59 = vpop.f32.mrf.mxu0  ;;  %v1191_v60 = vpop.f32.mrf.mxu1  ;;  %3070 = vmatmul.mubr.bf16.vlgmr.msra.gmra.mxu0 %v3565_v49  ;;  %3110 = vmatmul.mubr.bf16.vlgmr.msra.gmra.mxu1 %v3567_v50 }
  0xdf   : > { %v1192_v61 = vadd.f32 %v1191_v60, %v1151_v59  ;;  %3132 = vmatpush1.bf16.xpose.msra.mxu0 %v3680_v53  ;;  %3172 = vmatpush1.bf16.xpose.msra.mxu1 %v3682_v54 }
  0xe0   : > { %v1153_v62 = vpop.f32.mrf.mxu0  ;;  %v1193_v63 = vpop.f32.mrf.mxu1  ;;  %3149 = vmatprep.mubr.bf16.mxu0 %v3570_v55  ;;  %3189 = vmatprep.mubr.bf16.mxu1 %v3572_v56 }
  0xe1   : > { %3211 = vmatprep.subr.bf16.mxu0 %v3685_v57  ;;  %3251 = vmatprep.subr.bf16.mxu1 %v3687_v58 }
  0xe2   : > { %v1154_v2 = vpop.f32.mrf.mxu0  ;;  %v1194_v3 = vpop.f32.mrf.mxu1 }
  0xe4   : > { %v1155_v9 = vpop.f32.mrf.mxu0  ;;  %v1195_v10 = vpop.f32.mrf.mxu1 }
  0xe6   : > { %v1231_v14 = vpop.f32.mrf.mxu0  ;;  %v1271_v15 = vpop.f32.mrf.mxu1  ;;  %3150 = vmatmul.mubr.bf16.vlgmr.msra.gmra.mxu0 %v3569_v4  ;;  %3190 = vmatmul.mubr.bf16.vlgmr.msra.gmra.mxu1 %v3571_v5 }
  0xe7   : > { %v1232_v16 = vadd.f32 %v1231_v14, %v1192_v61  ;;  %3212 = vmatpush1.bf16.xpose.msra.mxu0 %v3684_v7  ;;  %3252 = vmatpush1.bf16.xpose.msra.mxu1 %v3686_v8 }
  0xe8   : > { %v1233_v17 = vpop.f32.mrf.mxu0  ;;  %v1273_v18 = vpop.f32.mrf.mxu1  ;;  %3229 = vmatprep.mubr.bf16.mxu0 %v3574_v11  ;;  %3269 = vmatprep.mubr.bf16.mxu1 %v3576_v12 }
  0xe9   : > { %v1272_v19 = vadd.f32 %v1271_v15, %v1232_v16  ;;  %3291 = vmatprep.subr.bf16.mxu0 %v3689_v13  ;;  %3698 = vmatprep.subr.bf16.mxu1 %v3982_v20 }
  0xea   : > { %v1234_v22 = vpop.f32.mrf.mxu0  ;;  %v1274_v23 = vpop.f32.mrf.mxu1 }
  0xec   : > { %v1235_v28 = vpop.f32.mrf.mxu0  ;;  %v1275_v29 = vpop.f32.mrf.mxu1 }
  0xee   : > { %v1311_v31 = vpop.f32.mrf.mxu0  ;;  %v1351_v32 = vpop.f32.mrf.mxu1  ;;  %3230 = vmatmul.mubr.bf16.vlgmr.msra.gmra.mxu0 %v3573_v24  ;;  %3270 = vmatmul.mubr.bf16.vlgmr.msra.gmra.mxu1 %v3575_v25 }
  0xef   : > { %v1312_v33 = vadd.f32 %v1311_v31, %v1272_v19  ;;  %3292 = vmatpush1.bf16.xpose.msra.mxu0 %v3688_v26  ;;  %3699 = vmatpush3.bf16.xpose.msra.mxu1 %v3949_v27 }
  0xf0   : > { %v1313_v34 = vpop.f32.mrf.mxu0  ;;  %v1353_v35 = vpop.f32.mrf.mxu1  ;;  %3309 = vmatprep.mubr.bf16.mxu0 %v3578_v30  ;;  %3700 = vmatprep.mubr.msk.bf16.mxu1 %vm3983_vm1, %v3982_v20 }
  0xf1   : > { %v1352_v36 = vadd.f32 %v1351_v32, %v1312_v33 }
  0xf2   : > { %v1314_v37 = vpop.f32.mrf.mxu0  ;;  %v1354_v38 = vpop.f32.mrf.mxu1 }
  0xf4   : > { %v1315_v41 = vpop.f32.mrf.mxu0  ;;  %v1355_v42 = vpop.f32.mrf.mxu1 }
  0xf6   : > { %v1391_v43 = vpop.f32.mrf.mxu0  ;;  %v1431_v44 = vpop.f32.mrf.mxu1  ;;  %3310 = vmatmul.mubr.bf16.vlgmr.msra.gmra.mxu0 %v3577_v39  ;;  %3701 = vmatmul.mubr.bf16.vlgmr.msra.gmra.mxu1 %v3952_v40 }
  0xf7   : > { %v1392_v45 = vadd.f32 %v1391_v43, %v1352_v36 }
  0xf8   : > { %v1393_v46 = vpop.f32.mrf.mxu0  ;;  %v1433_v47 = vpop.f32.mrf.mxu1 }
  0xf9   : > { %v1432_v48 = vadd.f32 %v1431_v44, %v1392_v45 }
  0xfa   : > { %v1394_v49 = vpop.f32.mrf.mxu0  ;;  %v1434_v50 = vpop.f32.mrf.mxu1 }
  0xfc   : > { %v1395_v51 = vpop.f32.mrf.mxu0  ;;  %v1435_v52 = vpop.f32.mrf.mxu1 }
  0xfe   : > { %v1471_v53 = vpop.f32.mrf.mxu0  ;;  %v1511_v54 = vpop.f32.mrf.mxu1 }
  0xff   : > { %v1472_v55 = vadd.f32 %v1471_v53, %v1432_v48 }
 0x100   : > { %v1473_v56 = vpop.f32.mrf.mxu0  ;;  %v1513_v57 = vpop.f32.mrf.mxu1 }
 0x101   : > { %v1512_v58 = vadd.f32 %v1511_v54, %v1472_v55 }
 0x102   : > { %v1474_v59 = vpop.f32.mrf.mxu0  ;;  %v1514_v60 = vpop.f32.mrf.mxu1 }
 0x104   : > { %v1475_v61 = vpop.f32.mrf.mxu0  ;;  %v1515_v62 = vpop.f32.mrf.mxu1 }
 0x106   : > { %v1551_v63 = vpop.f32.mrf.mxu0  ;;  %v1591_v0 = vpop.f32.mrf.mxu1 }
 0x107   : > { %v1552_v1 = vadd.f32 %v1551_v63, %v1512_v58 }
 0x108   : > { %v1553_v2 = vpop.f32.mrf.mxu0  ;;  %v1593_v3 = vpop.f32.mrf.mxu1 }
 0x109   : > { %v1592_v4 = vadd.f32 %v1591_v0, %v1552_v1 }
 0x10a   : > { %v1554_v5 = vpop.f32.mrf.mxu0  ;;  %v1594_v6 = vpop.f32.mrf.mxu1 }
 0x10c   : > { %v1555_v7 = vpop.f32.mrf.mxu0  ;;  %v1595_v8 = vpop.f32.mrf.mxu1 }
 0x10e   : > { %v1631_v9 = vpop.f32.mrf.mxu0  ;;  %v1671_v10 = vpop.f32.mrf.mxu1 }
 0x10f   : > { %v1632_v11 = vadd.f32 %v1631_v9, %v1592_v4 }
 0x110   : > { %v1633_v12 = vpop.f32.mrf.mxu0  ;;  %v1673_v13 = vpop.f32.mrf.mxu1 }
 0x111   : > { %v1672_v14 = vadd.f32 %v1671_v10, %v1632_v11 }
 0x112   : > { %v1634_v15 = vpop.f32.mrf.mxu0  ;;  %v1674_v16 = vpop.f32.mrf.mxu1 }
 0x114   : > { %v1635_v17 = vpop.f32.mrf.mxu0  ;;  %v1675_v18 = vpop.f32.mrf.mxu1 }
 0x116   : > { %v1711_v19 = vpop.f32.mrf.mxu0  ;;  %v1751_v20 = vpop.f32.mrf.mxu1 }
 0x117   : > { %v1712_v21 = vadd.f32 %v1711_v19, %v1672_v14 }
 0x118   : > { %v1713_v22 = vpop.f32.mrf.mxu0  ;;  %v1753_v23 = vpop.f32.mrf.mxu1 }
 0x119   : > { %v1752_v24 = vadd.f32 %v1751_v20, %v1712_v21 }
 0x11a   : > { %v1714_v25 = vpop.f32.mrf.mxu0  ;;  %v1754_v26 = vpop.f32.mrf.mxu1 }
 0x11c   : > { %v1715_v27 = vpop.f32.mrf.mxu0  ;;  %v1755_v28 = vpop.f32.mrf.mxu1 }
 0x11e   : > { %v1791_v29 = vpop.f32.mrf.mxu0  ;;  %v1831_v30 = vpop.f32.mrf.mxu1 }
 0x11f   : > { %v1792_v31 = vadd.f32 %v1791_v29, %v1752_v24 }
 0x120   : > { %v1793_v32 = vpop.f32.mrf.mxu0  ;;  %v1833_v33 = vpop.f32.mrf.mxu1 }
 0x121   : > { %v1832_v34 = vadd.f32 %v1831_v30, %v1792_v31 }
 0x122   : > { %v1794_v35 = vpop.f32.mrf.mxu0  ;;  %v1834_v36 = vpop.f32.mrf.mxu1 }
 0x124   : > { %v1795_v37 = vpop.f32.mrf.mxu0  ;;  %v1835_v38 = vpop.f32.mrf.mxu1 }
 0x126   : > { %v1871_v39 = vpop.f32.mrf.mxu0  ;;  %v1911_v40 = vpop.f32.mrf.mxu1 }
 0x127   : > { %v1872_v41 = vadd.f32 %v1871_v39, %v1832_v34 }
 0x128   : > { %v1873_v42 = vpop.f32.mrf.mxu0  ;;  %v1913_v43 = vpop.f32.mrf.mxu1 }
 0x129   : > { %v1912_v44 = vadd.f32 %v1911_v40, %v1872_v41 }
 0x12a   : > { %v1874_v45 = vpop.f32.mrf.mxu0  ;;  %v1914_v46 = vpop.f32.mrf.mxu1 }
 0x12c   : > { %v1875_v47 = vpop.f32.mrf.mxu0  ;;  %v1915_v48 = vpop.f32.mrf.mxu1 }
 0x12e   : > { %v1951_v49 = vpop.f32.mrf.mxu0  ;;  %v1991_v50 = vpop.f32.mrf.mxu1 }
 0x12f   : > { %v1952_v51 = vadd.f32 %v1951_v49, %v1912_v44 }
 0x130   : > { %v1953_v52 = vpop.f32.mrf.mxu0  ;;  %v1993_v53 = vpop.f32.mrf.mxu1 }
 0x131   : > { %v1992_v54 = vadd.f32 %v1991_v50, %v1952_v51 }
 0x132   : > { %v1954_v55 = vpop.f32.mrf.mxu0  ;;  %v1994_v56 = vpop.f32.mrf.mxu1 }
 0x134   : > { %v1955_v57 = vpop.f32.mrf.mxu0  ;;  %v1995_v58 = vpop.f32.mrf.mxu1 }
 0x136   : > { %v2031_v59 = vpop.f32.mrf.mxu0  ;;  %v2071_v60 = vpop.f32.mrf.mxu1 }
 0x137   : > { %v2032_v61 = vadd.f32 %v2031_v59, %v1992_v54 }
 0x138   : > { %v2033_v62 = vpop.f32.mrf.mxu0  ;;  %v2073_v63 = vpop.f32.mrf.mxu1 }
 0x139   : > { %v2072_v0 = vadd.f32 %v2071_v60, %v2032_v61 }
 0x13a   : > { %v2034_v1 = vpop.f32.mrf.mxu0  ;;  %v2074_v2 = vpop.f32.mrf.mxu1 }
 0x13c   : > { %v2035_v3 = vpop.f32.mrf.mxu0  ;;  %v2075_v4 = vpop.f32.mrf.mxu1 }
 0x13e   : > { %v2111_v5 = vpop.f32.mrf.mxu0  ;;  %v2151_v6 = vpop.f32.mrf.mxu1 }
 0x13f   : > { %v2112_v37 = vadd.f32 %v2111_v5, %v2072_v0 }
 0x140   : > { %v2113_v7 = vpop.f32.mrf.mxu0  ;;  %v2153_v8 = vpop.f32.mrf.mxu1 }
 0x141   : > { %v2152_v42 = vadd.f32 %v2151_v6, %v2112_v37 }
 0x142   : > { %v2114_v9 = vpop.f32.mrf.mxu0  ;;  %v2154_v10 = vpop.f32.mrf.mxu1 }
 0x144   : > { %v2115_v11 = vpop.f32.mrf.mxu0  ;;  %v2155_v12 = vpop.f32.mrf.mxu1 }
 0x146   : > { %v2191_v13 = vpop.f32.mrf.mxu0  ;;  %v2231_v14 = vpop.f32.mrf.mxu1 }
 0x147   : > { %v2192_v45 = vadd.f32 %v2191_v13, %v2152_v42 }
 0x148   : > { %v2193_v15 = vpop.f32.mrf.mxu0  ;;  %v2233_v16 = vpop.f32.mrf.mxu1 }
 0x149   : > { %v2232_v50 = vadd.f32 %v2231_v14, %v2192_v45 }
 0x14a   : > { %v2194_v17 = vpop.f32.mrf.mxu0  ;;  %v2234_v18 = vpop.f32.mrf.mxu1 }
 0x14c   : > { %v2195_v19 = vpop.f32.mrf.mxu0  ;;  %v2235_v20 = vpop.f32.mrf.mxu1 }
 0x14e   : > { %v2271_v21 = vpop.f32.mrf.mxu0  ;;  %v2311_v22 = vpop.f32.mrf.mxu1 }
 0x14f   : > { %v2272_v53 = vadd.f32 %v2271_v21, %v2232_v50 }
 0x150   : > { %v2273_v23 = vpop.f32.mrf.mxu0  ;;  %v2313_v24 = vpop.f32.mrf.mxu1 }
 0x151   : > { %v2312_v58 = vadd.f32 %v2311_v22, %v2272_v53 }
 0x152   : > { %v2274_v25 = vpop.f32.mrf.mxu0  ;;  %v2314_v26 = vpop.f32.mrf.mxu1 }
 0x154   : > { %v2275_v27 = vpop.f32.mrf.mxu0  ;;  %v2315_v28 = vpop.f32.mrf.mxu1 }
 0x156   : > { %v2351_v29 = vpop.f32.mrf.mxu0  ;;  %v2391_v30 = vpop.f32.mrf.mxu1 }
 0x157   : > { %v2352_v61 = vadd.f32 %v2351_v29, %v2312_v58 }
 0x158   : > { %v2353_v31 = vpop.f32.mrf.mxu0  ;;  %v2393_v32 = vpop.f32.mrf.mxu1 }
 0x159   : > { %v2392_v2 = vadd.f32 %v2391_v30, %v2352_v61 }
 0x15a   : > { %v2354_v33 = vpop.f32.mrf.mxu0  ;;  %v2394_v34 = vpop.f32.mrf.mxu1 }
 0x15c   : > { %v2355_v35 = vpop.f32.mrf.mxu0  ;;  %v2395_v36 = vpop.f32.mrf.mxu1 }
 0x15e   : > { %v2431_v38 = vpop.f32.mrf.mxu0  ;;  %v2471_v39 = vpop.f32.mrf.mxu1 }
 0x15f   : > { %v2432_v5 = vadd.f32 %v2431_v38, %v2392_v2 }
 0x160   : > { %v2433_v40 = vpop.f32.mrf.mxu0  ;;  %v2473_v41 = vpop.f32.mrf.mxu1 }
 0x161   : > { %v2472_v10 = vadd.f32 %v2471_v39, %v2432_v5 }
 0x162   : > { %v2434_v43 = vpop.f32.mrf.mxu0  ;;  %v2474_v44 = vpop.f32.mrf.mxu1 }
 0x164   : > { %v2435_v46 = vpop.f32.mrf.mxu0  ;;  %v2475_v47 = vpop.f32.mrf.mxu1 }
 0x166   : > { %v2511_v48 = vpop.f32.mrf.mxu0  ;;  %v2551_v49 = vpop.f32.mrf.mxu1 }
 0x167   : > { %v2512_v13 = vadd.f32 %v2511_v48, %v2472_v10 }
 0x168   : > { %v2513_v51 = vpop.f32.mrf.mxu0  ;;  %v2553_v52 = vpop.f32.mrf.mxu1 }
 0x169   : > { %v2552_v18 = vadd.f32 %v2551_v49, %v2512_v13 }
 0x16a   : > { %v2514_v54 = vpop.f32.mrf.mxu0  ;;  %v2554_v55 = vpop.f32.mrf.mxu1 }
 0x16c   : > { %v2515_v56 = vpop.f32.mrf.mxu0  ;;  %v2555_v57 = vpop.f32.mrf.mxu1 }
 0x16e   : > { %v2591_v59 = vpop.f32.mrf.mxu0  ;;  %v2631_v60 = vpop.f32.mrf.mxu1 }
 0x16f   : > { %v2592_v21 = vadd.f32 %v2591_v59, %v2552_v18 }
 0x170   : > { %v2593_v62 = vpop.f32.mrf.mxu0  ;;  %v2633_v63 = vpop.f32.mrf.mxu1 }
 0x171   : > { %v2632_v26 = vadd.f32 %v2631_v60, %v2592_v21 }
 0x172   : > { %v2594_v0 = vpop.f32.mrf.mxu0  ;;  %v2634_v1 = vpop.f32.mrf.mxu1 }
 0x174   : > { %v2595_v3 = vpop.f32.mrf.mxu0  ;;  %v2635_v4 = vpop.f32.mrf.mxu1 }
 0x176   : > { %v2671_v6 = vpop.f32.mrf.mxu0  ;;  %v2711_v7 = vpop.f32.mrf.mxu1 }
 0x177   : > { %v2672_v29 = vadd.f32 %v2671_v6, %v2632_v26 }
 0x178   : > { %v2673_v8 = vpop.f32.mrf.mxu0  ;;  %v2713_v9 = vpop.f32.mrf.mxu1 }
 0x179   : > { %v2712_v34 = vadd.f32 %v2711_v7, %v2672_v29 }
 0x17a   : > { %v2674_v11 = vpop.f32.mrf.mxu0  ;;  %v2714_v12 = vpop.f32.mrf.mxu1 }
 0x17c   : > { %v2675_v14 = vpop.f32.mrf.mxu0  ;;  %v2715_v15 = vpop.f32.mrf.mxu1 }
 0x17e   : > { %v2751_v16 = vpop.f32.mrf.mxu0  ;;  %v2791_v17 = vpop.f32.mrf.mxu1 }
 0x17f   : > { %v2752_v37 = vadd.f32 %v2751_v16, %v2712_v34 }
 0x180   : > { %v2753_v19 = vpop.f32.mrf.mxu0  ;;  %v2793_v20 = vpop.f32.mrf.mxu1 }
 0x181   : > { %v2792_v42 = vadd.f32 %v2791_v17, %v2752_v37 }
 0x182   : > { %v2754_v22 = vpop.f32.mrf.mxu0  ;;  %v2794_v23 = vpop.f32.mrf.mxu1 }
 0x184   : > { %v2755_v24 = vpop.f32.mrf.mxu0  ;;  %v2795_v25 = vpop.f32.mrf.mxu1 }
 0x186   : > { %v2831_v27 = vpop.f32.mrf.mxu0  ;;  %v2871_v28 = vpop.f32.mrf.mxu1 }
 0x187   : > { %v2832_v45 = vadd.f32 %v2831_v27, %v2792_v42 }
 0x188   : > { %v2833_v30 = vpop.f32.mrf.mxu0  ;;  %v2873_v31 = vpop.f32.mrf.mxu1 }
 0x189   : > { %v2872_v50 = vadd.f32 %v2871_v28, %v2832_v45  ;;  %v226_v30 = vld [vmem:[#allocation2] sm:$0xff] }
 0x18a   : > { %v2834_v32 = vpop.f32.mrf.mxu0  ;;  %v2874_v33 = vpop.f32.mrf.mxu1 }
 0x18c   : > { %v2835_v35 = vpop.f32.mrf.mxu0  ;;  %v2875_v36 = vpop.f32.mrf.mxu1 }
 0x18e   : > { %v2911_v38 = vpop.f32.mrf.mxu0  ;;  %v2951_v39 = vpop.f32.mrf.mxu1 }
 0x18f   : > { %v2912_v53 = vadd.f32 %v2911_v38, %v2872_v50 }
 0x190   : > { %v2913_v40 = vpop.f32.mrf.mxu0  ;;  %v2953_v41 = vpop.f32.mrf.mxu1 }
 0x191   : > { %v2952_v58 = vadd.f32 %v2951_v39, %v2912_v53 }
 0x192   : > { %v2914_v43 = vpop.f32.mrf.mxu0  ;;  %v2954_v44 = vpop.f32.mrf.mxu1 }
 0x194   : > { %v2915_v46 = vpop.f32.mrf.mxu0  ;;  %v2955_v47 = vpop.f32.mrf.mxu1 }
 0x196   : > { %v2991_v48 = vpop.f32.mrf.mxu0  ;;  %v3031_v49 = vpop.f32.mrf.mxu1 }
 0x197   : > { %v2992_v61 = vadd.f32 %v2991_v48, %v2952_v58 }
 0x198   : > { %v2993_v51 = vpop.f32.mrf.mxu0  ;;  %v3033_v52 = vpop.f32.mrf.mxu1 }
 0x199   : > { %v3032_v2 = vadd.f32 %v3031_v49, %v2992_v61 }
 0x19a   : > { %v2994_v54 = vpop.f32.mrf.mxu0  ;;  %v3034_v55 = vpop.f32.mrf.mxu1 }
 0x19c   : > { %v2995_v56 = vpop.f32.mrf.mxu0  ;;  %v3035_v57 = vpop.f32.mrf.mxu1 }
 0x19e   : > { %v3071_v59 = vpop.f32.mrf.mxu0  ;;  %v3111_v60 = vpop.f32.mrf.mxu1 }
 0x19f   : > { %v3072_v5 = vadd.f32 %v3071_v59, %v3032_v2 }
 0x1a0   : > { %v3073_v62 = vpop.f32.mrf.mxu0  ;;  %v3113_v63 = vpop.f32.mrf.mxu1 }
 0x1a1   : > { %v3112_v10 = vadd.f32 %v3111_v60, %v3072_v5 }
 0x1a2   : > { %v3074_v0 = vpop.f32.mrf.mxu0  ;;  %v3114_v1 = vpop.f32.mrf.mxu1 }
 0x1a4   : > { %v3075_v3 = vpop.f32.mrf.mxu0  ;;  %v3115_v4 = vpop.f32.mrf.mxu1 }
 0x1a6   : > { %v3151_v6 = vpop.f32.mrf.mxu0  ;;  %v3191_v7 = vpop.f32.mrf.mxu1 }
 0x1a7   : > { %v3152_v13 = vadd.f32 %v3151_v6, %v3112_v10 }
 0x1a8   : > { %v3153_v8 = vpop.f32.mrf.mxu0  ;;  %v3193_v9 = vpop.f32.mrf.mxu1 }
 0x1a9   : > { %v3192_v18 = vadd.f32 %v3191_v7, %v3152_v13 }
 0x1aa   : > { %v3154_v11 = vpop.f32.mrf.mxu0  ;;  %v3194_v12 = vpop.f32.mrf.mxu1 }
 0x1ac   : > { %v3155_v14 = vpop.f32.mrf.mxu0  ;;  %v3195_v15 = vpop.f32.mrf.mxu1 }
 0x1ae   : > { %v3231_v16 = vpop.f32.mrf.mxu0  ;;  %v3271_v17 = vpop.f32.mrf.mxu1 }
 0x1af   : > { %v3232_v21 = vadd.f32 %v3231_v16, %v3192_v18 }
 0x1b0   : > { %v3233_v19 = vpop.f32.mrf.mxu0  ;;  %v3273_v20 = vpop.f32.mrf.mxu1 }
 0x1b1   : > { %v3272_v26 = vadd.f32 %v3271_v17, %v3232_v21 }
 0x1b2   : > { %v3234_v22 = vpop.f32.mrf.mxu0  ;;  %v3274_v23 = vpop.f32.mrf.mxu1 }
 0x1b4   : > { %v3235_v24 = vpop.f32.mrf.mxu0  ;;  %v3275_v25 = vpop.f32.mrf.mxu1 }
 0x1b6   : > { %v3311_v27 = vpop.f32.mrf.mxu0  ;;  %v3351_v28 = vpop.f32.mrf.mxu1 }
 0x1b7   : > { %v3312_v29 = vadd.f32 %v3311_v27, %v3272_v26 }
 0x1b8   : > { %v3313_v31 = vpop.f32.mrf.mxu0  ;;  %v3702_v32 = vpop.f32.mrf.mxu1 }
 0x1b9   : > { %v3352_v33 = vadd.f32 %v3351_v28, %v3312_v29  ;;  %3363 = sbr.rel (%p3691_p6) target bundleno = 768 (0x300), region = 40 }
 0x1ba   : > { %v3314_v34 = vpop.f32.mrf.mxu0  ;;  %v3354_v35 = vpop.f32.mrf.mxu1 }
 0x1bb   : > { %v3357_v36 = vadd.f32 %v3352_v33, %v226_v30 }
 0x1bc   : > { %v3315_v37 = vpop.f32.mrf.mxu0  ;;  %v3703_v38 = vpop.f32.mrf.mxu1 }
 0x1bd   : > { %3359 = vst.msk [vmem:[#allocation2] sm:$0xff] %vm3358_vm2, %v3357_v36 }
 0x1be   : > { %v3692_v40 = vld [vmem:[%s4170_s2] ss:$0 sm:$0xff] }
 0x1c4   : > { %v3364_v39 = vld [vmem:[#allocation2] sm:$0xff] }
 0x1c5   : > { %v3372_v41 = vadd.f32 %v3692_v40, %v3364_v39 }
 0x1c7   : > { %v3373_v42 = vsel %vm3358_vm2, %v3372_v41, -inf }
 0x1c8   : > { %3374 = vmax.xlane.f32.xlu0 %v3373_v42 }
 0x251   : > { %v3375_v43 = vpop.xlane.xlu0 %3374 }
 0x252   : > { %v3376_v44 = vsub.f32 %v3372_v41, %v3375_v43 }
 0x254   : > { %v3377_v45 = vmul.f32 1.442695, %v3376_v44 }
 0x256   : > { %3953 = vpow2.f32 %v3377_v45 }
 0x263   : > { %v3954_v46 = vpop.eup %3953 }
 0x264   : > { %v3379_v47 = vsel %vm3358_vm2, %v3954_v46, 0.0 }
 0x265   : > { %3380 = vadd.xlane.f32.xlu0 %v3379_v47 }
 0x2ee   : > { %v3381_v48 = vpop.xlane.xlu0 %3380 }
 0x2ef   : > { %3955 = vrcp.f32 %v3381_v48 }
 0x2fc   : > { %v3956_v49 = vpop.eup %3955 }
 0x2fd   : > { %v3383_v50 = vmul.f32 %v3956_v49, %v3954_v46 }
 0x2ff   : > { %3384 = vst.msk [vmem:[%s4171_s3] sm:$0xff] %vm3358_vm2, %v3383_v50 }
 0x300 PF: > { %s13_s14 = sadd.s32 1, %s3979_s14   ;;  %s4172_s12 = smov %s3975_s13 }
 0x301   : > { %p10_p7 = scmp.ge.s32.totalorder %s13_s14, 9   ;;  %s4173_s13 = smov %s4175_s15 }
 0x303   :  { %12 = sbr.rel (!%p10_p7) target bundleno = 2 (0x2), region = 73 }

</bundles_post_ra>
